<compile_context>
chip_gen: v7x
topology: tpu7x:2x2x1
jax: 0.10.0
libtpu: 0.0.40
codegen_flags: <defaults>
</compile_context>

<pallas_src>
import functools
import math

import jax
import jax.numpy as jnp
import numpy as np
from jax.experimental import pallas as pl
from jax.experimental.pallas import tpu as pltpu  # noqa: F401

# ----------------------------- hyper-parameters -----------------------------
NUM_CHANNEL = 4        # NetParameters.NUM_CHANNEL
NET_SIZE = 32          # NetParameters.NET_SIZE
GOAL_REPR_SIZE = 8     # NetParameters.GOAL_REPR_SIZE
VECTOR_LEN = 8         # NetParameters.VECTOR_LEN
FOV_SIZE = 9           # EnvParameters.FOV_SIZE (9 -> 4 -> 5,6,7 -> 3 -> 1)
N_ACTIONS = 5          # EnvParameters.N_ACTIONS
GAIN = 0.01            # NetParameters.GAIN
RELU_GAIN = math.sqrt(2.0)
LN_EPS = 1e-5

CONV3_OUT = NET_SIZE - GOAL_REPR_SIZE        # 24
N_HEADS = N_ACTIONS + 2                      # policy(5) + value(1) + blocking(1)

# LayerNorm parameter packing (sublane offsets; all multiples of 8).
_LN_SIZES = dict(fn=VECTOR_LEN, ln1=CONV3_OUT, ln2=GOAL_REPR_SIZE,
                 ln3=NET_SIZE, ln4=NET_SIZE, ln5=NET_SIZE)
_LN_OFFSETS = {}
_off = 0
for _k, _s in _LN_SIZES.items():
    _LN_OFFSETS[_k] = _off
    _off += _s
LN_PACK_TOTAL = _off   # 136


# --------------------------- the single fused kernel -------------------------
def _net_kernel(
    a0_ref,
    w1_ref, b1_ref, w1a_ref, b1a_ref, w1b_ref, b1b_ref,
    w2_ref, b2_ref, w2a_ref, b2a_ref, w2b_ref, b2b_ref,
    w3_ref, b3_ref,
    r11_ref, r2a_ref, r2b_ref, s1_ref, s2_ref,
    vec_ref, h0_ref, c0_ref,
    lng_ref, lnb_ref,
    wfc1_ref, bfc1_ref, wfc2_ref, bfc2_ref, wfc3_ref, bfc3_ref,
    wih_ref, whh_ref, blstm_ref,
    whead_ref, bhead_ref,
    heads_ref, h_out_ref, c_out_ref,
    *, m,
):
    f32 = jnp.float32

    def shift(x, s):
        # result[:, q] = x[:, q + s]  (zero fill at the top lanes; unambiguous)
        if s == 0:
            return x
        rows, _ = x.shape
        return jnp.concatenate(
            [x[:, s:], jnp.zeros((rows, s), x.dtype)], axis=1)

    def conv(x, w_ref, b_ref, k, wp):
        # x: (m*Cin, wp*wp); w_ref: (k*k, m*Cout, m*Cin) block-diag taps;
        # b_ref: (m*Cout, 1).  Output valid at lanes h*wp+w, h,w < wp-k+1.
        acc = None
        t = 0
        for di in range(k):
            for dj in range(k):
                contrib = jnp.dot(w_ref[t], shift(x, di * wp + dj),
                                  preferred_element_type=f32)
                acc = contrib if acc is None else acc + contrib
                t += 1
        return jnp.maximum(acc + b_ref[...], 0.0)

    def pool_max(x, wp):
        # 2x2/stride-2 max (the stride-2 selection happens in the S matmul).
        return jnp.maximum(jnp.maximum(x, shift(x, 1)),
                           jnp.maximum(shift(x, wp), shift(x, wp + 1)))

    def reframe(x, r_ref):
        # Constant 0/1 matmul: re-pad / re-frame (and pool-select) in one MXU op.
        return jnp.dot(x, r_ref[...], preferred_element_type=f32)

    def layer_norm(x, off, size):
        # Feature dim is on sublanes (axis 0); matches torch.nn.LayerNorm.
        g = lng_ref[off:off + size, :]
        b = lnb_ref[off:off + size, :]
        mu = jnp.mean(x, axis=0, keepdims=True)
        var = jnp.mean((x - mu) * (x - mu), axis=0, keepdims=True)
        return (x - mu) * jax.lax.rsqrt(var + LN_EPS) * g + b

    def sigmoid(x):
        return 1.0 / (1.0 + jnp.exp(-x))

    # ------------------------------ conv trunk -------------------------------
    x = a0_ref[...]                                    # (4m, 121)  frame 11x11
    x = conv(x, w1_ref, b1_ref, 3, 11)                 # (8m, 121)  valid 9x9
    x = reframe(x, r11_ref)                            # re-pad to 11x11
    x = conv(x, w1a_ref, b1a_ref, 3, 11)
    x = reframe(x, r11_ref)
    x = conv(x, w1b_ref, b1b_ref, 3, 11)
    x = reframe(pool_max(x, 11), s1_ref)               # (8m, 36)   4x4 -> pad 6x6
    x = conv(x, w2_ref, b2_ref, 2, 6)                  # (16m, 36)  valid 5x5
    x = reframe(x, r2a_ref)                            # (16m, 49)  pad 7x7
    x = conv(x, w2a_ref, b2a_ref, 2, 7)                # valid 6x6
    x = reframe(x, r2b_ref)                            # (16m, 64)  pad 8x8
    x = conv(x, w2b_ref, b2b_ref, 2, 8)                # valid 7x7
    x = reframe(pool_max(x, 8), s2_ref)                # (16m, 9)   3x3, no pad
    x = conv(x, w3_ref, b3_ref, 3, 3)                  # (24m, 9); relu == relu-after-flatten

    # 1x1 spatial output lives at lane 0; gather per-agent columns -> (24, m)
    x1 = jnp.concatenate(
        [x[mm * CONV3_OUT:(mm + 1) * CONV3_OUT, 0:1] for mm in range(m)],
        axis=1)

    # ------------------------- dense / LSTM / heads ---------------------------
    x1 = layer_norm(x1, _LN_OFFSETS["ln1"], CONV3_OUT)

    x2 = layer_norm(vec_ref[...], _LN_OFFSETS["fn"], VECTOR_LEN)
    x2 = jnp.maximum(
        jnp.dot(wfc1_ref[...], x2, preferred_element_type=f32) + bfc1_ref[...],
        0.0)
    x2 = layer_norm(x2, _LN_OFFSETS["ln2"], GOAL_REPR_SIZE)

    x3 = jnp.concatenate([x1, x2], axis=0)             # (32, m)
    x3 = layer_norm(x3, _LN_OFFSETS["ln3"], NET_SIZE)

    h1 = jnp.maximum(
        jnp.dot(wfc2_ref[...], x3, preferred_element_type=f32) + bfc2_ref[...],
        0.0)
    h1 = jnp.dot(wfc3_ref[...], h1, preferred_element_type=f32) + bfc3_ref[...]
    h2 = jnp.maximum(h1 + x3, 0.0)
    h2 = layer_norm(h2, _LN_OFFSETS["ln4"], NET_SIZE)

    # PyTorch LSTMCell gate order: i, f, g, o (8-aligned sublane slices).
    gates = (jnp.dot(wih_ref[...], h2, preferred_element_type=f32)
             + jnp.dot(whh_ref[...], h0_ref[...], preferred_element_type=f32)
             + blstm_ref[...])                          # (128, m)
    i_g = sigmoid(gates[0 * NET_SIZE:1 * NET_SIZE, :])
    f_g = sigmoid(gates[1 * NET_SIZE:2 * NET_SIZE, :])
    g_g = jnp.tanh(gates[2 * NET_SIZE:3 * NET_SIZE, :])
    o_g = sigmoid(gates[3 * NET_SIZE:4 * NET_SIZE, :])
    c_new = f_g * c0_ref[...] + i_g * g_g
    h_new = o_g * jnp.tanh(c_new)
    h_out_ref[...] = h_new
    c_out_ref[...] = c_new

    mem = layer_norm(h_new, _LN_OFFSETS["ln5"], NET_SIZE)
    # Fused heads: rows 0..4 policy, 5 value, 6 blocking.
    heads_ref[...] = (
        jnp.dot(whead_ref[...], mem, preferred_element_type=f32) + bhead_ref[...])


# ------------------ host-side constant matrices (conv trunk) -----------------
def _reframe_matrix(wp_in, n_valid, wp_out, pad):
    r = np.zeros((wp_in * wp_in, wp_out * wp_out), np.float32)
    for h in range(n_valid):
        for w in range(n_valid):
            r[h * wp_in + w, (h + pad) * wp_out + (w + pad)] = 1.0
    return r


def _pool_select_matrix(wp_in, n_out, wp_out, pad):
    s = np.zeros((wp_in * wp_in, wp_out * wp_out), np.float32)
    for ph in range(n_out):
        for pw in range(n_out):
            s[(2 * ph) * wp_in + 2 * pw, (ph + pad) * wp_out + (pw + pad)] = 1.0
    return s


# ------------------------------ initialization --------------------------------
def orthogonal(key, rows, cols, gain=1.0):
    """torch.nn.init.orthogonal_-style init for a (rows, cols) matrix."""
    n, mm = max(rows, cols), min(rows, cols)
    a = jax.random.normal(key, (n, mm), dtype=jnp.float32)
    q, r = jnp.linalg.qr(a)
    q = q * jnp.sign(jnp.diag(r))[None, :]
    if rows < cols:
        q = q.T
    return (gain * q).astype(jnp.float32)


def make_params(key):
    ks = iter(jax.random.split(key, 32))
    p = {}

    def conv_init(o, c, k, gain):
        w = orthogonal(next(ks), o, c * k * k, gain).reshape(o, c, k, k)
        return w, jnp.zeros((o,), jnp.float32)

    def lin_init(o, i, gain):
        w = orthogonal(next(ks), o, i, gain)          # torch layout (out, in)
        return w, jnp.zeros((o,), jnp.float32)

    q = NET_SIZE // 4
    h = NET_SIZE // 2
    p["conv1_w"], p["conv1_b"] = conv_init(q, NUM_CHANNEL, 3, RELU_GAIN)
    p["conv1a_w"], p["conv1a_b"] = conv_init(q, q, 3, RELU_GAIN)
    p["conv1b_w"], p["conv1b_b"] = conv_init(q, q, 3, RELU_GAIN)
    p["conv2_w"], p["conv2_b"] = conv_init(h, q, 2, RELU_GAIN)
    p["conv2a_w"], p["conv2a_b"] = conv_init(h, h, 2, RELU_GAIN)
    p["conv2b_w"], p["conv2b_b"] = conv_init(h, h, 2, RELU_GAIN)
    p["conv3_w"], p["conv3_b"] = conv_init(NET_SIZE - GOAL_REPR_SIZE, h, 3, RELU_GAIN)

    p["fc1_w"], p["fc1_b"] = lin_init(GOAL_REPR_SIZE, VECTOR_LEN, RELU_GAIN)
    p["fc2_w"], p["fc2_b"] = lin_init(NET_SIZE, NET_SIZE, RELU_GAIN)
    p["fc3_w"], p["fc3_b"] = lin_init(NET_SIZE, NET_SIZE, RELU_GAIN)

    p["lstm_wih"] = orthogonal(next(ks), 4 * NET_SIZE, NET_SIZE, 1.0)
    p["lstm_whh"] = orthogonal(next(ks), 4 * NET_SIZE, NET_SIZE, 1.0)
    p["lstm_b"] = jnp.zeros((4 * NET_SIZE,), jnp.float32)   # b_ih + b_hh (both zero)

    p["policy_w"], p["policy_b"] = lin_init(N_ACTIONS, NET_SIZE, GAIN)
    p["value_w"], p["value_b"] = lin_init(1, NET_SIZE, 1.0)
    p["blocking_w"], p["blocking_b"] = lin_init(1, NET_SIZE, GAIN)

    def ln(d):
        return jnp.ones((d,), jnp.float32), jnp.zeros((d,), jnp.float32)

    p["fn_g"], p["fn_b"] = ln(VECTOR_LEN)
    p["ln1_g"], p["ln1_b"] = ln(NET_SIZE - GOAL_REPR_SIZE)
    p["ln2_g"], p["ln2_b"] = ln(GOAL_REPR_SIZE)
    p["ln3_g"], p["ln3_b"] = ln(NET_SIZE)
    p["ln4_g"], p["ln4_b"] = ln(NET_SIZE)
    p["ln5_g"], p["ln5_b"] = ln(NET_SIZE)
    return p


def prepare_kernel_params(p, m):
    """Pack torch-layout params into fused-kernel operands (done once per M)."""
    eye = jnp.eye(m, dtype=jnp.float32)

    def conv_pack(w, b):
        o, c, kh, kw = w.shape
        taps = [jnp.kron(eye, w[:, :, di, dj].astype(jnp.float32))
                for di in range(kh) for dj in range(kw)]
        w_taps = jnp.stack(taps, axis=0)                  # (kh*kw, m*o, m*c)
        b_col = jnp.tile(b.astype(jnp.float32), (m,)).reshape(m * o, 1)
        return w_taps, b_col

    kp = {}
    kp["w1"], kp["b1"] = conv_pack(p["conv1_w"], p["conv1_b"])
    kp["w1a"], kp["b1a"] = conv_pack(p["conv1a_w"], p["conv1a_b"])
    kp["w1b"], kp["b1b"] = conv_pack(p["conv1b_w"], p["conv1b_b"])
    kp["w2"], kp["b2"] = conv_pack(p["conv2_w"], p["conv2_b"])
    kp["w2a"], kp["b2a"] = conv_pack(p["conv2a_w"], p["conv2a_b"])
    kp["w2b"], kp["b2b"] = conv_pack(p["conv2b_w"], p["conv2b_b"])
    kp["w3"], kp["b3"] = conv_pack(p["conv3_w"], p["conv3_b"])

    kp["r11"] = jnp.asarray(_reframe_matrix(11, 9, 11, 1))   # conv1->1a, 1a->1b
    kp["r2a"] = jnp.asarray(_reframe_matrix(6, 5, 7, 1))     # conv2->2a
    kp["r2b"] = jnp.asarray(_reframe_matrix(7, 6, 8, 1))     # conv2a->2b
    kp["s1"] = jnp.asarray(_pool_select_matrix(11, 4, 6, 1)) # pool1 -> conv2 in
    kp["s2"] = jnp.asarray(_pool_select_matrix(8, 3, 3, 0))  # pool2 -> conv3 in

    kp["lng"] = jnp.concatenate(
        [p["fn_g"], p["ln1_g"], p["ln2_g"], p["ln3_g"], p["ln4_g"], p["ln5_g"]]
    ).astype(jnp.float32).reshape(LN_PACK_TOTAL, 1)
    kp["lnb"] = jnp.concatenate(
        [p["fn_b"], p["ln1_b"], p["ln2_b"], p["ln3_b"], p["ln4_b"], p["ln5_b"]]
    ).astype(jnp.float32).reshape(LN_PACK_TOTAL, 1)

    def col(b):
        return b.astype(jnp.float32).reshape(-1, 1)

    kp["wfc1"], kp["bfc1"] = p["fc1_w"].astype(jnp.float32), col(p["fc1_b"])
    kp["wfc2"], kp["bfc2"] = p["fc2_w"].astype(jnp.float32), col(p["fc2_b"])
    kp["wfc3"], kp["bfc3"] = p["fc3_w"].astype(jnp.float32), col(p["fc3_b"])
    kp["wih"] = p["lstm_wih"].astype(jnp.float32)
    kp["whh"] = p["lstm_whh"].astype(jnp.float32)
    kp["blstm"] = col(p["lstm_b"])           # NOTE: must be b_ih + b_hh if loading real torch weights
    kp["whead"] = jnp.concatenate(
        [p["policy_w"], p["value_w"], p["blocking_w"]], axis=0).astype(jnp.float32)
    kp["bhead"] = jnp.concatenate(
        [p["policy_b"], p["value_b"], p["blocking_b"]]).astype(jnp.float32).reshape(N_HEADS, 1)
    return kp


_KP_ORDER_TRUNK = [
    "w1", "b1", "w1a", "b1a", "w1b", "b1b",
    "w2", "b2", "w2a", "b2a", "w2b", "b2b",
    "w3", "b3",
    "r11", "r2a", "r2b", "s1", "s2",
]
_KP_ORDER_DENSE = [
    "lng", "lnb",
    "wfc1", "bfc1", "wfc2", "bfc2", "wfc3", "bfc3",
    "wih", "whh", "blstm",
    "whead", "bhead",
]


def _full_spec(a):
    if a.ndim == 2:
        return pl.BlockSpec(a.shape, lambda i: (0, 0))
    return pl.BlockSpec(a.shape, lambda i: (0, 0, 0))


# --------------------------------- forward ------------------------------------
def net_forward(kp, obs, vector, input_state):
    num_agent = obs.shape[1]
    m = obs.shape[0] * num_agent
    fp = FOV_SIZE + 2

    # --- tiny plain-JAX prologue: pad + lay out operands for the fused kernel ---
    x = obs.reshape(-1, NUM_CHANNEL, FOV_SIZE, FOV_SIZE).astype(jnp.float32)
    x = jnp.pad(x, ((0, 0), (0, 0), (1, 1), (1, 1)))
    a0 = x.reshape(m * NUM_CHANNEL, fp * fp)                       # (4m, 121)
    vec_t = vector.reshape(-1, VECTOR_LEN).astype(jnp.float32).T   # (8, m)
    h0, c0 = input_state
    h0_t = h0.astype(jnp.float32).T                                # (32, m)
    c0_t = c0.astype(jnp.float32).T

    inputs = ([a0] + [kp[k] for k in _KP_ORDER_TRUNK]
              + [vec_t, h0_t, c0_t]
              + [kp[k] for k in _KP_ORDER_DENSE])

    in_specs = [_full_spec(a) for a in inputs]
    out_shape = (
        jax.ShapeDtypeStruct((N_HEADS, m), jnp.float32),
        jax.ShapeDtypeStruct((NET_SIZE, m), jnp.float32),
        jax.ShapeDtypeStruct((NET_SIZE, m), jnp.float32),
    )
    out_specs = (
        pl.BlockSpec((N_HEADS, m), lambda i: (0, 0)),
        pl.BlockSpec((NET_SIZE, m), lambda i: (0, 0)),
        pl.BlockSpec((NET_SIZE, m), lambda i: (0, 0)),
    )

    heads_t, h_new_t, c_new_t = pl.pallas_call(
        functools.partial(_net_kernel, m=m),
        out_shape=out_shape,
        grid=(1,),
        in_specs=in_specs,
        out_specs=out_specs,
    )(*inputs)

    # --- tiny plain-JAX epilogue: split heads, softmax/sigmoid, reshape ---
    heads = heads_t.T                                              # (m, 7)
    policy_layer = heads[:, 0:N_ACTIONS].reshape(-1, num_agent, N_ACTIONS)
    policy = jax.nn.softmax(policy_layer, axis=-1)
    policy_sig = jax.nn.sigmoid(policy_layer)
    value = heads[:, N_ACTIONS:N_ACTIONS + 1].reshape(-1, num_agent, 1)
    blocking = jax.nn.sigmoid(
        heads[:, N_ACTIONS + 1:N_ACTIONS + 2]).reshape(-1, num_agent, 1)
    memories = h_new_t.T                                           # (m, 32)
    memory_c = c_new_t.T
    output_state = (memories, memory_c)
    return policy, value, blocking, policy_sig, output_state, policy_layer


# ----------------------------------- main --------------------------------------
if __name__ == "__main__":
    root = jax.random.PRNGKey(0)
    k_params, k_obs, k_vec, k_h, k_c = jax.random.split(root, 5)

    params = make_params(k_params)

    B, A = 2, 2  # batch, num_agents
    M = B * A
    kparams = prepare_kernel_params(params, M)

    obs = jax.random.normal(k_obs, (B, A, NUM_CHANNEL, FOV_SIZE, FOV_SIZE), jnp.float32)
    vector = jax.random.normal(k_vec, (B, A, VECTOR_LEN), jnp.float32)
    h0 = jax.random.normal(k_h, (M, NET_SIZE), jnp.float32) * 0.1
    c0 = jax.random.normal(k_c, (M, NET_SIZE), jnp.float32) * 0.1

    fwd = jax.jit(net_forward)
    policy, value, blocking, policy_sig, out_state, policy_layer = fwd(
        kparams, obs, vector, (h0, c0))
    jax.block_until_ready((policy, value, blocking, policy_sig, out_state, policy_layer))

    assert policy.shape == (B, A, N_ACTIONS)
    assert value.shape == (B, A, 1)
    assert blocking.shape == (B, A, 1)
    assert policy_sig.shape == (B, A, N_ACTIONS)
    assert out_state[0].shape == (M, NET_SIZE) and out_state[1].shape == (M, NET_SIZE)
    assert policy_layer.shape == (B, A, N_ACTIONS)
    assert bool(jnp.all(jnp.isfinite(policy)))

    print("KERNEL_OK")
</pallas_src>

<mosaic_0001>
module attributes {stable_mosaic.version = 11 : i64} {
  func.func @_net_kernel(%arg0: i32, %arg1: memref<16x121xf32, #tpu.memory_space<vmem>>, %arg2: memref<9x32x16xf32, #tpu.memory_space<vmem>>, %arg3: memref<32x1xf32, #tpu.memory_space<vmem>>, %arg4: memref<9x32x32xf32, #tpu.memory_space<vmem>>, %arg5: memref<32x1xf32, #tpu.memory_space<vmem>>, %arg6: memref<9x32x32xf32, #tpu.memory_space<vmem>>, %arg7: memref<32x1xf32, #tpu.memory_space<vmem>>, %arg8: memref<4x64x32xf32, #tpu.memory_space<vmem>>, %arg9: memref<64x1xf32, #tpu.memory_space<vmem>>, %arg10: memref<4x64x64xf32, #tpu.memory_space<vmem>>, %arg11: memref<64x1xf32, #tpu.memory_space<vmem>>, %arg12: memref<4x64x64xf32, #tpu.memory_space<vmem>>, %arg13: memref<64x1xf32, #tpu.memory_space<vmem>>, %arg14: memref<9x96x64xf32, #tpu.memory_space<vmem>>, %arg15: memref<96x1xf32, #tpu.memory_space<vmem>>, %arg16: memref<121x121xf32, #tpu.memory_space<vmem>>, %arg17: memref<36x49xf32, #tpu.memory_space<vmem>>, %arg18: memref<49x64xf32, #tpu.memory_space<vmem>>, %arg19: memref<121x36xf32, #tpu.memory_space<vmem>>, %arg20: memref<64x9xf32, #tpu.memory_space<vmem>>, %arg21: memref<8x4xf32, #tpu.memory_space<vmem>>, %arg22: memref<32x4xf32, #tpu.memory_space<vmem>>, %arg23: memref<32x4xf32, #tpu.memory_space<vmem>>, %arg24: memref<136x1xf32, #tpu.memory_space<vmem>>, %arg25: memref<136x1xf32, #tpu.memory_space<vmem>>, %arg26: memref<8x8xf32, #tpu.memory_space<vmem>>, %arg27: memref<8x1xf32, #tpu.memory_space<vmem>>, %arg28: memref<32x32xf32, #tpu.memory_space<vmem>>, %arg29: memref<32x1xf32, #tpu.memory_space<vmem>>, %arg30: memref<32x32xf32, #tpu.memory_space<vmem>>, %arg31: memref<32x1xf32, #tpu.memory_space<vmem>>, %arg32: memref<128x32xf32, #tpu.memory_space<vmem>>, %arg33: memref<128x32xf32, #tpu.memory_space<vmem>>, %arg34: memref<128x1xf32, #tpu.memory_space<vmem>>, %arg35: memref<7x32xf32, #tpu.memory_space<vmem>>, %arg36: memref<7x1xf32, #tpu.memory_space<vmem>>, %arg37: memref<7x4xf32, #tpu.memory_space<vmem>>, %arg38: memref<32x4xf32, #tpu.memory_space<vmem>>, %arg39: memref<32x4xf32, #tpu.memory_space<vmem>>) attributes {dimension_semantics = [#tpu.dimension_semantics<arbitrary>], iteration_bounds = array<i64: 1>, scalar_prefetch = 0 : i64, scratch_operands = 0 : i64, tpu.core_type = #tpu.core_type<tc>, window_params = [{pipeline_mode = #tpu.pipeline_mode<synchronous>, transform_indices = @transform_0, window_bounds = array<i64: 16, 121>}, {pipeline_mode = #tpu.pipeline_mode<synchronous>, transform_indices = @transform_1, window_bounds = array<i64: 9, 32, 16>}, {pipeline_mode = #tpu.pipeline_mode<synchronous>, transform_indices = @transform_2, window_bounds = array<i64: 32, 1>}, {pipeline_mode = #tpu.pipeline_mode<synchronous>, transform_indices = @transform_3, window_bounds = array<i64: 9, 32, 32>}, {pipeline_mode = #tpu.pipeline_mode<synchronous>, transform_indices = @transform_4, window_bounds = array<i64: 32, 1>}, {pipeline_mode = #tpu.pipeline_mode<synchronous>, transform_indices = @transform_5, window_bounds = array<i64: 9, 32, 32>}, {pipeline_mode = #tpu.pipeline_mode<synchronous>, transform_indices = @transform_6, window_bounds = array<i64: 32, 1>}, {pipeline_mode = #tpu.pipeline_mode<synchronous>, transform_indices = @transform_7, window_bounds = array<i64: 4, 64, 32>}, {pipeline_mode = #tpu.pipeline_mode<synchronous>, transform_indices = @transform_8, window_bounds = array<i64: 64, 1>}, {pipeline_mode = #tpu.pipeline_mode<synchronous>, transform_indices = @transform_9, window_bounds = array<i64: 4, 64, 64>}, {pipeline_mode = #tpu.pipeline_mode<synchronous>, transform_indices = @transform_10, window_bounds = array<i64: 64, 1>}, {pipeline_mode = #tpu.pipeline_mode<synchronous>, transform_indices = @transform_11, window_bounds = array<i64: 4, 64, 64>}, {pipeline_mode = #tpu.pipeline_mode<synchronous>, transform_indices = @transform_12, window_bounds = array<i64: 64, 1>}, {pipeline_mode = #tpu.pipeline_mode<synchronous>, transform_indices = @transform_13, window_bounds = array<i64: 9, 96, 64>}, {pipeline_mode = #tpu.pipeline_mode<synchronous>, transform_indices = @transform_14, window_bounds = array<i64: 96, 1>}, {pipeline_mode = #tpu.pipeline_mode<synchronous>, transform_indices = @transform_15, window_bounds = array<i64: 121, 121>}, {pipeline_mode = #tpu.pipeline_mode<synchronous>, transform_indices = @transform_16, window_bounds = array<i64: 36, 49>}, {pipeline_mode = #tpu.pipeline_mode<synchronous>, transform_indices = @transform_17, window_bounds = array<i64: 49, 64>}, {pipeline_mode = #tpu.pipeline_mode<synchronous>, transform_indices = @transform_18, window_bounds = array<i64: 121, 36>}, {pipeline_mode = #tpu.pipeline_mode<synchronous>, transform_indices = @transform_19, window_bounds = array<i64: 64, 9>}, {pipeline_mode = #tpu.pipeline_mode<synchronous>, transform_indices = @transform_20, window_bounds = array<i64: 8, 4>}, {pipeline_mode = #tpu.pipeline_mode<synchronous>, transform_indices = @transform_21, window_bounds = array<i64: 32, 4>}, {pipeline_mode = #tpu.pipeline_mode<synchronous>, transform_indices = @transform_22, window_bounds = array<i64: 32, 4>}, {pipeline_mode = #tpu.pipeline_mode<synchronous>, transform_indices = @transform_23, window_bounds = array<i64: 136, 1>}, {pipeline_mode = #tpu.pipeline_mode<synchronous>, transform_indices = @transform_24, window_bounds = array<i64: 136, 1>}, {pipeline_mode = #tpu.pipeline_mode<synchronous>, transform_indices = @transform_25, window_bounds = array<i64: 8, 8>}, {pipeline_mode = #tpu.pipeline_mode<synchronous>, transform_indices = @transform_26, window_bounds = array<i64: 8, 1>}, {pipeline_mode = #tpu.pipeline_mode<synchronous>, transform_indices = @transform_27, window_bounds = array<i64: 32, 32>}, {pipeline_mode = #tpu.pipeline_mode<synchronous>, transform_indices = @transform_28, window_bounds = array<i64: 32, 1>}, {pipeline_mode = #tpu.pipeline_mode<synchronous>, transform_indices = @transform_29, window_bounds = array<i64: 32, 32>}, {pipeline_mode = #tpu.pipeline_mode<synchronous>, transform_indices = @transform_30, window_bounds = array<i64: 32, 1>}, {pipeline_mode = #tpu.pipeline_mode<synchronous>, transform_indices = @transform_31, window_bounds = array<i64: 128, 32>}, {pipeline_mode = #tpu.pipeline_mode<synchronous>, transform_indices = @transform_32, window_bounds = array<i64: 128, 32>}, {pipeline_mode = #tpu.pipeline_mode<synchronous>, transform_indices = @transform_33, window_bounds = array<i64: 128, 1>}, {pipeline_mode = #tpu.pipeline_mode<synchronous>, transform_indices = @transform_34, window_bounds = array<i64: 7, 32>}, {pipeline_mode = #tpu.pipeline_mode<synchronous>, transform_indices = @transform_35, window_bounds = array<i64: 7, 1>}, {pipeline_mode = #tpu.pipeline_mode<synchronous>, transform_indices = @transform_36, window_bounds = array<i64: 7, 4>}, {pipeline_mode = #tpu.pipeline_mode<synchronous>, transform_indices = @transform_37, window_bounds = array<i64: 32, 4>}, {pipeline_mode = #tpu.pipeline_mode<synchronous>, transform_indices = @transform_38, window_bounds = array<i64: 32, 4>}]} {
    %c0 = arith.constant 0 : index
    %c0_0 = arith.constant 0 : index
    %0 = vector.load %arg1[%c0, %c0_0] : memref<16x121xf32, #tpu.memory_space<vmem>>, vector<16x121xf32>
    %c0_1 = arith.constant 0 : index
    %c0_2 = arith.constant 0 : index
    %c0_3 = arith.constant 0 : index
    %1 = vector.load %arg2[%c0_1, %c0_2, %c0_3] : memref<9x32x16xf32, #tpu.memory_space<vmem>>, vector<1x32x16xf32>
    %2 = vector.shape_cast %1 : vector<1x32x16xf32> to vector<32x16xf32>
    %cst = arith.constant dense<0.000000e+00> : vector<32x121xf32>
    %3 = tpu.matmul %2, %0, %cst {dimension_numbers = #tpu.dot_dimension_numbers<[1], [0], [0], [1], [0, 0, 1, 1], [], []>} : vector<32x16xf32>, vector<16x121xf32>, vector<32x121xf32> -> vector<32x121xf32>
    %c1 = arith.constant 1 : index
    %c0_4 = arith.constant 0 : index
    %c0_5 = arith.constant 0 : index
    %4 = vector.load %arg2[%c1, %c0_4, %c0_5] : memref<9x32x16xf32, #tpu.memory_space<vmem>>, vector<1x32x16xf32>
    %5 = vector.shape_cast %4 : vector<1x32x16xf32> to vector<32x16xf32>
    %6 = vector.extract_strided_slice %0 {offsets = [0, 1], sizes = [16, 120], strides = [1, 1]} : vector<16x121xf32> to vector<16x120xf32>
    %cst_6 = arith.constant 0.000000e+00 : f32
    %7 = vector.broadcast %cst_6 : f32 to vector<16x1xf32>
    %8 = tpu.concatenate %6, %7 in 1 : vector<16x120xf32>, vector<16x1xf32> -> vector<16x121xf32>
    %cst_7 = arith.constant dense<0.000000e+00> : vector<32x121xf32>
    %9 = tpu.matmul %5, %8, %cst_7 {dimension_numbers = #tpu.dot_dimension_numbers<[1], [0], [0], [1], [0, 0, 1, 1], [], []>} : vector<32x16xf32>, vector<16x121xf32>, vector<32x121xf32> -> vector<32x121xf32>
    %10 = arith.addf %3, %9 : vector<32x121xf32>
    %c2 = arith.constant 2 : index
    %c0_8 = arith.constant 0 : index
    %c0_9 = arith.constant 0 : index
    %11 = vector.load %arg2[%c2, %c0_8, %c0_9] : memref<9x32x16xf32, #tpu.memory_space<vmem>>, vector<1x32x16xf32>
    %12 = vector.shape_cast %11 : vector<1x32x16xf32> to vector<32x16xf32>
    %13 = vector.extract_strided_slice %0 {offsets = [0, 2], sizes = [16, 119], strides = [1, 1]} : vector<16x121xf32> to vector<16x119xf32>
    %cst_10 = arith.constant 0.000000e+00 : f32
    %14 = vector.broadcast %cst_10 : f32 to vector<16x2xf32>
    %15 = tpu.concatenate %13, %14 in 1 : vector<16x119xf32>, vector<16x2xf32> -> vector<16x121xf32>
    %cst_11 = arith.constant dense<0.000000e+00> : vector<32x121xf32>
    %16 = tpu.matmul %12, %15, %cst_11 {dimension_numbers = #tpu.dot_dimension_numbers<[1], [0], [0], [1], [0, 0, 1, 1], [], []>} : vector<32x16xf32>, vector<16x121xf32>, vector<32x121xf32> -> vector<32x121xf32>
    %17 = arith.addf %10, %16 : vector<32x121xf32>
    %c3 = arith.constant 3 : index
    %c0_12 = arith.constant 0 : index
    %c0_13 = arith.constant 0 : index
    %18 = vector.load %arg2[%c3, %c0_12, %c0_13] : memref<9x32x16xf32, #tpu.memory_space<vmem>>, vector<1x32x16xf32>
    %19 = vector.shape_cast %18 : vector<1x32x16xf32> to vector<32x16xf32>
    %20 = vector.extract_strided_slice %0 {offsets = [0, 11], sizes = [16, 110], strides = [1, 1]} : vector<16x121xf32> to vector<16x110xf32>
    %cst_14 = arith.constant 0.000000e+00 : f32
    %21 = vector.broadcast %cst_14 : f32 to vector<16x11xf32>
    %22 = tpu.concatenate %20, %21 in 1 : vector<16x110xf32>, vector<16x11xf32> -> vector<16x121xf32>
    %cst_15 = arith.constant dense<0.000000e+00> : vector<32x121xf32>
    %23 = tpu.matmul %19, %22, %cst_15 {dimension_numbers = #tpu.dot_dimension_numbers<[1], [0], [0], [1], [0, 0, 1, 1], [], []>} : vector<32x16xf32>, vector<16x121xf32>, vector<32x121xf32> -> vector<32x121xf32>
    %24 = arith.addf %17, %23 : vector<32x121xf32>
    %c4 = arith.constant 4 : index
    %c0_16 = arith.constant 0 : index
    %c0_17 = arith.constant 0 : index
    %25 = vector.load %arg2[%c4, %c0_16, %c0_17] : memref<9x32x16xf32, #tpu.memory_space<vmem>>, vector<1x32x16xf32>
    %26 = vector.shape_cast %25 : vector<1x32x16xf32> to vector<32x16xf32>
    %27 = vector.extract_strided_slice %0 {offsets = [0, 12], sizes = [16, 109], strides = [1, 1]} : vector<16x121xf32> to vector<16x109xf32>
    %cst_18 = arith.constant 0.000000e+00 : f32
    %28 = vector.broadcast %cst_18 : f32 to vector<16x12xf32>
    %29 = tpu.concatenate %27, %28 in 1 : vector<16x109xf32>, vector<16x12xf32> -> vector<16x121xf32>
    %cst_19 = arith.constant dense<0.000000e+00> : vector<32x121xf32>
    %30 = tpu.matmul %26, %29, %cst_19 {dimension_numbers = #tpu.dot_dimension_numbers<[1], [0], [0], [1], [0, 0, 1, 1], [], []>} : vector<32x16xf32>, vector<16x121xf32>, vector<32x121xf32> -> vector<32x121xf32>
    %31 = arith.addf %24, %30 : vector<32x121xf32>
    %c5 = arith.constant 5 : index
    %c0_20 = arith.constant 0 : index
    %c0_21 = arith.constant 0 : index
    %32 = vector.load %arg2[%c5, %c0_20, %c0_21] : memref<9x32x16xf32, #tpu.memory_space<vmem>>, vector<1x32x16xf32>
    %33 = vector.shape_cast %32 : vector<1x32x16xf32> to vector<32x16xf32>
    %34 = vector.extract_strided_slice %0 {offsets = [0, 13], sizes = [16, 108], strides = [1, 1]} : vector<16x121xf32> to vector<16x108xf32>
    %cst_22 = arith.constant 0.000000e+00 : f32
    %35 = vector.broadcast %cst_22 : f32 to vector<16x13xf32>
    %36 = tpu.concatenate %34, %35 in 1 : vector<16x108xf32>, vector<16x13xf32> -> vector<16x121xf32>
    %cst_23 = arith.constant dense<0.000000e+00> : vector<32x121xf32>
    %37 = tpu.matmul %33, %36, %cst_23 {dimension_numbers = #tpu.dot_dimension_numbers<[1], [0], [0], [1], [0, 0, 1, 1], [], []>} : vector<32x16xf32>, vector<16x121xf32>, vector<32x121xf32> -> vector<32x121xf32>
    %38 = arith.addf %31, %37 : vector<32x121xf32>
    %c6 = arith.constant 6 : index
    %c0_24 = arith.constant 0 : index
    %c0_25 = arith.constant 0 : index
    %39 = vector.load %arg2[%c6, %c0_24, %c0_25] : memref<9x32x16xf32, #tpu.memory_space<vmem>>, vector<1x32x16xf32>
    %40 = vector.shape_cast %39 : vector<1x32x16xf32> to vector<32x16xf32>
    %41 = vector.extract_strided_slice %0 {offsets = [0, 22], sizes = [16, 99], strides = [1, 1]} : vector<16x121xf32> to vector<16x99xf32>
    %cst_26 = arith.constant 0.000000e+00 : f32
    %42 = vector.broadcast %cst_26 : f32 to vector<16x22xf32>
    %43 = tpu.concatenate %41, %42 in 1 : vector<16x99xf32>, vector<16x22xf32> -> vector<16x121xf32>
    %cst_27 = arith.constant dense<0.000000e+00> : vector<32x121xf32>
    %44 = tpu.matmul %40, %43, %cst_27 {dimension_numbers = #tpu.dot_dimension_numbers<[1], [0], [0], [1], [0, 0, 1, 1], [], []>} : vector<32x16xf32>, vector<16x121xf32>, vector<32x121xf32> -> vector<32x121xf32>
    %45 = arith.addf %38, %44 : vector<32x121xf32>
    %c7 = arith.constant 7 : index
    %c0_28 = arith.constant 0 : index
    %c0_29 = arith.constant 0 : index
    %46 = vector.load %arg2[%c7, %c0_28, %c0_29] : memref<9x32x16xf32, #tpu.memory_space<vmem>>, vector<1x32x16xf32>
    %47 = vector.shape_cast %46 : vector<1x32x16xf32> to vector<32x16xf32>
    %48 = vector.extract_strided_slice %0 {offsets = [0, 23], sizes = [16, 98], strides = [1, 1]} : vector<16x121xf32> to vector<16x98xf32>
    %cst_30 = arith.constant 0.000000e+00 : f32
    %49 = vector.broadcast %cst_30 : f32 to vector<16x23xf32>
    %50 = tpu.concatenate %48, %49 in 1 : vector<16x98xf32>, vector<16x23xf32> -> vector<16x121xf32>
    %cst_31 = arith.constant dense<0.000000e+00> : vector<32x121xf32>
    %51 = tpu.matmul %47, %50, %cst_31 {dimension_numbers = #tpu.dot_dimension_numbers<[1], [0], [0], [1], [0, 0, 1, 1], [], []>} : vector<32x16xf32>, vector<16x121xf32>, vector<32x121xf32> -> vector<32x121xf32>
    %52 = arith.addf %45, %51 : vector<32x121xf32>
    %c8 = arith.constant 8 : index
    %c0_32 = arith.constant 0 : index
    %c0_33 = arith.constant 0 : index
    %53 = vector.load %arg2[%c8, %c0_32, %c0_33] : memref<9x32x16xf32, #tpu.memory_space<vmem>>, vector<1x32x16xf32>
    %54 = vector.shape_cast %53 : vector<1x32x16xf32> to vector<32x16xf32>
    %55 = vector.extract_strided_slice %0 {offsets = [0, 24], sizes = [16, 97], strides = [1, 1]} : vector<16x121xf32> to vector<16x97xf32>
    %cst_34 = arith.constant 0.000000e+00 : f32
    %56 = vector.broadcast %cst_34 : f32 to vector<16x24xf32>
    %57 = tpu.concatenate %55, %56 in 1 : vector<16x97xf32>, vector<16x24xf32> -> vector<16x121xf32>
    %cst_35 = arith.constant dense<0.000000e+00> : vector<32x121xf32>
    %58 = tpu.matmul %54, %57, %cst_35 {dimension_numbers = #tpu.dot_dimension_numbers<[1], [0], [0], [1], [0, 0, 1, 1], [], []>} : vector<32x16xf32>, vector<16x121xf32>, vector<32x121xf32> -> vector<32x121xf32>
    %59 = arith.addf %52, %58 : vector<32x121xf32>
    %c0_36 = arith.constant 0 : index
    %c0_37 = arith.constant 0 : index
    %60 = vector.load %arg3[%c0_36, %c0_37] : memref<32x1xf32, #tpu.memory_space<vmem>>, vector<32x1xf32>
    %61 = vector.broadcast %60 : vector<32x1xf32> to vector<32x121xf32>
    %62 = arith.addf %59, %61 : vector<32x121xf32>
    %cst_38 = arith.constant 0.000000e+00 : f32
    %63 = vector.broadcast %cst_38 : f32 to vector<32x121xf32>
    %64 = arith.maximumf %62, %63 : vector<32x121xf32>
    %c0_39 = arith.constant 0 : index
    %c0_40 = arith.constant 0 : index
    %65 = vector.load %arg16[%c0_39, %c0_40] : memref<121x121xf32, #tpu.memory_space<vmem>>, vector<121x121xf32>
    %cst_41 = arith.constant dense<0.000000e+00> : vector<32x121xf32>
    %66 = tpu.matmul %64, %65, %cst_41 {dimension_numbers = #tpu.dot_dimension_numbers<[1], [0], [0], [1], [0, 0, 1, 1], [], []>} : vector<32x121xf32>, vector<121x121xf32>, vector<32x121xf32> -> vector<32x121xf32>
    %c0_42 = arith.constant 0 : index
    %c0_43 = arith.constant 0 : index
    %c0_44 = arith.constant 0 : index
    %67 = vector.load %arg4[%c0_42, %c0_43, %c0_44] : memref<9x32x32xf32, #tpu.memory_space<vmem>>, vector<1x32x32xf32>
    %68 = vector.shape_cast %67 : vector<1x32x32xf32> to vector<32x32xf32>
    %cst_45 = arith.constant dense<0.000000e+00> : vector<32x121xf32>
    %69 = tpu.matmul %68, %66, %cst_45 {dimension_numbers = #tpu.dot_dimension_numbers<[1], [0], [0], [1], [0, 0, 1, 1], [], []>} : vector<32x32xf32>, vector<32x121xf32>, vector<32x121xf32> -> vector<32x121xf32>
    %c1_46 = arith.constant 1 : index
    %c0_47 = arith.constant 0 : index
    %c0_48 = arith.constant 0 : index
    %70 = vector.load %arg4[%c1_46, %c0_47, %c0_48] : memref<9x32x32xf32, #tpu.memory_space<vmem>>, vector<1x32x32xf32>
    %71 = vector.shape_cast %70 : vector<1x32x32xf32> to vector<32x32xf32>
    %72 = vector.extract_strided_slice %66 {offsets = [0, 1], sizes = [32, 120], strides = [1, 1]} : vector<32x121xf32> to vector<32x120xf32>
    %cst_49 = arith.constant 0.000000e+00 : f32
    %73 = vector.broadcast %cst_49 : f32 to vector<32x1xf32>
    %74 = tpu.concatenate %72, %73 in 1 : vector<32x120xf32>, vector<32x1xf32> -> vector<32x121xf32>
    %cst_50 = arith.constant dense<0.000000e+00> : vector<32x121xf32>
    %75 = tpu.matmul %71, %74, %cst_50 {dimension_numbers = #tpu.dot_dimension_numbers<[1], [0], [0], [1], [0, 0, 1, 1], [], []>} : vector<32x32xf32>, vector<32x121xf32>, vector<32x121xf32> -> vector<32x121xf32>
    %76 = arith.addf %69, %75 : vector<32x121xf32>
    %c2_51 = arith.constant 2 : index
    %c0_52 = arith.constant 0 : index
    %c0_53 = arith.constant 0 : index
    %77 = vector.load %arg4[%c2_51, %c0_52, %c0_53] : memref<9x32x32xf32, #tpu.memory_space<vmem>>, vector<1x32x32xf32>
    %78 = vector.shape_cast %77 : vector<1x32x32xf32> to vector<32x32xf32>
    %79 = vector.extract_strided_slice %66 {offsets = [0, 2], sizes = [32, 119], strides = [1, 1]} : vector<32x121xf32> to vector<32x119xf32>
    %cst_54 = arith.constant 0.000000e+00 : f32
    %80 = vector.broadcast %cst_54 : f32 to vector<32x2xf32>
    %81 = tpu.concatenate %79, %80 in 1 : vector<32x119xf32>, vector<32x2xf32> -> vector<32x121xf32>
    %cst_55 = arith.constant dense<0.000000e+00> : vector<32x121xf32>
    %82 = tpu.matmul %78, %81, %cst_55 {dimension_numbers = #tpu.dot_dimension_numbers<[1], [0], [0], [1], [0, 0, 1, 1], [], []>} : vector<32x32xf32>, vector<32x121xf32>, vector<32x121xf32> -> vector<32x121xf32>
    %83 = arith.addf %76, %82 : vector<32x121xf32>
    %c3_56 = arith.constant 3 : index
    %c0_57 = arith.constant 0 : index
    %c0_58 = arith.constant 0 : index
    %84 = vector.load %arg4[%c3_56, %c0_57, %c0_58] : memref<9x32x32xf32, #tpu.memory_space<vmem>>, vector<1x32x32xf32>
    %85 = vector.shape_cast %84 : vector<1x32x32xf32> to vector<32x32xf32>
    %86 = vector.extract_strided_slice %66 {offsets = [0, 11], sizes = [32, 110], strides = [1, 1]} : vector<32x121xf32> to vector<32x110xf32>
    %cst_59 = arith.constant 0.000000e+00 : f32
    %87 = vector.broadcast %cst_59 : f32 to vector<32x11xf32>
    %88 = tpu.concatenate %86, %87 in 1 : vector<32x110xf32>, vector<32x11xf32> -> vector<32x121xf32>
    %cst_60 = arith.constant dense<0.000000e+00> : vector<32x121xf32>
    %89 = tpu.matmul %85, %88, %cst_60 {dimension_numbers = #tpu.dot_dimension_numbers<[1], [0], [0], [1], [0, 0, 1, 1], [], []>} : vector<32x32xf32>, vector<32x121xf32>, vector<32x121xf32> -> vector<32x121xf32>
    %90 = arith.addf %83, %89 : vector<32x121xf32>
    %c4_61 = arith.constant 4 : index
    %c0_62 = arith.constant 0 : index
    %c0_63 = arith.constant 0 : index
    %91 = vector.load %arg4[%c4_61, %c0_62, %c0_63] : memref<9x32x32xf32, #tpu.memory_space<vmem>>, vector<1x32x32xf32>
    %92 = vector.shape_cast %91 : vector<1x32x32xf32> to vector<32x32xf32>
    %93 = vector.extract_strided_slice %66 {offsets = [0, 12], sizes = [32, 109], strides = [1, 1]} : vector<32x121xf32> to vector<32x109xf32>
    %cst_64 = arith.constant 0.000000e+00 : f32
    %94 = vector.broadcast %cst_64 : f32 to vector<32x12xf32>
    %95 = tpu.concatenate %93, %94 in 1 : vector<32x109xf32>, vector<32x12xf32> -> vector<32x121xf32>
    %cst_65 = arith.constant dense<0.000000e+00> : vector<32x121xf32>
    %96 = tpu.matmul %92, %95, %cst_65 {dimension_numbers = #tpu.dot_dimension_numbers<[1], [0], [0], [1], [0, 0, 1, 1], [], []>} : vector<32x32xf32>, vector<32x121xf32>, vector<32x121xf32> -> vector<32x121xf32>
    %97 = arith.addf %90, %96 : vector<32x121xf32>
    %c5_66 = arith.constant 5 : index
    %c0_67 = arith.constant 0 : index
    %c0_68 = arith.constant 0 : index
    %98 = vector.load %arg4[%c5_66, %c0_67, %c0_68] : memref<9x32x32xf32, #tpu.memory_space<vmem>>, vector<1x32x32xf32>
    %99 = vector.shape_cast %98 : vector<1x32x32xf32> to vector<32x32xf32>
    %100 = vector.extract_strided_slice %66 {offsets = [0, 13], sizes = [32, 108], strides = [1, 1]} : vector<32x121xf32> to vector<32x108xf32>
    %cst_69 = arith.constant 0.000000e+00 : f32
    %101 = vector.broadcast %cst_69 : f32 to vector<32x13xf32>
    %102 = tpu.concatenate %100, %101 in 1 : vector<32x108xf32>, vector<32x13xf32> -> vector<32x121xf32>
    %cst_70 = arith.constant dense<0.000000e+00> : vector<32x121xf32>
    %103 = tpu.matmul %99, %102, %cst_70 {dimension_numbers = #tpu.dot_dimension_numbers<[1], [0], [0], [1], [0, 0, 1, 1], [], []>} : vector<32x32xf32>, vector<32x121xf32>, vector<32x121xf32> -> vector<32x121xf32>
    %104 = arith.addf %97, %103 : vector<32x121xf32>
    %c6_71 = arith.constant 6 : index
    %c0_72 = arith.constant 0 : index
    %c0_73 = arith.constant 0 : index
    %105 = vector.load %arg4[%c6_71, %c0_72, %c0_73] : memref<9x32x32xf32, #tpu.memory_space<vmem>>, vector<1x32x32xf32>
    %106 = vector.shape_cast %105 : vector<1x32x32xf32> to vector<32x32xf32>
    %107 = vector.extract_strided_slice %66 {offsets = [0, 22], sizes = [32, 99], strides = [1, 1]} : vector<32x121xf32> to vector<32x99xf32>
    %cst_74 = arith.constant 0.000000e+00 : f32
    %108 = vector.broadcast %cst_74 : f32 to vector<32x22xf32>
    %109 = tpu.concatenate %107, %108 in 1 : vector<32x99xf32>, vector<32x22xf32> -> vector<32x121xf32>
    %cst_75 = arith.constant dense<0.000000e+00> : vector<32x121xf32>
    %110 = tpu.matmul %106, %109, %cst_75 {dimension_numbers = #tpu.dot_dimension_numbers<[1], [0], [0], [1], [0, 0, 1, 1], [], []>} : vector<32x32xf32>, vector<32x121xf32>, vector<32x121xf32> -> vector<32x121xf32>
    %111 = arith.addf %104, %110 : vector<32x121xf32>
    %c7_76 = arith.constant 7 : index
    %c0_77 = arith.constant 0 : index
    %c0_78 = arith.constant 0 : index
    %112 = vector.load %arg4[%c7_76, %c0_77, %c0_78] : memref<9x32x32xf32, #tpu.memory_space<vmem>>, vector<1x32x32xf32>
    %113 = vector.shape_cast %112 : vector<1x32x32xf32> to vector<32x32xf32>
    %114 = vector.extract_strided_slice %66 {offsets = [0, 23], sizes = [32, 98], strides = [1, 1]} : vector<32x121xf32> to vector<32x98xf32>
    %cst_79 = arith.constant 0.000000e+00 : f32
    %115 = vector.broadcast %cst_79 : f32 to vector<32x23xf32>
    %116 = tpu.concatenate %114, %115 in 1 : vector<32x98xf32>, vector<32x23xf32> -> vector<32x121xf32>
    %cst_80 = arith.constant dense<0.000000e+00> : vector<32x121xf32>
    %117 = tpu.matmul %113, %116, %cst_80 {dimension_numbers = #tpu.dot_dimension_numbers<[1], [0], [0], [1], [0, 0, 1, 1], [], []>} : vector<32x32xf32>, vector<32x121xf32>, vector<32x121xf32> -> vector<32x121xf32>
    %118 = arith.addf %111, %117 : vector<32x121xf32>
    %c8_81 = arith.constant 8 : index
    %c0_82 = arith.constant 0 : index
    %c0_83 = arith.constant 0 : index
    %119 = vector.load %arg4[%c8_81, %c0_82, %c0_83] : memref<9x32x32xf32, #tpu.memory_space<vmem>>, vector<1x32x32xf32>
    %120 = vector.shape_cast %119 : vector<1x32x32xf32> to vector<32x32xf32>
    %121 = vector.extract_strided_slice %66 {offsets = [0, 24], sizes = [32, 97], strides = [1, 1]} : vector<32x121xf32> to vector<32x97xf32>
    %cst_84 = arith.constant 0.000000e+00 : f32
    %122 = vector.broadcast %cst_84 : f32 to vector<32x24xf32>
    %123 = tpu.concatenate %121, %122 in 1 : vector<32x97xf32>, vector<32x24xf32> -> vector<32x121xf32>
    %cst_85 = arith.constant dense<0.000000e+00> : vector<32x121xf32>
    %124 = tpu.matmul %120, %123, %cst_85 {dimension_numbers = #tpu.dot_dimension_numbers<[1], [0], [0], [1], [0, 0, 1, 1], [], []>} : vector<32x32xf32>, vector<32x121xf32>, vector<32x121xf32> -> vector<32x121xf32>
    %125 = arith.addf %118, %124 : vector<32x121xf32>
    %c0_86 = arith.constant 0 : index
    %c0_87 = arith.constant 0 : index
    %126 = vector.load %arg5[%c0_86, %c0_87] : memref<32x1xf32, #tpu.memory_space<vmem>>, vector<32x1xf32>
    %127 = vector.broadcast %126 : vector<32x1xf32> to vector<32x121xf32>
    %128 = arith.addf %125, %127 : vector<32x121xf32>
    %cst_88 = arith.constant 0.000000e+00 : f32
    %129 = vector.broadcast %cst_88 : f32 to vector<32x121xf32>
    %130 = arith.maximumf %128, %129 : vector<32x121xf32>
    %c0_89 = arith.constant 0 : index
    %c0_90 = arith.constant 0 : index
    %131 = vector.load %arg16[%c0_89, %c0_90] : memref<121x121xf32, #tpu.memory_space<vmem>>, vector<121x121xf32>
    %cst_91 = arith.constant dense<0.000000e+00> : vector<32x121xf32>
    %132 = tpu.matmul %130, %131, %cst_91 {dimension_numbers = #tpu.dot_dimension_numbers<[1], [0], [0], [1], [0, 0, 1, 1], [], []>} : vector<32x121xf32>, vector<121x121xf32>, vector<32x121xf32> -> vector<32x121xf32>
    %c0_92 = arith.constant 0 : index
    %c0_93 = arith.constant 0 : index
    %c0_94 = arith.constant 0 : index
    %133 = vector.load %arg6[%c0_92, %c0_93, %c0_94] : memref<9x32x32xf32, #tpu.memory_space<vmem>>, vector<1x32x32xf32>
    %134 = vector.shape_cast %133 : vector<1x32x32xf32> to vector<32x32xf32>
    %cst_95 = arith.constant dense<0.000000e+00> : vector<32x121xf32>
    %135 = tpu.matmul %134, %132, %cst_95 {dimension_numbers = #tpu.dot_dimension_numbers<[1], [0], [0], [1], [0, 0, 1, 1], [], []>} : vector<32x32xf32>, vector<32x121xf32>, vector<32x121xf32> -> vector<32x121xf32>
    %c1_96 = arith.constant 1 : index
    %c0_97 = arith.constant 0 : index
    %c0_98 = arith.constant 0 : index
    %136 = vector.load %arg6[%c1_96, %c0_97, %c0_98] : memref<9x32x32xf32, #tpu.memory_space<vmem>>, vector<1x32x32xf32>
    %137 = vector.shape_cast %136 : vector<1x32x32xf32> to vector<32x32xf32>
    %138 = vector.extract_strided_slice %132 {offsets = [0, 1], sizes = [32, 120], strides = [1, 1]} : vector<32x121xf32> to vector<32x120xf32>
    %cst_99 = arith.constant 0.000000e+00 : f32
    %139 = vector.broadcast %cst_99 : f32 to vector<32x1xf32>
    %140 = tpu.concatenate %138, %139 in 1 : vector<32x120xf32>, vector<32x1xf32> -> vector<32x121xf32>
    %cst_100 = arith.constant dense<0.000000e+00> : vector<32x121xf32>
    %141 = tpu.matmul %137, %140, %cst_100 {dimension_numbers = #tpu.dot_dimension_numbers<[1], [0], [0], [1], [0, 0, 1, 1], [], []>} : vector<32x32xf32>, vector<32x121xf32>, vector<32x121xf32> -> vector<32x121xf32>
    %142 = arith.addf %135, %141 : vector<32x121xf32>
    %c2_101 = arith.constant 2 : index
    %c0_102 = arith.constant 0 : index
    %c0_103 = arith.constant 0 : index
    %143 = vector.load %arg6[%c2_101, %c0_102, %c0_103] : memref<9x32x32xf32, #tpu.memory_space<vmem>>, vector<1x32x32xf32>
    %144 = vector.shape_cast %143 : vector<1x32x32xf32> to vector<32x32xf32>
    %145 = vector.extract_strided_slice %132 {offsets = [0, 2], sizes = [32, 119], strides = [1, 1]} : vector<32x121xf32> to vector<32x119xf32>
    %cst_104 = arith.constant 0.000000e+00 : f32
    %146 = vector.broadcast %cst_104 : f32 to vector<32x2xf32>
    %147 = tpu.concatenate %145, %146 in 1 : vector<32x119xf32>, vector<32x2xf32> -> vector<32x121xf32>
    %cst_105 = arith.constant dense<0.000000e+00> : vector<32x121xf32>
    %148 = tpu.matmul %144, %147, %cst_105 {dimension_numbers = #tpu.dot_dimension_numbers<[1], [0], [0], [1], [0, 0, 1, 1], [], []>} : vector<32x32xf32>, vector<32x121xf32>, vector<32x121xf32> -> vector<32x121xf32>
    %149 = arith.addf %142, %148 : vector<32x121xf32>
    %c3_106 = arith.constant 3 : index
    %c0_107 = arith.constant 0 : index
    %c0_108 = arith.constant 0 : index
    %150 = vector.load %arg6[%c3_106, %c0_107, %c0_108] : memref<9x32x32xf32, #tpu.memory_space<vmem>>, vector<1x32x32xf32>
    %151 = vector.shape_cast %150 : vector<1x32x32xf32> to vector<32x32xf32>
    %152 = vector.extract_strided_slice %132 {offsets = [0, 11], sizes = [32, 110], strides = [1, 1]} : vector<32x121xf32> to vector<32x110xf32>
    %cst_109 = arith.constant 0.000000e+00 : f32
    %153 = vector.broadcast %cst_109 : f32 to vector<32x11xf32>
    %154 = tpu.concatenate %152, %153 in 1 : vector<32x110xf32>, vector<32x11xf32> -> vector<32x121xf32>
    %cst_110 = arith.constant dense<0.000000e+00> : vector<32x121xf32>
    %155 = tpu.matmul %151, %154, %cst_110 {dimension_numbers = #tpu.dot_dimension_numbers<[1], [0], [0], [1], [0, 0, 1, 1], [], []>} : vector<32x32xf32>, vector<32x121xf32>, vector<32x121xf32> -> vector<32x121xf32>
    %156 = arith.addf %149, %155 : vector<32x121xf32>
    %c4_111 = arith.constant 4 : index
    %c0_112 = arith.constant 0 : index
    %c0_113 = arith.constant 0 : index
    %157 = vector.load %arg6[%c4_111, %c0_112, %c0_113] : memref<9x32x32xf32, #tpu.memory_space<vmem>>, vector<1x32x32xf32>
    %158 = vector.shape_cast %157 : vector<1x32x32xf32> to vector<32x32xf32>
    %159 = vector.extract_strided_slice %132 {offsets = [0, 12], sizes = [32, 109], strides = [1, 1]} : vector<32x121xf32> to vector<32x109xf32>
    %cst_114 = arith.constant 0.000000e+00 : f32
    %160 = vector.broadcast %cst_114 : f32 to vector<32x12xf32>
    %161 = tpu.concatenate %159, %160 in 1 : vector<32x109xf32>, vector<32x12xf32> -> vector<32x121xf32>
    %cst_115 = arith.constant dense<0.000000e+00> : vector<32x121xf32>
    %162 = tpu.matmul %158, %161, %cst_115 {dimension_numbers = #tpu.dot_dimension_numbers<[1], [0], [0], [1], [0, 0, 1, 1], [], []>} : vector<32x32xf32>, vector<32x121xf32>, vector<32x121xf32> -> vector<32x121xf32>
    %163 = arith.addf %156, %162 : vector<32x121xf32>
    %c5_116 = arith.constant 5 : index
    %c0_117 = arith.constant 0 : index
    %c0_118 = arith.constant 0 : index
    %164 = vector.load %arg6[%c5_116, %c0_117, %c0_118] : memref<9x32x32xf32, #tpu.memory_space<vmem>>, vector<1x32x32xf32>
    %165 = vector.shape_cast %164 : vector<1x32x32xf32> to vector<32x32xf32>
    %166 = vector.extract_strided_slice %132 {offsets = [0, 13], sizes = [32, 108], strides = [1, 1]} : vector<32x121xf32> to vector<32x108xf32>
    %cst_119 = arith.constant 0.000000e+00 : f32
    %167 = vector.broadcast %cst_119 : f32 to vector<32x13xf32>
    %168 = tpu.concatenate %166, %167 in 1 : vector<32x108xf32>, vector<32x13xf32> -> vector<32x121xf32>
    %cst_120 = arith.constant dense<0.000000e+00> : vector<32x121xf32>
    %169 = tpu.matmul %165, %168, %cst_120 {dimension_numbers = #tpu.dot_dimension_numbers<[1], [0], [0], [1], [0, 0, 1, 1], [], []>} : vector<32x32xf32>, vector<32x121xf32>, vector<32x121xf32> -> vector<32x121xf32>
    %170 = arith.addf %163, %169 : vector<32x121xf32>
    %c6_121 = arith.constant 6 : index
    %c0_122 = arith.constant 0 : index
    %c0_123 = arith.constant 0 : index
    %171 = vector.load %arg6[%c6_121, %c0_122, %c0_123] : memref<9x32x32xf32, #tpu.memory_space<vmem>>, vector<1x32x32xf32>
    %172 = vector.shape_cast %171 : vector<1x32x32xf32> to vector<32x32xf32>
    %173 = vector.extract_strided_slice %132 {offsets = [0, 22], sizes = [32, 99], strides = [1, 1]} : vector<32x121xf32> to vector<32x99xf32>
    %cst_124 = arith.constant 0.000000e+00 : f32
    %174 = vector.broadcast %cst_124 : f32 to vector<32x22xf32>
    %175 = tpu.concatenate %173, %174 in 1 : vector<32x99xf32>, vector<32x22xf32> -> vector<32x121xf32>
    %cst_125 = arith.constant dense<0.000000e+00> : vector<32x121xf32>
    %176 = tpu.matmul %172, %175, %cst_125 {dimension_numbers = #tpu.dot_dimension_numbers<[1], [0], [0], [1], [0, 0, 1, 1], [], []>} : vector<32x32xf32>, vector<32x121xf32>, vector<32x121xf32> -> vector<32x121xf32>
    %177 = arith.addf %170, %176 : vector<32x121xf32>
    %c7_126 = arith.constant 7 : index
    %c0_127 = arith.constant 0 : index
    %c0_128 = arith.constant 0 : index
    %178 = vector.load %arg6[%c7_126, %c0_127, %c0_128] : memref<9x32x32xf32, #tpu.memory_space<vmem>>, vector<1x32x32xf32>
    %179 = vector.shape_cast %178 : vector<1x32x32xf32> to vector<32x32xf32>
    %180 = vector.extract_strided_slice %132 {offsets = [0, 23], sizes = [32, 98], strides = [1, 1]} : vector<32x121xf32> to vector<32x98xf32>
    %cst_129 = arith.constant 0.000000e+00 : f32
    %181 = vector.broadcast %cst_129 : f32 to vector<32x23xf32>
    %182 = tpu.concatenate %180, %181 in 1 : vector<32x98xf32>, vector<32x23xf32> -> vector<32x121xf32>
    %cst_130 = arith.constant dense<0.000000e+00> : vector<32x121xf32>
    %183 = tpu.matmul %179, %182, %cst_130 {dimension_numbers = #tpu.dot_dimension_numbers<[1], [0], [0], [1], [0, 0, 1, 1], [], []>} : vector<32x32xf32>, vector<32x121xf32>, vector<32x121xf32> -> vector<32x121xf32>
    %184 = arith.addf %177, %183 : vector<32x121xf32>
    %c8_131 = arith.constant 8 : index
    %c0_132 = arith.constant 0 : index
    %c0_133 = arith.constant 0 : index
    %185 = vector.load %arg6[%c8_131, %c0_132, %c0_133] : memref<9x32x32xf32, #tpu.memory_space<vmem>>, vector<1x32x32xf32>
    %186 = vector.shape_cast %185 : vector<1x32x32xf32> to vector<32x32xf32>
    %187 = vector.extract_strided_slice %132 {offsets = [0, 24], sizes = [32, 97], strides = [1, 1]} : vector<32x121xf32> to vector<32x97xf32>
    %cst_134 = arith.constant 0.000000e+00 : f32
    %188 = vector.broadcast %cst_134 : f32 to vector<32x24xf32>
    %189 = tpu.concatenate %187, %188 in 1 : vector<32x97xf32>, vector<32x24xf32> -> vector<32x121xf32>
    %cst_135 = arith.constant dense<0.000000e+00> : vector<32x121xf32>
    %190 = tpu.matmul %186, %189, %cst_135 {dimension_numbers = #tpu.dot_dimension_numbers<[1], [0], [0], [1], [0, 0, 1, 1], [], []>} : vector<32x32xf32>, vector<32x121xf32>, vector<32x121xf32> -> vector<32x121xf32>
    %191 = arith.addf %184, %190 : vector<32x121xf32>
    %c0_136 = arith.constant 0 : index
    %c0_137 = arith.constant 0 : index
    %192 = vector.load %arg7[%c0_136, %c0_137] : memref<32x1xf32, #tpu.memory_space<vmem>>, vector<32x1xf32>
    %193 = vector.broadcast %192 : vector<32x1xf32> to vector<32x121xf32>
    %194 = arith.addf %191, %193 : vector<32x121xf32>
    %cst_138 = arith.constant 0.000000e+00 : f32
    %195 = vector.broadcast %cst_138 : f32 to vector<32x121xf32>
    %196 = arith.maximumf %194, %195 : vector<32x121xf32>
    %197 = vector.extract_strided_slice %196 {offsets = [0, 1], sizes = [32, 120], strides = [1, 1]} : vector<32x121xf32> to vector<32x120xf32>
    %cst_139 = arith.constant 0.000000e+00 : f32
    %198 = vector.broadcast %cst_139 : f32 to vector<32x1xf32>
    %199 = tpu.concatenate %197, %198 in 1 : vector<32x120xf32>, vector<32x1xf32> -> vector<32x121xf32>
    %200 = arith.maximumf %196, %199 : vector<32x121xf32>
    %201 = vector.extract_strided_slice %196 {offsets = [0, 11], sizes = [32, 110], strides = [1, 1]} : vector<32x121xf32> to vector<32x110xf32>
    %cst_140 = arith.constant 0.000000e+00 : f32
    %202 = vector.broadcast %cst_140 : f32 to vector<32x11xf32>
    %203 = tpu.concatenate %201, %202 in 1 : vector<32x110xf32>, vector<32x11xf32> -> vector<32x121xf32>
    %204 = vector.extract_strided_slice %196 {offsets = [0, 12], sizes = [32, 109], strides = [1, 1]} : vector<32x121xf32> to vector<32x109xf32>
    %cst_141 = arith.constant 0.000000e+00 : f32
    %205 = vector.broadcast %cst_141 : f32 to vector<32x12xf32>
    %206 = tpu.concatenate %204, %205 in 1 : vector<32x109xf32>, vector<32x12xf32> -> vector<32x121xf32>
    %207 = arith.maximumf %203, %206 : vector<32x121xf32>
    %208 = arith.maximumf %200, %207 : vector<32x121xf32>
    %c0_142 = arith.constant 0 : index
    %c0_143 = arith.constant 0 : index
    %209 = vector.load %arg19[%c0_142, %c0_143] : memref<121x36xf32, #tpu.memory_space<vmem>>, vector<121x36xf32>
    %cst_144 = arith.constant dense<0.000000e+00> : vector<32x36xf32>
    %210 = tpu.matmul %208, %209, %cst_144 {dimension_numbers = #tpu.dot_dimension_numbers<[1], [0], [0], [1], [0, 0, 1, 1], [], []>} : vector<32x121xf32>, vector<121x36xf32>, vector<32x36xf32> -> vector<32x36xf32>
    %c0_145 = arith.constant 0 : index
    %c0_146 = arith.constant 0 : index
    %c0_147 = arith.constant 0 : index
    %211 = vector.load %arg8[%c0_145, %c0_146, %c0_147] : memref<4x64x32xf32, #tpu.memory_space<vmem>>, vector<1x64x32xf32>
    %212 = vector.shape_cast %211 : vector<1x64x32xf32> to vector<64x32xf32>
    %cst_148 = arith.constant dense<0.000000e+00> : vector<64x36xf32>
    %213 = tpu.matmul %212, %210, %cst_148 {dimension_numbers = #tpu.dot_dimension_numbers<[1], [0], [0], [1], [0, 0, 1, 1], [], []>} : vector<64x32xf32>, vector<32x36xf32>, vector<64x36xf32> -> vector<64x36xf32>
    %c1_149 = arith.constant 1 : index
    %c0_150 = arith.constant 0 : index
    %c0_151 = arith.constant 0 : index
    %214 = vector.load %arg8[%c1_149, %c0_150, %c0_151] : memref<4x64x32xf32, #tpu.memory_space<vmem>>, vector<1x64x32xf32>
    %215 = vector.shape_cast %214 : vector<1x64x32xf32> to vector<64x32xf32>
    %216 = vector.extract_strided_slice %210 {offsets = [0, 1], sizes = [32, 35], strides = [1, 1]} : vector<32x36xf32> to vector<32x35xf32>
    %cst_152 = arith.constant 0.000000e+00 : f32
    %217 = vector.broadcast %cst_152 : f32 to vector<32x1xf32>
    %218 = tpu.concatenate %216, %217 in 1 : vector<32x35xf32>, vector<32x1xf32> -> vector<32x36xf32>
    %cst_153 = arith.constant dense<0.000000e+00> : vector<64x36xf32>
    %219 = tpu.matmul %215, %218, %cst_153 {dimension_numbers = #tpu.dot_dimension_numbers<[1], [0], [0], [1], [0, 0, 1, 1], [], []>} : vector<64x32xf32>, vector<32x36xf32>, vector<64x36xf32> -> vector<64x36xf32>
    %220 = arith.addf %213, %219 : vector<64x36xf32>
    %c2_154 = arith.constant 2 : index
    %c0_155 = arith.constant 0 : index
    %c0_156 = arith.constant 0 : index
    %221 = vector.load %arg8[%c2_154, %c0_155, %c0_156] : memref<4x64x32xf32, #tpu.memory_space<vmem>>, vector<1x64x32xf32>
    %222 = vector.shape_cast %221 : vector<1x64x32xf32> to vector<64x32xf32>
    %223 = vector.extract_strided_slice %210 {offsets = [0, 6], sizes = [32, 30], strides = [1, 1]} : vector<32x36xf32> to vector<32x30xf32>
    %cst_157 = arith.constant 0.000000e+00 : f32
    %224 = vector.broadcast %cst_157 : f32 to vector<32x6xf32>
    %225 = tpu.concatenate %223, %224 in 1 : vector<32x30xf32>, vector<32x6xf32> -> vector<32x36xf32>
    %cst_158 = arith.constant dense<0.000000e+00> : vector<64x36xf32>
    %226 = tpu.matmul %222, %225, %cst_158 {dimension_numbers = #tpu.dot_dimension_numbers<[1], [0], [0], [1], [0, 0, 1, 1], [], []>} : vector<64x32xf32>, vector<32x36xf32>, vector<64x36xf32> -> vector<64x36xf32>
    %227 = arith.addf %220, %226 : vector<64x36xf32>
    %c3_159 = arith.constant 3 : index
    %c0_160 = arith.constant 0 : index
    %c0_161 = arith.constant 0 : index
    %228 = vector.load %arg8[%c3_159, %c0_160, %c0_161] : memref<4x64x32xf32, #tpu.memory_space<vmem>>, vector<1x64x32xf32>
    %229 = vector.shape_cast %228 : vector<1x64x32xf32> to vector<64x32xf32>
    %230 = vector.extract_strided_slice %210 {offsets = [0, 7], sizes = [32, 29], strides = [1, 1]} : vector<32x36xf32> to vector<32x29xf32>
    %cst_162 = arith.constant 0.000000e+00 : f32
    %231 = vector.broadcast %cst_162 : f32 to vector<32x7xf32>
    %232 = tpu.concatenate %230, %231 in 1 : vector<32x29xf32>, vector<32x7xf32> -> vector<32x36xf32>
    %cst_163 = arith.constant dense<0.000000e+00> : vector<64x36xf32>
    %233 = tpu.matmul %229, %232, %cst_163 {dimension_numbers = #tpu.dot_dimension_numbers<[1], [0], [0], [1], [0, 0, 1, 1], [], []>} : vector<64x32xf32>, vector<32x36xf32>, vector<64x36xf32> -> vector<64x36xf32>
    %234 = arith.addf %227, %233 : vector<64x36xf32>
    %c0_164 = arith.constant 0 : index
    %c0_165 = arith.constant 0 : index
    %235 = vector.load %arg9[%c0_164, %c0_165] : memref<64x1xf32, #tpu.memory_space<vmem>>, vector<64x1xf32>
    %236 = vector.broadcast %235 : vector<64x1xf32> to vector<64x36xf32>
    %237 = arith.addf %234, %236 : vector<64x36xf32>
    %cst_166 = arith.constant 0.000000e+00 : f32
    %238 = vector.broadcast %cst_166 : f32 to vector<64x36xf32>
    %239 = arith.maximumf %237, %238 : vector<64x36xf32>
    %c0_167 = arith.constant 0 : index
    %c0_168 = arith.constant 0 : index
    %240 = vector.load %arg17[%c0_167, %c0_168] : memref<36x49xf32, #tpu.memory_space<vmem>>, vector<36x49xf32>
    %cst_169 = arith.constant dense<0.000000e+00> : vector<64x49xf32>
    %241 = tpu.matmul %239, %240, %cst_169 {dimension_numbers = #tpu.dot_dimension_numbers<[1], [0], [0], [1], [0, 0, 1, 1], [], []>} : vector<64x36xf32>, vector<36x49xf32>, vector<64x49xf32> -> vector<64x49xf32>
    %c0_170 = arith.constant 0 : index
    %c0_171 = arith.constant 0 : index
    %c0_172 = arith.constant 0 : index
    %242 = vector.load %arg10[%c0_170, %c0_171, %c0_172] : memref<4x64x64xf32, #tpu.memory_space<vmem>>, vector<1x64x64xf32>
    %243 = vector.shape_cast %242 : vector<1x64x64xf32> to vector<64x64xf32>
    %cst_173 = arith.constant dense<0.000000e+00> : vector<64x49xf32>
    %244 = tpu.matmul %243, %241, %cst_173 {dimension_numbers = #tpu.dot_dimension_numbers<[1], [0], [0], [1], [0, 0, 1, 1], [], []>} : vector<64x64xf32>, vector<64x49xf32>, vector<64x49xf32> -> vector<64x49xf32>
    %c1_174 = arith.constant 1 : index
    %c0_175 = arith.constant 0 : index
    %c0_176 = arith.constant 0 : index
    %245 = vector.load %arg10[%c1_174, %c0_175, %c0_176] : memref<4x64x64xf32, #tpu.memory_space<vmem>>, vector<1x64x64xf32>
    %246 = vector.shape_cast %245 : vector<1x64x64xf32> to vector<64x64xf32>
    %247 = vector.extract_strided_slice %241 {offsets = [0, 1], sizes = [64, 48], strides = [1, 1]} : vector<64x49xf32> to vector<64x48xf32>
    %cst_177 = arith.constant 0.000000e+00 : f32
    %248 = vector.broadcast %cst_177 : f32 to vector<64x1xf32>
    %249 = tpu.concatenate %247, %248 in 1 : vector<64x48xf32>, vector<64x1xf32> -> vector<64x49xf32>
    %cst_178 = arith.constant dense<0.000000e+00> : vector<64x49xf32>
    %250 = tpu.matmul %246, %249, %cst_178 {dimension_numbers = #tpu.dot_dimension_numbers<[1], [0], [0], [1], [0, 0, 1, 1], [], []>} : vector<64x64xf32>, vector<64x49xf32>, vector<64x49xf32> -> vector<64x49xf32>
    %251 = arith.addf %244, %250 : vector<64x49xf32>
    %c2_179 = arith.constant 2 : index
    %c0_180 = arith.constant 0 : index
    %c0_181 = arith.constant 0 : index
    %252 = vector.load %arg10[%c2_179, %c0_180, %c0_181] : memref<4x64x64xf32, #tpu.memory_space<vmem>>, vector<1x64x64xf32>
    %253 = vector.shape_cast %252 : vector<1x64x64xf32> to vector<64x64xf32>
    %254 = vector.extract_strided_slice %241 {offsets = [0, 7], sizes = [64, 42], strides = [1, 1]} : vector<64x49xf32> to vector<64x42xf32>
    %cst_182 = arith.constant 0.000000e+00 : f32
    %255 = vector.broadcast %cst_182 : f32 to vector<64x7xf32>
    %256 = tpu.concatenate %254, %255 in 1 : vector<64x42xf32>, vector<64x7xf32> -> vector<64x49xf32>
    %cst_183 = arith.constant dense<0.000000e+00> : vector<64x49xf32>
    %257 = tpu.matmul %253, %256, %cst_183 {dimension_numbers = #tpu.dot_dimension_numbers<[1], [0], [0], [1], [0, 0, 1, 1], [], []>} : vector<64x64xf32>, vector<64x49xf32>, vector<64x49xf32> -> vector<64x49xf32>
    %258 = arith.addf %251, %257 : vector<64x49xf32>
    %c3_184 = arith.constant 3 : index
    %c0_185 = arith.constant 0 : index
    %c0_186 = arith.constant 0 : index
    %259 = vector.load %arg10[%c3_184, %c0_185, %c0_186] : memref<4x64x64xf32, #tpu.memory_space<vmem>>, vector<1x64x64xf32>
    %260 = vector.shape_cast %259 : vector<1x64x64xf32> to vector<64x64xf32>
    %261 = vector.extract_strided_slice %241 {offsets = [0, 8], sizes = [64, 41], strides = [1, 1]} : vector<64x49xf32> to vector<64x41xf32>
    %cst_187 = arith.constant 0.000000e+00 : f32
    %262 = vector.broadcast %cst_187 : f32 to vector<64x8xf32>
    %263 = tpu.concatenate %261, %262 in 1 : vector<64x41xf32>, vector<64x8xf32> -> vector<64x49xf32>
    %cst_188 = arith.constant dense<0.000000e+00> : vector<64x49xf32>
    %264 = tpu.matmul %260, %263, %cst_188 {dimension_numbers = #tpu.dot_dimension_numbers<[1], [0], [0], [1], [0, 0, 1, 1], [], []>} : vector<64x64xf32>, vector<64x49xf32>, vector<64x49xf32> -> vector<64x49xf32>
    %265 = arith.addf %258, %264 : vector<64x49xf32>
    %c0_189 = arith.constant 0 : index
    %c0_190 = arith.constant 0 : index
    %266 = vector.load %arg11[%c0_189, %c0_190] : memref<64x1xf32, #tpu.memory_space<vmem>>, vector<64x1xf32>
    %267 = vector.broadcast %266 : vector<64x1xf32> to vector<64x49xf32>
    %268 = arith.addf %265, %267 : vector<64x49xf32>
    %cst_191 = arith.constant 0.000000e+00 : f32
    %269 = vector.broadcast %cst_191 : f32 to vector<64x49xf32>
    %270 = arith.maximumf %268, %269 : vector<64x49xf32>
    %c0_192 = arith.constant 0 : index
    %c0_193 = arith.constant 0 : index
    %271 = vector.load %arg18[%c0_192, %c0_193] : memref<49x64xf32, #tpu.memory_space<vmem>>, vector<49x64xf32>
    %cst_194 = arith.constant dense<0.000000e+00> : vector<64x64xf32>
    %272 = tpu.matmul %270, %271, %cst_194 {dimension_numbers = #tpu.dot_dimension_numbers<[1], [0], [0], [1], [0, 0, 1, 1], [], []>} : vector<64x49xf32>, vector<49x64xf32>, vector<64x64xf32> -> vector<64x64xf32>
    %c0_195 = arith.constant 0 : index
    %c0_196 = arith.constant 0 : index
    %c0_197 = arith.constant 0 : index
    %273 = vector.load %arg12[%c0_195, %c0_196, %c0_197] : memref<4x64x64xf32, #tpu.memory_space<vmem>>, vector<1x64x64xf32>
    %274 = vector.shape_cast %273 : vector<1x64x64xf32> to vector<64x64xf32>
    %cst_198 = arith.constant dense<0.000000e+00> : vector<64x64xf32>
    %275 = tpu.matmul %274, %272, %cst_198 {dimension_numbers = #tpu.dot_dimension_numbers<[1], [0], [0], [1], [0, 0, 1, 1], [], []>} : vector<64x64xf32>, vector<64x64xf32>, vector<64x64xf32> -> vector<64x64xf32>
    %c1_199 = arith.constant 1 : index
    %c0_200 = arith.constant 0 : index
    %c0_201 = arith.constant 0 : index
    %276 = vector.load %arg12[%c1_199, %c0_200, %c0_201] : memref<4x64x64xf32, #tpu.memory_space<vmem>>, vector<1x64x64xf32>
    %277 = vector.shape_cast %276 : vector<1x64x64xf32> to vector<64x64xf32>
    %278 = vector.extract_strided_slice %272 {offsets = [0, 1], sizes = [64, 63], strides = [1, 1]} : vector<64x64xf32> to vector<64x63xf32>
    %cst_202 = arith.constant 0.000000e+00 : f32
    %279 = vector.broadcast %cst_202 : f32 to vector<64x1xf32>
    %280 = tpu.concatenate %278, %279 in 1 : vector<64x63xf32>, vector<64x1xf32> -> vector<64x64xf32>
    %cst_203 = arith.constant dense<0.000000e+00> : vector<64x64xf32>
    %281 = tpu.matmul %277, %280, %cst_203 {dimension_numbers = #tpu.dot_dimension_numbers<[1], [0], [0], [1], [0, 0, 1, 1], [], []>} : vector<64x64xf32>, vector<64x64xf32>, vector<64x64xf32> -> vector<64x64xf32>
    %282 = arith.addf %275, %281 : vector<64x64xf32>
    %c2_204 = arith.constant 2 : index
    %c0_205 = arith.constant 0 : index
    %c0_206 = arith.constant 0 : index
    %283 = vector.load %arg12[%c2_204, %c0_205, %c0_206] : memref<4x64x64xf32, #tpu.memory_space<vmem>>, vector<1x64x64xf32>
    %284 = vector.shape_cast %283 : vector<1x64x64xf32> to vector<64x64xf32>
    %285 = vector.extract_strided_slice %272 {offsets = [0, 8], sizes = [64, 56], strides = [1, 1]} : vector<64x64xf32> to vector<64x56xf32>
    %cst_207 = arith.constant 0.000000e+00 : f32
    %286 = vector.broadcast %cst_207 : f32 to vector<64x8xf32>
    %287 = tpu.concatenate %285, %286 in 1 : vector<64x56xf32>, vector<64x8xf32> -> vector<64x64xf32>
    %cst_208 = arith.constant dense<0.000000e+00> : vector<64x64xf32>
    %288 = tpu.matmul %284, %287, %cst_208 {dimension_numbers = #tpu.dot_dimension_numbers<[1], [0], [0], [1], [0, 0, 1, 1], [], []>} : vector<64x64xf32>, vector<64x64xf32>, vector<64x64xf32> -> vector<64x64xf32>
    %289 = arith.addf %282, %288 : vector<64x64xf32>
    %c3_209 = arith.constant 3 : index
    %c0_210 = arith.constant 0 : index
    %c0_211 = arith.constant 0 : index
    %290 = vector.load %arg12[%c3_209, %c0_210, %c0_211] : memref<4x64x64xf32, #tpu.memory_space<vmem>>, vector<1x64x64xf32>
    %291 = vector.shape_cast %290 : vector<1x64x64xf32> to vector<64x64xf32>
    %292 = vector.extract_strided_slice %272 {offsets = [0, 9], sizes = [64, 55], strides = [1, 1]} : vector<64x64xf32> to vector<64x55xf32>
    %cst_212 = arith.constant 0.000000e+00 : f32
    %293 = vector.broadcast %cst_212 : f32 to vector<64x9xf32>
    %294 = tpu.concatenate %292, %293 in 1 : vector<64x55xf32>, vector<64x9xf32> -> vector<64x64xf32>
    %cst_213 = arith.constant dense<0.000000e+00> : vector<64x64xf32>
    %295 = tpu.matmul %291, %294, %cst_213 {dimension_numbers = #tpu.dot_dimension_numbers<[1], [0], [0], [1], [0, 0, 1, 1], [], []>} : vector<64x64xf32>, vector<64x64xf32>, vector<64x64xf32> -> vector<64x64xf32>
    %296 = arith.addf %289, %295 : vector<64x64xf32>
    %c0_214 = arith.constant 0 : index
    %c0_215 = arith.constant 0 : index
    %297 = vector.load %arg13[%c0_214, %c0_215] : memref<64x1xf32, #tpu.memory_space<vmem>>, vector<64x1xf32>
    %298 = vector.broadcast %297 : vector<64x1xf32> to vector<64x64xf32>
    %299 = arith.addf %296, %298 : vector<64x64xf32>
    %cst_216 = arith.constant 0.000000e+00 : f32
    %300 = vector.broadcast %cst_216 : f32 to vector<64x64xf32>
    %301 = arith.maximumf %299, %300 : vector<64x64xf32>
    %302 = vector.extract_strided_slice %301 {offsets = [0, 1], sizes = [64, 63], strides = [1, 1]} : vector<64x64xf32> to vector<64x63xf32>
    %cst_217 = arith.constant 0.000000e+00 : f32
    %303 = vector.broadcast %cst_217 : f32 to vector<64x1xf32>
    %304 = tpu.concatenate %302, %303 in 1 : vector<64x63xf32>, vector<64x1xf32> -> vector<64x64xf32>
    %305 = arith.maximumf %301, %304 : vector<64x64xf32>
    %306 = vector.extract_strided_slice %301 {offsets = [0, 8], sizes = [64, 56], strides = [1, 1]} : vector<64x64xf32> to vector<64x56xf32>
    %cst_218 = arith.constant 0.000000e+00 : f32
    %307 = vector.broadcast %cst_218 : f32 to vector<64x8xf32>
    %308 = tpu.concatenate %306, %307 in 1 : vector<64x56xf32>, vector<64x8xf32> -> vector<64x64xf32>
    %309 = vector.extract_strided_slice %301 {offsets = [0, 9], sizes = [64, 55], strides = [1, 1]} : vector<64x64xf32> to vector<64x55xf32>
    %cst_219 = arith.constant 0.000000e+00 : f32
    %310 = vector.broadcast %cst_219 : f32 to vector<64x9xf32>
    %311 = tpu.concatenate %309, %310 in 1 : vector<64x55xf32>, vector<64x9xf32> -> vector<64x64xf32>
    %312 = arith.maximumf %308, %311 : vector<64x64xf32>
    %313 = arith.maximumf %305, %312 : vector<64x64xf32>
    %c0_220 = arith.constant 0 : index
    %c0_221 = arith.constant 0 : index
    %314 = vector.load %arg20[%c0_220, %c0_221] : memref<64x9xf32, #tpu.memory_space<vmem>>, vector<64x9xf32>
    %cst_222 = arith.constant dense<0.000000e+00> : vector<64x9xf32>
    %315 = tpu.matmul %313, %314, %cst_222 {dimension_numbers = #tpu.dot_dimension_numbers<[1], [0], [0], [1], [0, 0, 1, 1], [], []>} : vector<64x64xf32>, vector<64x9xf32>, vector<64x9xf32> -> vector<64x9xf32>
    %c0_223 = arith.constant 0 : index
    %c0_224 = arith.constant 0 : index
    %c0_225 = arith.constant 0 : index
    %316 = vector.load %arg14[%c0_223, %c0_224, %c0_225] : memref<9x96x64xf32, #tpu.memory_space<vmem>>, vector<1x96x64xf32>
    %317 = vector.shape_cast %316 : vector<1x96x64xf32> to vector<96x64xf32>
    %cst_226 = arith.constant dense<0.000000e+00> : vector<96x9xf32>
    %318 = tpu.matmul %317, %315, %cst_226 {dimension_numbers = #tpu.dot_dimension_numbers<[1], [0], [0], [1], [0, 0, 1, 1], [], []>} : vector<96x64xf32>, vector<64x9xf32>, vector<96x9xf32> -> vector<96x9xf32>
    %c1_227 = arith.constant 1 : index
    %c0_228 = arith.constant 0 : index
    %c0_229 = arith.constant 0 : index
    %319 = vector.load %arg14[%c1_227, %c0_228, %c0_229] : memref<9x96x64xf32, #tpu.memory_space<vmem>>, vector<1x96x64xf32>
    %320 = vector.shape_cast %319 : vector<1x96x64xf32> to vector<96x64xf32>
    %321 = vector.extract_strided_slice %315 {offsets = [0, 1], sizes = [64, 8], strides = [1, 1]} : vector<64x9xf32> to vector<64x8xf32>
    %cst_230 = arith.constant 0.000000e+00 : f32
    %322 = vector.broadcast %cst_230 : f32 to vector<64x1xf32>
    %323 = tpu.concatenate %321, %322 in 1 : vector<64x8xf32>, vector<64x1xf32> -> vector<64x9xf32>
    %cst_231 = arith.constant dense<0.000000e+00> : vector<96x9xf32>
    %324 = tpu.matmul %320, %323, %cst_231 {dimension_numbers = #tpu.dot_dimension_numbers<[1], [0], [0], [1], [0, 0, 1, 1], [], []>} : vector<96x64xf32>, vector<64x9xf32>, vector<96x9xf32> -> vector<96x9xf32>
    %325 = arith.addf %318, %324 : vector<96x9xf32>
    %c2_232 = arith.constant 2 : index
    %c0_233 = arith.constant 0 : index
    %c0_234 = arith.constant 0 : index
    %326 = vector.load %arg14[%c2_232, %c0_233, %c0_234] : memref<9x96x64xf32, #tpu.memory_space<vmem>>, vector<1x96x64xf32>
    %327 = vector.shape_cast %326 : vector<1x96x64xf32> to vector<96x64xf32>
    %328 = vector.extract_strided_slice %315 {offsets = [0, 2], sizes = [64, 7], strides = [1, 1]} : vector<64x9xf32> to vector<64x7xf32>
    %cst_235 = arith.constant 0.000000e+00 : f32
    %329 = vector.broadcast %cst_235 : f32 to vector<64x2xf32>
    %330 = tpu.concatenate %328, %329 in 1 : vector<64x7xf32>, vector<64x2xf32> -> vector<64x9xf32>
    %cst_236 = arith.constant dense<0.000000e+00> : vector<96x9xf32>
    %331 = tpu.matmul %327, %330, %cst_236 {dimension_numbers = #tpu.dot_dimension_numbers<[1], [0], [0], [1], [0, 0, 1, 1], [], []>} : vector<96x64xf32>, vector<64x9xf32>, vector<96x9xf32> -> vector<96x9xf32>
    %332 = arith.addf %325, %331 : vector<96x9xf32>
    %c3_237 = arith.constant 3 : index
    %c0_238 = arith.constant 0 : index
    %c0_239 = arith.constant 0 : index
    %333 = vector.load %arg14[%c3_237, %c0_238, %c0_239] : memref<9x96x64xf32, #tpu.memory_space<vmem>>, vector<1x96x64xf32>
    %334 = vector.shape_cast %333 : vector<1x96x64xf32> to vector<96x64xf32>
    %335 = vector.extract_strided_slice %315 {offsets = [0, 3], sizes = [64, 6], strides = [1, 1]} : vector<64x9xf32> to vector<64x6xf32>
    %cst_240 = arith.constant 0.000000e+00 : f32
    %336 = vector.broadcast %cst_240 : f32 to vector<64x3xf32>
    %337 = tpu.concatenate %335, %336 in 1 : vector<64x6xf32>, vector<64x3xf32> -> vector<64x9xf32>
    %cst_241 = arith.constant dense<0.000000e+00> : vector<96x9xf32>
    %338 = tpu.matmul %334, %337, %cst_241 {dimension_numbers = #tpu.dot_dimension_numbers<[1], [0], [0], [1], [0, 0, 1, 1], [], []>} : vector<96x64xf32>, vector<64x9xf32>, vector<96x9xf32> -> vector<96x9xf32>
    %339 = arith.addf %332, %338 : vector<96x9xf32>
    %c4_242 = arith.constant 4 : index
    %c0_243 = arith.constant 0 : index
    %c0_244 = arith.constant 0 : index
    %340 = vector.load %arg14[%c4_242, %c0_243, %c0_244] : memref<9x96x64xf32, #tpu.memory_space<vmem>>, vector<1x96x64xf32>
    %341 = vector.shape_cast %340 : vector<1x96x64xf32> to vector<96x64xf32>
    %342 = vector.extract_strided_slice %315 {offsets = [0, 4], sizes = [64, 5], strides = [1, 1]} : vector<64x9xf32> to vector<64x5xf32>
    %cst_245 = arith.constant 0.000000e+00 : f32
    %343 = vector.broadcast %cst_245 : f32 to vector<64x4xf32>
    %344 = tpu.concatenate %342, %343 in 1 : vector<64x5xf32>, vector<64x4xf32> -> vector<64x9xf32>
    %cst_246 = arith.constant dense<0.000000e+00> : vector<96x9xf32>
    %345 = tpu.matmul %341, %344, %cst_246 {dimension_numbers = #tpu.dot_dimension_numbers<[1], [0], [0], [1], [0, 0, 1, 1], [], []>} : vector<96x64xf32>, vector<64x9xf32>, vector<96x9xf32> -> vector<96x9xf32>
    %346 = arith.addf %339, %345 : vector<96x9xf32>
    %c5_247 = arith.constant 5 : index
    %c0_248 = arith.constant 0 : index
    %c0_249 = arith.constant 0 : index
    %347 = vector.load %arg14[%c5_247, %c0_248, %c0_249] : memref<9x96x64xf32, #tpu.memory_space<vmem>>, vector<1x96x64xf32>
    %348 = vector.shape_cast %347 : vector<1x96x64xf32> to vector<96x64xf32>
    %349 = vector.extract_strided_slice %315 {offsets = [0, 5], sizes = [64, 4], strides = [1, 1]} : vector<64x9xf32> to vector<64x4xf32>
    %cst_250 = arith.constant 0.000000e+00 : f32
    %350 = vector.broadcast %cst_250 : f32 to vector<64x5xf32>
    %351 = tpu.concatenate %349, %350 in 1 : vector<64x4xf32>, vector<64x5xf32> -> vector<64x9xf32>
    %cst_251 = arith.constant dense<0.000000e+00> : vector<96x9xf32>
    %352 = tpu.matmul %348, %351, %cst_251 {dimension_numbers = #tpu.dot_dimension_numbers<[1], [0], [0], [1], [0, 0, 1, 1], [], []>} : vector<96x64xf32>, vector<64x9xf32>, vector<96x9xf32> -> vector<96x9xf32>
    %353 = arith.addf %346, %352 : vector<96x9xf32>
    %c6_252 = arith.constant 6 : index
    %c0_253 = arith.constant 0 : index
    %c0_254 = arith.constant 0 : index
    %354 = vector.load %arg14[%c6_252, %c0_253, %c0_254] : memref<9x96x64xf32, #tpu.memory_space<vmem>>, vector<1x96x64xf32>
    %355 = vector.shape_cast %354 : vector<1x96x64xf32> to vector<96x64xf32>
    %356 = vector.extract_strided_slice %315 {offsets = [0, 6], sizes = [64, 3], strides = [1, 1]} : vector<64x9xf32> to vector<64x3xf32>
    %cst_255 = arith.constant 0.000000e+00 : f32
    %357 = vector.broadcast %cst_255 : f32 to vector<64x6xf32>
    %358 = tpu.concatenate %356, %357 in 1 : vector<64x3xf32>, vector<64x6xf32> -> vector<64x9xf32>
    %cst_256 = arith.constant dense<0.000000e+00> : vector<96x9xf32>
    %359 = tpu.matmul %355, %358, %cst_256 {dimension_numbers = #tpu.dot_dimension_numbers<[1], [0], [0], [1], [0, 0, 1, 1], [], []>} : vector<96x64xf32>, vector<64x9xf32>, vector<96x9xf32> -> vector<96x9xf32>
    %360 = arith.addf %353, %359 : vector<96x9xf32>
    %c7_257 = arith.constant 7 : index
    %c0_258 = arith.constant 0 : index
    %c0_259 = arith.constant 0 : index
    %361 = vector.load %arg14[%c7_257, %c0_258, %c0_259] : memref<9x96x64xf32, #tpu.memory_space<vmem>>, vector<1x96x64xf32>
    %362 = vector.shape_cast %361 : vector<1x96x64xf32> to vector<96x64xf32>
    %363 = vector.extract_strided_slice %315 {offsets = [0, 7], sizes = [64, 2], strides = [1, 1]} : vector<64x9xf32> to vector<64x2xf32>
    %cst_260 = arith.constant 0.000000e+00 : f32
    %364 = vector.broadcast %cst_260 : f32 to vector<64x7xf32>
    %365 = tpu.concatenate %363, %364 in 1 : vector<64x2xf32>, vector<64x7xf32> -> vector<64x9xf32>
    %cst_261 = arith.constant dense<0.000000e+00> : vector<96x9xf32>
    %366 = tpu.matmul %362, %365, %cst_261 {dimension_numbers = #tpu.dot_dimension_numbers<[1], [0], [0], [1], [0, 0, 1, 1], [], []>} : vector<96x64xf32>, vector<64x9xf32>, vector<96x9xf32> -> vector<96x9xf32>
    %367 = arith.addf %360, %366 : vector<96x9xf32>
    %c8_262 = arith.constant 8 : index
    %c0_263 = arith.constant 0 : index
    %c0_264 = arith.constant 0 : index
    %368 = vector.load %arg14[%c8_262, %c0_263, %c0_264] : memref<9x96x64xf32, #tpu.memory_space<vmem>>, vector<1x96x64xf32>
    %369 = vector.shape_cast %368 : vector<1x96x64xf32> to vector<96x64xf32>
    %370 = vector.extract_strided_slice %315 {offsets = [0, 8], sizes = [64, 1], strides = [1, 1]} : vector<64x9xf32> to vector<64x1xf32>
    %cst_265 = arith.constant 0.000000e+00 : f32
    %371 = vector.broadcast %cst_265 : f32 to vector<64x8xf32>
    %372 = tpu.concatenate %370, %371 in 1 : vector<64x1xf32>, vector<64x8xf32> -> vector<64x9xf32>
    %cst_266 = arith.constant dense<0.000000e+00> : vector<96x9xf32>
    %373 = tpu.matmul %369, %372, %cst_266 {dimension_numbers = #tpu.dot_dimension_numbers<[1], [0], [0], [1], [0, 0, 1, 1], [], []>} : vector<96x64xf32>, vector<64x9xf32>, vector<96x9xf32> -> vector<96x9xf32>
    %374 = arith.addf %367, %373 : vector<96x9xf32>
    %c0_267 = arith.constant 0 : index
    %c0_268 = arith.constant 0 : index
    %375 = vector.load %arg15[%c0_267, %c0_268] : memref<96x1xf32, #tpu.memory_space<vmem>>, vector<96x1xf32>
    %376 = vector.broadcast %375 : vector<96x1xf32> to vector<96x9xf32>
    %377 = arith.addf %374, %376 : vector<96x9xf32>
    %cst_269 = arith.constant 0.000000e+00 : f32
    %378 = vector.broadcast %cst_269 : f32 to vector<96x9xf32>
    %379 = arith.maximumf %377, %378 : vector<96x9xf32>
    %380 = vector.extract_strided_slice %379 {offsets = [0, 0], sizes = [24, 1], strides = [1, 1]} : vector<96x9xf32> to vector<24x1xf32>
    %381 = vector.extract_strided_slice %379 {offsets = [24, 0], sizes = [24, 1], strides = [1, 1]} : vector<96x9xf32> to vector<24x1xf32>
    %382 = vector.extract_strided_slice %379 {offsets = [48, 0], sizes = [24, 1], strides = [1, 1]} : vector<96x9xf32> to vector<24x1xf32>
    %383 = vector.extract_strided_slice %379 {offsets = [72, 0], sizes = [24, 1], strides = [1, 1]} : vector<96x9xf32> to vector<24x1xf32>
    %384 = tpu.concatenate %380, %381, %382, %383 in 1 : vector<24x1xf32>, vector<24x1xf32>, vector<24x1xf32>, vector<24x1xf32> -> vector<24x4xf32>
    %c8_270 = arith.constant 8 : index
    %c0_271 = arith.constant 0 : index
    %385 = vector.load %arg24[%c8_270, %c0_271] : memref<136x1xf32, #tpu.memory_space<vmem>>, vector<24x1xf32>
    %c8_272 = arith.constant 8 : index
    %c0_273 = arith.constant 0 : index
    %386 = vector.load %arg25[%c8_272, %c0_273] : memref<136x1xf32, #tpu.memory_space<vmem>>, vector<24x1xf32>
    %cst_274 = arith.constant dense<0.000000e+00> : vector<4xf32>
    %387 = vector.multi_reduction <add>, %384, %cst_274 [0] : vector<24x4xf32> to vector<4xf32>
    %388 = vector.shape_cast %387 : vector<4xf32> to vector<1x4xf32>
    %cst_275 = arith.constant 2.400000e+01 : f32
    %389 = vector.broadcast %cst_275 : f32 to vector<1x4xf32>
    %390 = arith.divf %388, %389 : vector<1x4xf32>
    %391 = vector.broadcast %390 : vector<1x4xf32> to vector<24x4xf32>
    %392 = arith.subf %384, %391 : vector<24x4xf32>
    %393 = vector.broadcast %390 : vector<1x4xf32> to vector<24x4xf32>
    %394 = arith.subf %384, %393 : vector<24x4xf32>
    %395 = arith.mulf %392, %394 : vector<24x4xf32>
    %cst_276 = arith.constant dense<0.000000e+00> : vector<4xf32>
    %396 = vector.multi_reduction <add>, %395, %cst_276 [0] : vector<24x4xf32> to vector<4xf32>
    %397 = vector.shape_cast %396 : vector<4xf32> to vector<1x4xf32>
    %cst_277 = arith.constant 2.400000e+01 : f32
    %398 = vector.broadcast %cst_277 : f32 to vector<1x4xf32>
    %399 = arith.divf %397, %398 : vector<1x4xf32>
    %400 = vector.broadcast %390 : vector<1x4xf32> to vector<24x4xf32>
    %401 = arith.subf %384, %400 : vector<24x4xf32>
    %cst_278 = arith.constant 9.99999974E-6 : f32
    %402 = vector.broadcast %cst_278 : f32 to vector<1x4xf32>
    %403 = arith.addf %399, %402 : vector<1x4xf32>
    %404 = math.rsqrt %403 : vector<1x4xf32>
    %405 = vector.broadcast %404 : vector<1x4xf32> to vector<24x4xf32>
    %406 = arith.mulf %401, %405 : vector<24x4xf32>
    %407 = vector.broadcast %385 : vector<24x1xf32> to vector<24x4xf32>
    %408 = arith.mulf %406, %407 : vector<24x4xf32>
    %409 = vector.broadcast %386 : vector<24x1xf32> to vector<24x4xf32>
    %410 = arith.addf %408, %409 : vector<24x4xf32>
    %c0_279 = arith.constant 0 : index
    %c0_280 = arith.constant 0 : index
    %411 = vector.load %arg21[%c0_279, %c0_280] : memref<8x4xf32, #tpu.memory_space<vmem>>, vector<8x4xf32>
    %c0_281 = arith.constant 0 : index
    %c0_282 = arith.constant 0 : index
    %412 = vector.load %arg24[%c0_281, %c0_282] : memref<136x1xf32, #tpu.memory_space<vmem>>, vector<8x1xf32>
    %c0_283 = arith.constant 0 : index
    %c0_284 = arith.constant 0 : index
    %413 = vector.load %arg25[%c0_283, %c0_284] : memref<136x1xf32, #tpu.memory_space<vmem>>, vector<8x1xf32>
    %cst_285 = arith.constant dense<0.000000e+00> : vector<4xf32>
    %414 = vector.multi_reduction <add>, %411, %cst_285 [0] : vector<8x4xf32> to vector<4xf32>
    %415 = vector.shape_cast %414 : vector<4xf32> to vector<1x4xf32>
    %cst_286 = arith.constant 8.000000e+00 : f32
    %416 = vector.broadcast %cst_286 : f32 to vector<1x4xf32>
    %417 = arith.divf %415, %416 : vector<1x4xf32>
    %418 = vector.broadcast %417 : vector<1x4xf32> to vector<8x4xf32>
    %419 = arith.subf %411, %418 : vector<8x4xf32>
    %420 = vector.broadcast %417 : vector<1x4xf32> to vector<8x4xf32>
    %421 = arith.subf %411, %420 : vector<8x4xf32>
    %422 = arith.mulf %419, %421 : vector<8x4xf32>
    %cst_287 = arith.constant dense<0.000000e+00> : vector<4xf32>
    %423 = vector.multi_reduction <add>, %422, %cst_287 [0] : vector<8x4xf32> to vector<4xf32>
    %424 = vector.shape_cast %423 : vector<4xf32> to vector<1x4xf32>
    %cst_288 = arith.constant 8.000000e+00 : f32
    %425 = vector.broadcast %cst_288 : f32 to vector<1x4xf32>
    %426 = arith.divf %424, %425 : vector<1x4xf32>
    %427 = vector.broadcast %417 : vector<1x4xf32> to vector<8x4xf32>
    %428 = arith.subf %411, %427 : vector<8x4xf32>
    %cst_289 = arith.constant 9.99999974E-6 : f32
    %429 = vector.broadcast %cst_289 : f32 to vector<1x4xf32>
    %430 = arith.addf %426, %429 : vector<1x4xf32>
    %431 = math.rsqrt %430 : vector<1x4xf32>
    %432 = vector.broadcast %431 : vector<1x4xf32> to vector<8x4xf32>
    %433 = arith.mulf %428, %432 : vector<8x4xf32>
    %434 = vector.broadcast %412 : vector<8x1xf32> to vector<8x4xf32>
    %435 = arith.mulf %433, %434 : vector<8x4xf32>
    %436 = vector.broadcast %413 : vector<8x1xf32> to vector<8x4xf32>
    %437 = arith.addf %435, %436 : vector<8x4xf32>
    %c0_290 = arith.constant 0 : index
    %c0_291 = arith.constant 0 : index
    %438 = vector.load %arg26[%c0_290, %c0_291] : memref<8x8xf32, #tpu.memory_space<vmem>>, vector<8x8xf32>
    %cst_292 = arith.constant dense<0.000000e+00> : vector<8x4xf32>
    %439 = tpu.matmul %438, %437, %cst_292 {dimension_numbers = #tpu.dot_dimension_numbers<[1], [0], [0], [1], [0, 0, 1, 1], [], []>} : vector<8x8xf32>, vector<8x4xf32>, vector<8x4xf32> -> vector<8x4xf32>
    %c0_293 = arith.constant 0 : index
    %c0_294 = arith.constant 0 : index
    %440 = vector.load %arg27[%c0_293, %c0_294] : memref<8x1xf32, #tpu.memory_space<vmem>>, vector<8x1xf32>
    %441 = vector.broadcast %440 : vector<8x1xf32> to vector<8x4xf32>
    %442 = arith.addf %439, %441 : vector<8x4xf32>
    %cst_295 = arith.constant 0.000000e+00 : f32
    %443 = vector.broadcast %cst_295 : f32 to vector<8x4xf32>
    %444 = arith.maximumf %442, %443 : vector<8x4xf32>
    %c32 = arith.constant 32 : index
    %c0_296 = arith.constant 0 : index
    %445 = vector.load %arg24[%c32, %c0_296] : memref<136x1xf32, #tpu.memory_space<vmem>>, vector<8x1xf32>
    %c32_297 = arith.constant 32 : index
    %c0_298 = arith.constant 0 : index
    %446 = vector.load %arg25[%c32_297, %c0_298] : memref<136x1xf32, #tpu.memory_space<vmem>>, vector<8x1xf32>
    %cst_299 = arith.constant dense<0.000000e+00> : vector<4xf32>
    %447 = vector.multi_reduction <add>, %444, %cst_299 [0] : vector<8x4xf32> to vector<4xf32>
    %448 = vector.shape_cast %447 : vector<4xf32> to vector<1x4xf32>
    %cst_300 = arith.constant 8.000000e+00 : f32
    %449 = vector.broadcast %cst_300 : f32 to vector<1x4xf32>
    %450 = arith.divf %448, %449 : vector<1x4xf32>
    %451 = vector.broadcast %450 : vector<1x4xf32> to vector<8x4xf32>
    %452 = arith.subf %444, %451 : vector<8x4xf32>
    %453 = vector.broadcast %450 : vector<1x4xf32> to vector<8x4xf32>
    %454 = arith.subf %444, %453 : vector<8x4xf32>
    %455 = arith.mulf %452, %454 : vector<8x4xf32>
    %cst_301 = arith.constant dense<0.000000e+00> : vector<4xf32>
    %456 = vector.multi_reduction <add>, %455, %cst_301 [0] : vector<8x4xf32> to vector<4xf32>
    %457 = vector.shape_cast %456 : vector<4xf32> to vector<1x4xf32>
    %cst_302 = arith.constant 8.000000e+00 : f32
    %458 = vector.broadcast %cst_302 : f32 to vector<1x4xf32>
    %459 = arith.divf %457, %458 : vector<1x4xf32>
    %460 = vector.broadcast %450 : vector<1x4xf32> to vector<8x4xf32>
    %461 = arith.subf %444, %460 : vector<8x4xf32>
    %cst_303 = arith.constant 9.99999974E-6 : f32
    %462 = vector.broadcast %cst_303 : f32 to vector<1x4xf32>
    %463 = arith.addf %459, %462 : vector<1x4xf32>
    %464 = math.rsqrt %463 : vector<1x4xf32>
    %465 = vector.broadcast %464 : vector<1x4xf32> to vector<8x4xf32>
    %466 = arith.mulf %461, %465 : vector<8x4xf32>
    %467 = vector.broadcast %445 : vector<8x1xf32> to vector<8x4xf32>
    %468 = arith.mulf %466, %467 : vector<8x4xf32>
    %469 = vector.broadcast %446 : vector<8x1xf32> to vector<8x4xf32>
    %470 = arith.addf %468, %469 : vector<8x4xf32>
    %471 = tpu.concatenate %410, %470 in 0 : vector<24x4xf32>, vector<8x4xf32> -> vector<32x4xf32>
    %c40 = arith.constant 40 : index
    %c0_304 = arith.constant 0 : index
    %472 = vector.load %arg24[%c40, %c0_304] : memref<136x1xf32, #tpu.memory_space<vmem>>, vector<32x1xf32>
    %c40_305 = arith.constant 40 : index
    %c0_306 = arith.constant 0 : index
    %473 = vector.load %arg25[%c40_305, %c0_306] : memref<136x1xf32, #tpu.memory_space<vmem>>, vector<32x1xf32>
    %cst_307 = arith.constant dense<0.000000e+00> : vector<4xf32>
    %474 = vector.multi_reduction <add>, %471, %cst_307 [0] : vector<32x4xf32> to vector<4xf32>
    %475 = vector.shape_cast %474 : vector<4xf32> to vector<1x4xf32>
    %cst_308 = arith.constant 3.200000e+01 : f32
    %476 = vector.broadcast %cst_308 : f32 to vector<1x4xf32>
    %477 = arith.divf %475, %476 : vector<1x4xf32>
    %478 = vector.broadcast %477 : vector<1x4xf32> to vector<32x4xf32>
    %479 = arith.subf %471, %478 : vector<32x4xf32>
    %480 = vector.broadcast %477 : vector<1x4xf32> to vector<32x4xf32>
    %481 = arith.subf %471, %480 : vector<32x4xf32>
    %482 = arith.mulf %479, %481 : vector<32x4xf32>
    %cst_309 = arith.constant dense<0.000000e+00> : vector<4xf32>
    %483 = vector.multi_reduction <add>, %482, %cst_309 [0] : vector<32x4xf32> to vector<4xf32>
    %484 = vector.shape_cast %483 : vector<4xf32> to vector<1x4xf32>
    %cst_310 = arith.constant 3.200000e+01 : f32
    %485 = vector.broadcast %cst_310 : f32 to vector<1x4xf32>
    %486 = arith.divf %484, %485 : vector<1x4xf32>
    %487 = vector.broadcast %477 : vector<1x4xf32> to vector<32x4xf32>
    %488 = arith.subf %471, %487 : vector<32x4xf32>
    %cst_311 = arith.constant 9.99999974E-6 : f32
    %489 = vector.broadcast %cst_311 : f32 to vector<1x4xf32>
    %490 = arith.addf %486, %489 : vector<1x4xf32>
    %491 = math.rsqrt %490 : vector<1x4xf32>
    %492 = vector.broadcast %491 : vector<1x4xf32> to vector<32x4xf32>
    %493 = arith.mulf %488, %492 : vector<32x4xf32>
    %494 = vector.broadcast %472 : vector<32x1xf32> to vector<32x4xf32>
    %495 = arith.mulf %493, %494 : vector<32x4xf32>
    %496 = vector.broadcast %473 : vector<32x1xf32> to vector<32x4xf32>
    %497 = arith.addf %495, %496 : vector<32x4xf32>
    %c0_312 = arith.constant 0 : index
    %c0_313 = arith.constant 0 : index
    %498 = vector.load %arg28[%c0_312, %c0_313] : memref<32x32xf32, #tpu.memory_space<vmem>>, vector<32x32xf32>
    %cst_314 = arith.constant dense<0.000000e+00> : vector<32x4xf32>
    %499 = tpu.matmul %498, %497, %cst_314 {dimension_numbers = #tpu.dot_dimension_numbers<[1], [0], [0], [1], [0, 0, 1, 1], [], []>} : vector<32x32xf32>, vector<32x4xf32>, vector<32x4xf32> -> vector<32x4xf32>
    %c0_315 = arith.constant 0 : index
    %c0_316 = arith.constant 0 : index
    %500 = vector.load %arg29[%c0_315, %c0_316] : memref<32x1xf32, #tpu.memory_space<vmem>>, vector<32x1xf32>
    %501 = vector.broadcast %500 : vector<32x1xf32> to vector<32x4xf32>
    %502 = arith.addf %499, %501 : vector<32x4xf32>
    %cst_317 = arith.constant 0.000000e+00 : f32
    %503 = vector.broadcast %cst_317 : f32 to vector<32x4xf32>
    %504 = arith.maximumf %502, %503 : vector<32x4xf32>
    %c0_318 = arith.constant 0 : index
    %c0_319 = arith.constant 0 : index
    %505 = vector.load %arg30[%c0_318, %c0_319] : memref<32x32xf32, #tpu.memory_space<vmem>>, vector<32x32xf32>
    %cst_320 = arith.constant dense<0.000000e+00> : vector<32x4xf32>
    %506 = tpu.matmul %505, %504, %cst_320 {dimension_numbers = #tpu.dot_dimension_numbers<[1], [0], [0], [1], [0, 0, 1, 1], [], []>} : vector<32x32xf32>, vector<32x4xf32>, vector<32x4xf32> -> vector<32x4xf32>
    %c0_321 = arith.constant 0 : index
    %c0_322 = arith.constant 0 : index
    %507 = vector.load %arg31[%c0_321, %c0_322] : memref<32x1xf32, #tpu.memory_space<vmem>>, vector<32x1xf32>
    %508 = vector.broadcast %507 : vector<32x1xf32> to vector<32x4xf32>
    %509 = arith.addf %506, %508 : vector<32x4xf32>
    %510 = arith.addf %509, %497 : vector<32x4xf32>
    %cst_323 = arith.constant 0.000000e+00 : f32
    %511 = vector.broadcast %cst_323 : f32 to vector<32x4xf32>
    %512 = arith.maximumf %510, %511 : vector<32x4xf32>
    %c72 = arith.constant 72 : index
    %c0_324 = arith.constant 0 : index
    %513 = vector.load %arg24[%c72, %c0_324] : memref<136x1xf32, #tpu.memory_space<vmem>>, vector<32x1xf32>
    %c72_325 = arith.constant 72 : index
    %c0_326 = arith.constant 0 : index
    %514 = vector.load %arg25[%c72_325, %c0_326] : memref<136x1xf32, #tpu.memory_space<vmem>>, vector<32x1xf32>
    %cst_327 = arith.constant dense<0.000000e+00> : vector<4xf32>
    %515 = vector.multi_reduction <add>, %512, %cst_327 [0] : vector<32x4xf32> to vector<4xf32>
    %516 = vector.shape_cast %515 : vector<4xf32> to vector<1x4xf32>
    %cst_328 = arith.constant 3.200000e+01 : f32
    %517 = vector.broadcast %cst_328 : f32 to vector<1x4xf32>
    %518 = arith.divf %516, %517 : vector<1x4xf32>
    %519 = vector.broadcast %518 : vector<1x4xf32> to vector<32x4xf32>
    %520 = arith.subf %512, %519 : vector<32x4xf32>
    %521 = vector.broadcast %518 : vector<1x4xf32> to vector<32x4xf32>
    %522 = arith.subf %512, %521 : vector<32x4xf32>
    %523 = arith.mulf %520, %522 : vector<32x4xf32>
    %cst_329 = arith.constant dense<0.000000e+00> : vector<4xf32>
    %524 = vector.multi_reduction <add>, %523, %cst_329 [0] : vector<32x4xf32> to vector<4xf32>
    %525 = vector.shape_cast %524 : vector<4xf32> to vector<1x4xf32>
    %cst_330 = arith.constant 3.200000e+01 : f32
    %526 = vector.broadcast %cst_330 : f32 to vector<1x4xf32>
    %527 = arith.divf %525, %526 : vector<1x4xf32>
    %528 = vector.broadcast %518 : vector<1x4xf32> to vector<32x4xf32>
    %529 = arith.subf %512, %528 : vector<32x4xf32>
    %cst_331 = arith.constant 9.99999974E-6 : f32
    %530 = vector.broadcast %cst_331 : f32 to vector<1x4xf32>
    %531 = arith.addf %527, %530 : vector<1x4xf32>
    %532 = math.rsqrt %531 : vector<1x4xf32>
    %533 = vector.broadcast %532 : vector<1x4xf32> to vector<32x4xf32>
    %534 = arith.mulf %529, %533 : vector<32x4xf32>
    %535 = vector.broadcast %513 : vector<32x1xf32> to vector<32x4xf32>
    %536 = arith.mulf %534, %535 : vector<32x4xf32>
    %537 = vector.broadcast %514 : vector<32x1xf32> to vector<32x4xf32>
    %538 = arith.addf %536, %537 : vector<32x4xf32>
    %c0_332 = arith.constant 0 : index
    %c0_333 = arith.constant 0 : index
    %539 = vector.load %arg32[%c0_332, %c0_333] : memref<128x32xf32, #tpu.memory_space<vmem>>, vector<128x32xf32>
    %cst_334 = arith.constant dense<0.000000e+00> : vector<128x4xf32>
    %540 = tpu.matmul %539, %538, %cst_334 {dimension_numbers = #tpu.dot_dimension_numbers<[1], [0], [0], [1], [0, 0, 1, 1], [], []>} : vector<128x32xf32>, vector<32x4xf32>, vector<128x4xf32> -> vector<128x4xf32>
    %c0_335 = arith.constant 0 : index
    %c0_336 = arith.constant 0 : index
    %541 = vector.load %arg33[%c0_335, %c0_336] : memref<128x32xf32, #tpu.memory_space<vmem>>, vector<128x32xf32>
    %c0_337 = arith.constant 0 : index
    %c0_338 = arith.constant 0 : index
    %542 = vector.load %arg22[%c0_337, %c0_338] : memref<32x4xf32, #tpu.memory_space<vmem>>, vector<32x4xf32>
    %cst_339 = arith.constant dense<0.000000e+00> : vector<128x4xf32>
    %543 = tpu.matmul %541, %542, %cst_339 {dimension_numbers = #tpu.dot_dimension_numbers<[1], [0], [0], [1], [0, 0, 1, 1], [], []>} : vector<128x32xf32>, vector<32x4xf32>, vector<128x4xf32> -> vector<128x4xf32>
    %544 = arith.addf %540, %543 : vector<128x4xf32>
    %c0_340 = arith.constant 0 : index
    %c0_341 = arith.constant 0 : index
    %545 = vector.load %arg34[%c0_340, %c0_341] : memref<128x1xf32, #tpu.memory_space<vmem>>, vector<128x1xf32>
    %546 = vector.broadcast %545 : vector<128x1xf32> to vector<128x4xf32>
    %547 = arith.addf %544, %546 : vector<128x4xf32>
    %548 = vector.extract_strided_slice %547 {offsets = [0, 0], sizes = [32, 4], strides = [1, 1]} : vector<128x4xf32> to vector<32x4xf32>
    %cst_342 = arith.constant 0.000000e+00 : f32
    %549 = vector.broadcast %cst_342 : f32 to vector<32x4xf32>
    %550 = arith.subf %549, %548 : vector<32x4xf32>
    %551 = math.exp %550 : vector<32x4xf32>
    %cst_343 = arith.constant 1.000000e+00 : f32
    %552 = vector.broadcast %cst_343 : f32 to vector<32x4xf32>
    %553 = arith.addf %552, %551 : vector<32x4xf32>
    %cst_344 = arith.constant 1.000000e+00 : f32
    %554 = vector.broadcast %cst_344 : f32 to vector<32x4xf32>
    %555 = arith.divf %554, %553 : vector<32x4xf32>
    %556 = vector.extract_strided_slice %547 {offsets = [32, 0], sizes = [32, 4], strides = [1, 1]} : vector<128x4xf32> to vector<32x4xf32>
    %cst_345 = arith.constant 0.000000e+00 : f32
    %557 = vector.broadcast %cst_345 : f32 to vector<32x4xf32>
    %558 = arith.subf %557, %556 : vector<32x4xf32>
    %559 = math.exp %558 : vector<32x4xf32>
    %cst_346 = arith.constant 1.000000e+00 : f32
    %560 = vector.broadcast %cst_346 : f32 to vector<32x4xf32>
    %561 = arith.addf %560, %559 : vector<32x4xf32>
    %cst_347 = arith.constant 1.000000e+00 : f32
    %562 = vector.broadcast %cst_347 : f32 to vector<32x4xf32>
    %563 = arith.divf %562, %561 : vector<32x4xf32>
    %564 = vector.extract_strided_slice %547 {offsets = [64, 0], sizes = [32, 4], strides = [1, 1]} : vector<128x4xf32> to vector<32x4xf32>
    %565 = math.tanh %564 : vector<32x4xf32>
    %566 = vector.extract_strided_slice %547 {offsets = [96, 0], sizes = [32, 4], strides = [1, 1]} : vector<128x4xf32> to vector<32x4xf32>
    %cst_348 = arith.constant 0.000000e+00 : f32
    %567 = vector.broadcast %cst_348 : f32 to vector<32x4xf32>
    %568 = arith.subf %567, %566 : vector<32x4xf32>
    %569 = math.exp %568 : vector<32x4xf32>
    %cst_349 = arith.constant 1.000000e+00 : f32
    %570 = vector.broadcast %cst_349 : f32 to vector<32x4xf32>
    %571 = arith.addf %570, %569 : vector<32x4xf32>
    %cst_350 = arith.constant 1.000000e+00 : f32
    %572 = vector.broadcast %cst_350 : f32 to vector<32x4xf32>
    %573 = arith.divf %572, %571 : vector<32x4xf32>
    %c0_351 = arith.constant 0 : index
    %c0_352 = arith.constant 0 : index
    %574 = vector.load %arg23[%c0_351, %c0_352] : memref<32x4xf32, #tpu.memory_space<vmem>>, vector<32x4xf32>
    %575 = arith.mulf %563, %574 : vector<32x4xf32>
    %576 = arith.mulf %555, %565 : vector<32x4xf32>
    %577 = arith.addf %575, %576 : vector<32x4xf32>
    %578 = math.tanh %577 : vector<32x4xf32>
    %579 = arith.mulf %573, %578 : vector<32x4xf32>
    %c0_353 = arith.constant 0 : index
    %c0_354 = arith.constant 0 : index
    %580 = vector.load %arg38[%c0_353, %c0_354] : memref<32x4xf32, #tpu.memory_space<vmem>>, vector<32x4xf32>
    tpu.vector_store %arg38[%c0_353, %c0_354], %579 {strides = array<i32>} : memref<32x4xf32, #tpu.memory_space<vmem>>, vector<32x4xf32>,
    %c0_355 = arith.constant 0 : index
    %c0_356 = arith.constant 0 : index
    %581 = vector.load %arg39[%c0_355, %c0_356] : memref<32x4xf32, #tpu.memory_space<vmem>>, vector<32x4xf32>
    tpu.vector_store %arg39[%c0_355, %c0_356], %577 {strides = array<i32>} : memref<32x4xf32, #tpu.memory_space<vmem>>, vector<32x4xf32>,
    %c104 = arith.constant 104 : index
    %c0_357 = arith.constant 0 : index
    %582 = vector.load %arg24[%c104, %c0_357] : memref<136x1xf32, #tpu.memory_space<vmem>>, vector<32x1xf32>
    %c104_358 = arith.constant 104 : index
    %c0_359 = arith.constant 0 : index
    %583 = vector.load %arg25[%c104_358, %c0_359] : memref<136x1xf32, #tpu.memory_space<vmem>>, vector<32x1xf32>
    %cst_360 = arith.constant dense<0.000000e+00> : vector<4xf32>
    %584 = vector.multi_reduction <add>, %579, %cst_360 [0] : vector<32x4xf32> to vector<4xf32>
    %585 = vector.shape_cast %584 : vector<4xf32> to vector<1x4xf32>
    %cst_361 = arith.constant 3.200000e+01 : f32
    %586 = vector.broadcast %cst_361 : f32 to vector<1x4xf32>
    %587 = arith.divf %585, %586 : vector<1x4xf32>
    %588 = vector.broadcast %587 : vector<1x4xf32> to vector<32x4xf32>
    %589 = arith.subf %579, %588 : vector<32x4xf32>
    %590 = vector.broadcast %587 : vector<1x4xf32> to vector<32x4xf32>
    %591 = arith.subf %579, %590 : vector<32x4xf32>
    %592 = arith.mulf %589, %591 : vector<32x4xf32>
    %cst_362 = arith.constant dense<0.000000e+00> : vector<4xf32>
    %593 = vector.multi_reduction <add>, %592, %cst_362 [0] : vector<32x4xf32> to vector<4xf32>
    %594 = vector.shape_cast %593 : vector<4xf32> to vector<1x4xf32>
    %cst_363 = arith.constant 3.200000e+01 : f32
    %595 = vector.broadcast %cst_363 : f32 to vector<1x4xf32>
    %596 = arith.divf %594, %595 : vector<1x4xf32>
    %597 = vector.broadcast %587 : vector<1x4xf32> to vector<32x4xf32>
    %598 = arith.subf %579, %597 : vector<32x4xf32>
    %cst_364 = arith.constant 9.99999974E-6 : f32
    %599 = vector.broadcast %cst_364 : f32 to vector<1x4xf32>
    %600 = arith.addf %596, %599 : vector<1x4xf32>
    %601 = math.rsqrt %600 : vector<1x4xf32>
    %602 = vector.broadcast %601 : vector<1x4xf32> to vector<32x4xf32>
    %603 = arith.mulf %598, %602 : vector<32x4xf32>
    %604 = vector.broadcast %582 : vector<32x1xf32> to vector<32x4xf32>
    %605 = arith.mulf %603, %604 : vector<32x4xf32>
    %606 = vector.broadcast %583 : vector<32x1xf32> to vector<32x4xf32>
    %607 = arith.addf %605, %606 : vector<32x4xf32>
    %c0_365 = arith.constant 0 : index
    %c0_366 = arith.constant 0 : index
    %608 = vector.load %arg35[%c0_365, %c0_366] : memref<7x32xf32, #tpu.memory_space<vmem>>, vector<7x32xf32>
    %cst_367 = arith.constant dense<0.000000e+00> : vector<7x4xf32>
    %609 = tpu.matmul %608, %607, %cst_367 {dimension_numbers = #tpu.dot_dimension_numbers<[1], [0], [0], [1], [0, 0, 1, 1], [], []>} : vector<7x32xf32>, vector<32x4xf32>, vector<7x4xf32> -> vector<7x4xf32>
    %c0_368 = arith.constant 0 : index
    %c0_369 = arith.constant 0 : index
    %610 = vector.load %arg36[%c0_368, %c0_369] : memref<7x1xf32, #tpu.memory_space<vmem>>, vector<7x1xf32>
    %611 = vector.broadcast %610 : vector<7x1xf32> to vector<7x4xf32>
    %612 = arith.addf %609, %611 : vector<7x4xf32>
    %c0_370 = arith.constant 0 : index
    %c0_371 = arith.constant 0 : index
    %613 = vector.load %arg37[%c0_370, %c0_371] : memref<7x4xf32, #tpu.memory_space<vmem>>, vector<7x4xf32>
    tpu.vector_store %arg37[%c0_370, %c0_371], %612 {strides = array<i32>} : memref<7x4xf32, #tpu.memory_space<vmem>>, vector<7x4xf32>,
    return
  }
  func.func @transform_0(%arg0: i32) -> (i32, i32) {
    %c0_i32 = arith.constant 0 : i32
    %c0_i32_0 = arith.constant 0 : i32
    %c0_i32_1 = arith.constant 0 : i32
    return %c0_i32, %c0_i32_0 : i32, i32
  }
  func.func @transform_1(%arg0: i32) -> (i32, i32, i32) {
    %c0_i32 = arith.constant 0 : i32
    %c0_i32_0 = arith.constant 0 : i32
    %c0_i32_1 = arith.constant 0 : i32
    %c0_i32_2 = arith.constant 0 : i32
    return %c0_i32, %c0_i32_0, %c0_i32_1 : i32, i32, i32
  }
  func.func @transform_2(%arg0: i32) -> (i32, i32) {
    %c0_i32 = arith.constant 0 : i32
    %c0_i32_0 = arith.constant 0 : i32
    %c0_i32_1 = arith.constant 0 : i32
    return %c0_i32, %c0_i32_0 : i32, i32
  }
  func.func @transform_3(%arg0: i32) -> (i32, i32, i32) {
    %c0_i32 = arith.constant 0 : i32
    %c0_i32_0 = arith.constant 0 : i32
    %c0_i32_1 = arith.constant 0 : i32
    %c0_i32_2 = arith.constant 0 : i32
    return %c0_i32, %c0_i32_0, %c0_i32_1 : i32, i32, i32
  }
  func.func @transform_4(%arg0: i32) -> (i32, i32) {
    %c0_i32 = arith.constant 0 : i32
    %c0_i32_0 = arith.constant 0 : i32
    %c0_i32_1 = arith.constant 0 : i32
    return %c0_i32, %c0_i32_0 : i32, i32
  }
  func.func @transform_5(%arg0: i32) -> (i32, i32, i32) {
    %c0_i32 = arith.constant 0 : i32
    %c0_i32_0 = arith.constant 0 : i32
    %c0_i32_1 = arith.constant 0 : i32
    %c0_i32_2 = arith.constant 0 : i32
    return %c0_i32, %c0_i32_0, %c0_i32_1 : i32, i32, i32
  }
  func.func @transform_6(%arg0: i32) -> (i32, i32) {
    %c0_i32 = arith.constant 0 : i32
    %c0_i32_0 = arith.constant 0 : i32
    %c0_i32_1 = arith.constant 0 : i32
    return %c0_i32, %c0_i32_0 : i32, i32
  }
  func.func @transform_7(%arg0: i32) -> (i32, i32, i32) {
    %c0_i32 = arith.constant 0 : i32
    %c0_i32_0 = arith.constant 0 : i32
    %c0_i32_1 = arith.constant 0 : i32
    %c0_i32_2 = arith.constant 0 : i32
    return %c0_i32, %c0_i32_0, %c0_i32_1 : i32, i32, i32
  }
  func.func @transform_8(%arg0: i32) -> (i32, i32) {
    %c0_i32 = arith.constant 0 : i32
    %c0_i32_0 = arith.constant 0 : i32
    %c0_i32_1 = arith.constant 0 : i32
    return %c0_i32, %c0_i32_0 : i32, i32
  }
  func.func @transform_9(%arg0: i32) -> (i32, i32, i32) {
    %c0_i32 = arith.constant 0 : i32
    %c0_i32_0 = arith.constant 0 : i32
    %c0_i32_1 = arith.constant 0 : i32
    %c0_i32_2 = arith.constant 0 : i32
    return %c0_i32, %c0_i32_0, %c0_i32_1 : i32, i32, i32
  }
  func.func @transform_10(%arg0: i32) -> (i32, i32) {
    %c0_i32 = arith.constant 0 : i32
    %c0_i32_0 = arith.constant 0 : i32
    %c0_i32_1 = arith.constant 0 : i32
    return %c0_i32, %c0_i32_0 : i32, i32
  }
  func.func @transform_11(%arg0: i32) -> (i32, i32, i32) {
    %c0_i32 = arith.constant 0 : i32
    %c0_i32_0 = arith.constant 0 : i32
    %c0_i32_1 = arith.constant 0 : i32
    %c0_i32_2 = arith.constant 0 : i32
    return %c0_i32, %c0_i32_0, %c0_i32_1 : i32, i32, i32
  }
  func.func @transform_12(%arg0: i32) -> (i32, i32) {
    %c0_i32 = arith.constant 0 : i32
    %c0_i32_0 = arith.constant 0 : i32
    %c0_i32_1 = arith.constant 0 : i32
    return %c0_i32, %c0_i32_0 : i32, i32
  }
  func.func @transform_13(%arg0: i32) -> (i32, i32, i32) {
    %c0_i32 = arith.constant 0 : i32
    %c0_i32_0 = arith.constant 0 : i32
    %c0_i32_1 = arith.constant 0 : i32
    %c0_i32_2 = arith.constant 0 : i32
    return %c0_i32, %c0_i32_0, %c0_i32_1 : i32, i32, i32
  }
  func.func @transform_14(%arg0: i32) -> (i32, i32) {
    %c0_i32 = arith.constant 0 : i32
    %c0_i32_0 = arith.constant 0 : i32
    %c0_i32_1 = arith.constant 0 : i32
    return %c0_i32, %c0_i32_0 : i32, i32
  }
  func.func @transform_15(%arg0: i32) -> (i32, i32) {
    %c0_i32 = arith.constant 0 : i32
    %c0_i32_0 = arith.constant 0 : i32
    %c0_i32_1 = arith.constant 0 : i32
    return %c0_i32, %c0_i32_0 : i32, i32
  }
  func.func @transform_16(%arg0: i32) -> (i32, i32) {
    %c0_i32 = arith.constant 0 : i32
    %c0_i32_0 = arith.constant 0 : i32
    %c0_i32_1 = arith.constant 0 : i32
    return %c0_i32, %c0_i32_0 : i32, i32
  }
  func.func @transform_17(%arg0: i32) -> (i32, i32) {
    %c0_i32 = arith.constant 0 : i32
    %c0_i32_0 = arith.constant 0 : i32
    %c0_i32_1 = arith.constant 0 : i32
    return %c0_i32, %c0_i32_0 : i32, i32
  }
  func.func @transform_18(%arg0: i32) -> (i32, i32) {
    %c0_i32 = arith.constant 0 : i32
    %c0_i32_0 = arith.constant 0 : i32
    %c0_i32_1 = arith.constant 0 : i32
    return %c0_i32, %c0_i32_0 : i32, i32
  }
  func.func @transform_19(%arg0: i32) -> (i32, i32) {
    %c0_i32 = arith.constant 0 : i32
    %c0_i32_0 = arith.constant 0 : i32
    %c0_i32_1 = arith.constant 0 : i32
    return %c0_i32, %c0_i32_0 : i32, i32
  }
  func.func @transform_20(%arg0: i32) -> (i32, i32) {
    %c0_i32 = arith.constant 0 : i32
    %c0_i32_0 = arith.constant 0 : i32
    %c0_i32_1 = arith.constant 0 : i32
    return %c0_i32, %c0_i32_0 : i32, i32
  }
  func.func @transform_21(%arg0: i32) -> (i32, i32) {
    %c0_i32 = arith.constant 0 : i32
    %c0_i32_0 = arith.constant 0 : i32
    %c0_i32_1 = arith.constant 0 : i32
    return %c0_i32, %c0_i32_0 : i32, i32
  }
  func.func @transform_22(%arg0: i32) -> (i32, i32) {
    %c0_i32 = arith.constant 0 : i32
    %c0_i32_0 = arith.constant 0 : i32
    %c0_i32_1 = arith.constant 0 : i32
    return %c0_i32, %c0_i32_0 : i32, i32
  }
  func.func @transform_23(%arg0: i32) -> (i32, i32) {
    %c0_i32 = arith.constant 0 : i32
    %c0_i32_0 = arith.constant 0 : i32
    %c0_i32_1 = arith.constant 0 : i32
    return %c0_i32, %c0_i32_0 : i32, i32
  }
  func.func @transform_24(%arg0: i32) -> (i32, i32) {
    %c0_i32 = arith.constant 0 : i32
    %c0_i32_0 = arith.constant 0 : i32
    %c0_i32_1 = arith.constant 0 : i32
    return %c0_i32, %c0_i32_0 : i32, i32
  }
  func.func @transform_25(%arg0: i32) -> (i32, i32) {
    %c0_i32 = arith.constant 0 : i32
    %c0_i32_0 = arith.constant 0 : i32
    %c0_i32_1 = arith.constant 0 : i32
    return %c0_i32, %c0_i32_0 : i32, i32
  }
  func.func @transform_26(%arg0: i32) -> (i32, i32) {
    %c0_i32 = arith.constant 0 : i32
    %c0_i32_0 = arith.constant 0 : i32
    %c0_i32_1 = arith.constant 0 : i32
    return %c0_i32, %c0_i32_0 : i32, i32
  }
  func.func @transform_27(%arg0: i32) -> (i32, i32) {
    %c0_i32 = arith.constant 0 : i32
    %c0_i32_0 = arith.constant 0 : i32
    %c0_i32_1 = arith.constant 0 : i32
    return %c0_i32, %c0_i32_0 : i32, i32
  }
  func.func @transform_28(%arg0: i32) -> (i32, i32) {
    %c0_i32 = arith.constant 0 : i32
    %c0_i32_0 = arith.constant 0 : i32
    %c0_i32_1 = arith.constant 0 : i32
    return %c0_i32, %c0_i32_0 : i32, i32
  }
  func.func @transform_29(%arg0: i32) -> (i32, i32) {
    %c0_i32 = arith.constant 0 : i32
    %c0_i32_0 = arith.constant 0 : i32
    %c0_i32_1 = arith.constant 0 : i32
    return %c0_i32, %c0_i32_0 : i32, i32
  }
  func.func @transform_30(%arg0: i32) -> (i32, i32) {
    %c0_i32 = arith.constant 0 : i32
    %c0_i32_0 = arith.constant 0 : i32
    %c0_i32_1 = arith.constant 0 : i32
    return %c0_i32, %c0_i32_0 : i32, i32
  }
  func.func @transform_31(%arg0: i32) -> (i32, i32) {
    %c0_i32 = arith.constant 0 : i32
    %c0_i32_0 = arith.constant 0 : i32
    %c0_i32_1 = arith.constant 0 : i32
    return %c0_i32, %c0_i32_0 : i32, i32
  }
  func.func @transform_32(%arg0: i32) -> (i32, i32) {
    %c0_i32 = arith.constant 0 : i32
    %c0_i32_0 = arith.constant 0 : i32
    %c0_i32_1 = arith.constant 0 : i32
    return %c0_i32, %c0_i32_0 : i32, i32
  }
  func.func @transform_33(%arg0: i32) -> (i32, i32) {
    %c0_i32 = arith.constant 0 : i32
    %c0_i32_0 = arith.constant 0 : i32
    %c0_i32_1 = arith.constant 0 : i32
    return %c0_i32, %c0_i32_0 : i32, i32
  }
  func.func @transform_34(%arg0: i32) -> (i32, i32) {
    %c0_i32 = arith.constant 0 : i32
    %c0_i32_0 = arith.constant 0 : i32
    %c0_i32_1 = arith.constant 0 : i32
    return %c0_i32, %c0_i32_0 : i32, i32
  }
  func.func @transform_35(%arg0: i32) -> (i32, i32) {
    %c0_i32 = arith.constant 0 : i32
    %c0_i32_0 = arith.constant 0 : i32
    %c0_i32_1 = arith.constant 0 : i32
    return %c0_i32, %c0_i32_0 : i32, i32
  }
  func.func @transform_36(%arg0: i32) -> (i32, i32) {
    %c0_i32 = arith.constant 0 : i32
    %c0_i32_0 = arith.constant 0 : i32
    %c0_i32_1 = arith.constant 0 : i32
    return %c0_i32, %c0_i32_0 : i32, i32
  }
  func.func @transform_37(%arg0: i32) -> (i32, i32) {
    %c0_i32 = arith.constant 0 : i32
    %c0_i32_0 = arith.constant 0 : i32
    %c0_i32_1 = arith.constant 0 : i32
    return %c0_i32, %c0_i32_0 : i32, i32
  }
  func.func @transform_38(%arg0: i32) -> (i32, i32) {
    %c0_i32 = arith.constant 0 : i32
    %c0_i32_0 = arith.constant 0 : i32
    %c0_i32_1 = arith.constant 0 : i32
    return %c0_i32, %c0_i32_0 : i32, i32
  }
}

</mosaic_0001>

<bundles_post_ra>
// kernel: sub.5
= control target key start
LH: loop header
LB: loop body
LE: loop exit
PB: predicated region body
PF: predicated region fallthrough
CT: control target
= control target key end

     0   :  { %vm7_vm0 = vcmask 15360   ;;  %s39_s0 = inlined_call_operand.vmem [shape: f32[4], index: 0, kind: input, shape index: {}]   ;;  %s40_s1 = inlined_call_operand.vmem [shape: f32[2,2], index: 1, kind: output, shape index: {}]  }
   0x1   :  { %v4_v0 = vld [vmem:[%s39_s0] sm:$0x1]  ;;  %s22_s0 = smov 126  }
   0x2   :  { %5 = vst [vmem:[#allocation1] sm:$0x1] %v4_v0 }
   0x9   :  { %v9_v1 = vld [vmem:[#allocation1] sm:$0x1]  }
   0xa   :  { %v6_v2 = vld [vmem:[#allocation1] sm:$0x1]   ;;  %10 = vrot.lane.b32.xlu0 %v9_v1, %s22_s0 }
   0xb   :  { %8 = vst.msk [vmem:[#allocation0] sm:$0x1] %vm7_vm0, %v6_v2  }
  0x7c   :  { %v11_v3 = vpop.permute.xlu0 %10  }
  0x7d   :  { %14 = vst.msk [vmem:[#allocation0 + $0x1] sm:$0x1] %vm7_vm0, %v11_v3  }
  0x84   :  { %v18_v4 = vld [vmem:[#allocation0] sm:$0x3] }
  0x85   :  { %20 = vst [vmem:[%s40_s1] sm:$0x3] %v18_v4 }

// kernel: net_forward.1
= control target key start
LH: loop header
LB: loop body
LE: loop exit
PB: predicated region body
PF: predicated region fallthrough
CT: control target
= control target key end

     0   :  { %s14778_s6 = smov 1   ;;  %vm177_vm0 = vcmask 130048   ;;  %s14779_s10 = smov 127   ;;  %v14787_v5 = vmov 0   ;;  %vm174_vm1 = vcmask 982016   ;;  %vm383_vm3 = vcmask 973824   ;;  %s16897_s0 = inlined_call_operand.smem [shape: u32[39], index: -1, kind: input, shape index: {}] }
   0x1   :  { %s1_s5 = sld [smem:[%s16897_s0]]   ;;  %s14780_s11 = smov 117   ;;  %14231 = vset.pattern.permute.xlu1 %v14787_v5  ;;  %14230 = vset.pattern.permute.xlu0 %v14787_v5  ;;  %vm14915_vm2 = vmpackc.low %vm174_vm1, %vm174_vm1  ;;  %vm498_vm5 = vcmask 900096   ;;  %vm613_vm7 = vcmask 891904   ;;  %vm728_vm9 = vcmask 883712   ;;  %vm843_vm11 = vcmask 809984  }
   0x2   :  { %s14848_s9 = sld [smem:[%s16897_s0 + %s14778_s6]]   ;;  %s14781_s12 = smov 126   ;;  %vm14926_vm4 = vmpackc.low %vm383_vm3, %vm383_vm3  ;;  %vm958_vm13 = vcmask 801792   ;;  %vm1073_vm15 = vcmask 793600  }
   0x3   :  { %s14782_s13 = smov 116   ;;  %s14783_s14 = smov 115   ;;  %vm14943_vm6 = vmpackc.low %vm498_vm5, %vm498_vm5 }
   0x4   :  { %s14784_s15 = smov 106   ;;  %s14785_s16 = smov 105   ;;  %vm14961_vm8 = vmpackc.low %vm613_vm7, %vm613_vm7 }
   0x5   :  { %s14786_s17 = smov 104   ;;  %s14788_s18 = smov 2   ;;  %vm14977_vm10 = vmpackc.low %vm728_vm9, %vm728_vm9  ;;  %vm1238_vm9 = vcmask 1040384  }
   0x6   :  { %s10117_s21 = sld [smem:[%s16897_s0 + %s14788_s18]]   ;;  %s14789_s22 = smov 15   ;;  %vm14993_vm12 = vmpackc.low %vm843_vm11, %vm843_vm11  ;;  %vm14790_vm11 = vmmov 1  }
   0x7   :  { %v155_v0 = vld [vmem:[%s1_s5] sm:$0xff]  ;;  %v156_v1 = vld [vmem:[%s1_s5 + $0x8] sm:$0xff]  ;;  %s14869_s25 = sld [smem:[%s16897_s0 + %s14789_s22]]   ;;  %vm15009_vm14 = vmpackc.low %vm958_vm13, %vm958_vm13  ;;  %s14791_s26 = smov 3  }
   0x8   :  { %v14190_v2 = vpack.i.bf16 %v156_v1, %v155_v0  ;;  %v14852_v3 = vpack.c.bf16 %v156_v1, %v155_v0  ;;  %v10154_v4 = vld [vmem:[%s14848_s9 + $0x20] sm:$0xff]  ;;  %v10155_v39 = vld [vmem:[%s14848_s9 + $0x28] sm:$0xff]  ;;  %v10156_v40 = vld [vmem:[%s14848_s9 + $0x30] sm:$0xff]  ;;  %s15078_s29 = sld [smem:[%s16897_s0 + %s14791_s26]]   ;;  %s14792_s30 = smov 4  }
   0x9   :  { %11742 = vmatprep.mubr.msk.f32.mxu0 %vm177_vm0, %v10154_v4  ;;  %v10157_v44 = vld [vmem:[%s14848_s9 + $0x38] sm:$0xff]  ;;  %v157_v45 = vld [vmem:[%s14848_s9] sm:$0xff]  ;;  %v158_v48 = vld [vmem:[%s14848_s9 + $0x8] sm:$0xff]  ;;  %s10119_s3 = sld [smem:[%s16897_s0 + %s14792_s30]]   ;;  %s14793_s4 = smov 5  }
   0xa   :  { %14191 = vrot.lane.b32.xlu0 %v14190_v2, %s14779_s10  ;;  %14201 = vrot.lane.b32.xlu1 %v14190_v2, %s14780_s11  ;;  %v159_v49 = vld [vmem:[%s14848_s9 + $0x10] sm:$0xff]  ;;  %v160_v53 = vld [vmem:[%s14848_s9 + $0x18] sm:$0xff]  ;;  %vm15025_vm3 = vmpackc.low %vm1073_vm15, %vm1073_vm15  ;;  %vm1356_vm15 = vcmask 261120   ;;  %s15262_s8 = sld [smem:[%s16897_s0 + %s14793_s4]]   ;;  %s14797_s24 = smov 8  }
   0xb   :  { %v10168_v54 = vld [vmem:[%s14848_s9 + $0x40] sm:$0xff]  ;;  %v10169_v57 = vld [vmem:[%s14848_s9 + $0x48] sm:$0xff]  ;;  %v10170_v58 = vld [vmem:[%s14848_s9 + $0x50] sm:$0xff]  ;;  %s10123_s28 = sld [smem:[%s16897_s0 + %s14797_s24]]   ;;  %s14799_s30 = smov 121  }
   0xc   :  { %v1178_v6 = vld [vmem:[%s10117_s21 + $0x8] sm:$0xff]  ;;  %v1177_v7 = vld [vmem:[%s10117_s21] sm:$0xff]  ;;  %v1179_v8 = vld [vmem:[%s10117_s21 + $0x10] sm:$0xff]  ;;  %s14800_s1 = smov 16   ;;  %s14801_s5 = smov 9  }
   0xd   :  { %v1209_v9 = vld [vmem:[%s14869_s25] sm:$0xff]  ;;  %v1210_v10 = vld [vmem:[%s14869_s25 + $0x8] sm:$0xff]  ;;  %v1180_v11 = vld [vmem:[%s10117_s21 + $0x18] sm:$0xff]  ;;  %s15493_s4 = sld [smem:[%s16897_s0 + %s14800_s1]]   ;;  %s14802_s19 = smov 10  }
   0xe   :  { %14196 = vrot.lane.b32.xlu0 %v14190_v2, %s14781_s12  ;;  %14206 = vrot.lane.b32.xlu1 %v14190_v2, %s14782_s13  ;;  %v14873_v12 = vpack.c.bf16 %v1210_v10, %v1209_v9  ;;  %v1211_v13 = vld [vmem:[%s14869_s25 + $0x10] sm:$0xff]  ;;  %v1212_v14 = vld [vmem:[%s14869_s25 + $0x18] sm:$0xff]  ;;  %vm15060_vm13 = vmpackc.low %vm1238_vm9, %vm14790_vm11  ;;  %vm4998_vm11 = vcmask 343040   ;;  %s14805_s22 = smov 11   ;;  %s14806_s27 = smov 12  }
   0xf   :  { %v14877_v15 = vpack.c.bf16 %v1212_v14, %v1211_v13  ;;  %v1213_v16 = vld [vmem:[%s14869_s25 + $0x20] sm:$0xff]  ;;  %v1214_v17 = vld [vmem:[%s14869_s25 + $0x28] sm:$0xff]  ;;  %v1215_v19 = vld [vmem:[%s14869_s25 + $0x30] sm:$0xff]  ;;  %s10127_s2 = sld [smem:[%s16897_s0 + %s14806_s27]]   ;;  %s14827_s7 = smov 21  }
  0x10   :  { %13041 = vmatprep.subr.bf16.mxu1 %v14873_v12  ;;  %v14884_v18 = vpack.c.bf16 %v1214_v17, %v1213_v16  ;;  %v1216_v20 = vld [vmem:[%s14869_s25 + $0x38] sm:$0xff]  ;;  %v1217_v22 = vld [vmem:[%s14869_s25 + $0x40] sm:$0xff]  ;;  %v1218_v23 = vld [vmem:[%s14869_s25 + $0x48] sm:$0xff]  ;;  %s14833_s27 = smov 37  }
  0x11   :  { %13043 = vmatpush3.bf16.msra.mxu1 %v14873_v12  ;;  %v14890_v21 = vpack.c.bf16 %v1216_v20, %v1215_v19  ;;  %v14896_v24 = vpack.c.bf16 %v1218_v23, %v1217_v22  ;;  %v1219_v25 = vld [vmem:[%s14869_s25 + $0x50] sm:$0xff]  ;;  %v1220_v26 = vld [vmem:[%s14869_s25 + $0x58] sm:$0xff]  ;;  %v1221_v28 = vld [vmem:[%s14869_s25 + $0x60] sm:$0xff] }
  0x12   :  { %14211 = vrot.lane.b32.xlu0 %v14190_v2, %s14783_s14  ;;  %14216 = vrot.lane.b32.xlu1 %v14190_v2, %s14784_s15  ;;  %v14902_v27 = vpack.c.bf16 %v1220_v26, %v1219_v25  ;;  %v1222_v29 = vld [vmem:[%s14869_s25 + $0x68] sm:$0xff]  ;;  %v10171_v62 = vld [vmem:[%s14848_s9 + $0x58] sm:$0xff] }
  0x13   :  { %13045 = vmatprep.subr.bf16.mxu1 %v14877_v15  ;;  %v14908_v30 = vpack.c.bf16 %v1222_v29, %v1221_v28  ;;  %v10178_v63 = vld [vmem:[%s14848_s9 + $0x60] sm:$0xff]  ;;  %v10190_v13 = vld [vmem:[%s14848_s9 + $0x90] sm:$0xff]  ;;  %v10191_v19 = vld [vmem:[%s14848_s9 + $0x98] sm:$0xff] }
  0x14   :  { %v10198_v20 = vld [vmem:[%s14848_s9 + $0xa0] sm:$0xff]  ;;  %v10199_v25 = vld [vmem:[%s14848_s9 + $0xa8] sm:$0xff]  ;;  %v10200_v26 = vld [vmem:[%s14848_s9 + $0xb0] sm:$0xff] }
  0x15   :  { %13047 = vmatpush3.bf16.msra.mxu1 %v14877_v15  ;;  %v10367_v42 = vld [vmem:[%s15262_s8 + $0x58] sm:$0xff] }
  0x16   :  { %14221 = vrot.lane.b32.xlu0 %v14190_v2, %s14785_s16  ;;  %14226 = vrot.lane.b32.xlu1 %v14190_v2, %s14786_s17  ;;  %v10179_v2 = vld [vmem:[%s14848_s9 + $0x68] sm:$0xff]  ;;  %v10379_v51 = vld [vmem:[%s15262_s8 + $0x78] sm:$0xff] }
  0x17   :  { %13049 = vmatprep.subr.bf16.mxu1 %v14884_v18  ;;  %v10391_v60 = vld [vmem:[%s15262_s8 + $0x98] sm:$0xff] }
  0x18   :  { %v10403_v5 = vld [vmem:[%s15262_s8 + $0xb8] sm:$0xff] }
  0x19   :  { %13051 = vmatpush3.bf16.msra.mxu1 %v14884_v18  ;;  %v10415_v16 = vld [vmem:[%s15262_s8 + $0xd8] sm:$0xff] }
  0x1a   :  { %1188 = vperm.xlu1 %14231, %v1178_v6   ;;  %1183 = vperm.xlu0 %14230, %v1177_v7   ;;  %v10181_v7 = vld [vmem:[%s14848_s9 + $0x78] sm:$0xff] }
  0x1b   :  { %13053 = vmatprep.subr.bf16.mxu1 %v14890_v21  ;;  %v10427_v29 = vld [vmem:[%s15262_s8 + $0xf8] sm:$0xff] }
  0x1d   :  { %13055 = vmatpush3.bf16.msra.mxu1 %v14890_v21 }
  0x1e   :  { %1193 = vperm.xlu1 %14231, %v1179_v8   ;;  %1198 = vperm.xlu0 %14230, %v1180_v11   ;;  %v10188_v8 = vld [vmem:[%s14848_s9 + $0x80] sm:$0xff]  ;;  %v10189_v11 = vld [vmem:[%s14848_s9 + $0x88] sm:$0xff] }
  0x1f   :  { %13057 = vmatprep.subr.bf16.mxu1 %v14896_v24 }
  0x21   :  { %13059 = vmatpush3.bf16.msra.mxu1 %v14896_v24 }
  0x22   :  { %13061 = vmatprep.subr.bf16.mxu1 %v14902_v27 }
  0x25   :  { %13063 = vmatpush3.bf16.msra.mxu1 %v14902_v27 }
  0x26   :  { %13065 = vmatprep.subr.bf16.mxu1 %v14908_v30 }
  0x29   :  { %13067 = vmatpush3.bf16.msra.mxu1 %v14908_v30 }
  0x7c   :  { %v14192_v31 = vpop.permute.xlu0 %14191  ;;  %v14202_v43 = vpop.permute.xlu1 %14201 }
  0x7d   :  { %v14194_v32 = vunpack.i.h.bf16 %v14192_v31  ;;  %v14193_v33 = vunpack.i.l.bf16 %v14192_v31  ;;  %v14204_v46 = vunpack.i.h.bf16 %v14202_v43  ;;  %v14203_v47 = vunpack.i.l.bf16 %v14202_v43  ;;  %v10218_v43 = vld [vmem:[%s14848_s9 + $0xe0] sm:$0xff] }
  0x7f   :  { %v12988_v35 = vpack.c.bf16 %v14194_v32, %v14193_v33  ;;  %v13004_v50 = vpack.c.bf16 %v14204_v46, %v14203_v47  ;;  %v10201_v32 = vld [vmem:[%s14848_s9 + $0xb8] sm:$0xff]  ;;  %v10208_v33 = vld [vmem:[%s14848_s9 + $0xc0] sm:$0xff] }
  0x80   :  { %v14197_v36 = vpop.permute.xlu0 %14196  ;;  %v14207_v52 = vpop.permute.xlu1 %14206  ;;  %v10221_v46 = vld [vmem:[%s14848_s9 + $0xf8] sm:$0xff]  ;;  %v10228_v47 = vld [vmem:[%s14848_s9 + $0x100] sm:$0xff] }
  0x81   :  { %12990 = vmatprep.subr.msk.bf16.mxu0 %vm14915_vm2, %v12988_v35  ;;  %v14199_v37 = vunpack.i.h.bf16 %v14197_v36  ;;  %v14198_v38 = vunpack.i.l.bf16 %v14197_v36  ;;  %v14209_v55 = vunpack.i.h.bf16 %v14207_v52  ;;  %v14208_v56 = vunpack.i.l.bf16 %v14207_v52  ;;  %v1223_v52 = vld [vmem:[%s14869_s25 + $0x70] sm:$0xff] }
  0x82   :  { %12993 = vmatpush3.bf16.msk.msra.mxu0 %vm14915_vm2, %v12988_v35 }
  0x83   :  { %12995 = vmatprep.subr.bf16.mxu0 %v14852_v3  ;;  %v12998_v41 = vpack.c.bf16 %v14199_v37, %v14198_v38  ;;  %v13010_v59 = vpack.c.bf16 %v14209_v55, %v14208_v56  ;;  %v10209_v37 = vld [vmem:[%s14848_s9 + $0xc8] sm:$0xff]  ;;  %v10210_v38 = vld [vmem:[%s14848_s9 + $0xd0] sm:$0xff] }
  0x84   :  { %v14212_v61 = vpop.permute.xlu0 %14211  ;;  %v14217_v6 = vpop.permute.xlu1 %14216 }
  0x85   :  { %11743 = vmatmul.mubr.msk.f32.vlgmr.msra.gmra.mrb[0].mxu0 %vm177_vm0, %v10155_v39  ;;  %v14214_v0 = vunpack.i.h.bf16 %v14212_v61  ;;  %v14213_v1 = vunpack.i.l.bf16 %v14212_v61  ;;  %v14219_v9 = vunpack.i.h.bf16 %v14217_v6  ;;  %v14218_v10 = vunpack.i.l.bf16 %v14217_v6 }
  0x86   :  { %11745 = vmatprep.mubr.msk.f32.mxu0 %vm177_vm0, %v10156_v40  ;;  %12997 = vmatpush3.bf16.msra.mxu0 %v14852_v3  ;;  %v10180_v3 = vld [vmem:[%s14848_s9 + $0x70] sm:$0xff] }
  0x87   :  { %13000 = vmatprep.subr.msk.bf16.mxu0 %vm14926_vm4, %v12998_v41  ;;  %v13016_v4 = vpack.c.bf16 %v14214_v0, %v14213_v1  ;;  %v13022_v14 = vpack.c.bf16 %v14219_v9, %v14218_v10 }
  0x88   :  { %v14222_v17 = vpop.permute.xlu0 %14221  ;;  %v14227_v31 = vpop.permute.xlu1 %14226 }
  0x89   :  { %11746 = vmatmul.mubr.msk.f32.gmra.mrb[2].mxu0 %vm177_vm0, %v10157_v44  ;;  %v14224_v22 = vunpack.i.h.bf16 %v14222_v17  ;;  %v14223_v23 = vunpack.i.l.bf16 %v14222_v17  ;;  %v14229_v35 = vunpack.i.h.bf16 %v14227_v31  ;;  %v14228_v36 = vunpack.i.l.bf16 %v14227_v31  ;;  %v10219_v44 = vld [vmem:[%s14848_s9 + $0xe8] sm:$0xff]  ;;  %v2408_v31 = vld [vmem:[%s10119_s3 + $0x18] sm:$0xff] }
  0x8a   :  { %11752 = vmatprep.mubr.msk.f32.mxu0 %vm177_vm0, %v157_v45  ;;  %v10220_v45 = vld [vmem:[%s14848_s9 + $0xf0] sm:$0xff] }
  0x8b   :  { %v13028_v28 = vpack.c.bf16 %v14224_v22, %v14223_v23  ;;  %v13034_v39 = vpack.c.bf16 %v14229_v35, %v14228_v36 }
  0x8d   :  { %11753 = vmatmul.mubr.msk.f32.vlgmr.msra.gmra.mrb[0].mxu0 %vm177_vm0, %v158_v48  ;;  %v10229_v48 = vld [vmem:[%s14848_s9 + $0x108] sm:$0xff] }
  0x8e   :  { %11755 = vmatprep.mubr.msk.f32.mxu0 %vm177_vm0, %v159_v49  ;;  %13003 = vmatpush3.bf16.msk.msra.mxu0 %vm14926_vm4, %v12998_v41  ;;  %v10211_v41 = vld [vmem:[%s14848_s9 + $0xd8] sm:$0xff]  ;;  %v10230_v49 = vld [vmem:[%s14848_s9 + $0x110] sm:$0xff] }
  0x8f   :  { %13006 = vmatprep.subr.msk.bf16.mxu0 %vm14943_vm6, %v13004_v50 }
  0x91   :  { %11756 = vmatmul.mubr.msk.f32.gmra.mrb[2].mxu0 %vm177_vm0, %v160_v53  ;;  %v1224_v53 = vld [vmem:[%s14869_s25 + $0x78] sm:$0x1]  ;;  %s15784_s25 = sld [smem:[%s16897_s0 + %s14805_s22]]  }
  0x92   :  { %11762 = vmatprep.mubr.msk.f32.mxu0 %vm177_vm0, %v10168_v54  ;;  %v15057_v54 = vpack.c.bf16 %v1224_v53, %v1223_v52 }
  0x94   :  { %13070 = vmatprep.subr.msk.bf16.mxu1 %vm15060_vm13, %v15057_v54 }
  0x95   :  { %11763 = vmatmul.mubr.msk.f32.vlgmr.msra.gmra.mrb[0].mxu0 %vm177_vm0, %v10169_v57  ;;  %13073 = vmatpush3.bf16.msk.msra.mxu1 %vm15060_vm13, %v15057_v54 }
  0x96   :  { %11765 = vmatprep.mubr.msk.f32.mxu0 %vm177_vm0, %v10170_v58  ;;  %13009 = vmatpush3.bf16.msk.msra.mxu0 %vm14943_vm6, %v13004_v50  ;;  %v10231_v50 = vld [vmem:[%s14848_s9 + $0x118] sm:$0xff]  ;;  %s14794_s9 = smov 6  }
  0x97   :  { %13012 = vmatprep.subr.msk.bf16.mxu0 %vm14961_vm8, %v13010_v59  ;;  %s10121_s21 = sld [smem:[%s16897_s0 + %s14794_s9]]  }
  0x98   :  { %s15602_s9 = sld [smem:[%s16897_s0 + %s14801_s5]]  }
  0x99   :  { %11766 = vmatmul.mubr.msk.f32.gmra.mrb[2].mxu0 %vm177_vm0, %v10171_v62  ;;  %v1184_v56 = vpop.permute.xlu0 %1183  ;;  %v1189_v57 = vpop.permute.xlu1 %1188 }
  0x9a   :  { %11772 = vmatprep.mubr.msk.f32.mxu0 %vm177_vm0, %v10178_v63 }
  0x9d   :  { %11773 = vmatmul.mubr.msk.f32.vlgmr.msra.gmra.mrb[0].mxu0 %vm177_vm0, %v10179_v2  ;;  %v1199_v63 = vpop.permute.xlu0 %1198 }
  0x9e   :  { %11775 = vmatprep.mubr.msk.f32.mxu0 %vm177_vm0, %v10180_v3  ;;  %13015 = vmatpush3.bf16.msk.msra.mxu0 %vm14961_vm8, %v13010_v59  ;;  %v1194_v3 = vpop.permute.xlu1 %1193 }
  0x9f   :  { %13018 = vmatprep.subr.msk.bf16.mxu0 %vm14977_vm10, %v13016_v4 }
  0xa1   :  { %11776 = vmatmul.mubr.msk.f32.gmra.mrb[2].mxu0 %vm177_vm0, %v10181_v7 }
  0xa2   :  { %11782 = vmatprep.mubr.msk.f32.mxu0 %vm177_vm0, %v10188_v8 }
  0xa5   :  { %11783 = vmatmul.mubr.msk.f32.vlgmr.msra.gmra.mrb[0].mxu0 %vm177_vm0, %v10189_v11 }
  0xa6   :  { %11785 = vmatprep.mubr.msk.f32.mxu0 %vm177_vm0, %v10190_v13  ;;  %13021 = vmatpush3.bf16.msk.msra.mxu0 %vm14977_vm10, %v13016_v4 }
  0xa7   :  { %13024 = vmatprep.subr.msk.bf16.mxu0 %vm14993_vm12, %v13022_v14 }
  0xa9   :  { %11786 = vmatmul.mubr.msk.f32.gmra.mrb[2].mxu0 %vm177_vm0, %v10191_v19 }
  0xaa   :  { %11792 = vmatprep.mubr.msk.f32.mxu0 %vm177_vm0, %v10198_v20 }
  0xad   :  { %11793 = vmatmul.mubr.msk.f32.vlgmr.msra.gmra.mrb[0].mxu0 %vm177_vm0, %v10199_v25  ;;  %v2405_v25 = vld [vmem:[%s10119_s3] sm:$0xff] }
  0xae   :  { %11795 = vmatprep.mubr.msk.f32.mxu0 %vm177_vm0, %v10200_v26  ;;  %13027 = vmatpush3.bf16.msk.msra.mxu0 %vm14993_vm12, %v13022_v14  ;;  %v10243_v14 = vld [vmem:[%s15078_s29 + $0x20] sm:$0xff]  ;;  %v2407_v26 = vld [vmem:[%s10119_s3 + $0x10] sm:$0xff] }
  0xaf   :  { %13030 = vmatprep.subr.msk.bf16.mxu0 %vm15009_vm14, %v13028_v28 }
  0xb1   :  { %11796 = vmatmul.mubr.msk.f32.gmra.mrb[2].mxu0 %vm177_vm0, %v10201_v32 }
  0xb2   :  { %11802 = vmatprep.mubr.msk.f32.mxu0 %vm177_vm0, %v10208_v33 }
  0xb5   :  { %11803 = vmatmul.mubr.msk.f32.vlgmr.msra.gmra.mrb[0].mxu0 %vm177_vm0, %v10209_v37 }
  0xb6   :  { %11805 = vmatprep.mubr.msk.f32.mxu0 %vm177_vm0, %v10210_v38  ;;  %13033 = vmatpush3.bf16.msk.msra.mxu0 %vm15009_vm14, %v13028_v28  ;;  %v2406_v28 = vld [vmem:[%s10119_s3 + $0x8] sm:$0xff]  ;;  %s14807_s3 = smov 119  }
  0xb7   :  { %13036 = vmatprep.subr.msk.bf16.mxu0 %vm15025_vm3, %v13034_v39 }
  0xb9   :  { %11806 = vmatmul.mubr.msk.f32.gmra.mrb[2].mxu0 %vm177_vm0, %v10211_v41 }
  0xba   :  { %11812 = vmatprep.mubr.msk.f32.mxu0 %vm177_vm0, %v10218_v43 }
  0xbd   :  { %11813 = vmatmul.mubr.msk.f32.vlgmr.msra.gmra.mrb[0].mxu0 %vm177_vm0, %v10219_v44  ;;  %v10244_v44 = vld [vmem:[%s15078_s29 + $0x28] sm:$0xff] }
  0xbe   :  { %11815 = vmatprep.mubr.msk.f32.mxu0 %vm177_vm0, %v10220_v45  ;;  %13039 = vmatpush3.bf16.msk.msra.mxu0 %vm15025_vm3, %v13034_v39  ;;  %v10245_v45 = vld [vmem:[%s15078_s29 + $0x30] sm:$0xff] }
  0xc1   :  { %11816 = vmatmul.mubr.msk.f32.gmra.mrb[2].mxu0 %vm177_vm0, %v10221_v46 }
  0xc2   :  { %11822 = vmatprep.mubr.msk.f32.mxu0 %vm177_vm0, %v10228_v47 }
  0xc5   :  { %11823 = vmatmul.mubr.msk.f32.vlgmr.msra.gmra.mrb[0].mxu0 %vm177_vm0, %v10229_v48 }
  0xc6   :  { %11825 = vmatprep.mubr.msk.f32.mxu0 %vm177_vm0, %v10230_v49  ;;  %v10246_v49 = vld [vmem:[%s15078_s29 + $0x38] sm:$0xff] }
  0xc9   :  { %11826 = vmatmul.mubr.msk.f32.gmra.mrb[2].mxu0 %vm177_vm0, %v10231_v50  ;;  %vm1225_vm0 = vcmask 990208   ;;  %v1327_v50 = vld [vmem:[%s15078_s29] sm:$0xff] }
 0x198   :  { %v11824_v58 = vpop.f32.mrb[0].mxu0 }
 0x199   :  { %v1202_v59 = vadd.f32 %v11824_v58, %v1189_v57  ;;  %v1154_v61 = vpop.f32.mrb[1].mxu0  ;;  %v1328_v58 = vld [vmem:[%s15078_s29 + $0x8] sm:$0xff] }
 0x19a   :  { %v1201_v62 = vadd.f32 %v1184_v56, %v1154_v61 }
 0x19b   :  { %v1206_v2 = vmax.f32 %v1202_v59, 0.0  ;;  %v1329_v59 = vld [vmem:[%s15078_s29 + $0x10] sm:$0xff] }
 0x19c   :  { %v1205_v0 = vmax.f32 %v1201_v62, 0.0  ;;  %v11827_v1 = vpop.f32.mrb[2].mxu0 }
 0x19d   :  { %v1204_v4 = vadd.f32 %v11827_v1, %v1199_v63  ;;  %v1164_v6 = vpop.f32.mrb[3].mxu0  ;;  %v1330_v1 = vld [vmem:[%s15078_s29 + $0x18] sm:$0xff] }
 0x19e   :  { %v1203_v7 = vadd.f32 %v1194_v3, %v1164_v6  ;;  %11860 = vmatprep.mubr.msk.f32.mxu1 %vm1225_vm0, %v1205_v0 }
 0x19f   :  { %11861 = vmatmul.mubr.msk.f32.vlgmr.msra.gmra.mrb[0].mxu1 %vm1225_vm0, %v1206_v2  ;;  %v1208_v9 = vmax.f32 %v1204_v4, 0.0  ;;  %v10259_v2 = vld [vmem:[%s15078_s29 + $0x40] sm:$0xff] }
 0x1a0   :  { %v1207_v8 = vmax.f32 %v1203_v7, 0.0 }
 0x1a2   :  { %11863 = vmatprep.mubr.msk.f32.mxu1 %vm1225_vm0, %v1207_v8  ;;  %v10260_v8 = vld [vmem:[%s15078_s29 + $0x48] sm:$0xff] }
 0x1a3   :  { %11864 = vmatmul.mubr.msk.f32.gmra.mrb[2].mxu1 %vm1225_vm0, %v1208_v9  ;;  %v10261_v9 = vld [vmem:[%s15078_s29 + $0x50] sm:$0xff] }
 0x1a4   :  { %11874 = vmatprep.mubr.msk.f32.mxu1 %vm1356_vm15, %v10243_v14 }
 0x272   :  { %v11862_v10 = vpop.f32.mrb[0].mxu1 }
 0x273   :  { %v1308_v11 = vpop.f32.mrb[1].mxu1 }
 0x274   :  { %v14232_v13 = vpack.i.bf16 %v11862_v10, %v1308_v11  ;;  %v13086_v19 = vpack.c.bf16 %v11862_v10, %v1308_v11 }
 0x276   :  { %14233 = vrot.lane.b32.xlu1 %v14232_v13, %s14779_s10  ;;  %v11865_v17 = vpop.f32.mrb[2].mxu1 }
 0x277   :  { %v1318_v20 = vpop.f32.mrb[3].mxu1 }
 0x278   :  { %v14237_v22 = vpack.i.bf16 %v11865_v17, %v1318_v20  ;;  %v13090_v23 = vpack.c.bf16 %v11865_v17, %v1318_v20  ;;  %v10262_v17 = vld [vmem:[%s15078_s29 + $0x58] sm:$0xff] }
 0x27a   :  { %14243 = vrot.lane.b32.xlu1 %v14232_v13, %s14781_s12  ;;  %14238 = vrot.lane.b32.xlu0 %v14237_v22, %s14779_s10 }
 0x27e   :  { %14253 = vrot.lane.b32.xlu1 %v14232_v13, %s14780_s11  ;;  %14248 = vrot.lane.b32.xlu0 %v14237_v22, %s14781_s12 }
 0x282   :  { %14263 = vrot.lane.b32.xlu1 %v14232_v13, %s14782_s13  ;;  %14258 = vrot.lane.b32.xlu0 %v14237_v22, %s14780_s11 }
 0x286   :  { %14273 = vrot.lane.b32.xlu1 %v14232_v13, %s14783_s14  ;;  %14268 = vrot.lane.b32.xlu0 %v14237_v22, %s14782_s13 }
 0x28a   :  { %14283 = vrot.lane.b32.xlu1 %v14232_v13, %s14784_s15  ;;  %14278 = vrot.lane.b32.xlu0 %v14237_v22, %s14783_s14 }
 0x28e   :  { %14293 = vrot.lane.b32.xlu1 %v14232_v13, %s14785_s16  ;;  %14288 = vrot.lane.b32.xlu0 %v14237_v22, %s14784_s15 }
 0x292   :  { %14303 = vrot.lane.b32.xlu1 %v14232_v13, %s14786_s17  ;;  %14298 = vrot.lane.b32.xlu0 %v14237_v22, %s14785_s16 }
 0x296   :  { %2411 = vperm.xlu1 %14231, %v2405_v25   ;;  %14308 = vrot.lane.b32.xlu0 %v14237_v22, %s14786_s17 }
 0x29a   :  { %2421 = vperm.xlu1 %14231, %v2407_v26   ;;  %2416 = vperm.xlu0 %14230, %v2406_v28   ;;  %v10272_v26 = vld [vmem:[%s15078_s29 + $0x68] sm:$0xff]  ;;  %v10273_v28 = vld [vmem:[%s15078_s29 + $0x70] sm:$0xff] }
 0x29e   :  { %2426 = vperm.xlu0 %14230, %v2408_v31  }
 0x2e8   :  { %v14234_v32 = vpop.permute.xlu1 %14233 }
 0x2e9   :  { %v14236_v33 = vunpack.i.h.bf16 %v14234_v32  ;;  %v14235_v35 = vunpack.i.l.bf16 %v14234_v32 }
 0x2eb   :  { %v13074_v36 = vpack.c.bf16 %v14236_v33, %v14235_v35 }
 0x2ec   :  { %v14239_v37 = vpop.permute.xlu0 %14238  ;;  %v14244_v43 = vpop.permute.xlu1 %14243 }
 0x2ed   :  { %v14241_v38 = vunpack.i.h.bf16 %v14239_v37  ;;  %v14240_v39 = vunpack.i.l.bf16 %v14239_v37  ;;  %13076 = vmatprep.subr.msk.bf16.mxu1 %vm14915_vm2, %v13074_v36  ;;  %v14246_v46 = vunpack.i.h.bf16 %v14244_v43  ;;  %v14245_v47 = vunpack.i.l.bf16 %v14244_v43  ;;  %v10283_v37 = vld [vmem:[%s15078_s29 + $0x80] sm:$0xff] }
 0x2ee   :  { %13079 = vmatpush3.bf16.msk.msra.mxu1 %vm14915_vm2, %v13074_v36  ;;  %v10274_v36 = vld [vmem:[%s15078_s29 + $0x78] sm:$0xff] }
 0x2ef   :  { %v13080_v41 = vpack.c.bf16 %v14241_v38, %v14240_v39  ;;  %v13094_v52 = vpack.c.bf16 %v14246_v46, %v14245_v47 }
 0x2f0   :  { %v14249_v48 = vpop.permute.xlu0 %14248  ;;  %v14254_v57 = vpop.permute.xlu1 %14253 }
 0x2f1   :  { %13082 = vmatprep.subr.msk.bf16.mxu1 %vm14915_vm2, %v13080_v41  ;;  %v14251_v53 = vunpack.i.h.bf16 %v14249_v48  ;;  %v14250_v56 = vunpack.i.l.bf16 %v14249_v48  ;;  %v14256_v61 = vunpack.i.h.bf16 %v14254_v57  ;;  %v14255_v62 = vunpack.i.l.bf16 %v14254_v57 }
 0x2f2   :  { %13085 = vmatpush3.bf16.msk.msra.mxu1 %vm14915_vm2, %v13080_v41 }
 0x2f3   :  { %13087 = vmatprep.subr.bf16.mxu1 %v13086_v19  ;;  %v13100_v63 = vpack.c.bf16 %v14251_v53, %v14250_v56  ;;  %v13106_v3 = vpack.c.bf16 %v14256_v61, %v14255_v62  ;;  %v10297_v61 = vld [vmem:[%s15078_s29 + $0xb0] sm:$0xff] }
 0x2f4   :  { %v14259_v0 = vpop.permute.xlu0 %14258  ;;  %v14264_v7 = vpop.permute.xlu1 %14263 }
 0x2f5   :  { %11875 = vmatmul.mubr.msk.f32.vlgmr.msra.gmra.mrb[4].mxu1 %vm1356_vm15, %v10244_v44  ;;  %v14261_v4 = vunpack.i.h.bf16 %v14259_v0  ;;  %v14260_v6 = vunpack.i.l.bf16 %v14259_v0  ;;  %v14266_v10 = vunpack.i.h.bf16 %v14264_v7  ;;  %v14265_v11 = vunpack.i.l.bf16 %v14264_v7  ;;  %v10284_v44 = vld [vmem:[%s15078_s29 + $0x88] sm:$0xff] }
 0x2f6   :  { %13089 = vmatpush3.bf16.msra.mxu1 %v13086_v19  ;;  %11877 = vmatprep.mubr.msk.f32.mxu1 %vm1356_vm15, %v10245_v45  ;;  %v10271_v19 = vld [vmem:[%s15078_s29 + $0x60] sm:$0xff]  ;;  %v10285_v45 = vld [vmem:[%s15078_s29 + $0x90] sm:$0xff] }
 0x2f7   :  { %13091 = vmatprep.subr.bf16.mxu1 %v13090_v23  ;;  %v13112_v13 = vpack.c.bf16 %v14261_v4, %v14260_v6  ;;  %v13118_v20 = vpack.c.bf16 %v14266_v10, %v14265_v11  ;;  %v10309_v10 = vld [vmem:[%s15078_s29 + $0xd0] sm:$0xff] }
 0x2f8   :  { %v14269_v14 = vpop.permute.xlu0 %14268  ;;  %v14274_v25 = vpop.permute.xlu1 %14273 }
 0x2f9   :  { %11878 = vmatmul.mubr.msk.f32.gmra.mrb[6].mxu1 %vm1356_vm15, %v10246_v49  ;;  %v14271_v22 = vunpack.i.h.bf16 %v14269_v14  ;;  %v14276_v31 = vunpack.i.h.bf16 %v14274_v25  ;;  %v14275_v32 = vunpack.i.l.bf16 %v14274_v25 }
 0x2fa   :  { %13093 = vmatpush3.bf16.msra.mxu1 %v13090_v23  ;;  %11888 = vmatprep.mubr.msk.f32.mxu1 %vm1356_vm15, %v1327_v50  ;;  %v14270_v23 = vunpack.i.l.bf16 %v14269_v14  ;;  %v10286_v50 = vld [vmem:[%s15078_s29 + $0x98] sm:$0xff] }
 0x2fb   :  { %13096 = vmatprep.subr.msk.bf16.mxu1 %vm14926_vm4, %v13094_v52  ;;  %v13130_v38 = vpack.c.bf16 %v14276_v31, %v14275_v32  ;;  %v10322_v32 = vld [vmem:[%s15078_s29 + $0xf8] sm:$0xff] }
 0x2fc   :  { %v13124_v33 = vpack.c.bf16 %v14271_v22, %v14270_v23  ;;  %v14279_v35 = vpop.permute.xlu0 %14278  ;;  %v14284_v43 = vpop.permute.xlu1 %14283 }
 0x2fd   :  { %11889 = vmatmul.mubr.msk.f32.vlgmr.msra.gmra.mrb[4].mxu1 %vm1356_vm15, %v1328_v58  ;;  %v14281_v39 = vunpack.i.h.bf16 %v14279_v35  ;;  %v14280_v41 = vunpack.i.l.bf16 %v14279_v35  ;;  %v14286_v46 = vunpack.i.h.bf16 %v14284_v43  ;;  %v14285_v47 = vunpack.i.l.bf16 %v14284_v43  ;;  %v10332_v35 = vld [vmem:[%s15078_s29 + $0x108] sm:$0xff] }
 0x2fe   :  { %13099 = vmatpush3.bf16.msk.msra.mxu1 %vm14926_vm4, %v13094_v52  ;;  %11891 = vmatprep.mubr.msk.f32.mxu1 %vm1356_vm15, %v1329_v59  ;;  %v10295_v52 = vld [vmem:[%s15078_s29 + $0xa0] sm:$0xff]  ;;  %v10296_v59 = vld [vmem:[%s15078_s29 + $0xa8] sm:$0xff] }
 0x2ff   :  { %13102 = vmatprep.subr.msk.bf16.mxu1 %vm14926_vm4, %v13100_v63  ;;  %v13136_v48 = vpack.c.bf16 %v14281_v39, %v14280_v41  ;;  %v13142_v53 = vpack.c.bf16 %v14286_v46, %v14285_v47 }
 0x300   :  { %v14289_v49 = vpop.permute.xlu0 %14288  ;;  %v14294_v58 = vpop.permute.xlu1 %14293 }
 0x301   :  { %11892 = vmatmul.mubr.msk.f32.gmra.mrb[6].mxu1 %vm1356_vm15, %v1330_v1  ;;  %v14291_v56 = vunpack.i.h.bf16 %v14289_v49  ;;  %v14290_v57 = vunpack.i.l.bf16 %v14289_v49  ;;  %v14296_v62 = vunpack.i.h.bf16 %v14294_v58 }
 0x302   :  { %13105 = vmatpush3.bf16.msk.msra.mxu1 %vm14926_vm4, %v13100_v63  ;;  %11902 = vmatprep.mubr.msk.f32.mxu1 %vm1356_vm15, %v10259_v2  ;;  %v14295_v63 = vunpack.i.l.bf16 %v14294_v58  ;;  %v10298_v2 = vld [vmem:[%s15078_s29 + $0xb8] sm:$0xff] }
 0x303   :  { %13108 = vmatprep.subr.msk.bf16.mxu1 %vm14943_vm6, %v13106_v3  ;;  %v13148_v0 = vpack.c.bf16 %v14291_v56, %v14290_v57 }
 0x304   :  { %v14299_v1 = vpop.permute.xlu0 %14298  ;;  %v13154_v4 = vpack.c.bf16 %v14296_v62, %v14295_v63  ;;  %v3613_v62 = vld [vmem:[%s10121_s21 + $0x10] sm:$0xff]  ;;  %v3612_v63 = vld [vmem:[%s10121_s21 + $0x8] sm:$0xff] }
 0x305   :  { %11903 = vmatmul.mubr.msk.f32.vlgmr.msra.gmra.mrb[4].mxu1 %vm1356_vm15, %v10260_v8  ;;  %v14301_v6 = vunpack.i.h.bf16 %v14299_v1  ;;  %v14300_v7 = vunpack.i.l.bf16 %v14299_v1  ;;  %v14304_v8 = vpop.permute.xlu1 %14303 }
 0x306   :  { %13111 = vmatpush3.bf16.msk.msra.mxu1 %vm14943_vm6, %v13106_v3  ;;  %11905 = vmatprep.mubr.msk.f32.mxu1 %vm1356_vm15, %v10261_v9  ;;  %v10307_v3 = vld [vmem:[%s15078_s29 + $0xc0] sm:$0xff]  ;;  %v10308_v9 = vld [vmem:[%s15078_s29 + $0xc8] sm:$0xff]  ;;  %v14306_v11 = vunpack.i.h.bf16 %v14304_v8 }
 0x307   :  { %13114 = vmatprep.subr.msk.bf16.mxu1 %vm14943_vm6, %v13112_v13  ;;  %v13160_v14 = vpack.c.bf16 %v14301_v6, %v14300_v7 }
 0x309   :  { %11906 = vmatmul.mubr.msk.f32.gmra.mrb[6].mxu1 %vm1356_vm15, %v10262_v17  ;;  %v14309_v17 = vpop.permute.xlu0 %14308 }
 0x30a   :  { %13117 = vmatpush3.bf16.msk.msra.mxu1 %vm14943_vm6, %v13112_v13  ;;  %11916 = vmatprep.mubr.msk.f32.mxu1 %vm1356_vm15, %v10271_v19  ;;  %v14305_v13 = vunpack.i.l.bf16 %v14304_v8  ;;  %v10310_v19 = vld [vmem:[%s15078_s29 + $0xd8] sm:$0xff]  ;;  %v14311_v23 = vunpack.i.h.bf16 %v14309_v17  ;;  %v14310_v25 = vunpack.i.l.bf16 %v14309_v17 }
 0x30b   :  { %13120 = vmatprep.subr.msk.bf16.mxu1 %vm14961_vm8, %v13118_v20 }
 0x30c   :  { %v13166_v22 = vpack.c.bf16 %v14306_v11, %v14305_v13  ;;  %v13172_v31 = vpack.c.bf16 %v14311_v23, %v14310_v25  ;;  %v10349_v11 = vld [vmem:[%s15262_s8 + $0x28] sm:$0xff]  ;;  %v10350_v13 = vld [vmem:[%s15262_s8 + $0x30] sm:$0xff] }
 0x30d   :  { %11917 = vmatmul.mubr.msk.f32.vlgmr.msra.gmra.mrb[4].mxu1 %vm1356_vm15, %v10272_v26  ;;  %v10320_v26 = vld [vmem:[%s15078_s29 + $0xe8] sm:$0xff] }
 0x30e   :  { %13123 = vmatpush3.bf16.msk.msra.mxu1 %vm14961_vm8, %v13118_v20  ;;  %11919 = vmatprep.mubr.msk.f32.mxu1 %vm1356_vm15, %v10273_v28  ;;  %v10319_v20 = vld [vmem:[%s15078_s29 + $0xe0] sm:$0xff]  ;;  %v10321_v28 = vld [vmem:[%s15078_s29 + $0xf0] sm:$0xff] }
 0x30f   :  { %13126 = vmatprep.subr.msk.bf16.mxu1 %vm14961_vm8, %v13124_v33 }
 0x311   :  { %11920 = vmatmul.mubr.msk.f32.gmra.mrb[6].mxu1 %vm1356_vm15, %v10274_v36  ;;  %v10333_v36 = vld [vmem:[%s15078_s29 + $0x110] sm:$0xff] }
 0x312   :  { %13129 = vmatpush3.bf16.msk.msra.mxu1 %vm14961_vm8, %v13124_v33  ;;  %11930 = vmatprep.mubr.msk.f32.mxu1 %vm1356_vm15, %v10283_v37  ;;  %v10331_v33 = vld [vmem:[%s15078_s29 + $0x100] sm:$0xff]  ;;  %v10334_v37 = vld [vmem:[%s15078_s29 + $0x118] sm:$0xff]  ;;  %s14798_s29 = smov 122  }
 0x313   :  { %13132 = vmatprep.subr.msk.bf16.mxu1 %vm14977_vm10, %v13130_v38 }
 0x315   :  { %11931 = vmatmul.mubr.msk.f32.vlgmr.msra.gmra.mrb[4].mxu1 %vm1356_vm15, %v10284_v44 }
 0x316   :  { %13135 = vmatpush3.bf16.msk.msra.mxu1 %vm14977_vm10, %v13130_v38  ;;  %11933 = vmatprep.mubr.msk.f32.mxu1 %vm1356_vm15, %v10285_v45 }
 0x317   :  { %13138 = vmatprep.subr.msk.bf16.mxu1 %vm14977_vm10, %v13136_v48 }
 0x319   :  { %11934 = vmatmul.mubr.msk.f32.gmra.mrb[6].mxu1 %vm1356_vm15, %v10286_v50 }
 0x31a   :  { %13141 = vmatpush3.bf16.msk.msra.mxu1 %vm14977_vm10, %v13136_v48  ;;  %11944 = vmatprep.mubr.msk.f32.mxu1 %vm1356_vm15, %v10295_v52  ;;  %v10348_v52 = vld [vmem:[%s15262_s8 + $0x20] sm:$0xff] }
 0x31b   :  { %13144 = vmatprep.subr.msk.bf16.mxu1 %vm14993_vm12, %v13142_v53  ;;  %12038 = vmatprep.mubr.msk.f32.mxu0 %vm1356_vm15, %v10348_v52 }
 0x31d   :  { %11945 = vmatmul.mubr.msk.f32.vlgmr.msra.gmra.mrb[4].mxu1 %vm1356_vm15, %v10296_v59 }
 0x31e   :  { %13147 = vmatpush3.bf16.msk.msra.mxu1 %vm14993_vm12, %v13142_v53  ;;  %11947 = vmatprep.mubr.msk.f32.mxu1 %vm1356_vm15, %v10297_v61  ;;  %v3611_v61 = vld [vmem:[%s10121_s21] sm:$0xff] }
 0x31f   :  { %13150 = vmatprep.subr.msk.bf16.mxu1 %vm14993_vm12, %v13148_v0 }
 0x321   :  { %11948 = vmatmul.mubr.msk.f32.gmra.mrb[6].mxu1 %vm1356_vm15, %v10298_v2 }
 0x322   :  { %13153 = vmatpush3.bf16.msk.msra.mxu1 %vm14993_vm12, %v13148_v0  ;;  %11958 = vmatprep.mubr.msk.f32.mxu1 %vm1356_vm15, %v10307_v3  ;;  %v3614_v0 = vld [vmem:[%s10121_s21 + $0x18] sm:$0xff] }
 0x323   :  { %13156 = vmatprep.subr.msk.bf16.mxu1 %vm15009_vm14, %v13154_v4 }
 0x325   :  { %11959 = vmatmul.mubr.msk.f32.vlgmr.msra.gmra.mrb[4].mxu1 %vm1356_vm15, %v10308_v9 }
 0x326   :  { %13159 = vmatpush3.bf16.msk.msra.mxu1 %vm15009_vm14, %v13154_v4  ;;  %11961 = vmatprep.mubr.msk.f32.mxu1 %vm1356_vm15, %v10309_v10 }
 0x327   :  { %13162 = vmatprep.subr.msk.bf16.mxu1 %vm15009_vm14, %v13160_v14 }
 0x329   :  { %11962 = vmatmul.mubr.msk.f32.gmra.mrb[6].mxu1 %vm1356_vm15, %v10310_v19 }
 0x32a   :  { %13165 = vmatpush3.bf16.msk.msra.mxu1 %vm15009_vm14, %v13160_v14  ;;  %11972 = vmatprep.mubr.msk.f32.mxu1 %vm1356_vm15, %v10319_v20  ;;  %v10351_v20 = vld [vmem:[%s15262_s8 + $0x38] sm:$0xff] }
 0x32b   :  { %13168 = vmatprep.subr.msk.bf16.mxu1 %vm15025_vm3, %v13166_v22 }
 0x32d   :  { %11973 = vmatmul.mubr.msk.f32.vlgmr.msra.gmra.mrb[4].mxu1 %vm1356_vm15, %v10320_v26 }
 0x32e   :  { %13171 = vmatpush3.bf16.msk.msra.mxu1 %vm15025_vm3, %v13166_v22  ;;  %11975 = vmatprep.mubr.msk.f32.mxu1 %vm1356_vm15, %v10321_v28  ;;  %v2534_v22 = vld [vmem:[%s15262_s8] sm:$0xff]  ;;  %v2535_v28 = vld [vmem:[%s15262_s8 + $0x8] sm:$0xff] }
 0x32f   :  { %13174 = vmatprep.subr.msk.bf16.mxu1 %vm15025_vm3, %v13172_v31 }
 0x331   :  { %11976 = vmatmul.mubr.msk.f32.gmra.mrb[6].mxu1 %vm1356_vm15, %v10322_v32 }
 0x332   :  { %13177 = vmatpush3.bf16.msk.msra.mxu1 %vm15025_vm3, %v13172_v31  ;;  %11986 = vmatprep.mubr.msk.f32.mxu1 %vm1356_vm15, %v10331_v33  ;;  %v2536_v31 = vld [vmem:[%s15262_s8 + $0x10] sm:$0xff] }
 0x333   :  { %13179 = vmatprep.subr.bf16.mxu1 %v14873_v12 }
 0x335   :  { %11987 = vmatmul.mubr.msk.f32.vlgmr.msra.gmra.mrb[4].mxu1 %vm1356_vm15, %v10332_v35 }
 0x336   :  { %11989 = vmatprep.mubr.msk.f32.mxu1 %vm1356_vm15, %v10333_v36  ;;  %13181 = vmatpush3.bf16.msra.mxu1 %v14873_v12  ;;  %v2417_v12 = vpop.permute.xlu0 %2416 }
 0x337   :  { %13183 = vmatprep.subr.bf16.mxu1 %v14877_v15 }
 0x339   :  { %11990 = vmatmul.mubr.msk.f32.gmra.mrb[6].mxu1 %vm1356_vm15, %v10334_v37  ;;  %v2537_v37 = vld [vmem:[%s15262_s8 + $0x18] sm:$0xff] }
 0x33a   :  { %13185 = vmatpush3.bf16.msra.mxu1 %v14877_v15  ;;  %v2412_v15 = vpop.permute.xlu1 %2411  ;;  %v2427_v39 = vpop.permute.xlu0 %2426 }
 0x33b   :  { %13187 = vmatprep.subr.bf16.mxu1 %v14884_v18 }
 0x33e   :  { %13189 = vmatpush3.bf16.msra.mxu1 %v14884_v18  ;;  %v2422_v43 = vpop.permute.xlu1 %2421 }
 0x33f   :  { %13191 = vmatprep.subr.bf16.mxu1 %v14890_v21 }
 0x342   :  { %13193 = vmatpush3.bf16.msra.mxu1 %v14890_v21 }
 0x343   :  { %13195 = vmatprep.subr.bf16.mxu1 %v14896_v24 }
 0x346   :  { %13197 = vmatpush3.bf16.msra.mxu1 %v14896_v24 }
 0x347   :  { %13199 = vmatprep.subr.bf16.mxu1 %v14902_v27 }
 0x34a   :  { %13201 = vmatpush3.bf16.msra.mxu1 %v14902_v27 }
 0x34b   :  { %13203 = vmatprep.subr.bf16.mxu1 %v14908_v30 }
 0x34e   :  { %13205 = vmatpush3.bf16.msra.mxu1 %v14908_v30 }
 0x34f   :  { %13208 = vmatprep.subr.msk.bf16.mxu1 %vm15060_vm13, %v15057_v54 }
 0x352   :  { %13211 = vmatpush3.bf16.msk.msra.mxu1 %vm15060_vm13, %v15057_v54 }
 0x408   :  { %v11988_v18 = vpop.f32.mrb[4].mxu1 }
 0x409   :  { %v2430_v21 = vadd.f32 %v11988_v18, %v2417_v12  ;;  %v2382_v24 = vpop.f32.mrb[5].mxu1  ;;  %v10364_v12 = vld [vmem:[%s15262_s8 + $0x40] sm:$0xff] }
 0x40a   :  { %v2429_v38 = vadd.f32 %v2412_v15, %v2382_v24 }
 0x40b   :  { %v2434_v44 = vmax.f32 %v2430_v21, 0.0 }
 0x40c   :  { %v2433_v27 = vmax.f32 %v2429_v38, 0.0  ;;  %v11991_v41 = vpop.f32.mrb[6].mxu1  ;;  %v10365_v38 = vld [vmem:[%s15262_s8 + $0x48] sm:$0xff] }
 0x40d   :  { %v2432_v30 = vadd.f32 %v11991_v41, %v2427_v39  ;;  %v2392_v45 = vpop.f32.mrb[7].mxu1  ;;  %v10366_v39 = vld [vmem:[%s15262_s8 + $0x50] sm:$0xff] }
 0x40e   :  { %v2431_v46 = vadd.f32 %v2422_v43, %v2392_v45  ;;  %12024 = vmatprep.mubr.msk.f32.mxu1 %vm1225_vm0, %v2433_v27 }
 0x40f   :  { %12025 = vmatmul.mubr.msk.f32.vlgmr.msra.gmra.mrb[8].mxu1 %vm1225_vm0, %v2434_v44  ;;  %v2436_v54 = vmax.f32 %v2432_v30, 0.0  ;;  %v10376_v30 = vld [vmem:[%s15262_s8 + $0x60] sm:$0xff] }
 0x410   :  { %v2435_v47 = vmax.f32 %v2431_v46, 0.0 }
 0x412   :  { %12027 = vmatprep.mubr.msk.f32.mxu1 %vm1225_vm0, %v2435_v47 }
 0x413   :  { %12028 = vmatmul.mubr.msk.f32.gmra.mrb[10].mxu1 %vm1225_vm0, %v2436_v54 }
 0x4e2   :  { %v12026_v48 = vpop.f32.mrb[8].mxu1 }
 0x4e3   :  { %v2515_v49 = vpop.f32.mrb[9].mxu1 }
 0x4e4   :  { %v14312_v50 = vpack.i.bf16 %v12026_v48, %v2515_v49  ;;  %v13224_v56 = vpack.c.bf16 %v12026_v48, %v2515_v49  ;;  %v10377_v48 = vld [vmem:[%s15262_s8 + $0x68] sm:$0xff]  ;;  %v10378_v49 = vld [vmem:[%s15262_s8 + $0x70] sm:$0xff] }
 0x4e6   :  { %14313 = vrot.lane.b32.xlu1 %v14312_v50, %s14779_s10  ;;  %v12029_v53 = vpop.f32.mrb[10].mxu1 }
 0x4e7   :  { %v2525_v57 = vpop.f32.mrb[11].mxu1 }
 0x4e8   :  { %v14317_v58 = vpack.i.bf16 %v12029_v53, %v2525_v57  ;;  %v13228_v59 = vpack.c.bf16 %v12029_v53, %v2525_v57  ;;  %v10388_v57 = vld [vmem:[%s15262_s8 + $0x80] sm:$0xff] }
 0x4ea   :  { %14323 = vrot.lane.b32.xlu1 %v14312_v50, %s14781_s12  ;;  %14318 = vrot.lane.b32.xlu0 %v14317_v58, %s14779_s10 }
 0x4ee   :  { %14333 = vrot.lane.b32.xlu1 %v14312_v50, %s14780_s11  ;;  %14328 = vrot.lane.b32.xlu0 %v14317_v58, %s14781_s12 }
 0x4f2   :  { %14343 = vrot.lane.b32.xlu1 %v14312_v50, %s14782_s13  ;;  %14338 = vrot.lane.b32.xlu0 %v14317_v58, %s14780_s11 }
 0x4f6   :  { %14353 = vrot.lane.b32.xlu1 %v14312_v50, %s14783_s14  ;;  %14348 = vrot.lane.b32.xlu0 %v14317_v58, %s14782_s13 }
 0x4fa   :  { %14363 = vrot.lane.b32.xlu1 %v14312_v50, %s14784_s15  ;;  %14358 = vrot.lane.b32.xlu0 %v14317_v58, %s14783_s14  ;;  %s14795_s14 = smov 18  }
 0x4fe   :  { %14373 = vrot.lane.b32.xlu1 %v14312_v50, %s14785_s16  ;;  %14368 = vrot.lane.b32.xlu0 %v14317_v58, %s14784_s15  ;;  %s14803_s15 = smov 120  }
 0x502   :  { %14383 = vrot.lane.b32.xlu1 %v14312_v50, %s14786_s17  ;;  %14378 = vrot.lane.b32.xlu0 %v14317_v58, %s14785_s16  ;;  %s14804_s16 = smov 17  }
 0x506   :  { %3617 = vperm.xlu1 %14231, %v3611_v61   ;;  %14388 = vrot.lane.b32.xlu0 %v14317_v58, %s14786_s17  ;;  %s15422_s17 = sld [smem:[%s16897_s0 + %s14795_s14]]  }
 0x507   :  { %s10125_s14 = sld [smem:[%s16897_s0 + %s14802_s19]]  }
 0x508   :  { %s10136_s19 = sld [smem:[%s16897_s0 + %s14827_s7]]  }
 0x50a   :  { %3627 = vperm.xlu1 %14231, %v3613_v62   ;;  %3622 = vperm.xlu0 %14230, %v3612_v63   ;;  %v10389_v63 = vld [vmem:[%s15262_s8 + $0x88] sm:$0xff] }
 0x50c   :  { %v3707_v40 = vld [vmem:[%s15422_s17] sm:$0xff] }
 0x50e   :  { %3632 = vperm.xlu0 %14230, %v3614_v0   ;;  %v10390_v0 = vld [vmem:[%s15262_s8 + $0x90] sm:$0xff] }
 0x558   :  { %v14314_v1 = vpop.permute.xlu1 %14313 }
 0x559   :  { %v14316_v2 = vunpack.i.h.bf16 %v14314_v1  ;;  %v14315_v3 = vunpack.i.l.bf16 %v14314_v1 }
 0x55b   :  { %v13212_v4 = vpack.c.bf16 %v14316_v2, %v14315_v3 }
 0x55c   :  { %v14319_v6 = vpop.permute.xlu0 %14318  ;;  %v14324_v10 = vpop.permute.xlu1 %14323 }
 0x55d   :  { %v14321_v7 = vunpack.i.h.bf16 %v14319_v6  ;;  %v14320_v8 = vunpack.i.l.bf16 %v14319_v6  ;;  %13214 = vmatprep.subr.msk.bf16.mxu0 %vm14915_vm2, %v13212_v4  ;;  %v14326_v14 = vunpack.i.h.bf16 %v14324_v10  ;;  %v14325_v17 = vunpack.i.l.bf16 %v14324_v10  ;;  %v10400_v6 = vld [vmem:[%s15262_s8 + $0xa0] sm:$0xff] }
 0x55e   :  { %13217 = vmatpush3.bf16.msk.msra.mxu0 %vm14915_vm2, %v13212_v4 }
 0x55f   :  { %v13218_v9 = vpack.c.bf16 %v14321_v7, %v14320_v8  ;;  %v13232_v23 = vpack.c.bf16 %v14326_v14, %v14325_v17 }
 0x560   :  { %v14329_v19 = vpop.permute.xlu0 %14328  ;;  %v14334_v26 = vpop.permute.xlu1 %14333 }
 0x561   :  { %13220 = vmatprep.subr.msk.bf16.mxu0 %vm14915_vm2, %v13218_v9  ;;  %v14331_v25 = vunpack.i.h.bf16 %v14329_v19  ;;  %v14330_v34 = vunpack.i.l.bf16 %v14329_v19  ;;  %v14336_v32 = vunpack.i.h.bf16 %v14334_v26  ;;  %v14335_v33 = vunpack.i.l.bf16 %v14334_v26 }
 0x562   :  { %13223 = vmatpush3.bf16.msk.msra.mxu0 %vm14915_vm2, %v13218_v9 }
 0x563   :  { %13225 = vmatprep.subr.bf16.mxu0 %v13224_v56  ;;  %v13238_v35 = vpack.c.bf16 %v14331_v25, %v14330_v34  ;;  %v13244_v15 = vpack.c.bf16 %v14336_v32, %v14335_v33 }
 0x564   :  { %v14339_v36 = vpop.permute.xlu0 %14338  ;;  %v14344_v24 = vpop.permute.xlu1 %14343 }
 0x565   :  { %12039 = vmatmul.mubr.msk.f32.vlgmr.msra.gmra.mrb[4].mxu0 %vm1356_vm15, %v10349_v11  ;;  %v14341_v18 = vunpack.i.h.bf16 %v14339_v36  ;;  %v14340_v21 = vunpack.i.l.bf16 %v14339_v36  ;;  %v14346_v27 = vunpack.i.h.bf16 %v14344_v24  ;;  %v14345_v41 = vunpack.i.l.bf16 %v14344_v24  ;;  %v10401_v11 = vld [vmem:[%s15262_s8 + $0xa8] sm:$0xff]  ;;  %v10426_v24 = vld [vmem:[%s15262_s8 + $0xf0] sm:$0xff] }
 0x566   :  { %13227 = vmatpush3.bf16.msra.mxu0 %v13224_v56  ;;  %12041 = vmatprep.mubr.msk.f32.mxu0 %vm1356_vm15, %v10350_v13  ;;  %v10402_v13 = vld [vmem:[%s15262_s8 + $0xb0] sm:$0xff] }
 0x567   :  { %13229 = vmatprep.subr.bf16.mxu0 %v13228_v59  ;;  %v13250_v43 = vpack.c.bf16 %v14341_v18, %v14340_v21  ;;  %v13256_v45 = vpack.c.bf16 %v14346_v27, %v14345_v41  ;;  %v10425_v21 = vld [vmem:[%s15262_s8 + $0xe8] sm:$0xff]  ;;  %v10438_v41 = vld [vmem:[%s15262_s8 + $0x110] sm:$0xff] }
 0x568   :  { %v14349_v44 = vpop.permute.xlu0 %14348  ;;  %v14354_v54 = vpop.permute.xlu1 %14353  ;;  %v10437_v27 = vld [vmem:[%s15262_s8 + $0x108] sm:$0xff] }
 0x569   :  { %12042 = vmatmul.mubr.msk.f32.gmra.mrb[6].mxu0 %vm1356_vm15, %v10351_v20  ;;  %v14351_v46 = vunpack.i.h.bf16 %v14349_v44  ;;  %v14350_v47 = vunpack.i.l.bf16 %v14349_v44  ;;  %v14356_v50 = vunpack.i.h.bf16 %v14354_v54  ;;  %v14355_v52 = vunpack.i.l.bf16 %v14354_v54  ;;  %v3708_v44 = vld [vmem:[%s15422_s17 + $0x8] sm:$0xff] }
 0x56a   :  { %13231 = vmatpush3.bf16.msra.mxu0 %v13228_v59  ;;  %12052 = vmatprep.mubr.msk.f32.mxu0 %vm1356_vm15, %v2534_v22  ;;  %v10412_v22 = vld [vmem:[%s15262_s8 + $0xc0] sm:$0xff]  ;;  %v3712_v54 = vld [vmem:[%s15422_s17 + $0x28] sm:$0xff] }
 0x56b   :  { %13234 = vmatprep.subr.msk.bf16.mxu0 %vm14926_vm4, %v13232_v23  ;;  %v13262_v53 = vpack.c.bf16 %v14351_v46, %v14350_v47  ;;  %v13268_v58 = vpack.c.bf16 %v14356_v50, %v14355_v52  ;;  %v3711_v47 = vld [vmem:[%s15422_s17 + $0x20] sm:$0xff]  ;;  %v3714_v50 = vld [vmem:[%s15422_s17 + $0x38] sm:$0xff] }
 0x56c   :  { %v14359_v56 = vpop.permute.xlu0 %14358  ;;  %v14364_v62 = vpop.permute.xlu1 %14363 }
 0x56d   :  { %12053 = vmatmul.mubr.msk.f32.vlgmr.msra.gmra.mrb[4].mxu0 %vm1356_vm15, %v2535_v28  ;;  %v14361_v59 = vunpack.i.h.bf16 %v14359_v56  ;;  %v14360_v61 = vunpack.i.l.bf16 %v14359_v56  ;;  %v14366_v1 = vunpack.i.h.bf16 %v14364_v62  ;;  %v14365_v2 = vunpack.i.l.bf16 %v14364_v62  ;;  %v10413_v28 = vld [vmem:[%s15262_s8 + $0xc8] sm:$0xff] }
 0x56e   :  { %13237 = vmatpush3.bf16.msk.msra.mxu0 %vm14926_vm4, %v13232_v23  ;;  %12055 = vmatprep.mubr.msk.f32.mxu0 %vm1356_vm15, %v2536_v31  ;;  %v10414_v31 = vld [vmem:[%s15262_s8 + $0xd0] sm:$0xff]  ;;  %v3716_v56 = vld [vmem:[%s15422_s17 + $0x48] sm:$0xff] }
 0x56f   :  { %13240 = vmatprep.subr.msk.bf16.mxu0 %vm14926_vm4, %v13238_v35  ;;  %v13274_v3 = vpack.c.bf16 %v14361_v59, %v14360_v61  ;;  %v13280_v7 = vpack.c.bf16 %v14366_v1, %v14365_v2  ;;  %v3719_v61 = vld [vmem:[%s15422_s17 + $0x60] sm:$0xff]  ;;  %v3720_v62 = vld [vmem:[%s15422_s17 + $0x68] sm:$0xff] }
 0x570   :  { %v14369_v4 = vpop.permute.xlu0 %14368  ;;  %v14374_v10 = vpop.permute.xlu1 %14373 }
 0x571   :  { %12056 = vmatmul.mubr.msk.f32.gmra.mrb[6].mxu0 %vm1356_vm15, %v2537_v37  ;;  %v14371_v8 = vunpack.i.h.bf16 %v14369_v4  ;;  %v14370_v9 = vunpack.i.l.bf16 %v14369_v4  ;;  %v14376_v14 = vunpack.i.h.bf16 %v14374_v10  ;;  %v14375_v17 = vunpack.i.l.bf16 %v14374_v10  ;;  %v10424_v37 = vld [vmem:[%s15262_s8 + $0xe0] sm:$0xff]  ;;  %v3721_v4 = vld [vmem:[%s15422_s17 + $0x70] sm:$0xff] }
 0x572   :  { %13243 = vmatpush3.bf16.msk.msra.mxu0 %vm14926_vm4, %v13238_v35  ;;  %12066 = vmatprep.mubr.msk.f32.mxu0 %vm1356_vm15, %v10364_v12  ;;  %vm4140_vm4 = vcmask 244736  }
 0x573   :  { %13246 = vmatprep.subr.msk.bf16.mxu0 %vm14943_vm6, %v13244_v15  ;;  %v13286_v19 = vpack.c.bf16 %v14371_v8, %v14370_v9  ;;  %v13292_v23 = vpack.c.bf16 %v14376_v14, %v14375_v17 }
 0x574   :  { %v14379_v20 = vpop.permute.xlu0 %14378  ;;  %v14384_v26 = vpop.permute.xlu1 %14383 }
 0x575   :  { %12067 = vmatmul.mubr.msk.f32.vlgmr.msra.gmra.mrb[4].mxu0 %vm1356_vm15, %v10365_v38  ;;  %v14381_v25 = vunpack.i.h.bf16 %v14379_v20  ;;  %v14380_v34 = vunpack.i.l.bf16 %v14379_v20  ;;  %v14386_v32 = vunpack.i.h.bf16 %v14384_v26  ;;  %v14385_v33 = vunpack.i.l.bf16 %v14384_v26 }
 0x576   :  { %13249 = vmatpush3.bf16.msk.msra.mxu0 %vm14943_vm6, %v13244_v15  ;;  %12069 = vmatprep.mubr.msk.f32.mxu0 %vm1356_vm15, %v10366_v39  ;;  %v10436_v39 = vld [vmem:[%s15262_s8 + $0x100] sm:$0xff] }
 0x577   :  { %13252 = vmatprep.subr.msk.bf16.mxu0 %vm14943_vm6, %v13250_v43  ;;  %v13298_v35 = vpack.c.bf16 %v14381_v25, %v14380_v34  ;;  %v13304_v12 = vpack.c.bf16 %v14386_v32, %v14385_v33 }
 0x578   :  { %v14389_v36 = vpop.permute.xlu0 %14388 }
 0x579   :  { %12070 = vmatmul.mubr.msk.f32.gmra.mrb[6].mxu0 %vm1356_vm15, %v10367_v42  ;;  %v14391_v15 = vunpack.i.h.bf16 %v14389_v36  ;;  %v14390_v18 = vunpack.i.l.bf16 %v14389_v36  ;;  %v3709_v42 = vld [vmem:[%s15422_s17 + $0x10] sm:$0xff] }
 0x57a   :  { %13255 = vmatpush3.bf16.msk.msra.mxu0 %vm14943_vm6, %v13250_v43  ;;  %12080 = vmatprep.mubr.msk.f32.mxu0 %vm1356_vm15, %v10376_v30  ;;  %v10439_v43 = vld [vmem:[%s15262_s8 + $0x118] sm:$0xff]  ;;  %v13316_v30 = vpack.c.bf16 %v3708_v44, %v3707_v40  ;;  %vm4303_vm6 = vcmask 236544  }
 0x57b   :  { %13258 = vmatprep.subr.msk.bf16.mxu0 %vm14961_vm8, %v13256_v45  ;;  %v13310_v38 = vpack.c.bf16 %v14391_v15, %v14390_v18 }
 0x57c   :  { %13317 = vmatprep.subr.bf16.mxu1 %v13316_v30 }
 0x57d   :  { %12081 = vmatmul.mubr.msk.f32.vlgmr.msra.gmra.mrb[4].mxu0 %vm1356_vm15, %v10377_v48  ;;  %13319 = vmatpush3.bf16.msra.mxu1 %v13316_v30  ;;  %v13324_v48 = vpack.c.bf16 %v3712_v54, %v3711_v47 }
 0x57e   :  { %13261 = vmatpush3.bf16.msk.msra.mxu0 %vm14961_vm8, %v13256_v45  ;;  %12083 = vmatprep.mubr.msk.f32.mxu0 %vm1356_vm15, %v10378_v49  ;;  %v3710_v45 = vld [vmem:[%s15422_s17 + $0x18] sm:$0xff]  ;;  %v3713_v49 = vld [vmem:[%s15422_s17 + $0x30] sm:$0xff] }
 0x57f   :  { %13264 = vmatprep.subr.msk.bf16.mxu0 %vm14961_vm8, %v13262_v53  ;;  %v13320_v46 = vpack.c.bf16 %v3710_v45, %v3709_v42  ;;  %v13328_v52 = vpack.c.bf16 %v3714_v50, %v3713_v49 }
 0x581   :  { %12084 = vmatmul.mubr.msk.f32.gmra.mrb[6].mxu0 %vm1356_vm15, %v10379_v51  ;;  %13321 = vmatprep.subr.bf16.mxu1 %v13320_v46 }
 0x582   :  { %13267 = vmatpush3.bf16.msk.msra.mxu0 %vm14961_vm8, %v13262_v53  ;;  %12094 = vmatprep.mubr.msk.f32.mxu0 %vm1356_vm15, %v10388_v57  ;;  %v3715_v53 = vld [vmem:[%s15422_s17 + $0x40] sm:$0xff]  ;;  %v3717_v57 = vld [vmem:[%s15422_s17 + $0x50] sm:$0xff]  ;;  %vm4539_vm8 = vcmask 1043456  }
 0x583   :  { %13270 = vmatprep.subr.msk.bf16.mxu0 %vm14977_vm10, %v13268_v58  ;;  %13323 = vmatpush3.bf16.msra.mxu1 %v13320_v46  ;;  %v13332_v51 = vpack.c.bf16 %v3716_v56, %v3715_v53 }
 0x584   :  { %13325 = vmatprep.subr.bf16.mxu1 %v13324_v48 }
 0x585   :  { %12095 = vmatmul.mubr.msk.f32.vlgmr.msra.gmra.mrb[4].mxu0 %vm1356_vm15, %v10389_v63  ;;  %v13340_v63 = vpack.c.bf16 %v3720_v62, %v3719_v61 }
 0x586   :  { %13273 = vmatpush3.bf16.msk.msra.mxu0 %vm14977_vm10, %v13268_v58  ;;  %12097 = vmatprep.mubr.msk.f32.mxu0 %vm1356_vm15, %v10390_v0  ;;  %v3718_v58 = vld [vmem:[%s15422_s17 + $0x58] sm:$0xff] }
 0x587   :  { %13276 = vmatprep.subr.msk.bf16.mxu0 %vm14977_vm10, %v13274_v3  ;;  %13327 = vmatpush3.bf16.msra.mxu1 %v13324_v48  ;;  %v13336_v59 = vpack.c.bf16 %v3718_v58, %v3717_v57 }
 0x588   :  { %13329 = vmatprep.subr.bf16.mxu1 %v13328_v52 }
 0x589   :  { %12098 = vmatmul.mubr.msk.f32.gmra.mrb[6].mxu0 %vm1356_vm15, %v10391_v60  ;;  %v3623_v0 = vpop.permute.xlu0 %3622  ;;  %v3722_v60 = vld [vmem:[%s15422_s17 + $0x78] sm:$0x1]  ;;  %s14813_s17 = smov 23  }
 0x58a   :  { %13279 = vmatpush3.bf16.msk.msra.mxu0 %vm14977_vm10, %v13274_v3  ;;  %12108 = vmatprep.mubr.msk.f32.mxu0 %vm1356_vm15, %v10400_v6  ;;  %v3618_v6 = vpop.permute.xlu1 %3617  ;;  %vm4514_vm10 = vcmask 293888   ;;  %s16125_s22 = sld [smem:[%s16897_s0 + %s14813_s17]]   ;;  %s14831_s17 = smov 22  }
 0x58b   :  { %13282 = vmatprep.subr.msk.bf16.mxu0 %vm14993_vm12, %v13280_v7  ;;  %13331 = vmatpush3.bf16.msra.mxu1 %v13328_v52 }
 0x58c   :  { %13333 = vmatprep.subr.bf16.mxu1 %v13332_v51 }
 0x58d   :  { %12109 = vmatmul.mubr.msk.f32.vlgmr.msra.gmra.mrb[4].mxu0 %vm1356_vm15, %v10401_v11  ;;  %v3633_v17 = vpop.permute.xlu0 %3632 }
 0x58e   :  { %13285 = vmatpush3.bf16.msk.msra.mxu0 %vm14993_vm12, %v13280_v7  ;;  %12111 = vmatprep.mubr.msk.f32.mxu0 %vm1356_vm15, %v10402_v13  ;;  %v13344_v7 = vpack.c.bf16 %v3722_v60, %v3721_v4  ;;  %v3628_v14 = vpop.permute.xlu1 %3627  ;;  %v4451_v4 = vld [vmem:[%s10123_s28 + $0x30] sm:$0xff]  ;;  %v4448_v60 = vld [vmem:[%s10123_s28 + $0x18] sm:$0xff] }
 0x58f   :  { %13288 = vmatprep.subr.msk.bf16.mxu0 %vm14993_vm12, %v13286_v19  ;;  %13335 = vmatpush3.bf16.msra.mxu1 %v13332_v51 }
 0x590   :  { %13337 = vmatprep.subr.bf16.mxu1 %v13336_v59 }
 0x591   :  { %12112 = vmatmul.mubr.msk.f32.gmra.mrb[6].mxu0 %vm1356_vm15, %v10403_v5 }
 0x592   :  { %13291 = vmatpush3.bf16.msk.msra.mxu0 %vm14993_vm12, %v13286_v19  ;;  %12122 = vmatprep.mubr.msk.f32.mxu0 %vm1356_vm15, %v10412_v22  ;;  %vm4706_vm12 = vcmask 523264  }
 0x593   :  { %13294 = vmatprep.subr.msk.bf16.mxu0 %vm15009_vm14, %v13292_v23  ;;  %13339 = vmatpush3.bf16.msra.mxu1 %v13336_v59 }
 0x594   :  { %13341 = vmatprep.subr.bf16.mxu1 %v13340_v63 }
 0x595   :  { %12123 = vmatmul.mubr.msk.f32.vlgmr.msra.gmra.mrb[4].mxu0 %vm1356_vm15, %v10413_v28 }
 0x596   :  { %13297 = vmatpush3.bf16.msk.msra.mxu0 %vm15009_vm14, %v13292_v23  ;;  %12125 = vmatprep.mubr.msk.f32.mxu0 %vm1356_vm15, %v10414_v31 }
 0x597   :  { %13300 = vmatprep.subr.msk.bf16.mxu0 %vm15009_vm14, %v13298_v35  ;;  %13343 = vmatpush3.bf16.msra.mxu1 %v13340_v63  ;;  %v4445_v63 = vld [vmem:[%s10123_s28] sm:$0xff] }
 0x598   :  { %13346 = vmatprep.subr.msk.bf16.mxu1 %vm15060_vm13, %v13344_v7 }
 0x599   :  { %12126 = vmatmul.mubr.msk.f32.gmra.mrb[6].mxu0 %vm1356_vm15, %v10415_v16 }
 0x59a   :  { %13303 = vmatpush3.bf16.msk.msra.mxu0 %vm15009_vm14, %v13298_v35  ;;  %12136 = vmatprep.mubr.msk.f32.mxu0 %vm1356_vm15, %v10424_v37  ;;  %vm4697_vm14 = vcmask 392192  }
 0x59b   :  { %13306 = vmatprep.subr.msk.bf16.mxu0 %vm15025_vm3, %v13304_v12  ;;  %13349 = vmatpush3.bf16.msk.msra.mxu1 %vm15060_vm13, %v13344_v7  ;;  %v4452_v7 = vld [vmem:[%s10123_s28 + $0x38] sm:$0xff]  ;;  %vm15676_vm13 = vmpackc.low %vm4998_vm11, %vm4998_vm11  ;;  %vm7174_vm11 = vcmask 48128  }
 0x59d   :  { %12137 = vmatmul.mubr.msk.f32.vlgmr.msra.gmra.mrb[4].mxu0 %vm1356_vm15, %v10425_v21 }
 0x59e   :  { %13309 = vmatpush3.bf16.msk.msra.mxu0 %vm15025_vm3, %v13304_v12  ;;  %12139 = vmatprep.mubr.msk.f32.mxu0 %vm1356_vm15, %v10426_v24 }
 0x59f   :  { %13312 = vmatprep.subr.msk.bf16.mxu0 %vm15025_vm3, %v13310_v38 }
 0x5a1   :  { %12140 = vmatmul.mubr.msk.f32.gmra.mrb[6].mxu0 %vm1356_vm15, %v10427_v29 }
 0x5a2   :  { %13315 = vmatpush3.bf16.msk.msra.mxu0 %vm15025_vm3, %v13310_v38  ;;  %12150 = vmatprep.mubr.msk.f32.mxu0 %vm1356_vm15, %v10436_v39  ;;  %vm15635_vm3 = vmpackc.low %vm4697_vm14, %vm4697_vm14 }
 0x5a5   :  { %12151 = vmatmul.mubr.msk.f32.vlgmr.msra.gmra.mrb[4].mxu0 %vm1356_vm15, %v10437_v27 }
 0x5a6   :  { %12153 = vmatprep.mubr.msk.f32.mxu0 %vm1356_vm15, %v10438_v41 }
 0x5a9   :  { %12154 = vmatmul.mubr.msk.f32.gmra.mrb[6].mxu0 %vm1356_vm15, %v10439_v43 }
 0x678   :  { %v12152_v1 = vpop.f32.mrb[4].mxu0 }
 0x679   :  { %v3636_v2 = vadd.f32 %v12152_v1, %v3623_v0  ;;  %v3588_v3 = vpop.f32.mrb[5].mxu0  ;;  %v4447_v1 = vld [vmem:[%s10123_s28 + $0x10] sm:$0xff] }
 0x67a   :  { %v3635_v9 = vadd.f32 %v3618_v6, %v3588_v3  ;;  %v4446_v3 = vld [vmem:[%s10123_s28 + $0x8] sm:$0xff] }
 0x67b   :  { %v3640_v8 = vmax.f32 %v3636_v2, 0.0  ;;  %v4449_v2 = vld [vmem:[%s10123_s28 + $0x20] sm:$0xff]  ;;  %v4450_v6 = vld [vmem:[%s10123_s28 + $0x28] sm:$0xff] }
 0x67c   :  { %v12155_v10 = vpop.f32.mrb[6].mxu0  ;;  %v3639_v13 = vmax.f32 %v3635_v9, 0.0  ;;  %v4510_v9 = vld [vmem:[%s15493_s4 + $0x8] sm:$0xff] }
 0x67d   :  { %3669 = vrot.lane.b32.xlu1 %v3640_v8, %s14780_s11  ;;  %3649 = vrot.lane.b32.xlu0 %v3640_v8, %s14779_s10  ;;  %v3598_v11 = vpop.f32.mrb[7].mxu0  ;;  %v3638_v19 = vadd.f32 %v12155_v10, %v3633_v17 }
 0x67e   :  { %v3637_v20 = vadd.f32 %v3628_v14, %v3598_v11 }
 0x67f   :  { %v3642_v5 = vmax.f32 %v3638_v19, 0.0 }
 0x680   :  { %v3641_v22 = vmax.f32 %v3637_v20, 0.0 }
 0x681   :  { %3685 = vrot.lane.b32.xlu0 %v3640_v8, %s14782_s13  ;;  %3647 = vrot.lane.b32.xlu1 %v3639_v13, %s14779_s10 }
 0x685   :  { %3667 = vrot.lane.b32.xlu0 %v3639_v13, %s14780_s11  ;;  %3683 = vrot.lane.b32.xlu1 %v3639_v13, %s14782_s13 }
 0x689   :  { %3653 = vrot.lane.b32.xlu0 %v3642_v5, %s14779_s10  ;;  %3651 = vrot.lane.b32.xlu1 %v3641_v22, %s14779_s10 }
 0x68d   :  { %3671 = vrot.lane.b32.xlu0 %v3641_v22, %s14780_s11  ;;  %3687 = vrot.lane.b32.xlu1 %v3641_v22, %s14782_s13 }
 0x691   :  { %3689 = vrot.lane.b32.xlu0 %v3642_v5, %s14782_s13  ;;  %3673 = vrot.lane.b32.xlu1 %v3642_v5, %s14780_s11  ;;  %s14796_s11 = smov 7   ;;  %s15629_s13 = sld [smem:[%s16897_s0 + %s14804_s16]]  }
 0x692   :  { %s15478_s23 = sld [smem:[%s16897_s0 + %s14796_s11]]   ;;  %s14811_s16 = smov 124  }
 0x698   :  { %v10453_v58 = vld [vmem:[%s15478_s23 + $0x40] sm:$0xff] }
 0x6ef   :  { %v3670_v55 = vpop.permute.xlu1 %3669  ;;  %v3650_v23 = vpop.permute.xlu0 %3649 }
 0x6f0   :  { %v3680_v31 = vsel %vm498_vm5, %v3670_v55, 0.0  ;;  %v3660_v32 = vsel %vm174_vm1, %v3650_v23, 0.0  ;;  %v10454_v23 = vld [vmem:[%s15478_s23 + $0x48] sm:$0xff] }
 0x6f1   :  { %v3664_v18 = vmax.f32 %v3640_v8, %v3660_v32  ;;  %v4509_v8 = vld [vmem:[%s15493_s4] sm:$0xff] }
 0x6f2   :  { %v13394_v10 = vpack.c.bf16 %v4510_v9, %v4509_v8 }
 0x6f3   :  { %v3686_v25 = vpop.permute.xlu0 %3685  ;;  %v3648_v34 = vpop.permute.xlu1 %3647 }
 0x6f4   :  { %v3696_v26 = vsel %vm613_vm7, %v3686_v25, 0.0  ;;  %v3659_v28 = vsel %vm174_vm1, %v3648_v34, 0.0  ;;  %13395 = vmatprep.subr.bf16.mxu0 %v13394_v10  ;;  %v10455_v25 = vld [vmem:[%s15478_s23 + $0x50] sm:$0xff] }
 0x6f5   :  { %v3700_v36 = vmax.f32 %v3680_v31, %v3696_v26  ;;  %v3663_v12 = vmax.f32 %v3639_v13, %v3659_v28  ;;  %13397 = vmatpush3.bf16.msra.mxu0 %v13394_v10  ;;  %v10456_v28 = vld [vmem:[%s15478_s23 + $0x58] sm:$0xff]  ;;  %v10457_v31 = vld [vmem:[%s15478_s23 + $0x60] sm:$0xff] }
 0x6f7   :  { %v3668_v33 = vpop.permute.xlu0 %3667  ;;  %v3684_v35 = vpop.permute.xlu1 %3683  ;;  %v3704_v29 = vmax.f32 %v3664_v18, %v3700_v36  ;;  %v10459_v36 = vld [vmem:[%s15478_s23 + $0x70] sm:$0xff] }
 0x6f8   :  { %v3679_v16 = vsel %vm498_vm5, %v3668_v33, 0.0  ;;  %v3695_v37 = vsel %vm613_vm7, %v3684_v35, 0.0  ;;  %v10458_v35 = vld [vmem:[%s15478_s23 + $0x68] sm:$0xff] }
 0x6f9   :  { %v3699_v15 = vmax.f32 %v3679_v16, %v3695_v37  ;;  %v10460_v37 = vld [vmem:[%s15478_s23 + $0x78] sm:$0xff] }
 0x6fb   :  { %v3703_v21 = vmax.f32 %v3663_v12, %v3699_v15  ;;  %v3654_v24 = vpop.permute.xlu0 %3653  ;;  %v3652_v38 = vpop.permute.xlu1 %3651  ;;  %v3823_v12 = vld [vmem:[%s15478_s23] sm:$0xff] }
 0x6fc   :  { %v3661_v39 = vsel %vm174_vm1, %v3652_v38, 0.0  ;;  %v3662_v30 = vsel %vm174_vm1, %v3654_v24, 0.0  ;;  %vm3856_vm1 = vcmask 285696   ;;  %v3824_v24 = vld [vmem:[%s15478_s23 + $0x8] sm:$0xff]  ;;  %v3825_v38 = vld [vmem:[%s15478_s23 + $0x10] sm:$0xff] }
 0x6fd   :  { %12188 = vmatprep.mubr.msk.f32.mxu1 %vm1225_vm0, %v3703_v21  ;;  %v3665_v44 = vmax.f32 %v3641_v22, %v3661_v39  ;;  %v3666_v49 = vmax.f32 %v3642_v5, %v3662_v30  ;;  %vm13351_vm2 = vmpackc.low %vm3856_vm1, %vm3856_vm1  ;;  %v3829_v30 = vld [vmem:[%s15478_s23 + $0x30] sm:$0xff] }
 0x6fe   :  { %12189 = vmatmul.mubr.msk.f32.vlgmr.msra.gmra.mrb[12].mxu1 %vm1225_vm0, %v3704_v29 }
 0x6ff   :  { %v3672_v27 = vpop.permute.xlu0 %3671  ;;  %v3688_v41 = vpop.permute.xlu1 %3687 }
 0x700   :  { %v3681_v43 = vsel %vm498_vm5, %v3672_v27, 0.0  ;;  %v3697_v40 = vsel %vm613_vm7, %v3688_v41, 0.0  ;;  %v3826_v41 = vld [vmem:[%s15478_s23 + $0x18] sm:$0xff] }
 0x701   :  { %v3701_v42 = vmax.f32 %v3681_v43, %v3697_v40  ;;  %v3827_v43 = vld [vmem:[%s15478_s23 + $0x20] sm:$0xff] }
 0x703   :  { %v3705_v45 = vmax.f32 %v3665_v44, %v3701_v42  ;;  %v3690_v46 = vpop.permute.xlu0 %3689  ;;  %v3674_v47 = vpop.permute.xlu1 %3673  ;;  %v3828_v42 = vld [vmem:[%s15478_s23 + $0x28] sm:$0xff] }
 0x704   :  { %v3698_v54 = vsel %vm613_vm7, %v3690_v46, 0.0  ;;  %v3682_v48 = vsel %vm498_vm5, %v3674_v47, 0.0  ;;  %vm15505_vm5 = vmpackc.low %vm4140_vm4, %vm4140_vm4  ;;  %v3830_v46 = vld [vmem:[%s15478_s23 + $0x38] sm:$0xff]  ;;  %v10481_v47 = vld [vmem:[%s15478_s23 + $0x80] sm:$0xff] }
 0x705   :  { %v3702_v50 = vmax.f32 %v3682_v48, %v3698_v54  ;;  %12191 = vmatprep.mubr.msk.f32.mxu1 %vm1225_vm0, %v3705_v45  ;;  %vm15531_vm7 = vmpackc.low %vm4303_vm6, %vm4303_vm6 }
 0x707   :  { %v3706_v52 = vmax.f32 %v3666_v49, %v3702_v50  ;;  %v10482_v49 = vld [vmem:[%s15478_s23 + $0x88] sm:$0xff]  ;;  %v10483_v50 = vld [vmem:[%s15478_s23 + $0x90] sm:$0xff] }
 0x709   :  { %12192 = vmatmul.mubr.msk.f32.gmra.mrb[14].mxu1 %vm1225_vm0, %v3706_v52  ;;  %vm5177_vm0 = vcmask 334848  }
 0x70a   :  { %12202 = vmatprep.mubr.msk.f32.mxu1 %vm1356_vm15, %v10453_v58  ;;  %v10488_v58 = vld [vmem:[%s15478_s23 + $0xb8] sm:$0xff]  ;;  %vm15711_vm1 = vmpackc.low %vm5177_vm0, %vm5177_vm0  ;;  %vm7393_vm0 = vcmask 39936  }
 0x7d1   :  { %v12190_v53 = vpop.f32.mrb[12].mxu1 }
 0x7d2   :  { %v3804_v56 = vpop.f32.mrb[13].mxu1 }
 0x7d3   :  { %v14392_v51 = vpack.i.bf16 %v12190_v53, %v3804_v56  ;;  %v15472_v57 = vpack.c.bf16 %v12190_v53, %v3804_v56  ;;  %v10484_v53 = vld [vmem:[%s15478_s23 + $0x98] sm:$0xff]  ;;  %v10485_v56 = vld [vmem:[%s15478_s23 + $0xa0] sm:$0xff] }
 0x7d5   :  { %14393 = vrot.lane.b32.xlu1 %v14392_v51, %s14779_s10 }
 0x7d9   :  { %14403 = vrot.lane.b32.xlu1 %v14392_v51, %s14798_s29 }
 0x7dc   :  { %v12193_v59 = vpop.f32.mrb[14].mxu1 }
 0x7dd   :  { %14413 = vrot.lane.b32.xlu1 %v14392_v51, %s14799_s30  ;;  %v3814_v61 = vpop.f32.mrb[15].mxu1  ;;  %v10486_v51 = vld [vmem:[%s15478_s23 + $0xa8] sm:$0xff] }
 0x7de   :  { %v14397_v62 = vpack.i.bf16 %v12193_v59, %v3814_v61  ;;  %v13366_v0 = vpack.c.bf16 %v12193_v59, %v3814_v61  ;;  %v10501_v59 = vld [vmem:[%s15478_s23 + $0xc0] sm:$0xff]  ;;  %v10502_v61 = vld [vmem:[%s15478_s23 + $0xc8] sm:$0xff] }
 0x7e0   :  { %14398 = vrot.lane.b32.xlu0 %v14397_v62, %s14779_s10 }
 0x7e1   :  { %4455 = vperm.xlu1 %14231, %v4445_v63   ;;  %v10504_v63 = vld [vmem:[%s15478_s23 + $0xd8] sm:$0xff] }
 0x7e4   :  { %14408 = vrot.lane.b32.xlu0 %v14397_v62, %s14798_s29 }
 0x7e5   :  { %4465 = vperm.xlu1 %14231, %v4447_v1   ;;  %v10506_v1 = vld [vmem:[%s15478_s23 + $0xe8] sm:$0xff] }
 0x7e8   :  { %14418 = vrot.lane.b32.xlu0 %v14397_v62, %s14799_s30  ;;  %v10503_v62 = vld [vmem:[%s15478_s23 + $0xd0] sm:$0xff] }
 0x7e9   :  { %4475 = vperm.xlu1 %14231, %v4449_v2   ;;  %v10507_v2 = vld [vmem:[%s15478_s23 + $0xf0] sm:$0xff] }
 0x7ec   :  { %4460 = vperm.xlu0 %14230, %v4446_v3   ;;  %v10508_v3 = vld [vmem:[%s15478_s23 + $0xf8] sm:$0xff] }
 0x7ed   :  { %4485 = vperm.xlu1 %14231, %v4451_v4   ;;  %v4511_v4 = vld [vmem:[%s15493_s4 + $0x10] sm:$0xff] }
 0x7f0   :  { %4470 = vperm.xlu0 %14230, %v4448_v60   ;;  %v4512_v60 = vld [vmem:[%s15493_s4 + $0x18] sm:$0xff] }
 0x7f4   :  { %4480 = vperm.xlu0 %14230, %v4450_v6   ;;  %v13398_v6 = vpack.c.bf16 %v4512_v60, %v4511_v4  ;;  %v5390_v60 = vld [vmem:[%s15629_s13 + $0x18] sm:$0xff] }
 0x7f6   :  { %13399 = vmatprep.subr.bf16.mxu0 %v13398_v6 }
 0x7f7   :  { %13401 = vmatpush3.bf16.msra.mxu0 %v13398_v6 }
 0x7f8   :  { %4490 = vperm.xlu0 %14230, %v4452_v7   ;;  %v4513_v7 = vld [vmem:[%s15493_s4 + $0x20] sm:$0xf]  ;;  %s14808_s4 = smov 19  }
 0x7f9   :  { %12282 = vmatprep.subr.msk.mxu0 %vm4539_vm8, %v4513_v7  ;;  %s10134_s8 = sld [smem:[%s16897_s0 + %s14808_s4]]   ;;  %s14818_s4 = smov 25  }
 0x7fb   :  { %12283 = vmatpush3.msk.msra.mxu0 %vm4539_vm8, %v4513_v7 }
 0x847   :  { %v14394_v11 = vpop.permute.xlu1 %14393 }
 0x848   :  { %v14396_v13 = vunpack.i.h.bf16 %v14394_v11  ;;  %v14395_v14 = vunpack.i.l.bf16 %v14394_v11 }
 0x84a   :  { %v13350_v17 = vpack.c.bf16 %v14396_v13, %v14395_v14 }
 0x84b   :  { %v14404_v55 = vpop.permute.xlu1 %14403 }
 0x84c   :  { %13352 = vmatprep.subr.msk.bf16.mxu1 %vm13351_vm2, %v13350_v17  ;;  %v14406_v34 = vunpack.i.h.bf16 %v14404_v55  ;;  %v14405_v26 = vunpack.i.l.bf16 %v14404_v55 }
 0x84d   :  { %13355 = vmatpush3.bf16.msk.msra.mxu1 %vm13351_vm2, %v13350_v17 }
 0x84e   :  { %v13370_v33 = vpack.c.bf16 %v14406_v34, %v14405_v26 }
 0x84f   :  { %v14414_v21 = vpop.permute.xlu1 %14413 }
 0x850   :  { %v14416_v29 = vunpack.i.h.bf16 %v14414_v21  ;;  %v14415_v39 = vunpack.i.l.bf16 %v14414_v21 }
 0x852   :  { %v14399_v19 = vpop.permute.xlu0 %14398  ;;  %v13382_v44 = vpack.c.bf16 %v14416_v29, %v14415_v39 }
 0x853   :  { %v14401_v20 = vunpack.i.h.bf16 %v14399_v19  ;;  %v14400_v5 = vunpack.i.l.bf16 %v14399_v19 }
 0x855   :  { %v13356_v22 = vpack.c.bf16 %v14401_v20, %v14400_v5 }
 0x856   :  { %v14409_v16 = vpop.permute.xlu0 %14408 }
 0x857   :  { %13358 = vmatprep.subr.msk.bf16.mxu1 %vm13351_vm2, %v13356_v22  ;;  %v14411_v15 = vunpack.i.h.bf16 %v14409_v16  ;;  %v14410_v18 = vunpack.i.l.bf16 %v14409_v16 }
 0x858   :  { %13361 = vmatpush3.bf16.msk.msra.mxu1 %vm13351_vm2, %v13356_v22  ;;  %vm5394_vm2 = vcmask 400384  }
 0x859   :  { %13363 = vmatprep.subr.bf16.mxu1 %v15472_v57  ;;  %v13376_v27 = vpack.c.bf16 %v14411_v15, %v14410_v18 }
 0x85a   :  { %v14419_v45 = vpop.permute.xlu0 %14418 }
 0x85b   :  { %12203 = vmatmul.mubr.msk.f32.vlgmr.msra.gmra.mrb[16].mxu1 %vm1356_vm15, %v10454_v23  ;;  %v14421_v54 = vunpack.i.h.bf16 %v14419_v45  ;;  %v14420_v48 = vunpack.i.l.bf16 %v14419_v45 }
 0x85c   :  { %13365 = vmatpush3.bf16.msra.mxu1 %v15472_v57  ;;  %12205 = vmatprep.mubr.msk.f32.mxu1 %vm1356_vm15, %v10455_v25  ;;  %v10487_v57 = vld [vmem:[%s15478_s23 + $0xb0] sm:$0xff] }
 0x85d   :  { %13367 = vmatprep.subr.bf16.mxu1 %v13366_v0  ;;  %v13388_v52 = vpack.c.bf16 %v14421_v54, %v14420_v48 }
 0x85f   :  { %12206 = vmatmul.mubr.msk.f32.gmra.mrb[18].mxu1 %vm1356_vm15, %v10456_v28 }
 0x860   :  { %13369 = vmatpush3.bf16.msra.mxu1 %v13366_v0  ;;  %12208 = vmatprep.mubr.msk.f32.mxu1 %vm1356_vm15, %v10457_v31  ;;  %v10505_v0 = vld [vmem:[%s15478_s23 + $0xe0] sm:$0xff]  ;;  %v4456_v9 = vpop.permute.xlu1 %4455  ;;  %s14832_s23 = smov 38  }
 0x861   :  { %13372 = vmatprep.subr.msk.bf16.mxu1 %vm15505_vm5, %v13370_v33 }
 0x863   :  { %12209 = vmatmul.mubr.msk.f32.gmra.mrb[20].mxu1 %vm1356_vm15, %v10458_v35 }
 0x864   :  { %12211 = vmatprep.mubr.msk.f32.mxu1 %vm1356_vm15, %v10459_v36  ;;  %v4466_v13 = vpop.permute.xlu1 %4465 }
 0x867   :  { %12212 = vmatmul.mubr.msk.f32.gmra.mrb[22].mxu1 %vm1356_vm15, %v10460_v37 }
 0x868   :  { %12222 = vmatprep.mubr.msk.f32.mxu1 %vm1356_vm15, %v3823_v12  ;;  %v4476_v26 = vpop.permute.xlu1 %4475 }
 0x86b   :  { %12223 = vmatmul.mubr.msk.f32.vlgmr.msra.gmra.mrb[16].mxu1 %vm1356_vm15, %v3824_v24  ;;  %v4461_v8 = vpop.permute.xlu0 %4460 }
 0x86c   :  { %13375 = vmatpush3.bf16.msk.msra.mxu1 %vm15505_vm5, %v13370_v33  ;;  %12225 = vmatprep.mubr.msk.f32.mxu1 %vm1356_vm15, %v3825_v38  ;;  %v4486_v15 = vpop.permute.xlu1 %4485 }
 0x86d   :  { %13378 = vmatprep.subr.msk.bf16.mxu1 %vm15505_vm5, %v13376_v27 }
 0x86f   :  { %12226 = vmatmul.mubr.msk.f32.gmra.mrb[18].mxu1 %vm1356_vm15, %v3826_v41  ;;  %v4471_v10 = vpop.permute.xlu0 %4470 }
 0x870   :  { %13381 = vmatpush3.bf16.msk.msra.mxu1 %vm15505_vm5, %v13376_v27  ;;  %12228 = vmatprep.mubr.msk.f32.mxu1 %vm1356_vm15, %v3827_v43  ;;  %vm5876_vm5 = vcmask 457728  }
 0x871   :  { %13384 = vmatprep.subr.msk.bf16.mxu1 %vm15531_vm7, %v13382_v44  ;;  %vm15853_vm6 = vmpackc.low %vm5876_vm5, %vm5876_vm5 }
 0x873   :  { %12229 = vmatmul.mubr.msk.f32.gmra.mrb[20].mxu1 %vm1356_vm15, %v3828_v42  ;;  %v4481_v25 = vpop.permute.xlu0 %4480 }
 0x874   :  { %12231 = vmatprep.mubr.msk.f32.mxu1 %vm1356_vm15, %v3829_v30 }
 0x877   :  { %12232 = vmatmul.mubr.msk.f32.gmra.mrb[22].mxu1 %vm1356_vm15, %v3830_v46  ;;  %v4491_v16 = vpop.permute.xlu0 %4490 }
 0x878   :  { %12242 = vmatprep.mubr.msk.f32.mxu1 %vm1356_vm15, %v10481_v47 }
 0x87b   :  { %12243 = vmatmul.mubr.msk.f32.vlgmr.msra.gmra.mrb[16].mxu1 %vm1356_vm15, %v10482_v49  ;;  %v10530_v49 = vld [vmem:[%s15602_s9 + $0x40] sm:$0xff] }
 0x87c   :  { %13387 = vmatpush3.bf16.msk.msra.mxu1 %vm15531_vm7, %v13382_v44  ;;  %12245 = vmatprep.mubr.msk.f32.mxu1 %vm1356_vm15, %v10483_v50 }
 0x87d   :  { %13390 = vmatprep.subr.msk.bf16.mxu1 %vm15531_vm7, %v13388_v52 }
 0x87f   :  { %12246 = vmatmul.mubr.msk.f32.gmra.mrb[18].mxu1 %vm1356_vm15, %v10484_v53 }
 0x880   :  { %13393 = vmatpush3.bf16.msk.msra.mxu1 %vm15531_vm7, %v13388_v52  ;;  %12248 = vmatprep.mubr.msk.f32.mxu1 %vm1356_vm15, %v10485_v56  ;;  %vm6055_vm7 = vcmask 449536  }
 0x881   :  { %vm15890_vm8 = vmpackc.low %vm6055_vm7, %vm6055_vm7 }
 0x883   :  { %12249 = vmatmul.mubr.msk.f32.gmra.mrb[20].mxu1 %vm1356_vm15, %v10486_v51  ;;  %v5323_v51 = vld [vmem:[%s10125_s14] sm:$0xff] }
 0x884   :  { %12251 = vmatprep.mubr.msk.f32.mxu1 %vm1356_vm15, %v10487_v57  ;;  %v5325_v57 = vld [vmem:[%s10125_s14 + $0x10] sm:$0xff] }
 0x887   :  { %12252 = vmatmul.mubr.msk.f32.gmra.mrb[22].mxu1 %vm1356_vm15, %v10488_v58  ;;  %v5324_v58 = vld [vmem:[%s10125_s14 + $0x8] sm:$0xff] }
 0x888   :  { %12262 = vmatprep.mubr.msk.f32.mxu1 %vm1356_vm15, %v10501_v59  ;;  %v5327_v59 = vld [vmem:[%s10125_s14 + $0x20] sm:$0xff] }
 0x88b   :  { %12263 = vmatmul.mubr.msk.f32.vlgmr.msra.gmra.mrb[16].mxu1 %vm1356_vm15, %v10502_v61  ;;  %v5326_v61 = vld [vmem:[%s10125_s14 + $0x18] sm:$0xff] }
 0x88c   :  { %12265 = vmatprep.mubr.msk.f32.mxu1 %vm1356_vm15, %v10503_v62  ;;  %v5329_v62 = vld [vmem:[%s10125_s14 + $0x30] sm:$0xff] }
 0x88f   :  { %12266 = vmatmul.mubr.msk.f32.gmra.mrb[18].mxu1 %vm1356_vm15, %v10504_v63  ;;  %v5328_v63 = vld [vmem:[%s10125_s14 + $0x28] sm:$0xff] }
 0x890   :  { %12268 = vmatprep.mubr.msk.f32.mxu1 %vm1356_vm15, %v10505_v0  ;;  %v5330_v0 = vld [vmem:[%s10125_s14 + $0x38] sm:$0xff]  ;;  %s14810_s14 = smov 125  }
 0x893   :  { %12269 = vmatmul.mubr.msk.f32.gmra.mrb[20].mxu1 %vm1356_vm15, %v10506_v1  ;;  %v5387_v1 = vld [vmem:[%s15629_s13] sm:$0xff] }
 0x894   :  { %12271 = vmatprep.mubr.msk.f32.mxu1 %vm1356_vm15, %v10507_v2  ;;  %v5388_v2 = vld [vmem:[%s15629_s13 + $0x8] sm:$0xff] }
 0x895   :  { %v13490_v4 = vpack.c.bf16 %v5388_v2, %v5387_v1  ;;  %v10563_v2 = vld [vmem:[%s15602_s9 + $0x88] sm:$0xff] }
 0x897   :  { %12272 = vmatmul.mubr.msk.f32.gmra.mrb[22].mxu1 %vm1356_vm15, %v10508_v3  ;;  %v5389_v3 = vld [vmem:[%s15629_s13 + $0x10] sm:$0xff]  ;;  %13491 = vmatprep.subr.bf16.mxu1 %v13490_v4 }
 0x898   :  { %v13494_v6 = vpack.c.bf16 %v5390_v60, %v5389_v3  ;;  %13493 = vmatpush3.bf16.msra.mxu1 %v13490_v4  ;;  %v10564_v3 = vld [vmem:[%s15602_s9 + $0x90] sm:$0xff] }
 0x89a   :  { %13495 = vmatprep.subr.bf16.mxu1 %v13494_v6 }
 0x89c   :  { %13497 = vmatpush3.bf16.msra.mxu1 %v13494_v6 }
 0x95e   :  { %v12264_v11 = vpop.f32.mrb[16].mxu1 }
 0x95f   :  { %v4494_v14 = vadd.f32 %v12264_v11, %v4461_v8  ;;  %v4398_v17 = vpop.f32.mrb[17].mxu1 }
 0x960   :  { %v4493_v19 = vadd.f32 %v4456_v9, %v4398_v17 }
 0x961   :  { %v4502_v22 = vmax.f32 %v4494_v14, 0.0 }
 0x962   :  { %v4501_v20 = vmax.f32 %v4493_v19, 0.0  ;;  %v12267_v5 = vpop.f32.mrb[18].mxu1 }
 0x963   :  { %v4496_v55 = vadd.f32 %v12267_v5, %v4471_v10  ;;  %v4408_v23 = vpop.f32.mrb[19].mxu1 }
 0x964   :  { %v4495_v34 = vadd.f32 %v4466_v13, %v4408_v23  ;;  %12284 = vmatprep.mubr.msk.f32.mxu0 %vm4514_vm10, %v4501_v20 }
 0x965   :  { %12285 = vmatmul.mubr.msk.f32.vlgmr.msra.gmra.mrb[8].mxu0 %vm4514_vm10, %v4502_v22  ;;  %v4504_v32 = vmax.f32 %v4496_v55, 0.0 }
 0x966   :  { %v4503_v28 = vmax.f32 %v4495_v34, 0.0  ;;  %v12270_v31 = vpop.f32.mrb[20].mxu1 }
 0x967   :  { %v4498_v33 = vadd.f32 %v12270_v31, %v4481_v25  ;;  %v4418_v35 = vpop.f32.mrb[21].mxu1  ;;  %v10532_v31 = vld [vmem:[%s15602_s9 + $0x50] sm:$0xff] }
 0x968   :  { %v4497_v36 = vadd.f32 %v4476_v26, %v4418_v35  ;;  %12287 = vmatprep.mubr.msk.f32.mxu0 %vm4514_vm10, %v4503_v28  ;;  %v10531_v28 = vld [vmem:[%s15602_s9 + $0x48] sm:$0xff] }
 0x969   :  { %12288 = vmatmul.mubr.msk.f32.gmra.mrb[10].mxu0 %vm4514_vm10, %v4504_v32  ;;  %v4506_v18 = vmax.f32 %v4498_v33, 0.0  ;;  %v10533_v32 = vld [vmem:[%s15602_s9 + $0x58] sm:$0xff]  ;;  %v10534_v33 = vld [vmem:[%s15602_s9 + $0x60] sm:$0xff] }
 0x96a   :  { %v4505_v37 = vmax.f32 %v4497_v36, 0.0  ;;  %v12273_v12 = vpop.f32.mrb[22].mxu1  ;;  %v10535_v36 = vld [vmem:[%s15602_s9 + $0x68] sm:$0xff] }
 0x96b   :  { %v4500_v21 = vadd.f32 %v12273_v12, %v4491_v16  ;;  %v4428_v24 = vpop.f32.mrb[23].mxu1  ;;  %v10536_v16 = vld [vmem:[%s15602_s9 + $0x70] sm:$0xff] }
 0x96c   :  { %v4499_v38 = vadd.f32 %v4486_v15, %v4428_v24  ;;  %12290 = vmatprep.mubr.msk.f32.mxu0 %vm4514_vm10, %v4505_v37 }
 0x96d   :  { %12291 = vmatmul.mubr.msk.f32.gmra.mrb[12].mxu0 %vm4514_vm10, %v4506_v18  ;;  %v4508_v39 = vmax.f32 %v4500_v21, 0.0  ;;  %v10537_v18 = vld [vmem:[%s15602_s9 + $0x78] sm:$0xff]  ;;  %v4648_v21 = vld [vmem:[%s15602_s9] sm:$0xff] }
 0x96e   :  { %v4507_v29 = vmax.f32 %v4499_v38, 0.0 }
 0x970   :  { %12293 = vmatprep.mubr.msk.f32.mxu0 %vm4514_vm10, %v4507_v29 }
 0x971   :  { %12294 = vmatmul.mubr.msk.f32.gmra.mrb[14].mxu0 %vm4514_vm10, %v4508_v39  ;;  %vm6955_vm10 = vcmask 56320  }
 0x972   :  { %12312 = vmatprep.mubr.msk.f32.mxu0 %vm4706_vm12, %v10530_v49  ;;  %vm16167_vm14 = vmpackc.low %vm6955_vm10, %vm6955_vm10 }
 0xa38   :  { %v12286_v27 = vpop.f32.mrb[8].mxu0 }
 0xa39   :  { %v4609_v41 = vpop.f32.mrb[9].mxu0 }
 0xa3a   :  { %v14422_v43 = vpack.i.bf16 %v12286_v27, %v4609_v41  ;;  %v15596_v40 = vpack.c.bf16 %v12286_v27, %v4609_v41  ;;  %v4649_v41 = vld [vmem:[%s15602_s9 + $0x8] sm:$0xff] }
 0xa3c   :  { %14423 = vrot.lane.b32.xlu1 %v14422_v43, %s14779_s10  ;;  %v12289_v44 = vpop.f32.mrb[10].mxu0 }
 0xa3d   :  { %v4619_v42 = vpop.f32.mrb[11].mxu0 }
 0xa3e   :  { %v14427_v30 = vpack.i.bf16 %v12289_v44, %v4619_v42  ;;  %v15604_v45 = vpack.c.bf16 %v12289_v44, %v4619_v42 }
 0xa40   :  { %14428 = vrot.lane.b32.xlu0 %v14427_v30, %s14779_s10  ;;  %v12292_v46 = vpop.f32.mrb[12].mxu0 }
 0xa41   :  { %v4629_v47 = vpop.f32.mrb[13].mxu0 }
 0xa42   :  { %v14432_v54 = vpack.i.bf16 %v12292_v46, %v4629_v47  ;;  %v15607_v48 = vpack.c.bf16 %v12292_v46, %v4629_v47  ;;  %v4652_v46 = vld [vmem:[%s15602_s9 + $0x20] sm:$0xff] }
 0xa44   :  { %14433 = vrot.lane.b32.xlu1 %v14432_v54, %s14779_s10  ;;  %v12295_v50 = vpop.f32.mrb[14].mxu0 }
 0xa45   :  { %v4639_v52 = vpop.f32.mrb[15].mxu0 }
 0xa46   :  { %v14437_v53 = vpack.i.bf16 %v12295_v50, %v4639_v52  ;;  %v15612_v56 = vpack.c.bf16 %v12295_v50, %v4639_v52  ;;  %v4653_v50 = vld [vmem:[%s15602_s9 + $0x28] sm:$0xff]  ;;  %v4654_v52 = vld [vmem:[%s15602_s9 + $0x30] sm:$0xff] }
 0xa48   :  { %14443 = vrot.lane.b32.xlu1 %v14422_v43, %s14799_s30  ;;  %14438 = vrot.lane.b32.xlu0 %v14437_v53, %s14779_s10 }
 0xa4c   :  { %14453 = vrot.lane.b32.xlu1 %v14432_v54, %s14799_s30  ;;  %14448 = vrot.lane.b32.xlu0 %v14427_v30, %s14799_s30 }
 0xa50   :  { %14463 = vrot.lane.b32.xlu1 %v14422_v43, %s14803_s15  ;;  %14458 = vrot.lane.b32.xlu0 %v14437_v53, %s14799_s30  ;;  %v4650_v43 = vld [vmem:[%s15602_s9 + $0x10] sm:$0xff] }
 0xa54   :  { %14473 = vrot.lane.b32.xlu1 %v14432_v54, %s14803_s15  ;;  %14468 = vrot.lane.b32.xlu0 %v14427_v30, %s14803_s15 }
 0xa58   :  { %5333 = vperm.xlu1 %14231, %v5323_v51   ;;  %14478 = vrot.lane.b32.xlu0 %v14437_v53, %s14803_s15 }
 0xa5c   :  { %5343 = vperm.xlu1 %14231, %v5325_v57   ;;  %5338 = vperm.xlu0 %14230, %v5324_v58   ;;  %v4655_v58 = vld [vmem:[%s15602_s9 + $0x38] sm:$0xff] }
 0xa60   :  { %5353 = vperm.xlu1 %14231, %v5327_v59   ;;  %5348 = vperm.xlu0 %14230, %v5326_v61   ;;  %v10562_v59 = vld [vmem:[%s15602_s9 + $0x80] sm:$0xff] }
 0xa64   :  { %5363 = vperm.xlu1 %14231, %v5329_v62   ;;  %5358 = vperm.xlu0 %14230, %v5328_v63  }
 0xa68   :  { %5368 = vperm.xlu0 %14230, %v5330_v0  }
 0xaae   :  { %v14424_v7 = vpop.permute.xlu1 %14423 }
 0xaaf   :  { %v14426_v8 = vunpack.i.h.bf16 %v14424_v7  ;;  %v14425_v9 = vunpack.i.l.bf16 %v14424_v7 }
 0xab1   :  { %v13402_v11 = vpack.c.bf16 %v14426_v8, %v14425_v9  ;;  %v10565_v8 = vld [vmem:[%s15602_s9 + $0x98] sm:$0xff]  ;;  %v10566_v9 = vld [vmem:[%s15602_s9 + $0xa0] sm:$0xff] }
 0xab2   :  { %v14429_v13 = vpop.permute.xlu0 %14428 }
 0xab3   :  { %v14431_v14 = vunpack.i.h.bf16 %v14429_v13  ;;  %v14430_v17 = vunpack.i.l.bf16 %v14429_v13  ;;  %13404 = vmatprep.subr.msk.bf16.mxu0 %vm15635_vm3, %v13402_v11 }
 0xab4   :  { %13407 = vmatpush3.bf16.msk.msra.mxu0 %vm15635_vm3, %v13402_v11 }
 0xab5   :  { %v13408_v19 = vpack.c.bf16 %v14431_v14, %v14430_v17  ;;  %v10567_v14 = vld [vmem:[%s15602_s9 + $0xa8] sm:$0xff]  ;;  %v10568_v17 = vld [vmem:[%s15602_s9 + $0xb0] sm:$0xff] }
 0xab6   :  { %v14434_v20 = vpop.permute.xlu1 %14433 }
 0xab7   :  { %v14436_v5 = vunpack.i.h.bf16 %v14434_v20  ;;  %v14435_v22 = vunpack.i.l.bf16 %v14434_v20  ;;  %13410 = vmatprep.subr.msk.bf16.mxu0 %vm15635_vm3, %v13408_v19  ;;  %v10569_v20 = vld [vmem:[%s15602_s9 + $0xb8] sm:$0xff] }
 0xab8   :  { %13413 = vmatpush3.bf16.msk.msra.mxu0 %vm15635_vm3, %v13408_v19 }
 0xab9   :  { %v13414_v55 = vpack.c.bf16 %v14436_v5, %v14435_v22  ;;  %v10586_v5 = vld [vmem:[%s15602_s9 + $0xc0] sm:$0xff]  ;;  %v10587_v22 = vld [vmem:[%s15602_s9 + $0xc8] sm:$0xff] }
 0xaba   :  { %v14439_v23 = vpop.permute.xlu0 %14438  ;;  %v14444_v35 = vpop.permute.xlu1 %14443 }
 0xabb   :  { %v14441_v25 = vunpack.i.h.bf16 %v14439_v23  ;;  %v14440_v34 = vunpack.i.l.bf16 %v14439_v23  ;;  %13416 = vmatprep.subr.msk.bf16.mxu0 %vm15635_vm3, %v13414_v55  ;;  %v14446_v37 = vunpack.i.h.bf16 %v14444_v35  ;;  %v14445_v12 = vunpack.i.l.bf16 %v14444_v35  ;;  %v10589_v23 = vld [vmem:[%s15602_s9 + $0xd8] sm:$0xff]  ;;  %v5393_v35 = vld [vmem:[%s15629_s13 + $0x30] sm:$0x1] }
 0xabc   :  { %13419 = vmatpush3.bf16.msk.msra.mxu0 %vm15635_vm3, %v13414_v55  ;;  %v10588_v55 = vld [vmem:[%s15602_s9 + $0xd0] sm:$0xff] }
 0xabd   :  { %v13420_v26 = vpack.c.bf16 %v14441_v25, %v14440_v34  ;;  %v13442_v38 = vpack.c.bf16 %v14446_v37, %v14445_v12  ;;  %v10590_v25 = vld [vmem:[%s15602_s9 + $0xe0] sm:$0xff]  ;;  %v10591_v34 = vld [vmem:[%s15602_s9 + $0xe8] sm:$0xff] }
 0xabe   :  { %v14449_v15 = vpop.permute.xlu0 %14448  ;;  %v14454_v27 = vpop.permute.xlu1 %14453 }
 0xabf   :  { %13422 = vmatprep.subr.msk.bf16.mxu0 %vm15635_vm3, %v13420_v26  ;;  %v14451_v29 = vunpack.i.h.bf16 %v14449_v15  ;;  %v14450_v39 = vunpack.i.l.bf16 %v14449_v15  ;;  %v14455_v44 = vunpack.i.l.bf16 %v14454_v27 }
 0xac0   :  { %13425 = vmatpush3.bf16.msk.msra.mxu0 %vm15635_vm3, %v13420_v26  ;;  %v10592_v26 = vld [vmem:[%s15602_s9 + $0xf0] sm:$0xff]  ;;  %vm7612_vm3 = vcmask 31744  }
 0xac1   :  { %13427 = vmatprep.subr.bf16.mxu0 %v15596_v40  ;;  %v13448_v42 = vpack.c.bf16 %v14451_v29, %v14450_v39 }
 0xac2   :  { %v14459_v30 = vpop.permute.xlu0 %14458  ;;  %v14464_v49 = vpop.permute.xlu1 %14463 }
 0xac3   :  { %12313 = vmatmul.mubr.msk.f32.vlgmr.msra.gmra.mrb[16].mxu0 %vm4706_vm12, %v10531_v28  ;;  %v14461_v54 = vunpack.i.h.bf16 %v14459_v30  ;;  %v14466_v53 = vunpack.i.h.bf16 %v14464_v49  ;;  %v10593_v28 = vld [vmem:[%s15602_s9 + $0xf8] sm:$0xff] }
 0xac4   :  { %13429 = vmatpush3.bf16.msra.mxu0 %v15596_v40  ;;  %12315 = vmatprep.mubr.msk.f32.mxu0 %vm4706_vm12, %v10532_v31  ;;  %v14456_v40 = vunpack.i.h.bf16 %v14454_v27  ;;  %v5391_v31 = vld [vmem:[%s15629_s13 + $0x20] sm:$0xff] }
 0xac5   :  { %13431 = vmatprep.subr.bf16.mxu0 %v15604_v45 }
 0xac6   :  { %v13454_v47 = vpack.c.bf16 %v14456_v40, %v14455_v44  ;;  %v14469_v57 = vpop.permute.xlu0 %14468  ;;  %v14474_v1 = vpop.permute.xlu1 %14473 }
 0xac7   :  { %12316 = vmatmul.mubr.msk.f32.gmra.mrb[18].mxu0 %vm4706_vm12, %v10533_v32  ;;  %v14471_v63 = vunpack.i.h.bf16 %v14469_v57  ;;  %v14470_v0 = vunpack.i.l.bf16 %v14469_v57  ;;  %v14476_v4 = vunpack.i.h.bf16 %v14474_v1  ;;  %v14475_v60 = vunpack.i.l.bf16 %v14474_v1  ;;  %v5392_v32 = vld [vmem:[%s15629_s13 + $0x28] sm:$0xff]  ;;  %s14823_s13 = smov 33  }
 0xac8   :  { %13433 = vmatpush3.bf16.msra.mxu0 %v15604_v45  ;;  %12318 = vmatprep.mubr.msk.f32.mxu0 %vm4706_vm12, %v10534_v33  ;;  %v4651_v45 = vld [vmem:[%s15602_s9 + $0x18] sm:$0xff]  ;;  %v13498_v33 = vpack.c.bf16 %v5392_v32, %v5391_v31  ;;  %s14809_s9 = smov 13   ;;  %s16665_s24 = sld [smem:[%s16897_s0 + %s14823_s13]]  }
 0xac9   :  { %13435 = vmatprep.subr.bf16.mxu0 %v15607_v48  ;;  %v13472_v6 = vpack.c.bf16 %v14471_v63, %v14470_v0  ;;  %v13478_v10 = vpack.c.bf16 %v14476_v4, %v14475_v60  ;;  %s16048_s21 = sld [smem:[%s16897_s0 + %s14809_s9]]   ;;  %s14820_s9 = smov 26  }
 0xaca   :  { %v14479_v7 = vpop.permute.xlu0 %14478  ;;  %13499 = vmatprep.subr.bf16.mxu1 %v13498_v33  ;;  %s10141_s20 = sld [smem:[%s16897_s0 + %s14820_s9]]  }
 0xacb   :  { %12319 = vmatmul.mubr.msk.f32.gmra.mrb[20].mxu0 %vm4706_vm12, %v10535_v36  ;;  %v14481_v11 = vunpack.i.h.bf16 %v14479_v7  ;;  %v14480_v13 = vunpack.i.l.bf16 %v14479_v7  ;;  %13501 = vmatpush3.bf16.msra.mxu1 %v13498_v33 }
 0xacc   :  { %13437 = vmatpush3.bf16.msra.mxu0 %v15607_v48  ;;  %12321 = vmatprep.mubr.msk.f32.mxu0 %vm4706_vm12, %v10536_v16  ;;  %v14460_v48 = vunpack.i.l.bf16 %v14459_v30 }
 0xacd   :  { %13439 = vmatprep.subr.bf16.mxu0 %v15612_v56  ;;  %v13484_v19 = vpack.c.bf16 %v14481_v11, %v14480_v13  ;;  %12420 = vmatprep.subr.msk.mxu1 %vm1238_vm9, %v5393_v35 }
 0xace   :  { %v13460_v51 = vpack.c.bf16 %v14461_v54, %v14460_v48 }
 0xacf   :  { %12322 = vmatmul.mubr.msk.f32.gmra.mrb[22].mxu0 %vm4706_vm12, %v10537_v18  ;;  %12421 = vmatpush3.msk.msra.mxu1 %vm1238_vm9, %v5393_v35  ;;  %vm5576_vm9 = vcmask 515072  }
 0xad0   :  { %13441 = vmatpush3.bf16.msra.mxu0 %v15612_v56  ;;  %12340 = vmatprep.mubr.msk.f32.mxu0 %vm4706_vm12, %v4648_v21  ;;  %v14465_v56 = vunpack.i.l.bf16 %v14464_v49  ;;  %vm15810_vm4 = vmpackc.low %vm5576_vm9, %vm5576_vm9 }
 0xad1   :  { %13444 = vmatprep.subr.msk.bf16.mxu0 %vm15676_vm13, %v13442_v38 }
 0xad2   :  { %v13466_v62 = vpack.c.bf16 %v14466_v53, %v14465_v56 }
 0xad3   :  { %12341 = vmatmul.mubr.msk.f32.vlgmr.msra.gmra.mrb[16].mxu0 %vm4706_vm12, %v4649_v41 }
 0xad4   :  { %13447 = vmatpush3.bf16.msk.msra.mxu0 %vm15676_vm13, %v13442_v38  ;;  %12343 = vmatprep.mubr.msk.f32.mxu0 %vm4706_vm12, %v4650_v43 }
 0xad5   :  { %13450 = vmatprep.subr.msk.bf16.mxu0 %vm15676_vm13, %v13448_v42 }
 0xad7   :  { %12344 = vmatmul.mubr.msk.f32.gmra.mrb[18].mxu0 %vm4706_vm12, %v4651_v45  ;;  %v5334_v16 = vpop.permute.xlu1 %5333 }
 0xad8   :  { %13453 = vmatpush3.bf16.msk.msra.mxu0 %vm15676_vm13, %v13448_v42  ;;  %12346 = vmatprep.mubr.msk.f32.mxu0 %vm4706_vm12, %v4652_v46 }
 0xad9   :  { %13456 = vmatprep.subr.msk.bf16.mxu0 %vm15676_vm13, %v13454_v47 }
 0xadb   :  { %12347 = vmatmul.mubr.msk.f32.gmra.mrb[20].mxu0 %vm4706_vm12, %v4653_v50  ;;  %v5339_v36 = vpop.permute.xlu0 %5338  ;;  %v5344_v15 = vpop.permute.xlu1 %5343 }
 0xadc   :  { %13459 = vmatpush3.bf16.msk.msra.mxu0 %vm15676_vm13, %v13454_v47  ;;  %12349 = vmatprep.mubr.msk.f32.mxu0 %vm4706_vm12, %v4654_v52 }
 0xadd   :  { %13462 = vmatprep.subr.msk.bf16.mxu0 %vm15676_vm13, %v13460_v51 }
 0xadf   :  { %12350 = vmatmul.mubr.msk.f32.gmra.mrb[22].mxu0 %vm4706_vm12, %v4655_v58  ;;  %v5349_v37 = vpop.permute.xlu0 %5348  ;;  %v5354_v44 = vpop.permute.xlu1 %5353 }
 0xae0   :  { %13465 = vmatpush3.bf16.msk.msra.mxu0 %vm15676_vm13, %v13460_v51  ;;  %12368 = vmatprep.mubr.msk.f32.mxu0 %vm4706_vm12, %v10562_v59  ;;  %vm16187_vm13 = vmpackc.low %vm7174_vm11, %vm7174_vm11 }
 0xae1   :  { %13468 = vmatprep.subr.msk.bf16.mxu0 %vm15711_vm1, %v13466_v62 }
 0xae3   :  { %12369 = vmatmul.mubr.msk.f32.vlgmr.msra.gmra.mrb[16].mxu0 %vm4706_vm12, %v10563_v2  ;;  %v5359_v43 = vpop.permute.xlu0 %5358  ;;  %v5364_v52 = vpop.permute.xlu1 %5363 }
 0xae4   :  { %13471 = vmatpush3.bf16.msk.msra.mxu0 %vm15711_vm1, %v13466_v62  ;;  %12371 = vmatprep.mubr.msk.f32.mxu0 %vm4706_vm12, %v10564_v3 }
 0xae5   :  { %13474 = vmatprep.subr.msk.bf16.mxu0 %vm15711_vm1, %v13472_v6 }
 0xae7   :  { %12372 = vmatmul.mubr.msk.f32.gmra.mrb[18].mxu0 %vm4706_vm12, %v10565_v8  ;;  %v5369_v48 = vpop.permute.xlu0 %5368 }
 0xae8   :  { %13477 = vmatpush3.bf16.msk.msra.mxu0 %vm15711_vm1, %v13472_v6  ;;  %12374 = vmatprep.mubr.msk.f32.mxu0 %vm4706_vm12, %v10566_v9  ;;  %v10619_v9 = vld [vmem:[%s15784_s25 + $0x40] sm:$0xff] }
 0xae9   :  { %13480 = vmatprep.subr.msk.bf16.mxu0 %vm15711_vm1, %v13478_v10 }
 0xaeb   :  { %12375 = vmatmul.mubr.msk.f32.gmra.mrb[20].mxu0 %vm4706_vm12, %v10567_v14 }
 0xaec   :  { %13483 = vmatpush3.bf16.msk.msra.mxu0 %vm15711_vm1, %v13478_v10  ;;  %12377 = vmatprep.mubr.msk.f32.mxu0 %vm4706_vm12, %v10568_v17  ;;  %v6201_v17 = vld [vmem:[%s10127_s2] sm:$0xff] }
 0xaed   :  { %13486 = vmatprep.subr.msk.bf16.mxu0 %vm15711_vm1, %v13484_v19 }
 0xaef   :  { %12378 = vmatmul.mubr.msk.f32.gmra.mrb[22].mxu0 %vm4706_vm12, %v10569_v20  ;;  %v6202_v20 = vld [vmem:[%s10127_s2 + $0x8] sm:$0xff] }
 0xaf0   :  { %13489 = vmatpush3.bf16.msk.msra.mxu0 %vm15711_vm1, %v13484_v19  ;;  %12396 = vmatprep.mubr.msk.f32.mxu0 %vm4706_vm12, %v10586_v5  ;;  %v6203_v19 = vld [vmem:[%s10127_s2 + $0x10] sm:$0xff]  ;;  %v6205_v5 = vld [vmem:[%s10127_s2 + $0x20] sm:$0xff]  ;;  %vm16239_vm1 = vmpackc.low %vm7393_vm0, %vm7393_vm0 }
 0xaf3   :  { %12397 = vmatmul.mubr.msk.f32.vlgmr.msra.gmra.mrb[16].mxu0 %vm4706_vm12, %v10587_v22  ;;  %v6204_v22 = vld [vmem:[%s10127_s2 + $0x18] sm:$0xff] }
 0xaf4   :  { %12399 = vmatprep.mubr.msk.f32.mxu0 %vm4706_vm12, %v10588_v55  ;;  %v6207_v55 = vld [vmem:[%s10127_s2 + $0x30] sm:$0xff] }
 0xaf7   :  { %12400 = vmatmul.mubr.msk.f32.gmra.mrb[18].mxu0 %vm4706_vm12, %v10589_v23  ;;  %v6206_v23 = vld [vmem:[%s10127_s2 + $0x28] sm:$0xff] }
 0xaf8   :  { %12402 = vmatprep.mubr.msk.f32.mxu0 %vm4706_vm12, %v10590_v25  ;;  %v6208_v25 = vld [vmem:[%s10127_s2 + $0x38] sm:$0xff]  ;;  %s14826_s2 = smov 29  }
 0xaf9   :  { %s10144_s5 = sld [smem:[%s16897_s0 + %s14826_s2]]  }
 0xafb   :  { %12403 = vmatmul.mubr.msk.f32.gmra.mrb[20].mxu0 %vm4706_vm12, %v10591_v34 }
 0xafc   :  { %12405 = vmatprep.mubr.msk.f32.mxu0 %vm4706_vm12, %v10592_v26 }
 0xaff   :  { %12406 = vmatmul.mubr.msk.f32.gmra.mrb[22].mxu0 %vm4706_vm12, %v10593_v28 }
 0xbc6   :  { %v12398_v12 = vpop.f32.mrb[16].mxu0 }
 0xbc7   :  { %v5372_v18 = vadd.f32 %v12398_v12, %v5339_v36  ;;  %v5276_v21 = vpop.f32.mrb[17].mxu0 }
 0xbc8   :  { %v5371_v24 = vadd.f32 %v5334_v16, %v5276_v21 }
 0xbc9   :  { %v5380_v39 = vmax.f32 %v5372_v18, 0.0 }
 0xbca   :  { %v5379_v38 = vmax.f32 %v5371_v24, 0.0  ;;  %v12401_v29 = vpop.f32.mrb[18].mxu0 }
 0xbcb   :  { %v5374_v27 = vadd.f32 %v12401_v29, %v5349_v37  ;;  %v5286_v41 = vpop.f32.mrb[19].mxu0 }
 0xbcc   :  { %v5373_v40 = vadd.f32 %v5344_v15, %v5286_v41  ;;  %12422 = vmatprep.mubr.msk.f32.mxu1 %vm5394_vm2, %v5379_v38  ;;  %v10622_v41 = vld [vmem:[%s15784_s25 + $0x58] sm:$0xff] }
 0xbcd   :  { %12423 = vmatmul.mubr.msk.f32.vlgmr.msra.gmra.mrb[24].mxu1 %vm5394_vm2, %v5380_v39  ;;  %v5382_v45 = vmax.f32 %v5374_v27, 0.0  ;;  %v10620_v39 = vld [vmem:[%s15784_s25 + $0x48] sm:$0xff]  ;;  %v10621_v27 = vld [vmem:[%s15784_s25 + $0x50] sm:$0xff] }
 0xbce   :  { %v5381_v42 = vmax.f32 %v5373_v40, 0.0  ;;  %v12404_v30 = vpop.f32.mrb[20].mxu0 }
 0xbcf   :  { %v5376_v46 = vadd.f32 %v12404_v30, %v5359_v43  ;;  %v5296_v47 = vpop.f32.mrb[21].mxu0  ;;  %v10623_v43 = vld [vmem:[%s15784_s25 + $0x60] sm:$0xff] }
 0xbd0   :  { %v5375_v54 = vadd.f32 %v5354_v44, %v5296_v47  ;;  %12425 = vmatprep.mubr.msk.f32.mxu1 %vm5394_vm2, %v5381_v42  ;;  %v10624_v44 = vld [vmem:[%s15784_s25 + $0x68] sm:$0xff]  ;;  %v10625_v42 = vld [vmem:[%s15784_s25 + $0x70] sm:$0xff]  ;;  %v10626_v47 = vld [vmem:[%s15784_s25 + $0x78] sm:$0xff] }
 0xbd1   :  { %12426 = vmatmul.mubr.msk.f32.gmra.mrb[26].mxu1 %vm5394_vm2, %v5382_v45  ;;  %v5384_v53 = vmax.f32 %v5376_v46, 0.0 }
 0xbd2   :  { %v5383_v49 = vmax.f32 %v5375_v54, 0.0  ;;  %v12407_v50 = vpop.f32.mrb[22].mxu0  ;;  %v5527_v54 = vld [vmem:[%s15784_s25] sm:$0xff] }
 0xbd3   :  { %v5378_v56 = vadd.f32 %v12407_v50, %v5369_v48  ;;  %v5306_v51 = vpop.f32.mrb[23].mxu0 }
 0xbd4   :  { %v5377_v57 = vadd.f32 %v5364_v52, %v5306_v51  ;;  %12428 = vmatprep.mubr.msk.f32.mxu1 %vm5394_vm2, %v5383_v49  ;;  %v5529_v51 = vld [vmem:[%s15784_s25 + $0x10] sm:$0xff] }
 0xbd5   :  { %12429 = vmatmul.mubr.msk.f32.gmra.mrb[28].mxu1 %vm5394_vm2, %v5384_v53  ;;  %v5386_v59 = vmax.f32 %v5378_v56, 0.0  ;;  %v5528_v56 = vld [vmem:[%s15784_s25 + $0x8] sm:$0xff] }
 0xbd6   :  { %v5385_v58 = vmax.f32 %v5377_v57, 0.0 }
 0xbd8   :  { %12431 = vmatprep.mubr.msk.f32.mxu1 %vm5394_vm2, %v5385_v58 }
 0xbd9   :  { %12432 = vmatmul.mubr.msk.f32.gmra.mrb[30].mxu1 %vm5394_vm2, %v5386_v59  ;;  %vm6587_vm2 = vcmask 64512  }
 0xbda   :  { %12450 = vmatprep.mubr.msk.f32.mxu1 %vm4706_vm12, %v10619_v9 }
 0xca0   :  { %v12424_v61 = vpop.f32.mrb[24].mxu1 }
 0xca1   :  { %v5488_v62 = vpop.f32.mrb[25].mxu1 }
 0xca2   :  { %v14522_v63 = vpack.i.bf16 %v12424_v61, %v5488_v62  ;;  %v15778_v0 = vpack.c.bf16 %v12424_v61, %v5488_v62  ;;  %v5530_v62 = vld [vmem:[%s15784_s25 + $0x18] sm:$0xff] }
 0xca4   :  { %14483 = vrot.lane.b32.xlu1 %v14522_v63, %s14779_s10  ;;  %v12427_v1 = vpop.f32.mrb[26].mxu1 }
 0xca5   :  { %v5498_v2 = vpop.f32.mrb[27].mxu1 }
 0xca6   :  { %v14527_v3 = vpack.i.bf16 %v12427_v1, %v5498_v2  ;;  %v15786_v4 = vpack.c.bf16 %v12427_v1, %v5498_v2 }
 0xca8   :  { %14488 = vrot.lane.b32.xlu0 %v14527_v3, %s14779_s10  ;;  %v12430_v60 = vpop.f32.mrb[28].mxu1 }
 0xca9   :  { %v5508_v6 = vpop.f32.mrb[29].mxu1 }
 0xcaa   :  { %v14532_v7 = vpack.i.bf16 %v12430_v60, %v5508_v6  ;;  %v15789_v8 = vpack.c.bf16 %v12430_v60, %v5508_v6  ;;  %v5533_v60 = vld [vmem:[%s15784_s25 + $0x30] sm:$0xff] }
 0xcac   :  { %14493 = vrot.lane.b32.xlu1 %v14532_v7, %s14779_s10  ;;  %v12433_v10 = vpop.f32.mrb[30].mxu1 }
 0xcad   :  { %v5518_v11 = vpop.f32.mrb[31].mxu1 }
 0xcae   :  { %v14537_v13 = vpack.i.bf16 %v12433_v10, %v5518_v11  ;;  %v15794_v14 = vpack.c.bf16 %v12433_v10, %v5518_v11  ;;  %v5534_v10 = vld [vmem:[%s15784_s25 + $0x38] sm:$0xff]  ;;  %v10651_v11 = vld [vmem:[%s15784_s25 + $0x80] sm:$0xff] }
 0xcb0   :  { %14503 = vrot.lane.b32.xlu1 %v14522_v63, %s14803_s15  ;;  %14498 = vrot.lane.b32.xlu0 %v14537_v13, %s14779_s10 }
 0xcb4   :  { %14513 = vrot.lane.b32.xlu1 %v14532_v7, %s14803_s15  ;;  %14508 = vrot.lane.b32.xlu0 %v14527_v3, %s14803_s15 }
 0xcb8   :  { %14523 = vrot.lane.b32.xlu1 %v14522_v63, %s14807_s3  ;;  %14518 = vrot.lane.b32.xlu0 %v14537_v13, %s14803_s15  ;;  %v5531_v63 = vld [vmem:[%s15784_s25 + $0x20] sm:$0xff] }
 0xcbc   :  { %14533 = vrot.lane.b32.xlu1 %v14532_v7, %s14807_s3  ;;  %14528 = vrot.lane.b32.xlu0 %v14527_v3, %s14807_s3 }
 0xcc0   :  { %6211 = vperm.xlu1 %14231, %v6201_v17   ;;  %14538 = vrot.lane.b32.xlu0 %v14537_v13, %s14807_s3 }
 0xcc4   :  { %6221 = vperm.xlu1 %14231, %v6203_v19   ;;  %6216 = vperm.xlu0 %14230, %v6202_v20  }
 0xcc8   :  { %6231 = vperm.xlu1 %14231, %v6205_v5   ;;  %6226 = vperm.xlu0 %14230, %v6204_v22   ;;  %v10652_v5 = vld [vmem:[%s15784_s25 + $0x88] sm:$0xff]  ;;  %v10653_v22 = vld [vmem:[%s15784_s25 + $0x90] sm:$0xff] }
 0xccc   :  { %6241 = vperm.xlu1 %14231, %v6207_v55   ;;  %6236 = vperm.xlu0 %14230, %v6206_v23  }
 0xcd0   :  { %6246 = vperm.xlu0 %14230, %v6208_v25  }
 0xd16   :  { %v14484_v34 = vpop.permute.xlu1 %14483 }
 0xd17   :  { %v14486_v26 = vunpack.i.h.bf16 %v14484_v34  ;;  %v14485_v28 = vunpack.i.l.bf16 %v14484_v34 }
 0xd19   :  { %v13502_v32 = vpack.c.bf16 %v14486_v26, %v14485_v28  ;;  %v10654_v26 = vld [vmem:[%s15784_s25 + $0x98] sm:$0xff]  ;;  %v10655_v28 = vld [vmem:[%s15784_s25 + $0xa0] sm:$0xff] }
 0xd1a   :  { %v14489_v33 = vpop.permute.xlu0 %14488 }
 0xd1b   :  { %v14491_v35 = vunpack.i.h.bf16 %v14489_v33  ;;  %v14490_v36 = vunpack.i.l.bf16 %v14489_v33  ;;  %13504 = vmatprep.subr.msk.bf16.mxu1 %vm15810_vm4, %v13502_v32 }
 0xd1c   :  { %13507 = vmatpush3.bf16.msk.msra.mxu1 %vm15810_vm4, %v13502_v32 }
 0xd1d   :  { %v13508_v16 = vpack.c.bf16 %v14491_v35, %v14490_v36  ;;  %v10656_v35 = vld [vmem:[%s15784_s25 + $0xa8] sm:$0xff]  ;;  %v10657_v36 = vld [vmem:[%s15784_s25 + $0xb0] sm:$0xff] }
 0xd1e   :  { %v14494_v37 = vpop.permute.xlu1 %14493 }
 0xd1f   :  { %v14496_v12 = vunpack.i.h.bf16 %v14494_v37  ;;  %v14495_v15 = vunpack.i.l.bf16 %v14494_v37  ;;  %13510 = vmatprep.subr.msk.bf16.mxu1 %vm15810_vm4, %v13508_v16  ;;  %v10658_v37 = vld [vmem:[%s15784_s25 + $0xb8] sm:$0xff] }
 0xd20   :  { %13513 = vmatpush3.bf16.msk.msra.mxu1 %vm15810_vm4, %v13508_v16 }
 0xd21   :  { %v13514_v18 = vpack.c.bf16 %v14496_v12, %v14495_v15  ;;  %v10675_v12 = vld [vmem:[%s15784_s25 + $0xc0] sm:$0xff]  ;;  %v10676_v15 = vld [vmem:[%s15784_s25 + $0xc8] sm:$0xff] }
 0xd22   :  { %v14499_v21 = vpop.permute.xlu0 %14498  ;;  %v14504_v40 = vpop.permute.xlu1 %14503 }
 0xd23   :  { %v14501_v24 = vunpack.i.h.bf16 %v14499_v21  ;;  %v14500_v38 = vunpack.i.l.bf16 %v14499_v21  ;;  %13516 = vmatprep.subr.msk.bf16.mxu1 %vm15810_vm4, %v13514_v18  ;;  %v14506_v30 = vunpack.i.h.bf16 %v14504_v40  ;;  %v14505_v45 = vunpack.i.l.bf16 %v14504_v40  ;;  %v10678_v21 = vld [vmem:[%s15784_s25 + $0xd8] sm:$0xff]  ;;  %v6395_v40 = vld [vmem:[%s10134_s8 + $0x10] sm:$0xff] }
 0xd24   :  { %13519 = vmatpush3.bf16.msk.msra.mxu1 %vm15810_vm4, %v13514_v18  ;;  %v10677_v18 = vld [vmem:[%s15784_s25 + $0xd0] sm:$0xff] }
 0xd25   :  { %v13520_v29 = vpack.c.bf16 %v14501_v24, %v14500_v38  ;;  %v13542_v49 = vpack.c.bf16 %v14506_v30, %v14505_v45  ;;  %v10679_v24 = vld [vmem:[%s15784_s25 + $0xe0] sm:$0xff]  ;;  %v10680_v38 = vld [vmem:[%s15784_s25 + $0xe8] sm:$0xff] }
 0xd26   :  { %v14509_v46 = vpop.permute.xlu0 %14508  ;;  %v14514_v53 = vpop.permute.xlu1 %14513  ;;  %v6397_v30 = vld [vmem:[%s10134_s8 + $0x20] sm:$0xff]  ;;  %v6398_v45 = vld [vmem:[%s10134_s8 + $0x28] sm:$0xff] }
 0xd27   :  { %13522 = vmatprep.subr.msk.bf16.mxu1 %vm15810_vm4, %v13520_v29  ;;  %v14511_v50 = vunpack.i.h.bf16 %v14509_v46  ;;  %v14510_v52 = vunpack.i.l.bf16 %v14509_v46  ;;  %v14516_v57 = vunpack.i.h.bf16 %v14514_v53  ;;  %v14515_v58 = vunpack.i.l.bf16 %v14514_v53 }
 0xd28   :  { %13525 = vmatpush3.bf16.msk.msra.mxu1 %vm15810_vm4, %v13520_v29  ;;  %v10681_v29 = vld [vmem:[%s15784_s25 + $0xf0] sm:$0xff]  ;;  %v13598_v46 = vpack.c.bf16 %v6398_v45, %v6397_v30  ;;  %vm16319_vm4 = vmpackc.low %vm7612_vm3, %vm7612_vm3 }
 0xd29   :  { %13527 = vmatprep.subr.bf16.mxu1 %v15778_v0  ;;  %v13548_v59 = vpack.c.bf16 %v14511_v50, %v14510_v52  ;;  %v6399_v50 = vld [vmem:[%s10134_s8 + $0x30] sm:$0xff]  ;;  %v6400_v52 = vld [vmem:[%s10134_s8 + $0x38] sm:$0xff] }
 0xd2a   :  { %v14519_v61 = vpop.permute.xlu0 %14518  ;;  %v14524_v3 = vpop.permute.xlu1 %14523 }
 0xd2b   :  { %12451 = vmatmul.mubr.msk.f32.vlgmr.msra.gmra.mrb[32].mxu1 %vm4706_vm12, %v10620_v39  ;;  %v14521_v1 = vunpack.i.h.bf16 %v14519_v61  ;;  %v14520_v2 = vunpack.i.l.bf16 %v14519_v61  ;;  %v14526_v6 = vunpack.i.h.bf16 %v14524_v3  ;;  %v14525_v7 = vunpack.i.l.bf16 %v14524_v3  ;;  %v10682_v39 = vld [vmem:[%s15784_s25 + $0xf8] sm:$0xff] }
 0xd2c   :  { %13529 = vmatpush3.bf16.msra.mxu1 %v15778_v0  ;;  %12453 = vmatprep.mubr.msk.f32.mxu1 %vm4706_vm12, %v10621_v27  ;;  %v13554_v0 = vpack.c.bf16 %v14516_v57, %v14515_v58  ;;  %v6393_v27 = vld [vmem:[%s10134_s8] sm:$0xff] }
 0xd2d   :  { %13531 = vmatprep.subr.bf16.mxu1 %v15786_v4 }
 0xd2e   :  { %v14529_v9 = vpop.permute.xlu0 %14528  ;;  %v14534_v20 = vpop.permute.xlu1 %14533 }
 0xd2f   :  { %12454 = vmatmul.mubr.msk.f32.gmra.mrb[34].mxu1 %vm4706_vm12, %v10622_v41  ;;  %v14531_v17 = vunpack.i.h.bf16 %v14529_v9  ;;  %v14530_v19 = vunpack.i.l.bf16 %v14529_v9  ;;  %v14536_v55 = vunpack.i.h.bf16 %v14534_v20  ;;  %v14535_v23 = vunpack.i.l.bf16 %v14534_v20  ;;  %v6394_v41 = vld [vmem:[%s10134_s8 + $0x8] sm:$0xff] }
 0xd30   :  { %13533 = vmatpush3.bf16.msra.mxu1 %v15786_v4  ;;  %12456 = vmatprep.mubr.msk.f32.mxu1 %vm4706_vm12, %v10623_v43  ;;  %v5532_v4 = vld [vmem:[%s15784_s25 + $0x28] sm:$0xff]  ;;  %v13590_v43 = vpack.c.bf16 %v6394_v41, %v6393_v27 }
 0xd31   :  { %13535 = vmatprep.subr.bf16.mxu1 %v15789_v8  ;;  %v13572_v25 = vpack.c.bf16 %v14531_v17, %v14530_v19  ;;  %v13578_v31 = vpack.c.bf16 %v14536_v55, %v14535_v23 }
 0xd32   :  { %v14539_v34 = vpop.permute.xlu0 %14538  ;;  %13591 = vmatprep.subr.bf16.mxu0 %v13590_v43 }
 0xd33   :  { %12457 = vmatmul.mubr.msk.f32.gmra.mrb[36].mxu1 %vm4706_vm12, %v10624_v44  ;;  %v14541_v32 = vunpack.i.h.bf16 %v14539_v34  ;;  %v14540_v33 = vunpack.i.l.bf16 %v14539_v34  ;;  %13593 = vmatpush3.bf16.msra.mxu0 %v13590_v43  ;;  %v6396_v44 = vld [vmem:[%s10134_s8 + $0x18] sm:$0xff]  ;;  %s10140_s8 = sld [smem:[%s16897_s0 + %s14818_s4]]   ;;  %s14835_s4 = smov 36  }
 0xd34   :  { %13537 = vmatpush3.bf16.msra.mxu1 %v15789_v8  ;;  %12459 = vmatprep.mubr.msk.f32.mxu1 %vm4706_vm12, %v10625_v42  ;;  %v13560_v8 = vpack.c.bf16 %v14521_v1, %v14520_v2  ;;  %v13594_v42 = vpack.c.bf16 %v6396_v44, %v6395_v40 }
 0xd35   :  { %13539 = vmatprep.subr.bf16.mxu1 %v15794_v14  ;;  %v13584_v16 = vpack.c.bf16 %v14541_v32, %v14540_v33 }
 0xd36   :  { %13595 = vmatprep.subr.bf16.mxu0 %v13594_v42 }
 0xd37   :  { %12460 = vmatmul.mubr.msk.f32.gmra.mrb[38].mxu1 %vm4706_vm12, %v10626_v47  ;;  %13597 = vmatpush3.bf16.msra.mxu0 %v13594_v42 }
 0xd38   :  { %13541 = vmatpush3.bf16.msra.mxu1 %v15794_v14  ;;  %12478 = vmatprep.mubr.msk.f32.mxu1 %vm4706_vm12, %v5527_v54  ;;  %v13566_v14 = vpack.c.bf16 %v14526_v6, %v14525_v7 }
 0xd39   :  { %13544 = vmatprep.subr.msk.bf16.mxu1 %vm15853_vm6, %v13542_v49  ;;  %13599 = vmatprep.subr.bf16.mxu0 %v13598_v46 }
 0xd3b   :  { %12479 = vmatmul.mubr.msk.f32.vlgmr.msra.gmra.mrb[32].mxu1 %vm4706_vm12, %v5528_v56  ;;  %13601 = vmatpush3.bf16.msra.mxu0 %v13598_v46  ;;  %v13602_v56 = vpack.c.bf16 %v6400_v52, %v6399_v50 }
 0xd3c   :  { %13547 = vmatpush3.bf16.msk.msra.mxu1 %vm15853_vm6, %v13542_v49  ;;  %12481 = vmatprep.mubr.msk.f32.mxu1 %vm4706_vm12, %v5529_v51 }
 0xd3d   :  { %13550 = vmatprep.subr.msk.bf16.mxu1 %vm15853_vm6, %v13548_v59  ;;  %13603 = vmatprep.subr.bf16.mxu0 %v13602_v56 }
 0xd3f   :  { %12482 = vmatmul.mubr.msk.f32.gmra.mrb[34].mxu1 %vm4706_vm12, %v5530_v62  ;;  %v6212_v53 = vpop.permute.xlu1 %6211  ;;  %13605 = vmatpush3.bf16.msra.mxu0 %v13602_v56 }
 0xd40   :  { %13553 = vmatpush3.bf16.msk.msra.mxu1 %vm15853_vm6, %v13548_v59  ;;  %12484 = vmatprep.mubr.msk.f32.mxu1 %vm4706_vm12, %v5531_v63 }
 0xd41   :  { %13556 = vmatprep.subr.msk.bf16.mxu1 %vm15853_vm6, %v13554_v0 }
 0xd43   :  { %12485 = vmatmul.mubr.msk.f32.gmra.mrb[36].mxu1 %vm4706_vm12, %v5532_v4  ;;  %v6217_v47 = vpop.permute.xlu0 %6216  ;;  %v6222_v4 = vpop.permute.xlu1 %6221 }
 0xd44   :  { %13559 = vmatpush3.bf16.msk.msra.mxu1 %vm15853_vm6, %v13554_v0  ;;  %12487 = vmatprep.mubr.msk.f32.mxu1 %vm4706_vm12, %v5533_v60 }
 0xd45   :  { %13562 = vmatprep.subr.msk.bf16.mxu1 %vm15853_vm6, %v13560_v8 }
 0xd47   :  { %12488 = vmatmul.mubr.msk.f32.gmra.mrb[38].mxu1 %vm4706_vm12, %v5534_v10  ;;  %v6227_v0 = vpop.permute.xlu0 %6226  ;;  %v6232_v10 = vpop.permute.xlu1 %6231 }
 0xd48   :  { %13565 = vmatpush3.bf16.msk.msra.mxu1 %vm15853_vm6, %v13560_v8  ;;  %12506 = vmatprep.mubr.msk.f32.mxu1 %vm4706_vm12, %v10651_v11 }
 0xd49   :  { %13568 = vmatprep.subr.msk.bf16.mxu1 %vm15890_vm8, %v13566_v14 }
 0xd4b   :  { %12507 = vmatmul.mubr.msk.f32.vlgmr.msra.gmra.mrb[32].mxu1 %vm4706_vm12, %v10652_v5  ;;  %v6237_v8 = vpop.permute.xlu0 %6236  ;;  %v6242_v17 = vpop.permute.xlu1 %6241 }
 0xd4c   :  { %13571 = vmatpush3.bf16.msk.msra.mxu1 %vm15890_vm8, %v13566_v14  ;;  %12509 = vmatprep.mubr.msk.f32.mxu1 %vm4706_vm12, %v10653_v22 }
 0xd4d   :  { %13574 = vmatprep.subr.msk.bf16.mxu1 %vm15890_vm8, %v13572_v25 }
 0xd4f   :  { %12510 = vmatmul.mubr.msk.f32.gmra.mrb[34].mxu1 %vm4706_vm12, %v10654_v26  ;;  %v6247_v19 = vpop.permute.xlu0 %6246 }
 0xd50   :  { %13577 = vmatpush3.bf16.msk.msra.mxu1 %vm15890_vm8, %v13572_v25  ;;  %12512 = vmatprep.mubr.msk.f32.mxu1 %vm4706_vm12, %v10655_v28 }
 0xd51   :  { %13580 = vmatprep.subr.msk.bf16.mxu1 %vm15890_vm8, %v13578_v31 }
 0xd53   :  { %12513 = vmatmul.mubr.msk.f32.gmra.mrb[36].mxu1 %vm4706_vm12, %v10656_v35 }
 0xd54   :  { %13583 = vmatpush3.bf16.msk.msra.mxu1 %vm15890_vm8, %v13578_v31  ;;  %12515 = vmatprep.mubr.msk.f32.mxu1 %vm4706_vm12, %v10657_v36 }
 0xd55   :  { %13586 = vmatprep.subr.msk.bf16.mxu1 %vm15890_vm8, %v13584_v16 }
 0xd57   :  { %12516 = vmatmul.mubr.msk.f32.gmra.mrb[38].mxu1 %vm4706_vm12, %v10658_v37 }
 0xd58   :  { %13589 = vmatpush3.bf16.msk.msra.mxu1 %vm15890_vm8, %v13584_v16  ;;  %12534 = vmatprep.mubr.msk.f32.mxu1 %vm4706_vm12, %v10675_v12  ;;  %vm8050_vm8 = vcmask 15360  }
 0xd59   :  { %vm16476_vm10 = vmpackc.low %vm8050_vm8, %vm8050_vm8 }
 0xd5b   :  { %12535 = vmatmul.mubr.msk.f32.vlgmr.msra.gmra.mrb[32].mxu1 %vm4706_vm12, %v10676_v15 }
 0xd5c   :  { %12537 = vmatprep.mubr.msk.f32.mxu1 %vm4706_vm12, %v10677_v18 }
 0xd5f   :  { %12538 = vmatmul.mubr.msk.f32.gmra.mrb[34].mxu1 %vm4706_vm12, %v10678_v21 }
 0xd60   :  { %12540 = vmatprep.mubr.msk.f32.mxu1 %vm4706_vm12, %v10679_v24 }
 0xd63   :  { %12541 = vmatmul.mubr.msk.f32.gmra.mrb[36].mxu1 %vm4706_vm12, %v10680_v38 }
 0xd64   :  { %12543 = vmatprep.mubr.msk.f32.mxu1 %vm4706_vm12, %v10681_v29 }
 0xd67   :  { %12544 = vmatmul.mubr.msk.f32.gmra.mrb[38].mxu1 %vm4706_vm12, %v10682_v39 }
 0xe2e   :  { %v12536_v54 = vpop.f32.mrb[32].mxu1 }
 0xe2f   :  { %v6250_v48 = vadd.f32 %v12536_v54, %v6217_v47  ;;  %v6154_v49 = vpop.f32.mrb[33].mxu1 }
 0xe30   :  { %v6249_v57 = vadd.f32 %v6212_v53, %v6154_v49 }
 0xe31   :  { %v15947_v51 = vmax.f32 %v6250_v48, 0.0 }
 0xe32   :  { %v12539_v58 = vpop.f32.mrb[34].mxu1  ;;  %v6257_v61 = vmax.f32 %v6249_v57, 0.0 }
 0xe33   :  { %6315 = vrot.lane.b32.xlu1 %v15947_v51, %s14803_s15  ;;  %6275 = vrot.lane.b32.xlu0 %v15947_v51, %s14779_s10  ;;  %v6164_v59 = vpop.f32.mrb[35].mxu1  ;;  %v6252_v1 = vadd.f32 %v12539_v58, %v6227_v0 }
 0xe34   :  { %v6251_v6 = vadd.f32 %v6222_v4, %v6164_v59 }
 0xe35   :  { %v15958_v60 = vmax.f32 %v6252_v1, 0.0 }
 0xe36   :  { %v12542_v62 = vpop.f32.mrb[36].mxu1  ;;  %v15964_v7 = vmax.f32 %v6251_v6, 0.0 }
 0xe37   :  { %6347 = vrot.lane.b32.xlu0 %v15947_v51, %s14807_s3  ;;  %6273 = vrot.lane.b32.xlu1 %v6257_v61, %s14779_s10  ;;  %v6174_v63 = vpop.f32.mrb[37].mxu1  ;;  %v6254_v9 = vadd.f32 %v12542_v62, %v6237_v8 }
 0xe38   :  { %v6253_v13 = vadd.f32 %v6232_v10, %v6174_v63 }
 0xe39   :  { %v15974_v11 = vmax.f32 %v6254_v9, 0.0 }
 0xe3a   :  { %v12545_v2 = vpop.f32.mrb[38].mxu1  ;;  %v15980_v14 = vmax.f32 %v6253_v13, 0.0 }
 0xe3b   :  { %6313 = vrot.lane.b32.xlu0 %v6257_v61, %s14803_s15  ;;  %6345 = vrot.lane.b32.xlu1 %v6257_v61, %s14807_s3  ;;  %v6184_v3 = vpop.f32.mrb[39].mxu1  ;;  %v6256_v20 = vadd.f32 %v12545_v2, %v6247_v19 }
 0xe3c   :  { %v6255_v5 = vadd.f32 %v6242_v17, %v6184_v3 }
 0xe3d   :  { %v15990_v22 = vmax.f32 %v6256_v20, 0.0 }
 0xe3e   :  { %v15992_v55 = vmax.f32 %v6255_v5, 0.0 }
 0xe3f   :  { %6319 = vrot.lane.b32.xlu1 %v15958_v60, %s14803_s15  ;;  %6279 = vrot.lane.b32.xlu0 %v15958_v60, %s14779_s10 }
 0xe43   :  { %6351 = vrot.lane.b32.xlu0 %v15958_v60, %s14807_s3  ;;  %6277 = vrot.lane.b32.xlu1 %v15964_v7, %s14779_s10 }
 0xe47   :  { %6317 = vrot.lane.b32.xlu0 %v15964_v7, %s14803_s15  ;;  %6349 = vrot.lane.b32.xlu1 %v15964_v7, %s14807_s3 }
 0xe4b   :  { %6323 = vrot.lane.b32.xlu1 %v15974_v11, %s14803_s15  ;;  %6283 = vrot.lane.b32.xlu0 %v15974_v11, %s14779_s10 }
 0xe4f   :  { %6355 = vrot.lane.b32.xlu0 %v15974_v11, %s14807_s3  ;;  %6281 = vrot.lane.b32.xlu1 %v15980_v14, %s14779_s10 }
 0xe53   :  { %6321 = vrot.lane.b32.xlu0 %v15980_v14, %s14803_s15  ;;  %6353 = vrot.lane.b32.xlu1 %v15980_v14, %s14807_s3 }
 0xe57   :  { %6287 = vrot.lane.b32.xlu0 %v15990_v22, %s14779_s10  ;;  %6285 = vrot.lane.b32.xlu1 %v15992_v55, %s14779_s10 }
 0xe5b   :  { %6325 = vrot.lane.b32.xlu0 %v15992_v55, %s14803_s15  ;;  %6357 = vrot.lane.b32.xlu1 %v15992_v55, %s14807_s3 }
 0xe5f   :  { %6359 = vrot.lane.b32.xlu0 %v15990_v22, %s14807_s3  ;;  %6327 = vrot.lane.b32.xlu1 %v15990_v22, %s14803_s15 }
 0xea5   :  { %v6316_v23 = vpop.permute.xlu1 %6315  ;;  %v6276_v25 = vpop.permute.xlu0 %6275 }
 0xea6   :  { %v6338_v32 = vsel %vm5876_vm5, %v6316_v23, 0.0  ;;  %v6298_v33 = vsel %vm5576_vm9, %v6276_v25, 0.0 }
 0xea7   :  { %v6306_v21 = vmax.f32 %v15947_v51, %v6298_v33 }
 0xea9   :  { %v6348_v34 = vpop.permute.xlu0 %6347  ;;  %v6274_v26 = vpop.permute.xlu1 %6273 }
 0xeaa   :  { %v6370_v28 = vsel %vm6055_vm7, %v6348_v34, 0.0  ;;  %v6297_v31 = vsel %vm5576_vm9, %v6274_v26, 0.0 }
 0xeab   :  { %v6378_v16 = vmax.f32 %v6338_v32, %v6370_v28  ;;  %v6305_v15 = vmax.f32 %v6257_v61, %v6297_v31 }
 0xead   :  { %v6314_v35 = vpop.permute.xlu0 %6313  ;;  %v6346_v36 = vpop.permute.xlu1 %6345  ;;  %v6386_v39 = vmax.f32 %v6306_v21, %v6378_v16 }
 0xeae   :  { %v6337_v37 = vsel %vm5876_vm5, %v6314_v35, 0.0  ;;  %v6369_v12 = vsel %vm6055_vm7, %v6346_v36, 0.0 }
 0xeaf   :  { %v6377_v18 = vmax.f32 %v6337_v37, %v6369_v12 }
 0xeb1   :  { %v6385_v24 = vmax.f32 %v6305_v15, %v6377_v18  ;;  %v6320_v38 = vpop.permute.xlu1 %6319  ;;  %v6280_v29 = vpop.permute.xlu0 %6279 }
 0xeb2   :  { %v6340_v44 = vsel %vm5876_vm5, %v6320_v38, 0.0  ;;  %v6300_v42 = vsel %vm5576_vm9, %v6280_v29, 0.0 }
 0xeb3   :  { %12562 = vmatprep.mubr.msk.f32.mxu0 %vm4706_vm12, %v6385_v24  ;;  %v6308_v50 = vmax.f32 %v15958_v60, %v6300_v42  ;;  %v6531_v42 = vld [vmem:[%s16048_s21 + $0x8] sm:$0xff] }
 0xeb4   :  { %12563 = vmatmul.mubr.msk.f32.vlgmr.msra.gmra.mrb[24].mxu0 %vm4706_vm12, %v6386_v39 }
 0xeb5   :  { %v6352_v27 = vpop.permute.xlu0 %6351  ;;  %v6278_v41 = vpop.permute.xlu1 %6277 }
 0xeb6   :  { %v6372_v43 = vsel %vm6055_vm7, %v6352_v27, 0.0  ;;  %v6299_v40 = vsel %vm5576_vm9, %v6278_v41, 0.0 }
 0xeb7   :  { %v6380_v46 = vmax.f32 %v6340_v44, %v6372_v43  ;;  %v6307_v48 = vmax.f32 %v15964_v7, %v6299_v40 }
 0xeb9   :  { %v6318_v30 = vpop.permute.xlu0 %6317  ;;  %v6350_v45 = vpop.permute.xlu1 %6349  ;;  %v6388_v51 = vmax.f32 %v6308_v50, %v6380_v46  ;;  %v6534_v46 = vld [vmem:[%s16048_s21 + $0x20] sm:$0xff]  ;;  %v6539_v50 = vld [vmem:[%s16048_s21 + $0x48] sm:$0xff] }
 0xeba   :  { %v6339_v47 = vsel %vm5876_vm5, %v6318_v30, 0.0  ;;  %v6371_v54 = vsel %vm6055_vm7, %v6350_v45, 0.0  ;;  %v6532_v30 = vld [vmem:[%s16048_s21 + $0x10] sm:$0xff]  ;;  %v6533_v45 = vld [vmem:[%s16048_s21 + $0x18] sm:$0xff] }
 0xebb   :  { %v6379_v49 = vmax.f32 %v6339_v47, %v6371_v54  ;;  %v6535_v47 = vld [vmem:[%s16048_s21 + $0x28] sm:$0xff]  ;;  %v6536_v54 = vld [vmem:[%s16048_s21 + $0x30] sm:$0xff] }
 0xebd   :  { %v6387_v52 = vmax.f32 %v6307_v48, %v6379_v49  ;;  %v6324_v53 = vpop.permute.xlu1 %6323  ;;  %v6284_v56 = vpop.permute.xlu0 %6283  ;;  %v6537_v48 = vld [vmem:[%s16048_s21 + $0x38] sm:$0xff]  ;;  %v6538_v49 = vld [vmem:[%s16048_s21 + $0x40] sm:$0xff] }
 0xebe   :  { %v6342_v62 = vsel %vm5876_vm5, %v6324_v53, 0.0  ;;  %v6302_v63 = vsel %vm5576_vm9, %v6284_v56, 0.0  ;;  %v6541_v53 = vld [vmem:[%s16048_s21 + $0x58] sm:$0xff]  ;;  %v10751_v56 = vld [vmem:[%s16048_s21 + $0xc0] sm:$0xff] }
 0xebf   :  { %12565 = vmatprep.mubr.msk.f32.mxu0 %vm4706_vm12, %v6387_v52  ;;  %v6310_v7 = vmax.f32 %v15974_v11, %v6302_v63  ;;  %v6540_v52 = vld [vmem:[%s16048_s21 + $0x50] sm:$0xff] }
 0xec0   :  { %12566 = vmatmul.mubr.msk.f32.gmra.mrb[26].mxu0 %vm4706_vm12, %v6388_v51  ;;  %v8671_v51 = vld [vmem:[%s16125_s22] sm:$0xff] }
 0xec1   :  { %v6356_v57 = vpop.permute.xlu0 %6355  ;;  %v6282_v58 = vpop.permute.xlu1 %6281 }
 0xec2   :  { %v6374_v59 = vsel %vm6055_vm7, %v6356_v57, 0.0  ;;  %v6301_v61 = vsel %vm5576_vm9, %v6282_v58, 0.0 }
 0xec3   :  { %v6382_v2 = vmax.f32 %v6342_v62, %v6374_v59  ;;  %v6309_v60 = vmax.f32 %v15980_v14, %v6301_v61  ;;  %v10707_v62 = vld [vmem:[%s16048_s21 + $0x60] sm:$0xff] }
 0xec4   :  { %12590 = vmatprep.mubr.msk.f32.mxu1 %vm4706_vm12, %v10707_v62 }
 0xec5   :  { %v6322_v0 = vpop.permute.xlu0 %6321  ;;  %v6354_v1 = vpop.permute.xlu1 %6353  ;;  %v6390_v13 = vmax.f32 %v6310_v7, %v6382_v2 }
 0xec6   :  { %v6341_v3 = vsel %vm5876_vm5, %v6322_v0, 0.0  ;;  %v6373_v4 = vsel %vm6055_vm7, %v6354_v1, 0.0 }
 0xec7   :  { %v6381_v6 = vmax.f32 %v6341_v3, %v6373_v4 }
 0xec9   :  { %v6389_v8 = vmax.f32 %v6309_v60, %v6381_v6  ;;  %v6288_v9 = vpop.permute.xlu0 %6287  ;;  %v6286_v10 = vpop.permute.xlu1 %6285 }
 0xeca   :  { %v6303_v17 = vsel %vm5576_vm9, %v6286_v10, 0.0  ;;  %v6304_v11 = vsel %vm5576_vm9, %v6288_v9, 0.0  ;;  %vm16283_vm9 = vmpackc.low %vm6587_vm2, %vm6587_vm2 }
 0xecb   :  { %12568 = vmatprep.mubr.msk.f32.mxu0 %vm4706_vm12, %v6389_v8  ;;  %v6311_v14 = vmax.f32 %v15992_v55, %v6303_v17  ;;  %v6312_v33 = vmax.f32 %v15990_v22, %v6304_v11  ;;  %v6530_v55 = vld [vmem:[%s16048_s21] sm:$0xff] }
 0xecc   :  { %12569 = vmatmul.mubr.msk.f32.gmra.mrb[28].mxu0 %vm4706_vm12, %v6390_v13  ;;  %v10760_v13 = vld [vmem:[%s16048_s21 + $0x108] sm:$0xff] }
 0xecd   :  { %v6326_v19 = vpop.permute.xlu0 %6325  ;;  %v6358_v20 = vpop.permute.xlu1 %6357 }
 0xece   :  { %v6343_v5 = vsel %vm5876_vm5, %v6326_v19, 0.0  ;;  %v6375_v23 = vsel %vm6055_vm7, %v6358_v20, 0.0 }
 0xecf   :  { %v6383_v25 = vmax.f32 %v6343_v5, %v6375_v23 }
 0xed1   :  { %v6391_v34 = vmax.f32 %v6311_v14, %v6383_v25  ;;  %v6360_v26 = vpop.permute.xlu0 %6359  ;;  %v6328_v28 = vpop.permute.xlu1 %6327 }
 0xed2   :  { %v6376_v31 = vsel %vm6055_vm7, %v6360_v26, 0.0  ;;  %v6344_v32 = vsel %vm5876_vm5, %v6328_v28, 0.0  ;;  %vm7831_vm5 = vcmask 23552   ;;  %vm14819_vm7 = vmmov 0  }
 0xed3   :  { %v6384_v35 = vmax.f32 %v6344_v32, %v6376_v31  ;;  %12571 = vmatprep.mubr.msk.f32.mxu0 %vm4706_vm12, %v6391_v34  ;;  %vm16407_vm6 = vmpackc.low %vm7831_vm5, %vm7831_vm5 }
 0xed5   :  { %v6392_v36 = vmax.f32 %v6312_v33, %v6384_v35 }
 0xed7   :  { %12572 = vmatmul.mubr.msk.f32.gmra.mrb[30].mxu0 %vm4706_vm12, %v6392_v36 }
 0xed8   :  { %12624 = vmatprep.mubr.msk.f32.mxu0 %vm4706_vm12, %v6530_v55 }
 0xf87   :  { %v12564_v16 = vpop.f32.mrb[24].mxu0 }
 0xf88   :  { %v6491_v37 = vpop.f32.mrb[25].mxu0 }
 0xf89   :  { %v13630_v12 = vpack.c.bf16 %v12564_v16, %v6491_v37  ;;  %v16052_v22 = vpack.i.bf16 %v12564_v16, %v6491_v37 }
 0xf8b   :  { %13631 = vmatprep.subr.bf16.mxu0 %v13630_v12  ;;  %14543 = vrot.lane.b32.xlu1 %v16052_v22, %s14781_s12 }
 0xf8c   :  { %13633 = vmatpush3.bf16.msra.mxu0 %v13630_v12 }
 0xf93   :  { %v12567_v15 = vpop.f32.mrb[26].mxu0 }
 0xf94   :  { %v6501_v18 = vpop.f32.mrb[27].mxu0 }
 0xf95   :  { %v13634_v21 = vpack.c.bf16 %v12567_v15, %v6501_v18  ;;  %v16056_v24 = vpack.i.bf16 %v12567_v15, %v6501_v18 }
 0xf97   :  { %13635 = vmatprep.subr.bf16.mxu0 %v13634_v21  ;;  %14548 = vrot.lane.b32.xlu0 %v16056_v24, %s14781_s12 }
 0xf98   :  { %13637 = vmatpush3.bf16.msra.mxu0 %v13634_v21 }
 0xf9f   :  { %v12570_v38 = vpop.f32.mrb[28].mxu0 }
 0xfa0   :  { %v6511_v29 = vpop.f32.mrb[29].mxu0 }
 0xfa1   :  { %v13638_v39 = vpack.c.bf16 %v12570_v38, %v6511_v29  ;;  %v16060_v27 = vpack.i.bf16 %v12570_v38, %v6511_v29 }
 0xfa3   :  { %13639 = vmatprep.subr.bf16.mxu0 %v13638_v39  ;;  %14553 = vrot.lane.b32.xlu1 %v16060_v27, %s14781_s12 }
 0xfa4   :  { %13641 = vmatpush3.bf16.msra.mxu0 %v13638_v39 }
 0xfa7   :  { %14563 = vrot.lane.b32.xlu1 %v16052_v22, %s14810_s14 }
 0xfaa   :  { %v12573_v41 = vpop.f32.mrb[30].mxu0 }
 0xfab   :  { %14573 = vrot.lane.b32.xlu1 %v16060_v27, %s14810_s14  ;;  %v6521_v43 = vpop.f32.mrb[31].mxu0 }
 0xfac   :  { %v16066_v40 = vpack.i.bf16 %v12573_v41, %v6521_v43  ;;  %v13642_v44 = vpack.c.bf16 %v12573_v41, %v6521_v43 }
 0xfae   :  { %14558 = vrot.lane.b32.xlu0 %v16066_v40, %s14781_s12  ;;  %13643 = vmatprep.subr.bf16.mxu0 %v13642_v44  ;;  %s14812_s12 = smov 123  }
 0xfaf   :  { %14583 = vrot.lane.b32.xlu1 %v16052_v22, %s14811_s16  ;;  %13645 = vmatpush3.bf16.msra.mxu0 %v13642_v44  ;;  %v10752_v44 = vld [vmem:[%s16048_s21 + $0xc8] sm:$0xff] }
 0xfb2   :  { %14568 = vrot.lane.b32.xlu0 %v16056_v24, %s14810_s14  ;;  %12625 = vmatmul.mubr.msk.f32.vlgmr.msra.gmra.mrb[32].mxu0 %vm4706_vm12, %v6531_v42  ;;  %v10753_v42 = vld [vmem:[%s16048_s21 + $0xd0] sm:$0xff] }
 0xfb3   :  { %14593 = vrot.lane.b32.xlu1 %v16060_v27, %s14811_s16  ;;  %12627 = vmatprep.mubr.msk.f32.mxu0 %vm4706_vm12, %v6532_v30 }
 0xfb6   :  { %14578 = vrot.lane.b32.xlu0 %v16066_v40, %s14810_s14  ;;  %12628 = vmatmul.mubr.msk.f32.gmra.mrb[34].mxu0 %vm4706_vm12, %v6533_v45 }
 0xfb7   :  { %14603 = vrot.lane.b32.xlu1 %v16052_v22, %s14812_s12  ;;  %12630 = vmatprep.mubr.msk.f32.mxu0 %vm4706_vm12, %v6534_v46 }
 0xfba   :  { %14588 = vrot.lane.b32.xlu0 %v16056_v24, %s14811_s16  ;;  %12631 = vmatmul.mubr.msk.f32.gmra.mrb[36].mxu0 %vm4706_vm12, %v6535_v47 }
 0xfbb   :  { %14613 = vrot.lane.b32.xlu1 %v16060_v27, %s14812_s12  ;;  %12633 = vmatprep.mubr.msk.f32.mxu0 %vm4706_vm12, %v6536_v54 }
 0xfbe   :  { %14598 = vrot.lane.b32.xlu0 %v16066_v40, %s14811_s16  ;;  %12634 = vmatmul.mubr.msk.f32.gmra.mrb[38].mxu0 %vm4706_vm12, %v6537_v48  ;;  %s14822_s16 = smov 30  }
 0xfbf   :  { %14623 = vrot.lane.b32.xlu1 %v16052_v22, %s14798_s29  ;;  %12636 = vmatprep.mubr.msk.f32.mxu0 %vm4706_vm12, %v6538_v49  ;;  %v10754_v49 = vld [vmem:[%s16048_s21 + $0xd8] sm:$0xff]  ;;  %s10145_s11 = sld [smem:[%s16897_s0 + %s14822_s16]]  }
 0xfc2   :  { %14608 = vrot.lane.b32.xlu0 %v16056_v24, %s14812_s12  ;;  %12637 = vmatmul.mubr.msk.f32.gmra.mrb[40].mxu0 %vm4706_vm12, %v6539_v50  ;;  %v10755_v50 = vld [vmem:[%s16048_s21 + $0xe0] sm:$0xff] }
 0xfc3   :  { %14633 = vrot.lane.b32.xlu1 %v16060_v27, %s14798_s29  ;;  %12639 = vmatprep.mubr.msk.f32.mxu0 %vm4706_vm12, %v6540_v52 }
 0xfc6   :  { %14618 = vrot.lane.b32.xlu0 %v16066_v40, %s14812_s12  ;;  %12640 = vmatmul.mubr.msk.f32.gmra.mrb[42].mxu0 %vm4706_vm12, %v6541_v53 }
 0xfc7   :  { %14643 = vrot.lane.b32.xlu1 %v16052_v22, %s14799_s30  ;;  %12658 = vmatprep.mubr.msk.f32.mxu0 %vm4706_vm12, %v10751_v56 }
 0xfca   :  { %14628 = vrot.lane.b32.xlu0 %v16056_v24, %s14798_s29 }
 0xfcb   :  { %14653 = vrot.lane.b32.xlu1 %v16060_v27, %s14799_s30 }
 0xfce   :  { %14638 = vrot.lane.b32.xlu0 %v16066_v40, %s14798_s29  ;;  %s14814_s29 = smov 14  }
 0xfcf   :  { %14663 = vrot.lane.b32.xlu1 %v16052_v22, %s14779_s10  ;;  %s16134_s25 = sld [smem:[%s16897_s0 + %s14814_s29]]  }
 0xfd0   :  { %s16855_s29 = sld [smem:[%s16897_s0 + %s14831_s17]]  }
 0xfd2   :  { %14648 = vrot.lane.b32.xlu0 %v16056_v24, %s14799_s30 }
 0xfd3   :  { %14673 = vrot.lane.b32.xlu1 %v16056_v24, %s14779_s10 }
 0xfd5   :  { %v8454_v57 = vld [vmem:[%s16134_s25 + $0x18] sm:$0xff]  ;;  %v8457_v58 = vld [vmem:[%s16134_s25 + $0x30] sm:$0xff]  ;;  %v8456_v61 = vld [vmem:[%s16134_s25 + $0x28] sm:$0xff] }
 0xfd6   :  { %14658 = vrot.lane.b32.xlu0 %v16066_v40, %s14799_s30  ;;  %s14815_s30 = smov 24   ;;  %v8455_v63 = vld [vmem:[%s16134_s25 + $0x20] sm:$0xff]  ;;  %v8461_v0 = vld [vmem:[%s16134_s25 + $0x50] sm:$0xff]  ;;  %v8458_v1 = vld [vmem:[%s16134_s25 + $0x38] sm:$0xff] }
 0xfd7   :  { %14683 = vrot.lane.b32.xlu1 %v16060_v27, %s14779_s10  ;;  %s16146_s1 = sld [smem:[%s16897_s0 + %s14815_s30]]   ;;  %v8462_v2 = vld [vmem:[%s16134_s25 + $0x58] sm:$0xff]  ;;  %v8460_v3 = vld [vmem:[%s16134_s25 + $0x48] sm:$0xff]  ;;  %v8459_v60 = vld [vmem:[%s16134_s25 + $0x40] sm:$0xff] }
 0xfd8   :  { %v8452_v4 = vld [vmem:[%s16134_s25 + $0x8] sm:$0xff]  ;;  %v8451_v6 = vld [vmem:[%s16134_s25] sm:$0xff]  ;;  %v8453_v10 = vld [vmem:[%s16134_s25 + $0x10] sm:$0xff]  ;;  %s14824_s25 = smov 35   ;;  %s16860_s30 = sld [smem:[%s16897_s0 + %s14832_s23]]  }
 0xfd9   :  { %s10150_s28 = sld [smem:[%s16897_s0 + %s14824_s25]]  }
 0xfda   :  { %14668 = vrot.lane.b32.xlu0 %v16052_v22, %s14803_s15 }
 0xfdb   :  { %14693 = vrot.lane.b32.xlu1 %v16066_v40, %s14779_s10  ;;  %s14816_s10 = smov 20  }
 0xfdc   :  { %s10135_s3 = sld [smem:[%s16897_s0 + %s14816_s10]]   ;;  %s14834_s10 = smov 34  }
 0xfdd   :  { %v8672_v59 = vld [vmem:[%s16146_s1] sm:$0xff] }
 0xfde   :  { %14678 = vrot.lane.b32.xlu0 %v16056_v24, %s14803_s15 }
 0xfdf   :  { %8697 = vperm.xlu1 %14231, %v8671_v51  }
 0xfe2   :  { %14688 = vrot.lane.b32.xlu0 %v16060_v27, %s14803_s15  ;;  %v8670_v23 = vld [vmem:[%s10135_s3] sm:$0xff]  ;;  %s10149_s3 = sld [smem:[%s16897_s0 + %s14834_s10]]  }
 0xfe3   :  { %8480 = vperm.xlu1 %14231, %v8454_v57   ;;  %v8673_v25 = vsel %vm7612_vm3, %v8670_v23, 0.0 }
 0xfe4   :  { %v8674_v11 = vrot.slane %v8673_v25, 4 }
 0xfe6   :  { %14698 = vrot.lane.b32.xlu0 %v16066_v40, %s14803_s15  ;;  %v8675_v34 = vadd.f32 %v8674_v11, %v8673_v25 }
 0xfe7   :  { %8495 = vperm.xlu1 %14231, %v8457_v58  }
 0xfe8   :  { %v8676_v33 = vrot.slane %v8675_v34, 2 }
 0xfea   :  { %8703 = vperm.xlu0 %14230, %v8672_v59   ;;  %v8677_v36 = vadd.f32 %v8676_v33, %v8675_v34  ;;  %v10756_v59 = vld [vmem:[%s16048_s21 + $0xe8] sm:$0xff] }
 0xfeb   :  { %8490 = vperm.xlu1 %14231, %v8456_v61   ;;  %v10757_v61 = vld [vmem:[%s16048_s21 + $0xf0] sm:$0xff] }
 0xfec   :  { %v8678_v37 = vrot.slane %v8677_v36, 1 }
 0xfee   :  { %8485 = vperm.xlu0 %14230, %v8455_v63   ;;  %v8679_v39 = vadd.f32 %v8678_v37, %v8677_v36 }
 0xfef   :  { %8515 = vperm.xlu1 %14231, %v8461_v0  }
 0xff0   :  { %v8681_v45 = vmul.f32 0.125, %v8679_v39 }
 0xff2   :  { %8500 = vperm.xlu0 %14230, %v8458_v1   ;;  %v16211_v53 = vsub.f32 %v8670_v23, %v8681_v45  ;;  %v10762_v23 = vld [vmem:[%s16048_s21 + $0x118] sm:$0xff] }
 0xff3   :  { %8520 = vperm.xlu1 %14231, %v8462_v2  }
 0xff4   :  { %v8683_v63 = vmul.f32 %v16211_v53, %v16211_v53 }
 0xff6   :  { %8510 = vperm.xlu0 %14230, %v8460_v3  }
 0xff7   :  { %8470 = vperm.xlu1 %14231, %v8452_v4   ;;  %v10758_v4 = vld [vmem:[%s16048_s21 + $0xf8] sm:$0xff] }
 0xffa   :  { %8505 = vperm.xlu0 %14230, %v8459_v60   ;;  %v10759_v60 = vld [vmem:[%s16048_s21 + $0x100] sm:$0xff] }
 0xffd   :  { %v14544_v7 = vpop.permute.xlu1 %14543 }
 0xffe   :  { %v14546_v8 = vunpack.i.h.bf16 %v14544_v7  ;;  %v14545_v9 = vunpack.i.l.bf16 %v14544_v7  ;;  %8465 = vperm.xlu0 %14230, %v8451_v6   ;;  %v10794_v7 = vld [vmem:[%s16048_s21 + $0x178] sm:$0xff] }
0x1000   :  { %v13646_v17 = vpack.c.bf16 %v14546_v8, %v14545_v9  ;;  %v8684_v8 = vsel %vm7612_vm3, %v8683_v63, 0.0 }
0x1002   :  { %8475 = vperm.xlu0 %14230, %v8453_v10   ;;  %13648 = vmatprep.subr.msk.bf16.mxu0 %vm16167_vm14, %v13646_v17 }
0x1003   :  { %13651 = vmatpush3.bf16.msk.msra.mxu0 %vm16167_vm14, %v13646_v17  ;;  %v10761_v17 = vld [vmem:[%s16048_s21 + $0x110] sm:$0xff] }
0x1009   :  { %v14549_v19 = vpop.permute.xlu0 %14548 }
0x100a   :  { %v14551_v20 = vunpack.i.h.bf16 %v14549_v19  ;;  %v14550_v5 = vunpack.i.l.bf16 %v14549_v19  ;;  %v8685_v19 = vrot.slane %v8684_v8, 4 }
0x100c   :  { %v13652_v14 = vpack.c.bf16 %v14551_v20, %v14550_v5  ;;  %v8686_v25 = vadd.f32 %v8685_v19, %v8684_v8 }
0x100e   :  { %13654 = vmatprep.subr.msk.bf16.mxu0 %vm16167_vm14, %v13652_v14  ;;  %v8687_v33 = vrot.slane %v8686_v25, 2 }
0x100f   :  { %13657 = vmatpush3.bf16.msk.msra.mxu0 %vm16167_vm14, %v13652_v14  ;;  %v10783_v14 = vld [vmem:[%s16048_s21 + $0x120] sm:$0xff] }
0x1015   :  { %v14554_v26 = vpop.permute.xlu1 %14553 }
0x1016   :  { %v14556_v28 = vunpack.i.h.bf16 %v14554_v26  ;;  %v14555_v31 = vunpack.i.l.bf16 %v14554_v26 }
0x1018   :  { %v13658_v32 = vpack.c.bf16 %v14556_v28, %v14555_v31  ;;  %v10784_v31 = vld [vmem:[%s16048_s21 + $0x128] sm:$0xff] }
0x1019   :  { %v14564_v35 = vpop.permute.xlu1 %14563 }
0x101a   :  { %13660 = vmatprep.subr.msk.bf16.mxu0 %vm16167_vm14, %v13658_v32  ;;  %v14566_v12 = vunpack.i.h.bf16 %v14564_v35  ;;  %v14565_v22 = vunpack.i.l.bf16 %v14564_v35 }
0x101b   :  { %13663 = vmatpush3.bf16.msk.msra.mxu0 %vm16167_vm14, %v13658_v32  ;;  %v10785_v32 = vld [vmem:[%s16048_s21 + $0x130] sm:$0xff] }
0x101c   :  { %v13670_v27 = vpack.c.bf16 %v14566_v12, %v14565_v22 }
0x101d   :  { %v14574_v55 = vpop.permute.xlu1 %14573 }
0x101e   :  { %v14576_v46 = vunpack.i.h.bf16 %v14574_v55  ;;  %v14575_v47 = vunpack.i.l.bf16 %v14574_v55 }
0x1020   :  { %v14559_v16 = vpop.permute.xlu0 %14558  ;;  %v13682_v56 = vpack.c.bf16 %v14576_v46, %v14575_v47 }
0x1021   :  { %v14561_v15 = vunpack.i.h.bf16 %v14559_v16  ;;  %v14560_v18 = vunpack.i.l.bf16 %v14559_v16  ;;  %v14584_v21 = vpop.permute.xlu1 %14583 }
0x1022   :  { %v14586_v0 = vunpack.i.h.bf16 %v14584_v21  ;;  %v14585_v1 = vunpack.i.l.bf16 %v14584_v21  ;;  %v8688_v21 = vadd.f32 %v8687_v33, %v8686_v25  ;;  %v10709_v25 = vld [vmem:[%s16048_s21 + $0x70] sm:$0xff]  ;;  %v10710_v33 = vld [vmem:[%s16048_s21 + $0x78] sm:$0xff] }
0x1023   :  { %v13664_v24 = vpack.c.bf16 %v14561_v15, %v14560_v18  ;;  %v10786_v15 = vld [vmem:[%s16048_s21 + $0x138] sm:$0xff] }
0x1024   :  { %v14569_v38 = vpop.permute.xlu0 %14568  ;;  %v13694_v9 = vpack.c.bf16 %v14586_v0, %v14585_v1  ;;  %v10791_v0 = vld [vmem:[%s16048_s21 + $0x160] sm:$0xff] }
0x1025   :  { %v14571_v41 = vunpack.i.h.bf16 %v14569_v38  ;;  %v14570_v43 = vunpack.i.l.bf16 %v14569_v38  ;;  %v16191_v40 = vpop.permute.xlu1 %14593  ;;  %13666 = vmatprep.subr.msk.bf16.mxu0 %vm16167_vm14, %v13664_v24 }
0x1026   :  { %13669 = vmatpush3.bf16.msk.msra.mxu0 %vm16167_vm14, %v13664_v24  ;;  %v14596_v35 = vunpack.i.h.bf16 %v16191_v40  ;;  %v14595_v36 = vunpack.i.l.bf16 %v16191_v40  ;;  %vm8269_vm14 = vcmask 7168  }
0x1027   :  { %13672 = vmatprep.subr.msk.bf16.mxu0 %vm16187_vm13, %v13670_v27  ;;  %v13676_v54 = vpack.c.bf16 %v14571_v41, %v14570_v43  ;;  %v10787_v41 = vld [vmem:[%s16048_s21 + $0x140] sm:$0xff]  ;;  %vm16530_vm11 = vmpackc.low %vm8269_vm14, %vm8269_vm14 }
0x1028   :  { %v14579_v30 = vpop.permute.xlu0 %14578  ;;  %v13706_v38 = vpack.c.bf16 %v14596_v35, %v14595_v36 }
0x1029   :  { %v16201_v48 = vpop.permute.xlu1 %14603  ;;  %12659 = vmatmul.mubr.msk.f32.vlgmr.msra.gmra.mrb[32].mxu0 %vm4706_vm12, %v10752_v44  ;;  %v14581_v51 = vunpack.i.h.bf16 %v14579_v30  ;;  %v14580_v57 = vunpack.i.l.bf16 %v14579_v30  ;;  %v10788_v44 = vld [vmem:[%s16048_s21 + $0x148] sm:$0xff]  ;;  %v8689_v30 = vrot.slane %v8688_v21, 1 }
0x102a   :  { %13675 = vmatpush3.bf16.msk.msra.mxu0 %vm16187_vm13, %v13670_v27  ;;  %12661 = vmatprep.mubr.msk.f32.mxu0 %vm4706_vm12, %v10753_v42  ;;  %v14606_v46 = vunpack.i.h.bf16 %v16201_v48  ;;  %v14605_v47 = vunpack.i.l.bf16 %v16201_v48 }
0x102b   :  { %13678 = vmatprep.subr.msk.bf16.mxu0 %vm16187_vm13, %v13676_v54  ;;  %v13688_v2 = vpack.c.bf16 %v14581_v51, %v14580_v57  ;;  %v10790_v51 = vld [vmem:[%s16048_s21 + $0x158] sm:$0xff]  ;;  %v8690_v48 = vadd.f32 %v8689_v30, %v8688_v21 }
0x102c   :  { %v14589_v52 = vpop.permute.xlu0 %14588  ;;  %v10822_v30 = vld [vmem:[%s16048_s21 + $0x1b8] sm:$0xff] }
0x102d   :  { %v16213_v58 = vpop.permute.xlu1 %14613  ;;  %12662 = vmatmul.mubr.msk.f32.gmra.mrb[34].mxu0 %vm4706_vm12, %v10754_v49  ;;  %v14591_v34 = vunpack.i.h.bf16 %v14589_v52  ;;  %v14590_v26 = vunpack.i.l.bf16 %v14589_v52  ;;  %v8691_v8 = vmul.f32 0.125, %v8690_v48  ;;  %v10718_v48 = vld [vmem:[%s16048_s21 + $0xb8] sm:$0xff] }
0x102e   :  { %13681 = vmatpush3.bf16.msk.msra.mxu0 %vm16187_vm13, %v13676_v54  ;;  %12664 = vmatprep.mubr.msk.f32.mxu0 %vm4706_vm12, %v10755_v50  ;;  %v10789_v50 = vld [vmem:[%s16048_s21 + $0x150] sm:$0xff]  ;;  %v14616_v35 = vunpack.i.h.bf16 %v16213_v58  ;;  %v14615_v36 = vunpack.i.l.bf16 %v16213_v58  ;;  %v10712_v58 = vld [vmem:[%s16048_s21 + $0x88] sm:$0xff] }
0x102f   :  { %13684 = vmatprep.subr.msk.bf16.mxu0 %vm16187_vm13, %v13682_v56  ;;  %v13700_v55 = vpack.c.bf16 %v14591_v34, %v14590_v26  ;;  %v8692_v19 = vadd.f32 1e-05, %v8691_v8 }
0x1030   :  { %v16223_v62 = vpop.permute.xlu0 %14598 }
0x1031   :  { %v16227_v3 = vpop.permute.xlu1 %14623  ;;  %12665 = vmatmul.mubr.msk.f32.gmra.mrb[36].mxu0 %vm4706_vm12, %v10756_v59  ;;  %v14601_v29 = vunpack.i.h.bf16 %v16223_v62  ;;  %v14600_v39 = vunpack.i.l.bf16 %v16223_v62  ;;  %14702 = vrsqrt.f32 %v8692_v19 }
0x1032   :  { %13687 = vmatpush3.bf16.msk.msra.mxu0 %vm16187_vm13, %v13682_v56  ;;  %12667 = vmatprep.mubr.msk.f32.mxu0 %vm4706_vm12, %v10757_v61  ;;  %v13718_v61 = vpack.c.bf16 %v14606_v46, %v14605_v47  ;;  %v10716_v47 = vld [vmem:[%s16048_s21 + $0xa8] sm:$0xff] }
0x1033   :  { %13690 = vmatprep.subr.msk.bf16.mxu0 %vm16187_vm13, %v13688_v2  ;;  %v13712_v54 = vpack.c.bf16 %v14601_v29, %v14600_v39  ;;  %v10821_v39 = vld [vmem:[%s16048_s21 + $0x1b0] sm:$0xff]  ;;  %v10888_v46 = vld [vmem:[%s16048_s21 + $0x288] sm:$0xff] }
0x1034   :  { %v16237_v6 = vpop.permute.xlu0 %14608 }
0x1035   :  { %v16244_v10 = vpop.permute.xlu1 %14633  ;;  %12668 = vmatmul.mubr.msk.f32.gmra.mrb[38].mxu0 %vm4706_vm12, %v10758_v4  ;;  %v10792_v4 = vld [vmem:[%s16048_s21 + $0x168] sm:$0xff]  ;;  %v14611_v34 = vunpack.i.h.bf16 %v16237_v6  ;;  %v14610_v26 = vunpack.i.l.bf16 %v16237_v6 }
0x1036   :  { %13693 = vmatpush3.bf16.msk.msra.mxu0 %vm16187_vm13, %v13688_v2  ;;  %12670 = vmatprep.mubr.msk.f32.mxu0 %vm4706_vm12, %v10759_v60  ;;  %v10793_v60 = vld [vmem:[%s16048_s21 + $0x170] sm:$0xff]  ;;  %v14636_v8 = vunpack.i.h.bf16 %v16244_v10 }
0x1037   :  { %13696 = vmatprep.subr.msk.bf16.mxu0 %vm16239_vm1, %v13694_v9  ;;  %v13724_v6 = vpack.c.bf16 %v14611_v34, %v14610_v26  ;;  %v10853_v34 = vld [vmem:[%s16048_s21 + $0x210] sm:$0xff] }
0x1038   :  { %v16254_v20 = vpop.permute.xlu0 %14618 }
0x1039   :  { %v16256_v5 = vpop.permute.xlu1 %14643  ;;  %12671 = vmatmul.mubr.msk.f32.gmra.mrb[40].mxu0 %vm4706_vm12, %v10760_v13  ;;  %v14621_v18 = vunpack.i.h.bf16 %v16254_v20  ;;  %v14620_v21 = vunpack.i.l.bf16 %v16254_v20  ;;  %v10714_v20 = vld [vmem:[%s16048_s21 + $0x98] sm:$0xff] }
0x103a   :  { %12673 = vmatprep.mubr.msk.f32.mxu0 %vm4706_vm12, %v10761_v17  ;;  %v10815_v17 = vld [vmem:[%s16048_s21 + $0x180] sm:$0xff]  ;;  %v14646_v26 = vunpack.i.h.bf16 %v16256_v5 }
0x103c   :  { %v16262_v11 = vpop.permute.xlu0 %14628 }
0x103d   :  { %v16264_v28 = vpop.permute.xlu1 %14653  ;;  %12674 = vmatmul.mubr.msk.f32.gmra.mrb[42].mxu0 %vm4706_vm12, %v10762_v23  ;;  %v10708_v23 = vld [vmem:[%s16048_s21 + $0x68] sm:$0xff] }
0x103e   :  { %12692 = vmatprep.mubr.msk.f32.mxu0 %vm4706_vm12, %v10783_v14  ;;  %v14817_v14 = vmov 0.0  }
0x1040   :  { %v16272_v16 = vpop.permute.xlu0 %14638 }
0x1041   :  { %v14664_v37 = vpop.permute.xlu1 %14663  ;;  %12693 = vmatmul.mubr.msk.f32.vlgmr.msra.gmra.mrb[32].mxu0 %vm4706_vm12, %v10784_v31  ;;  %v10816_v31 = vld [vmem:[%s16048_s21 + $0x188] sm:$0xff] }
0x1042   :  { %v14666_v12 = vunpack.i.h.bf16 %v14664_v37  ;;  %v14665_v22 = vunpack.i.l.bf16 %v14664_v37  ;;  %13699 = vmatpush3.bf16.msk.msra.mxu0 %vm16239_vm1, %v13694_v9  ;;  %12695 = vmatprep.mubr.msk.f32.mxu0 %vm4706_vm12, %v10785_v32  ;;  %v10817_v32 = vld [vmem:[%s16048_s21 + $0x190] sm:$0xff]  ;;  %v10711_v37 = vld [vmem:[%s16048_s21 + $0x80] sm:$0xff] }
0x1043   :  { %13702 = vmatprep.subr.msk.bf16.mxu0 %vm16239_vm1, %v13700_v55 }
0x1044   :  { %v13606_v24 = vpack.c.bf16 %v14666_v12, %v14665_v22  ;;  %v16296_v42 = vpop.permute.xlu0 %14648  ;;  %v10818_v12 = vld [vmem:[%s16048_s21 + $0x198] sm:$0xff]  ;;  %v10819_v22 = vld [vmem:[%s16048_s21 + $0x1a0] sm:$0xff] }
0x1045   :  { %v14674_v27 = vpop.permute.xlu1 %14673  ;;  %12696 = vmatmul.mubr.msk.f32.gmra.mrb[34].mxu0 %vm4706_vm12, %v10786_v15  ;;  %v13730_v15 = vpack.c.bf16 %v14616_v35, %v14615_v36  ;;  %v10856_v36 = vld [vmem:[%s16048_s21 + $0x228] sm:$0xff] }
0x1046   :  { %v14676_v43 = vunpack.i.h.bf16 %v14674_v27  ;;  %v14675_v40 = vunpack.i.l.bf16 %v14674_v27  ;;  %13705 = vmatpush3.bf16.msk.msra.mxu0 %vm16239_vm1, %v13700_v55  ;;  %13608 = vmatprep.subr.msk.bf16.mxu1 %vm16283_vm9, %v13606_v24  ;;  %v14703_v27 = vpop.eup %14702 }
0x1047   :  { %13708 = vmatprep.subr.msk.bf16.mxu0 %vm16239_vm1, %v13706_v38  ;;  %13611 = vmatpush3.bf16.msk.msra.mxu1 %vm16283_vm9, %v13606_v24  ;;  %v10713_v24 = vld [vmem:[%s16048_s21 + $0x90] sm:$0xff] }
0x1048   :  { %v13612_v45 = vpack.c.bf16 %v14676_v43, %v14675_v40  ;;  %12698 = vmatprep.mubr.msk.f32.mxu0 %vm4706_vm12, %v10787_v41  ;;  %v16323_v62 = vpop.permute.xlu0 %14658  ;;  %v14626_v41 = vunpack.i.h.bf16 %v16227_v3  ;;  %v14625_v43 = vunpack.i.l.bf16 %v16227_v3  ;;  %v13736_v40 = vpack.c.bf16 %v14621_v18, %v14620_v21  ;;  %v10881_v18 = vld [vmem:[%s16048_s21 + $0x250] sm:$0xff] }
0x1049   :  { %v14684_v49 = vpop.permute.xlu1 %14683  ;;  %12699 = vmatmul.mubr.msk.f32.gmra.mrb[36].mxu0 %vm4706_vm12, %v10788_v44  ;;  %v10715_v44 = vld [vmem:[%s16048_s21 + $0xa0] sm:$0xff]  ;;  %v8694_v3 = vmul.f32 %v14703_v27, %v16211_v53  ;;  %v10717_v53 = vld [vmem:[%s16048_s21 + $0xb0] sm:$0xff]  ;;  %v14656_v21 = vunpack.i.h.bf16 %v16264_v28  ;;  %v14661_v27 = vunpack.i.h.bf16 %v16323_v62 }
0x104a   :  { %v14686_v52 = vunpack.i.h.bf16 %v14684_v49  ;;  %v14685_v56 = vunpack.i.l.bf16 %v14684_v49  ;;  %13711 = vmatpush3.bf16.msk.msra.mxu0 %vm16239_vm1, %v13706_v38  ;;  %13614 = vmatprep.subr.msk.bf16.mxu1 %vm16283_vm9, %v13612_v45  ;;  %v10820_v38 = vld [vmem:[%s16048_s21 + $0x1a8] sm:$0xff] }
0x104b   :  { %13714 = vmatprep.subr.msk.bf16.mxu0 %vm16239_vm1, %v13712_v54  ;;  %13617 = vmatpush3.bf16.msk.msra.mxu1 %vm16283_vm9, %v13612_v45  ;;  %v10823_v45 = vld [vmem:[%s16048_s21 + $0x1c0] sm:$0xff] }
0x104c   :  { %v13618_v57 = vpack.c.bf16 %v14686_v52, %v14685_v56  ;;  %12701 = vmatprep.mubr.msk.f32.mxu0 %vm4706_vm12, %v10789_v50  ;;  %v16343_v13 = vpop.permute.xlu0 %14668  ;;  %v10824_v52 = vld [vmem:[%s16048_s21 + $0x1c8] sm:$0xff]  ;;  %v10825_v56 = vld [vmem:[%s16048_s21 + $0x1d0] sm:$0xff] }
0x104d   :  { %v14694_v63 = vpop.permute.xlu1 %14693  ;;  %12702 = vmatmul.mubr.msk.f32.gmra.mrb[38].mxu0 %vm4706_vm12, %v10790_v51 }
0x104e   :  { %v14696_v1 = vunpack.i.h.bf16 %v14694_v63  ;;  %v14695_v2 = vunpack.i.l.bf16 %v14694_v63  ;;  %13717 = vmatpush3.bf16.msk.msra.mxu0 %vm16239_vm1, %v13712_v54  ;;  %13620 = vmatprep.subr.msk.bf16.mxu1 %vm16283_vm9, %v13618_v57  ;;  %v13742_v54 = vpack.c.bf16 %v14626_v41, %v14625_v43  ;;  %v10847_v63 = vld [vmem:[%s16048_s21 + $0x1e0] sm:$0xff]  ;;  %v10884_v41 = vld [vmem:[%s16048_s21 + $0x268] sm:$0xff]  ;;  %v10885_v43 = vld [vmem:[%s16048_s21 + $0x270] sm:$0xff] }
0x104f   :  { %13720 = vmatprep.subr.msk.bf16.mxu0 %vm16319_vm4, %v13718_v61  ;;  %13623 = vmatpush3.bf16.msk.msra.mxu1 %vm16283_vm9, %v13618_v57 }
0x1050   :  { %v13624_v9 = vpack.c.bf16 %v14696_v1, %v14695_v2  ;;  %12704 = vmatprep.mubr.msk.f32.mxu0 %vm4706_vm12, %v10791_v0  ;;  %v16362_v55 = vpop.permute.xlu0 %14678  ;;  %v8707_v0 = vld [vmem:[%s10140_s8] sm:$0xff]  ;;  %v14631_v1 = vunpack.i.h.bf16 %v16262_v11  ;;  %v14630_v2 = vunpack.i.l.bf16 %v16262_v11  ;;  %v10850_v11 = vld [vmem:[%s16048_s21 + $0x1f8] sm:$0xff]  ;;  %s10151_s8 = sld [smem:[%s16897_s0 + %s14835_s4]]  }
0x1051   :  { %12705 = vmatmul.mubr.msk.f32.gmra.mrb[40].mxu0 %vm4706_vm12, %v10792_v4  ;;  %v10848_v4 = vld [vmem:[%s16048_s21 + $0x1e8] sm:$0xff] }
0x1052   :  { %13626 = vmatprep.subr.msk.bf16.mxu1 %vm16283_vm9, %v13624_v9  ;;  %12707 = vmatprep.mubr.msk.f32.mxu0 %vm4706_vm12, %v10793_v60  ;;  %v10849_v60 = vld [vmem:[%s16048_s21 + $0x1f0] sm:$0xff] }
0x1053   :  { %13629 = vmatpush3.bf16.msk.msra.mxu1 %vm16283_vm9, %v13624_v9  ;;  %v14635_v9 = vunpack.i.l.bf16 %v16244_v10  ;;  %v14640_v10 = vunpack.i.l.bf16 %v16272_v16 }
0x1054   :  { %12880 = vmatprep.subr.mxu1 %v14817_v14  ;;  %v16384_v29 = vpop.permute.xlu0 %14688 }
0x1055   :  { %12708 = vmatmul.mubr.msk.f32.gmra.mrb[42].mxu0 %vm4706_vm12, %v10794_v7  ;;  %v13748_v7 = vpack.c.bf16 %v14631_v1, %v14630_v2  ;;  %v13754_v19 = vpack.c.bf16 %v14636_v8, %v14635_v9  ;;  %v10917_v2 = vld [vmem:[%s16048_s21 + $0x2d0] sm:$0xff]  ;;  %v10920_v8 = vld [vmem:[%s16048_s21 + $0x2e8] sm:$0xff] }
0x1056   :  { %12726 = vmatprep.mubr.msk.f32.mxu0 %vm4706_vm12, %v10815_v17  ;;  %12591 = vmatmul.mubr.msk.f32.vlgmr.msra.gmra.mrb[40].mxu1 %vm4706_vm12, %v10708_v23  ;;  %v10851_v17 = vld [vmem:[%s16048_s21 + $0x200] sm:$0xff]  ;;  %v14641_v23 = vunpack.i.h.bf16 %v16272_v16  ;;  %v10921_v9 = vld [vmem:[%s16048_s21 + $0x2f0] sm:$0xff] }
0x1057   :  { %12593 = vmatprep.mubr.msk.f32.mxu1 %vm4706_vm12, %v10709_v25  ;;  %v10852_v25 = vld [vmem:[%s16048_s21 + $0x208] sm:$0xff] }
0x1058   :  { %v16416_v49 = vpop.permute.xlu0 %14698  ;;  %v13760_v16 = vpack.c.bf16 %v14641_v23, %v14640_v10  ;;  %v10946_v23 = vld [vmem:[%s16048_s21 + $0x318] sm:$0xff]  ;;  %v10947_v10 = vld [vmem:[%s16048_s21 + $0x320] sm:$0xff] }
0x1059   :  { %12727 = vmatmul.mubr.msk.f32.vlgmr.msra.gmra.mrb[32].mxu0 %vm4706_vm12, %v10816_v31  ;;  %v14645_v31 = vunpack.i.l.bf16 %v16256_v5  ;;  %v14700_v1 = vunpack.i.l.bf16 %v16416_v49 }
0x105a   :  { %13723 = vmatpush3.bf16.msk.msra.mxu0 %vm16319_vm4, %v13718_v61  ;;  %12729 = vmatprep.mubr.msk.f32.mxu0 %vm4706_vm12, %v10817_v32  ;;  %v10826_v61 = vld [vmem:[%s16048_s21 + $0x1d8] sm:$0xff] }
0x105b   :  { %13726 = vmatprep.subr.msk.bf16.mxu0 %vm16319_vm4, %v13724_v6  ;;  %12594 = vmatmul.mubr.msk.f32.gmra.mrb[42].mxu1 %vm4706_vm12, %v10710_v33  ;;  %v10854_v32 = vld [vmem:[%s16048_s21 + $0x218] sm:$0xff]  ;;  %v10855_v33 = vld [vmem:[%s16048_s21 + $0x220] sm:$0xff]  ;;  %v13766_v35 = vpack.c.bf16 %v14646_v26, %v14645_v31 }
0x105c   :  { %12596 = vmatprep.mubr.msk.f32.mxu1 %vm4706_vm12, %v10711_v37  ;;  %v10858_v37 = vld [vmem:[%s16048_s21 + $0x238] sm:$0xff]  ;;  %v10951_v31 = vld [vmem:[%s16048_s21 + $0x340] sm:$0xff] }
0x105d   :  { %12730 = vmatmul.mubr.msk.f32.gmra.mrb[34].mxu0 %vm4706_vm12, %v10818_v12  ;;  %v10879_v12 = vld [vmem:[%s16048_s21 + $0x240] sm:$0xff]  ;;  %v10950_v26 = vld [vmem:[%s16048_s21 + $0x338] sm:$0xff] }
0x105e   :  { %13729 = vmatpush3.bf16.msk.msra.mxu0 %vm16319_vm4, %v13724_v6  ;;  %12732 = vmatprep.mubr.msk.f32.mxu0 %vm4706_vm12, %v10819_v22  ;;  %v8698_v50 = vpop.permute.xlu1 %8697  ;;  %v10857_v6 = vld [vmem:[%s16048_s21 + $0x230] sm:$0xff]  ;;  %v14651_v22 = vunpack.i.h.bf16 %v16296_v42 }
0x105f   :  { %13732 = vmatprep.subr.msk.bf16.mxu0 %vm16319_vm4, %v13730_v15  ;;  %12597 = vmatmul.mubr.msk.f32.gmra.mrb[44].mxu1 %vm4706_vm12, %v10712_v58  ;;  %v8700_v51 = vmul.f32 %v8698_v50, %v8694_v3  ;;  %v14650_v58 = vunpack.i.l.bf16 %v16296_v42  ;;  %v10882_v42 = vld [vmem:[%s16048_s21 + $0x258] sm:$0xff]  ;;  %v10911_v50 = vld [vmem:[%s16048_s21 + $0x2a0] sm:$0xff] }
0x1060   :  { %12599 = vmatprep.mubr.msk.f32.mxu1 %vm4706_vm12, %v10713_v24  ;;  %v14655_v24 = vunpack.i.l.bf16 %v16264_v28  ;;  %v14660_v28 = vunpack.i.l.bf16 %v16323_v62  ;;  %v14670_v62 = vunpack.i.l.bf16 %v16343_v13 }
0x1061   :  { %12733 = vmatmul.mubr.msk.f32.gmra.mrb[36].mxu0 %vm4706_vm12, %v10820_v38  ;;  %v13772_v38 = vpack.c.bf16 %v14651_v22, %v14650_v58 }
0x1062   :  { %13735 = vmatpush3.bf16.msk.msra.mxu0 %vm16319_vm4, %v13730_v15  ;;  %12735 = vmatprep.mubr.msk.f32.mxu0 %vm4706_vm12, %v10821_v39  ;;  %v10880_v15 = vld [vmem:[%s16048_s21 + $0x248] sm:$0xff]  ;;  %v10883_v39 = vld [vmem:[%s16048_s21 + $0x260] sm:$0xff] }
0x1063   :  { %13738 = vmatprep.subr.msk.bf16.mxu0 %vm16319_vm4, %v13736_v40  ;;  %12600 = vmatmul.mubr.msk.f32.gmra.mrb[46].mxu1 %vm4706_vm12, %v10714_v20  ;;  %v13778_v20 = vpack.c.bf16 %v14656_v21, %v14655_v24 }
0x1064   :  { %12602 = vmatprep.mubr.msk.f32.mxu1 %vm4706_vm12, %v10715_v44  ;;  %v14671_v44 = vunpack.i.h.bf16 %v16343_v13 }
0x1065   :  { %12736 = vmatmul.mubr.msk.f32.gmra.mrb[38].mxu0 %vm4706_vm12, %v10822_v30  ;;  %v10886_v30 = vld [vmem:[%s16048_s21 + $0x278] sm:$0xff] }
0x1066   :  { %13741 = vmatpush3.bf16.msk.msra.mxu0 %vm16319_vm4, %v13736_v40  ;;  %12738 = vmatprep.mubr.msk.f32.mxu0 %vm4706_vm12, %v10823_v45  ;;  %v13784_v40 = vpack.c.bf16 %v14661_v27, %v14660_v28  ;;  %v10887_v45 = vld [vmem:[%s16048_s21 + $0x280] sm:$0xff]  ;;  %v13790_v13 = vpack.c.bf16 %v14671_v44, %v14670_v62 }
0x1067   :  { %13744 = vmatprep.subr.msk.bf16.mxu0 %vm16407_vm6, %v13742_v54  ;;  %12603 = vmatmul.mubr.msk.f32.gmra.mrb[48].mxu1 %vm4706_vm12, %v10716_v47  ;;  %v10889_v47 = vld [vmem:[%s16048_s21 + $0x290] sm:$0xff] }
0x1068   :  { %12605 = vmatprep.mubr.msk.f32.mxu1 %vm4706_vm12, %v10717_v53  ;;  %v14681_v53 = vunpack.i.h.bf16 %v16362_v55 }
0x1069   :  { %v8704_v57 = vpop.permute.xlu0 %8703  ;;  %12739 = vmatmul.mubr.msk.f32.gmra.mrb[40].mxu0 %vm4706_vm12, %v10824_v52  ;;  %v14680_v52 = vunpack.i.l.bf16 %v16362_v55  ;;  %v10914_v55 = vld [vmem:[%s16048_s21 + $0x2b8] sm:$0xff] }
0x106a   :  { %v8706_v59 = vadd.f32 %v8704_v57, %v8700_v51  ;;  %12741 = vmatprep.mubr.msk.f32.mxu0 %vm4706_vm12, %v10825_v56  ;;  %v10912_v56 = vld [vmem:[%s16048_s21 + $0x2a8] sm:$0xff]  ;;  %v10913_v51 = vld [vmem:[%s16048_s21 + $0x2b0] sm:$0xff]  ;;  %v14691_v57 = vunpack.i.h.bf16 %v16384_v29 }
0x106b   :  { %12606 = vmatmul.mubr.msk.f32.gmra.mrb[50].mxu1 %vm4706_vm12, %v10718_v48  ;;  %v13796_v48 = vpack.c.bf16 %v14681_v53, %v14680_v52 }
0x106c   :  { %12881 = vmatpush3.msra.mxu1 %v8706_v59  ;;  %12882 = vmatprep.mubr.msk.f32.mxu1 %vm14819_vm7, %v14817_v14  ;;  %v14690_v59 = vunpack.i.l.bf16 %v16384_v29  ;;  %v10916_v29 = vld [vmem:[%s16048_s21 + $0x2c8] sm:$0xff] }
0x106d   :  { %12742 = vmatmul.mubr.msk.f32.gmra.mrb[42].mxu0 %vm4706_vm12, %v10826_v61  ;;  %v10915_v61 = vld [vmem:[%s16048_s21 + $0x2c0] sm:$0xff]  ;;  %v8486_v28 = vpop.permute.xlu0 %8485 }
0x106e   :  { %12760 = vmatprep.mubr.msk.f32.mxu0 %vm4706_vm12, %v10847_v63  ;;  %v13802_v63 = vpack.c.bf16 %v14691_v57, %v14690_v59 }
0x106f   :  { %12883 = vmatmul.mubr.msk.f32.vlgmr.msra.gmra.mrb[52].mxu1 %vm6587_vm2, %v8707_v0  ;;  %v14701_v0 = vunpack.i.h.bf16 %v16416_v49  ;;  %v10918_v49 = vld [vmem:[%s16048_s21 + $0x2d8] sm:$0xff] }
0x1071   :  { %12761 = vmatmul.mubr.msk.f32.vlgmr.msra.gmra.mrb[32].mxu0 %vm4706_vm12, %v10848_v4  ;;  %v13808_v4 = vpack.c.bf16 %v14701_v0, %v14700_v1  ;;  %v8501_v3 = vpop.permute.xlu0 %8500 }
0x1072   :  { %13747 = vmatpush3.bf16.msk.msra.mxu0 %vm16407_vm6, %v13742_v54  ;;  %12763 = vmatprep.mubr.msk.f32.mxu0 %vm4706_vm12, %v10849_v60  ;;  %v10890_v54 = vld [vmem:[%s16048_s21 + $0x298] sm:$0xff]  ;;  %v10919_v60 = vld [vmem:[%s16048_s21 + $0x2e0] sm:$0xff] }
0x1073   :  { %13750 = vmatprep.subr.msk.bf16.mxu0 %vm16407_vm6, %v13748_v7 }
0x1075   :  { %12764 = vmatmul.mubr.msk.f32.gmra.mrb[34].mxu0 %vm4706_vm12, %v10850_v11  ;;  %v10943_v11 = vld [vmem:[%s16048_s21 + $0x300] sm:$0xff] }
0x1076   :  { %13753 = vmatpush3.bf16.msk.msra.mxu0 %vm16407_vm6, %v13748_v7  ;;  %12766 = vmatprep.mubr.msk.f32.mxu0 %vm4706_vm12, %v10851_v17  ;;  %v10922_v7 = vld [vmem:[%s16048_s21 + $0x2f8] sm:$0xff]  ;;  %v10944_v17 = vld [vmem:[%s16048_s21 + $0x308] sm:$0xff] }
0x1077   :  { %13756 = vmatprep.subr.msk.bf16.mxu0 %vm16407_vm6, %v13754_v19 }
0x1079   :  { %12767 = vmatmul.mubr.msk.f32.gmra.mrb[36].mxu0 %vm4706_vm12, %v10852_v25  ;;  %v10948_v25 = vld [vmem:[%s16048_s21 + $0x328] sm:$0xff] }
0x107a   :  { %13759 = vmatpush3.bf16.msk.msra.mxu0 %vm16407_vm6, %v13754_v19  ;;  %12769 = vmatprep.mubr.msk.f32.mxu0 %vm4706_vm12, %v10853_v34  ;;  %v10945_v19 = vld [vmem:[%s16048_s21 + $0x310] sm:$0xff] }
0x107b   :  { %13762 = vmatprep.subr.msk.bf16.mxu0 %vm16407_vm6, %v13760_v16  ;;  %v10949_v34 = vld [vmem:[%s16048_s21 + $0x330] sm:$0xff] }
0x107d   :  { %12770 = vmatmul.mubr.msk.f32.gmra.mrb[38].mxu0 %vm4706_vm12, %v10854_v32  ;;  %v10953_v32 = vld [vmem:[%s16048_s21 + $0x350] sm:$0xff] }
0x107e   :  { %13765 = vmatpush3.bf16.msk.msra.mxu0 %vm16407_vm6, %v13760_v16  ;;  %12772 = vmatprep.mubr.msk.f32.mxu0 %vm4706_vm12, %v10855_v33  ;;  %v10952_v16 = vld [vmem:[%s16048_s21 + $0x348] sm:$0xff]  ;;  %v10954_v33 = vld [vmem:[%s16048_s21 + $0x358] sm:$0xff]  ;;  %s14829_s21 = smov 31  }
0x107f   :  { %13768 = vmatprep.subr.msk.bf16.mxu0 %vm16476_vm10, %v13766_v35  ;;  %s16797_s12 = sld [smem:[%s16897_s0 + %s14829_s21]]  }
0x1081   :  { %12773 = vmatmul.mubr.msk.f32.gmra.mrb[40].mxu0 %vm4706_vm12, %v10856_v36 }
0x1082   :  { %12775 = vmatprep.mubr.msk.f32.mxu0 %vm4706_vm12, %v10857_v6 }
0x1085   :  { %12776 = vmatmul.mubr.msk.f32.gmra.mrb[42].mxu0 %vm4706_vm12, %v10858_v37 }
0x1086   :  { %12794 = vmatprep.mubr.msk.f32.mxu0 %vm4706_vm12, %v10879_v12 }
0x1089   :  { %12795 = vmatmul.mubr.msk.f32.vlgmr.msra.gmra.mrb[32].mxu0 %vm4706_vm12, %v10880_v15 }
0x108a   :  { %13771 = vmatpush3.bf16.msk.msra.mxu0 %vm16476_vm10, %v13766_v35  ;;  %12797 = vmatprep.mubr.msk.f32.mxu0 %vm4706_vm12, %v10881_v18 }
0x108b   :  { %13774 = vmatprep.subr.msk.bf16.mxu0 %vm16476_vm10, %v13772_v38 }
0x108d   :  { %12798 = vmatmul.mubr.msk.f32.gmra.mrb[34].mxu0 %vm4706_vm12, %v10882_v42 }
0x108e   :  { %13777 = vmatpush3.bf16.msk.msra.mxu0 %vm16476_vm10, %v13772_v38  ;;  %12800 = vmatprep.mubr.msk.f32.mxu0 %vm4706_vm12, %v10883_v39  ;;  %v8481_v38 = vpop.permute.xlu1 %8480 }
0x108f   :  { %13780 = vmatprep.subr.msk.bf16.mxu0 %vm16476_vm10, %v13778_v20 }
0x1091   :  { %12801 = vmatmul.mubr.msk.f32.gmra.mrb[36].mxu0 %vm4706_vm12, %v10884_v41 }
0x1092   :  { %13783 = vmatpush3.bf16.msk.msra.mxu0 %vm16476_vm10, %v13778_v20  ;;  %12803 = vmatprep.mubr.msk.f32.mxu0 %vm4706_vm12, %v10885_v43  ;;  %v8496_v41 = vpop.permute.xlu1 %8495 }
0x1093   :  { %13786 = vmatprep.subr.msk.bf16.mxu0 %vm16476_vm10, %v13784_v40 }
0x1095   :  { %12804 = vmatmul.mubr.msk.f32.gmra.mrb[38].mxu0 %vm4706_vm12, %v10886_v30 }
0x1096   :  { %13789 = vmatpush3.bf16.msk.msra.mxu0 %vm16476_vm10, %v13784_v40  ;;  %12806 = vmatprep.mubr.msk.f32.mxu0 %vm4706_vm12, %v10887_v45 }
0x1097   :  { %13792 = vmatprep.subr.msk.bf16.mxu0 %vm16530_vm11, %v13790_v13 }
0x1099   :  { %12807 = vmatmul.mubr.msk.f32.gmra.mrb[40].mxu0 %vm4706_vm12, %v10888_v46 }
0x109a   :  { %12809 = vmatprep.mubr.msk.f32.mxu0 %vm4706_vm12, %v10889_v47 }
0x109d   :  { %12810 = vmatmul.mubr.msk.f32.gmra.mrb[42].mxu0 %vm4706_vm12, %v10890_v54  ;;  %v8491_v54 = vpop.permute.xlu1 %8490 }
0x109e   :  { %12828 = vmatprep.mubr.msk.f32.mxu0 %vm4706_vm12, %v10911_v50 }
0x10a1   :  { %12829 = vmatmul.mubr.msk.f32.vlgmr.msra.gmra.mrb[32].mxu0 %vm4706_vm12, %v10912_v56 }
0x10a2   :  { %13795 = vmatpush3.bf16.msk.msra.mxu0 %vm16530_vm11, %v13790_v13  ;;  %12831 = vmatprep.mubr.msk.f32.mxu0 %vm4706_vm12, %v10913_v51 }
0x10a3   :  { %13798 = vmatprep.subr.msk.bf16.mxu0 %vm16530_vm11, %v13796_v48 }
0x10a5   :  { %12832 = vmatmul.mubr.msk.f32.gmra.mrb[34].mxu0 %vm4706_vm12, %v10914_v55 }
0x10a6   :  { %13801 = vmatpush3.bf16.msk.msra.mxu0 %vm16530_vm11, %v13796_v48  ;;  %12834 = vmatprep.mubr.msk.f32.mxu0 %vm4706_vm12, %v10915_v61  ;;  %v8511_v61 = vpop.permute.xlu0 %8510 }
0x10a7   :  { %13804 = vmatprep.subr.msk.bf16.mxu0 %vm16530_vm11, %v13802_v63 }
0x10a9   :  { %12835 = vmatmul.mubr.msk.f32.gmra.mrb[36].mxu0 %vm4706_vm12, %v10916_v29 }
0x10aa   :  { %13807 = vmatpush3.bf16.msk.msra.mxu0 %vm16530_vm11, %v13802_v63  ;;  %12837 = vmatprep.mubr.msk.f32.mxu0 %vm4706_vm12, %v10917_v2 }
0x10ab   :  { %13810 = vmatprep.subr.msk.bf16.mxu0 %vm16530_vm11, %v13808_v4 }
0x10ad   :  { %12838 = vmatmul.mubr.msk.f32.gmra.mrb[38].mxu0 %vm4706_vm12, %v10918_v49 }
0x10ae   :  { %13813 = vmatpush3.bf16.msk.msra.mxu0 %vm16530_vm11, %v13808_v4  ;;  %12840 = vmatprep.mubr.msk.f32.mxu0 %vm4706_vm12, %v10919_v60 }
0x10b1   :  { %12841 = vmatmul.mubr.msk.f32.gmra.mrb[40].mxu0 %vm4706_vm12, %v10920_v8  ;;  %v8516_v8 = vpop.permute.xlu1 %8515 }
0x10b2   :  { %12843 = vmatprep.mubr.msk.f32.mxu0 %vm4706_vm12, %v10921_v9 }
0x10b5   :  { %12844 = vmatmul.mubr.msk.f32.gmra.mrb[42].mxu0 %vm4706_vm12, %v10922_v7 }
0x10b6   :  { %12862 = vmatprep.mubr.msk.f32.mxu0 %vm4706_vm12, %v10943_v11  ;;  %v8506_v11 = vpop.permute.xlu0 %8505 }
0x10b9   :  { %12863 = vmatmul.mubr.msk.f32.vlgmr.msra.gmra.mrb[32].mxu0 %vm4706_vm12, %v10944_v17 }
0x10ba   :  { %12865 = vmatprep.mubr.msk.f32.mxu0 %vm4706_vm12, %v10945_v19 }
0x10bd   :  { %12866 = vmatmul.mubr.msk.f32.gmra.mrb[34].mxu0 %vm4706_vm12, %v10946_v23 }
0x10be   :  { %12868 = vmatprep.mubr.msk.f32.mxu0 %vm4706_vm12, %v10947_v10 }
0x10c1   :  { %12869 = vmatmul.mubr.msk.f32.gmra.mrb[36].mxu0 %vm4706_vm12, %v10948_v25 }
0x10c2   :  { %12871 = vmatprep.mubr.msk.f32.mxu0 %vm4706_vm12, %v10949_v34 }
0x10c5   :  { %12872 = vmatmul.mubr.msk.f32.gmra.mrb[38].mxu0 %vm4706_vm12, %v10950_v26  ;;  %v8521_v26 = vpop.permute.xlu1 %8520 }
0x10c6   :  { %12874 = vmatprep.mubr.msk.f32.mxu0 %vm4706_vm12, %v10951_v31 }
0x10c9   :  { %12875 = vmatmul.mubr.msk.f32.gmra.mrb[40].mxu0 %vm4706_vm12, %v10952_v16 }
0x10ca   :  { %12877 = vmatprep.mubr.msk.f32.mxu0 %vm4706_vm12, %v10953_v32 }
0x10cd   :  { %12878 = vmatmul.mubr.msk.f32.gmra.mrb[42].mxu0 %vm4706_vm12, %v10954_v33  ;;  %v8708_v33 = vld [vmem:[%s10141_s20] sm:$0xff]  ;;  %vm10102_vm12 = vcmask 30720  }
0x1129   :  { %v12592_v5 = vpop.f32.mrb[40].mxu1 }
0x112a   :  { %v6698_v35 = vpop.f32.mrb[41].mxu1 }
0x112e   :  { %v12595_v36 = vpop.f32.mrb[42].mxu1 }
0x112f   :  { %v6708_v6 = vpop.f32.mrb[43].mxu1 }
0x1132   :  { %v12598_v37 = vpop.f32.mrb[44].mxu1 }
0x1133   :  { %v6718_v12 = vpop.f32.mrb[45].mxu1 }
0x1136   :  { %v12601_v22 = vpop.f32.mrb[46].mxu1 }
0x1137   :  { %v6728_v58 = vpop.f32.mrb[47].mxu1 }
0x113a   :  { %v12604_v15 = vpop.f32.mrb[48].mxu1 }
0x113b   :  { %v6738_v18 = vpop.f32.mrb[49].mxu1 }
0x113e   :  { %v12607_v21 = vpop.f32.mrb[50].mxu1 }
0x113f   :  { %v6748_v24 = vpop.f32.mrb[51].mxu1 }
0x118c   :  { %v12864_v42 = vpop.f32.mrb[32].mxu0 }
0x118d   :  { %v16614_v39 = vadd.f32 %v12864_v42, %v12592_v5  ;;  %v8380_v20 = vpop.f32.mrb[33].mxu0  ;;  %v8828_v42 = vld [vmem:[%s16146_s1 + $0x30] sm:$0xff] }
0x118e   :  { %v16616_v27 = vadd.f32 %v8380_v20, %v6698_v35  ;;  %v16632_v35 = vpop.f32.mrb[52].mxu1  ;;  %v8827_v20 = vld [vmem:[%s16146_s1 + $0x28] sm:$0xff] }
0x1190   :  { %v12867_v43 = vpop.f32.mrb[34].mxu0 }
0x1191   :  { %v13854_v40 = vadd.f32 %v12867_v43, %v12595_v36  ;;  %v8390_v44 = vpop.f32.mrb[35].mxu0  ;;  %v8593_v36 = vld [vmem:[%s16125_s22 + $0x10] sm:$0xff]  ;;  %v8830_v43 = vld [vmem:[%s16146_s1 + $0x40] sm:$0xff] }
0x1192   :  { %v16618_v62 = vadd.f32 %v8390_v44, %v6708_v6  ;;  %v8592_v6 = vld [vmem:[%s16125_s22 + $0x8] sm:$0xff] }
0x1193   :  { %v8526_v30 = vadd.f32 %v13854_v40, %v8481_v38  ;;  %v8823_v38 = vld [vmem:[%s16125_s22 + $0x28] sm:$0xff]  ;;  %v8829_v40 = vld [vmem:[%s16146_s1 + $0x38] sm:$0xff] }
0x1194   :  { %v12870_v45 = vpop.f32.mrb[36].mxu0 }
0x1195   :  { %v8538_v13 = vmax.f32 %v8526_v30, 0.0  ;;  %v13856_v46 = vadd.f32 %v12870_v45, %v12598_v37  ;;  %v8400_v47 = vpop.f32.mrb[37].mxu0  ;;  %v12884_v37 = vpop.f32.mrb[53].mxu1 }
0x1196   :  { %v13857_v50 = vadd.f32 %v8400_v47, %v6718_v12  ;;  %v8595_v12 = vld [vmem:[%s16146_s1 + $0x8] sm:$0xff]  ;;  %v9058_v47 = vld [vmem:[%s10145_s11 + $0x18] sm:$0xff] }
0x1197   :  { %v8528_v53 = vadd.f32 %v13856_v46, %v8491_v54  ;;  %8550 = vrot.lane.b32.xlu1 %v8538_v13, %s14778_s6  ;;  %v9056_v13 = vld [vmem:[%s10145_s11 + $0x8] sm:$0xff]  ;;  %v9055_v46 = vld [vmem:[%s10145_s11] sm:$0xff]  ;;  %v9057_v54 = vld [vmem:[%s10145_s11 + $0x10] sm:$0xff] }
0x1198   :  { %v8527_v52 = vadd.f32 %v13857_v50, %v8486_v28  ;;  %v12873_v56 = vpop.f32.mrb[38].mxu0  ;;  %v8826_v28 = vld [vmem:[%s16125_s22 + $0x40] sm:$0xff]  ;;  %v9185_v50 = vld [vmem:[%s16125_s22 + $0x50] sm:$0xff] }
0x1199   :  { %v8540_v51 = vmax.f32 %v8528_v53, 0.0  ;;  %v13858_v48 = vadd.f32 %v12873_v56, %v12601_v22  ;;  %v8410_v57 = vpop.f32.mrb[39].mxu0  ;;  %v8594_v22 = vld [vmem:[%s16125_s22 + $0x18] sm:$0xff]  ;;  %v9184_v53 = vld [vmem:[%s16125_s22 + $0x48] sm:$0xff] }
0x119a   :  { %v8539_v59 = vmax.f32 %v8527_v52, 0.0  ;;  %v13859_v55 = vadd.f32 %v8410_v57, %v6728_v58  ;;  %v8597_v58 = vld [vmem:[%s16146_s1 + $0x18] sm:$0xff]  ;;  %v9189_v52 = vld [vmem:[%s16146_s1 + $0x50] sm:$0xff]  ;;  %v9188_v56 = vld [vmem:[%s16146_s1 + $0x48] sm:$0xff] }
0x119b   :  { %v8530_v63 = vadd.f32 %v13858_v48, %v8501_v3  ;;  %8554 = vrot.lane.b32.xlu1 %v8540_v51, %s14778_s6  ;;  %v9187_v51 = vld [vmem:[%s16125_s22 + $0x60] sm:$0xff]  ;;  %v9186_v48 = vld [vmem:[%s16125_s22 + $0x58] sm:$0xff] }
0x119c   :  { %v8529_v0 = vadd.f32 %v13859_v55, %v8496_v41  ;;  %8552 = vrot.lane.b32.xlu0 %v8539_v59, %s14778_s6  ;;  %v12876_v1 = vpop.f32.mrb[40].mxu0  ;;  %v8825_v41 = vld [vmem:[%s16125_s22 + $0x38] sm:$0xff]  ;;  %v9191_v57 = vld [vmem:[%s16146_s1 + $0x60] sm:$0xff]  ;;  %v9705_v55 = vld [vmem:[%s16665_s24 + $0x8] sm:$0xff]  ;;  %s14828_s6 = smov 32  }
0x119d   :  { %v8542_v29 = vmax.f32 %v8530_v63, 0.0  ;;  %v13860_v2 = vadd.f32 %v12876_v1, %v12604_v15  ;;  %v8420_v4 = vpop.f32.mrb[41].mxu0  ;;  %v8596_v15 = vld [vmem:[%s16146_s1 + $0x10] sm:$0xff]  ;;  %v9190_v59 = vld [vmem:[%s16146_s1 + $0x58] sm:$0xff]  ;;  %v9709_v63 = vld [vmem:[%s16665_s24 + $0x28] sm:$0xff] }
0x119e   :  { %v8541_v49 = vmax.f32 %v8529_v0, 0.0  ;;  %v13861_v60 = vadd.f32 %v8420_v4, %v6738_v18  ;;  %v8789_v18 = vld [vmem:[%s16146_s1 + $0x20] sm:$0xff]  ;;  %v9710_v1 = vld [vmem:[%s16665_s24 + $0x30] sm:$0xff]  ;;  %v9707_v4 = vld [vmem:[%s16665_s24 + $0x18] sm:$0xff] }
0x119f   :  { %v8532_v9 = vadd.f32 %v13860_v2, %v8511_v61  ;;  %v9704_v61 = vld [vmem:[%s16665_s24] sm:$0xff]  ;;  %v9711_v2 = vld [vmem:[%s16665_s24 + $0x38] sm:$0xff] }
0x11a0   :  { %8564 = vrot.lane.b32.xlu0 %v8542_v29, %s14788_s18  ;;  %8562 = vrot.lane.b32.xlu1 %v8541_v49, %s14788_s18  ;;  %v12879_v7 = vpop.f32.mrb[42].mxu0  ;;  %v8531_v10 = vadd.f32 %v13861_v60, %v8506_v11  ;;  %v9708_v0 = vld [vmem:[%s16665_s24 + $0x20] sm:$0xff]  ;;  %v9706_v29 = vld [vmem:[%s16665_s24 + $0x10] sm:$0xff]  ;;  %v8471_v11 = vpop.permute.xlu1 %8470 }
0x11a1   :  { %v8544_v17 = vmax.f32 %v8532_v9, 0.0  ;;  %v13862_v19 = vadd.f32 %v12879_v7, %v12607_v21  ;;  %v8430_v23 = vpop.f32.mrb[43].mxu0  ;;  %v8788_v21 = vld [vmem:[%s16125_s22 + $0x20] sm:$0xff]  ;;  %v9717_v49 = vld [vmem:[%s16665_s24 + $0x68] sm:$0xff]  ;;  %v8466_v7 = vpop.permute.xlu0 %8465  ;;  %v8524_v37 = vadd.f32 %v16614_v39, %v8471_v11 }
0x11a2   :  { %v13863_v25 = vadd.f32 %v8430_v23, %v6748_v24  ;;  %v8543_v31 = vmax.f32 %v8531_v10, 0.0  ;;  %v8824_v24 = vld [vmem:[%s16125_s22 + $0x30] sm:$0xff]  ;;  %v9716_v60 = vld [vmem:[%s16665_s24 + $0x60] sm:$0xff]  ;;  %v9715_v10 = vld [vmem:[%s16665_s24 + $0x58] sm:$0xff] }
0x11a3   :  { %v8534_v16 = vadd.f32 %v13862_v19, %v8521_v26  ;;  %v9712_v9 = vld [vmem:[%s16665_s24 + $0x40] sm:$0xff]  ;;  %v9718_v19 = vld [vmem:[%s16665_s24 + $0x70] sm:$0xff] }
0x11a4   :  { %v8533_v34 = vadd.f32 %v13863_v25, %v8516_v8  ;;  %8574 = vrot.lane.b32.xlu0 %v8544_v17, %s14791_s26  ;;  %v9713_v8 = vld [vmem:[%s16665_s24 + $0x48] sm:$0xff]  ;;  %v9714_v17 = vld [vmem:[%s16665_s24 + $0x50] sm:$0xff]  ;;  %v9719_v25 = vld [vmem:[%s16665_s24 + $0x78] sm:$0xff] }
0x11a5   :  { %v8546_v5 = vmax.f32 %v8534_v16, 0.0  ;;  %v9925_v26 = vld [vmem:[%s16125_s22 + $0x70] sm:$0xff] }
0x11a6   :  { %v8545_v32 = vmax.f32 %v8533_v34, 0.0  ;;  %v8476_v34 = vpop.permute.xlu0 %8475 }
0x11a8   :  { %8566 = vrot.lane.b32.xlu0 %v8543_v31, %s14788_s18  ;;  %8576 = vrot.lane.b32.xlu1 %v8545_v32, %s14791_s26  ;;  %s14821_s18 = smov 28   ;;  %v9924_v31 = vld [vmem:[%s16125_s22 + $0x68] sm:$0xff] }
0x11a9   :  { %s10143_s14 = sld [smem:[%s16897_s0 + %s14821_s18]]  }
0x11ac   :  { %8711 = vperm.xlu0 %14230, %v8708_v33   ;;  %8578 = vrot.lane.b32.xlu1 %v8546_v5, %s14791_s26  ;;  %v8523_v33 = vadd.f32 %v16616_v27, %v8466_v7  ;;  %v9929_v5 = vld [vmem:[%s16146_s1 + $0x70] sm:$0xff]  ;;  %v8536_v27 = vmax.f32 %v8524_v37, 0.0  ;;  %s16763_s26 = sld [smem:[%s16897_s0 + %s14828_s6]]  }
0x11af   :  { %v8927_v44 = vld [vmem:[%s10143_s14 + $0x8] sm:$0xff]  ;;  %v8926_v30 = vld [vmem:[%s10143_s14] sm:$0xff]  ;;  %v8929_v45 = vld [vmem:[%s10143_s14 + $0x18] sm:$0xff] }
0x11b0   :  { %8641 = vperm.xlu0 %14230, %v8593_v36   ;;  %8636 = vperm.xlu1 %14231, %v8592_v6   ;;  %v8928_v3 = vld [vmem:[%s10143_s14 + $0x10] sm:$0xff]  ;;  %v9928_v36 = vld [vmem:[%s16146_s1 + $0x68] sm:$0xff] }
0x11b4   :  { %8654 = vperm.xlu0 %14230, %v8595_v12   ;;  %8646 = vperm.xlu1 %14231, %v8594_v22   ;;  %v8535_v12 = vmax.f32 %v8523_v33, 0.0 }
0x11b8   :  { %8664 = vperm.xlu0 %14230, %v8597_v58   ;;  %8659 = vperm.xlu1 %14231, %v8596_v15   ;;  %v9927_v58 = vld [vmem:[%s16125_s22 + $0x80] sm:$0xff]  ;;  %v9926_v15 = vld [vmem:[%s16125_s22 + $0x78] sm:$0xff]  ;;  %s14825_s22 = smov 27  }
0x11b9   :  { %s16714_s15 = sld [smem:[%s16897_s0 + %s14825_s22]]  }
0x11bc   :  { %8819 = vperm.xlu0 %14230, %v8789_v18   ;;  %8813 = vperm.xlu1 %14231, %v8788_v21   ;;  %v8525_v21 = vadd.f32 %v16618_v62, %v8476_v34 }
0x11c0   :  { %8881 = vperm.xlu0 %14230, %v8824_v24   ;;  %8876 = vperm.xlu1 %14231, %v8823_v38  }
0x11c4   :  { %8905 = vperm.xlu0 %14230, %v8828_v42   ;;  %8900 = vperm.xlu1 %14231, %v8827_v20   ;;  %v9931_v20 = vld [vmem:[%s16146_s1 + $0x80] sm:$0xff] }
0x11c8   :  { %8891 = vperm.xlu0 %14230, %v8826_v28   ;;  %8886 = vperm.xlu1 %14231, %v8825_v41   ;;  %v9930_v28 = vld [vmem:[%s16146_s1 + $0x78] sm:$0xff]  ;;  %s10152_s1 = sld [smem:[%s16897_s0 + %s14833_s27]]  }
0x11cc   :  { %8915 = vperm.xlu0 %14230, %v8830_v43   ;;  %8910 = vperm.xlu1 %14231, %v8829_v40   ;;  %v8537_v40 = vmax.f32 %v8525_v21, 0.0 }
0x11d0   :  { %8937 = vperm.xlu0 %14230, %v8927_v44   ;;  %8932 = vperm.xlu1 %14231, %v8926_v30  }
0x11d4   :  { %8947 = vperm.xlu0 %14230, %v8929_v45   ;;  %8942 = vperm.xlu1 %14231, %v8928_v3  }
0x11d8   :  { %9066 = vperm.xlu0 %14230, %v9056_v13   ;;  %9061 = vperm.xlu1 %14231, %v9055_v46   ;;  %v10023_v46 = vld [vmem:[%s10150_s28] sm:$0x7f] }
0x11dc   :  { %9076 = vperm.xlu0 %14230, %v9058_v47   ;;  %9071 = vperm.xlu1 %14231, %v9057_v54  }
0x11e0   :  { %9241 = vperm.xlu0 %14230, %v9185_v50   ;;  %9236 = vperm.xlu1 %14231, %v9184_v53  }
0x11e4   :  { %9265 = vperm.xlu0 %14230, %v9189_v52   ;;  %9260 = vperm.xlu1 %14231, %v9188_v56  }
0x11e8   :  { %9251 = vperm.xlu0 %14230, %v9187_v51   ;;  %9246 = vperm.xlu1 %14231, %v9186_v48  }
0x11ec   :  { %9275 = vperm.xlu0 %14230, %v9191_v57   ;;  %9270 = vperm.xlu1 %14231, %v9190_v59  }
0x11f0   :  { %9727 = vperm.xlu0 %14230, %v9705_v55   ;;  %9722 = vperm.xlu1 %14231, %v9704_v61  }
0x11f4   :  { %9747 = vperm.xlu0 %14230, %v9709_v63   ;;  %9742 = vperm.xlu1 %14231, %v9708_v0   ;;  %v8922_v63 = vld [vmem:[%s16714_s15] sm:$0xff] }
0x11f5   :  { %12893 = vmatprep.mubr.msk.f32.mxu1 %vm1356_vm15, %v8922_v63 }
0x11f8   :  { %9752 = vperm.xlu0 %14230, %v9710_v1   ;;  %9732 = vperm.xlu1 %14231, %v9706_v29  }
0x11fc   :  { %9757 = vperm.xlu0 %14230, %v9711_v2   ;;  %9737 = vperm.xlu1 %14231, %v9707_v4  }
0x1200   :  { %9787 = vperm.xlu0 %14230, %v9717_v49   ;;  %9782 = vperm.xlu1 %14231, %v9716_v60  }
0x1204   :  { %9767 = vperm.xlu0 %14230, %v9713_v8   ;;  %9762 = vperm.xlu1 %14231, %v9712_v9  }
0x1208   :  { %9772 = vperm.xlu0 %14230, %v9714_v17   ;;  %9792 = vperm.xlu1 %14231, %v9718_v19  }
0x1209   :  { %v8551_v23 = vpop.permute.xlu1 %8550 }
0x120a   :  { %v8583_v24 = vsel %vm8269_vm14, %v8535_v12, %v8551_v23 }
0x120c   :  { %9777 = vperm.xlu0 %14230, %v9715_v10   ;;  %9797 = vperm.xlu1 %14231, %v9719_v25  }
0x120d   :  { %v8555_v32 = vpop.permute.xlu1 %8554 }
0x120e   :  { %v8553_v16 = vpop.permute.xlu0 %8552  ;;  %v8585_v3 = vsel %vm8269_vm14, %v8537_v40, %v8555_v32 }
0x120f   :  { %v8584_v38 = vsel %vm8269_vm14, %v8536_v27, %v8553_v16 }
0x1210   :  { %9981 = vperm.xlu0 %14230, %v9925_v26   ;;  %9976 = vperm.xlu1 %14231, %v9924_v31  }
0x1212   :  { %v8565_v6 = vpop.permute.xlu0 %8564  ;;  %v8563_v22 = vpop.permute.xlu1 %8562 }
0x1213   :  { %v8586_v39 = vsel %vm8050_vm8, %v8583_v24, %v8563_v22  ;;  %v8587_v41 = vsel %vm8050_vm8, %v8584_v38, %v8565_v6 }
0x1214   :  { %10005 = vperm.xlu0 %14230, %v9929_v5   ;;  %10000 = vperm.xlu1 %14231, %v9928_v36  }
0x1216   :  { %v8575_v18 = vpop.permute.xlu0 %8574 }
0x1217   :  { %v8589_v42 = vsel %vm7831_vm5, %v8586_v39, %v8575_v18 }
0x1218   :  { %9991 = vperm.xlu0 %14230, %v9927_v58   ;;  %9986 = vperm.xlu1 %14231, %v9926_v15   ;;  %v8598_v62 = vsel %vm7612_vm3, %v8589_v42, 0.0 }
0x121a   :  { %v8577_v43 = vpop.permute.xlu1 %8576  ;;  %v8567_v44 = vpop.permute.xlu0 %8566 }
0x121b   :  { %v8590_v30 = vsel %vm7831_vm5, %v8587_v41, %v8577_v43  ;;  %v8588_v47 = vsel %vm8050_vm8, %v8585_v3, %v8567_v44 }
0x121c   :  { %v8599_v45 = vsel %vm7612_vm3, %v8590_v30, 0.0  ;;  %10015 = vperm.xlu0 %14230, %v9931_v20   ;;  %10010 = vperm.xlu1 %14231, %v9930_v28  }
0x121d   :  { %v8600_v13 = vadd.f32 %v8599_v45, %v8598_v62 }
0x121e   :  { %v8579_v54 = vpop.permute.xlu1 %8578 }
0x121f   :  { %v8591_v50 = vsel %vm7831_vm5, %v8588_v47, %v8579_v54 }
0x1220   :  { %v8601_v53 = vsel %vm7612_vm3, %v8591_v50, 0.0  ;;  %10026 = vperm.xlu1 %14231, %v10023_v46  }
0x1221   :  { %v8602_v52 = vadd.f32 %v8601_v53, %v8600_v13 }
0x1223   :  { %v8603_v56 = vrot.slane %v8602_v52, 4 }
0x1225   :  { %v8604_v51 = vadd.f32 %v8603_v56, %v8602_v52 }
0x1227   :  { %v8605_v48 = vrot.slane %v8604_v51, 2 }
0x1229   :  { %v8606_v57 = vadd.f32 %v8605_v48, %v8604_v51 }
0x122b   :  { %v8607_v59 = vrot.slane %v8606_v57, 1  ;;  %v8712_v55 = vpop.permute.xlu0 %8711 }
0x122c   :  { %v8784_v61 = vadd.f32 %v16632_v35, %v8712_v55 }
0x122d   :  { %v8608_v0 = vadd.f32 %v8607_v59, %v8606_v57 }
0x122e   :  { %v8787_v1 = vmax.f32 %v8784_v61, 0.0 }
0x122f   :  { %v8610_v29 = vmul.f32 0.041666668, %v8608_v0  ;;  %v8642_v20 = vpop.permute.xlu0 %8641  ;;  %v8637_v28 = vpop.permute.xlu1 %8636 }
0x1230   :  { %v8790_v2 = vsel %vm7612_vm3, %v8787_v1, 0.0 }
0x1231   :  { %v8611_v4 = vsub.f32 %v8589_v42, %v8610_v29  ;;  %v8613_v49 = vsub.f32 %v8591_v50, %v8610_v29  ;;  %v8791_v60 = vrot.slane %v8790_v2, 4  ;;  %v8612_v8 = vsub.f32 %v8590_v30, %v8610_v29 }
0x1233   :  { %v8616_v9 = vmul.f32 %v8613_v49, %v8613_v49  ;;  %v8792_v7 = vadd.f32 %v8791_v60, %v8790_v2  ;;  %v8614_v11 = vmul.f32 %v8611_v4, %v8611_v4  ;;  %v8615_v17 = vmul.f32 %v8612_v8, %v8612_v8  ;;  %v8655_v44 = vpop.permute.xlu0 %8654  ;;  %v8647_v30 = vpop.permute.xlu1 %8646 }
0x1235   :  { %v8793_v19 = vrot.slane %v8792_v7, 2  ;;  %v8617_v23 = vsel %vm7612_vm3, %v8614_v11, 0.0  ;;  %v8618_v35 = vsel %vm7612_vm3, %v8615_v17, 0.0  ;;  %v8620_v25 = vsel %vm7612_vm3, %v8616_v9, 0.0 }
0x1236   :  { %v8619_v10 = vadd.f32 %v8618_v35, %v8617_v23 }
0x1237   :  { %v8794_v34 = vadd.f32 %v8793_v19, %v8792_v7  ;;  %v8665_v50 = vpop.permute.xlu0 %8664  ;;  %v8660_v53 = vpop.permute.xlu1 %8659 }
0x1238   :  { %v8621_v26 = vadd.f32 %v8620_v25, %v8619_v10 }
0x1239   :  { %v8795_v31 = vrot.slane %v8794_v34, 1 }
0x123a   :  { %v8622_v16 = vrot.slane %v8621_v26, 4 }
0x123b   :  { %v8796_v32 = vadd.f32 %v8795_v31, %v8794_v34  ;;  %v8820_v2 = vpop.permute.xlu0 %8819 }
0x123c   :  { %v8623_v33 = vadd.f32 %v8622_v16, %v8621_v26 }
0x123d   :  { %v8797_v5 = vmul.f32 0.125, %v8796_v32 }
0x123e   :  { %v8624_v36 = vrot.slane %v8623_v33, 2 }
0x123f   :  { %v8798_v6 = vsub.f32 %v8787_v1, %v8797_v5  ;;  %v8814_v1 = vpop.permute.xlu1 %8813 }
0x1240   :  { %v8625_v37 = vadd.f32 %v8624_v36, %v8623_v33 }
0x1241   :  { %v8799_v12 = vmul.f32 %v8798_v6, %v8798_v6 }
0x1242   :  { %v8626_v22 = vrot.slane %v8625_v37, 1 }
0x1243   :  { %v8800_v58 = vsel %vm7612_vm3, %v8799_v12, 0.0 }
0x1244   :  { %v8801_v15 = vrot.slane %v8800_v58, 4  ;;  %v8627_v18 = vadd.f32 %v8626_v22, %v8625_v37 }
0x1246   :  { %v8802_v27 = vadd.f32 %v8801_v15, %v8800_v58  ;;  %v8628_v21 = vmul.f32 0.041666668, %v8627_v18 }
0x1248   :  { %v8803_v24 = vrot.slane %v8802_v27, 2  ;;  %v8629_v39 = vadd.f32 1e-05, %v8628_v21 }
0x124a   :  { %v8804_v38 = vadd.f32 %v8803_v24, %v8802_v27  ;;  %14704 = vrsqrt.f32 %v8629_v39  ;;  %v8882_v39 = vpop.permute.xlu0 %8881 }
0x124c   :  { %v8805_v42 = vrot.slane %v8804_v38, 1 }
0x124e   :  { %v8806_v41 = vadd.f32 %v8805_v42, %v8804_v38  ;;  %v8877_v42 = vpop.permute.xlu1 %8876 }
0x1250   :  { %v8807_v43 = vmul.f32 0.125, %v8806_v41 }
0x1252   :  { %v8808_v40 = vadd.f32 1e-05, %v8807_v43  ;;  %v8901_v41 = vpop.permute.xlu1 %8900 }
0x1254   :  { %v14705_v62 = vpop.eup %14704  ;;  %14706 = vrsqrt.f32 %v8808_v40 }
0x1255   :  { %v8632_v45 = vmul.f32 %v14705_v62, %v8612_v8  ;;  %v8631_v3 = vmul.f32 %v14705_v62, %v8611_v4  ;;  %v8633_v13 = vmul.f32 %v14705_v62, %v8613_v49 }
0x1256   :  { %v8887_v40 = vpop.permute.xlu1 %8886 }
0x1257   :  { %v8650_v46 = vmul.f32 %v8642_v20, %v8632_v45  ;;  %v8649_v47 = vmul.f32 %v8637_v28, %v8631_v3  ;;  %v8651_v54 = vmul.f32 %v8647_v30, %v8633_v13  ;;  %v8906_v28 = vpop.permute.xlu0 %8905 }
0x1259   :  { %v8667_v52 = vadd.f32 %v8655_v44, %v8649_v47  ;;  %v8669_v56 = vadd.f32 %v8665_v50, %v8651_v54  ;;  %v8668_v51 = vadd.f32 %v8660_v53, %v8650_v46 }
0x125a   :  { %v8911_v53 = vpop.permute.xlu1 %8910 }
0x125b   :  { %v8831_v48 = vsel %vm7612_vm3, %v8667_v52, 0.0  ;;  %v8832_v57 = vsel %vm7612_vm3, %v8668_v51, 0.0  ;;  %v8834_v55 = vsel %vm7612_vm3, %v8669_v56, 0.0  ;;  %v8892_v43 = vpop.permute.xlu0 %8891 }
0x125c   :  { %v8833_v59 = vadd.f32 %v8832_v57, %v8831_v48 }
0x125e   :  { %v14707_v61 = vpop.eup %14706  ;;  %v8835_v63 = vadd.f32 %v8834_v55, %v8833_v59  ;;  %v8923_v55 = vld [vmem:[%s16714_s15 + $0x8] sm:$0xff] }
0x125f   :  { %v8810_v0 = vmul.f32 %v14707_v61, %v8798_v6  ;;  %v8916_v50 = vpop.permute.xlu0 %8915  ;;  %v8924_v61 = vld [vmem:[%s16714_s15 + $0x10] sm:$0xff] }
0x1261   :  { %v8816_v29 = vmul.f32 %v8814_v1, %v8810_v0  ;;  %v9051_v0 = vld [vmem:[%s10144_s5] sm:$0xff] }
0x1263   :  { %v8822_v4 = vadd.f32 %v8820_v2, %v8816_v29  ;;  %v8938_v1 = vpop.permute.xlu0 %8937  ;;  %v8933_v29 = vpop.permute.xlu1 %8932 }
0x1265   :  { %v8836_v49 = vsel %vm7612_vm3, %v8822_v4, 0.0 }
0x1266   :  { %v8837_v60 = vadd.f32 %v8836_v49, %v8835_v63  ;;  %v8925_v63 = vld [vmem:[%s16714_s15 + $0x18] sm:$0xff] }
0x1268   :  { %v8838_v8 = vrot.slane %v8837_v60, 4 }
0x126a   :  { %v8839_v9 = vadd.f32 %v8838_v8, %v8837_v60 }
0x126c   :  { %v8840_v7 = vrot.slane %v8839_v9, 2 }
0x126e   :  { %v8841_v11 = vadd.f32 %v8840_v7, %v8839_v9  ;;  %v8948_v9 = vpop.permute.xlu0 %8947 }
0x1270   :  { %v8842_v17 = vrot.slane %v8841_v11, 1 }
0x1272   :  { %v8843_v19 = vadd.f32 %v8842_v17, %v8841_v11  ;;  %v8943_v17 = vpop.permute.xlu1 %8942 }
0x1274   :  { %v8845_v23 = vmul.f32 0.03125, %v8843_v19 }
0x1276   :  { %v8849_v35 = vsub.f32 %v8822_v4, %v8845_v23  ;;  %v8846_v10 = vsub.f32 %v8667_v52, %v8845_v23  ;;  %v8847_v25 = vsub.f32 %v8668_v51, %v8845_v23  ;;  %v8848_v34 = vsub.f32 %v8669_v56, %v8845_v23 }
0x1278   :  { %v8850_v26 = vmul.f32 %v8846_v10, %v8846_v10  ;;  %v8851_v31 = vmul.f32 %v8847_v25, %v8847_v25  ;;  %v8852_v16 = vmul.f32 %v8848_v34, %v8848_v34  ;;  %v8853_v32 = vmul.f32 %v8849_v35, %v8849_v35 }
0x127a   :  { %v8854_v33 = vsel %vm7612_vm3, %v8850_v26, 0.0  ;;  %v8855_v5 = vsel %vm7612_vm3, %v8851_v31, 0.0  ;;  %v8857_v6 = vsel %vm7612_vm3, %v8852_v16, 0.0  ;;  %v8859_v12 = vsel %vm7612_vm3, %v8853_v32, 0.0  ;;  %v9052_v31 = vld [vmem:[%s10144_s5 + $0x8] sm:$0xff]  ;;  %v9053_v16 = vld [vmem:[%s10144_s5 + $0x10] sm:$0xff] }
0x127b   :  { %v8856_v36 = vadd.f32 %v8855_v5, %v8854_v33  ;;  %v9054_v32 = vld [vmem:[%s10144_s5 + $0x18] sm:$0xff]  ;;  %v9314_v33 = vld [vmem:[%s10136_s19] sm:$0xff]  ;;  %v9315_v5 = vld [vmem:[%s10136_s19 + $0x8] sm:$0xff] }
0x127d   :  { %v8858_v37 = vadd.f32 %v8857_v6, %v8856_v36  ;;  %v13830_v36 = vpack.c.bf16 %v9315_v5, %v9314_v33  ;;  %v9316_v6 = vld [vmem:[%s10136_s19 + $0x10] sm:$0xff] }
0x127f   :  { %v8860_v22 = vadd.f32 %v8859_v12, %v8858_v37  ;;  %v9317_v37 = vld [vmem:[%s10136_s19 + $0x18] sm:$0xff] }
0x1280   :  { %v13834_v12 = vpack.c.bf16 %v9317_v37, %v9316_v6 }
0x1281   :  { %v8861_v58 = vrot.slane %v8860_v22, 4 }
0x1283   :  { %v8862_v15 = vadd.f32 %v8861_v58, %v8860_v22  ;;  %v9298_v22 = vld [vmem:[%s16763_s26] sm:$0xff]  ;;  %v9299_v58 = vld [vmem:[%s16763_s26 + $0x8] sm:$0xff] }
0x1285   :  { %v8863_v18 = vrot.slane %v8862_v15, 2 }
0x1287   :  { %v8864_v27 = vadd.f32 %v8863_v18, %v8862_v15  ;;  %v9300_v15 = vld [vmem:[%s16763_s26 + $0x10] sm:$0xff]  ;;  %v9301_v18 = vld [vmem:[%s16763_s26 + $0x18] sm:$0xff] }
0x1289   :  { %v8865_v21 = vrot.slane %v8864_v27, 1 }
0x128b   :  { %v8866_v24 = vadd.f32 %v8865_v21, %v8864_v27  ;;  %v9302_v27 = vld [vmem:[%s16763_s26 + $0x20] sm:$0xff]  ;;  %v9303_v21 = vld [vmem:[%s16763_s26 + $0x28] sm:$0xff] }
0x128d   :  { %v8867_v38 = vmul.f32 0.03125, %v8866_v24  ;;  %v9304_v24 = vld [vmem:[%s16763_s26 + $0x30] sm:$0xff] }
0x128f   :  { %v8868_v20 = vadd.f32 1e-05, %v8867_v38  ;;  %v9306_v38 = vld [vmem:[%s16763_s26 + $0x40] sm:$0xff] }
0x1291   :  { %14708 = vrsqrt.f32 %v8868_v20  ;;  %v9308_v20 = vld [vmem:[%s16763_s26 + $0x50] sm:$0xff] }
0x129b   :  { %v14709_v44 = vpop.eup %14708 }
0x129c   :  { %v8871_v30 = vmul.f32 %v14709_v44, %v8847_v25  ;;  %v8870_v62 = vmul.f32 %v14709_v44, %v8846_v10  ;;  %v8873_v45 = vmul.f32 %v14709_v44, %v8849_v35  ;;  %v8872_v3 = vmul.f32 %v14709_v44, %v8848_v34  ;;  %v9313_v44 = vld [vmem:[%s16763_s26 + $0x78] sm:$0xff] }
0x129e   :  { %v8895_v13 = vmul.f32 %v8882_v39, %v8871_v30  ;;  %v8894_v46 = vmul.f32 %v8877_v42, %v8870_v62  ;;  %v8897_v47 = vmul.f32 %v8892_v43, %v8873_v45  ;;  %v8896_v54 = vmul.f32 %v8887_v40, %v8872_v3  ;;  %v9305_v39 = vld [vmem:[%s16763_s26 + $0x38] sm:$0xff]  ;;  %v9307_v42 = vld [vmem:[%s16763_s26 + $0x48] sm:$0xff]  ;;  %v9312_v40 = vld [vmem:[%s16763_s26 + $0x70] sm:$0xff]  ;;  %v9067_v62 = vpop.permute.xlu0 %9066  ;;  %v9062_v45 = vpop.permute.xlu1 %9061 }
0x129f   :  { %v9311_v43 = vld [vmem:[%s16763_s26 + $0x68] sm:$0xff]  ;;  %v9282_v30 = vld [vmem:[%s16797_s12] sm:$0xff] }
0x12a0   :  { %v16732_v52 = vadd.f32 %v8906_v28, %v8895_v13  ;;  %v16734_v56 = vadd.f32 %v8901_v41, %v8894_v46  ;;  %v16736_v51 = vadd.f32 %v8916_v50, %v8897_v47  ;;  %v16738_v48 = vadd.f32 %v8911_v53, %v8896_v54  ;;  %v9309_v28 = vld [vmem:[%s16763_s26 + $0x58] sm:$0xff]  ;;  %v9310_v41 = vld [vmem:[%s16763_s26 + $0x60] sm:$0xff] }
0x12a2   :  { %v13814_v57 = vpack.c.bf16 %v16732_v52, %v16734_v56  ;;  %v13818_v59 = vpack.c.bf16 %v16736_v51, %v16738_v48  ;;  %v9077_v50 = vpop.permute.xlu0 %9076 }
0x12a4   :  { %13815 = vmatprep.subr.bf16.mxu1 %v13814_v57 }
0x12a5   :  { %13817 = vmatpush3.bf16.msra.mxu1 %v13814_v57 }
0x12a6   :  { %13819 = vmatprep.subr.bf16.mxu1 %v13818_v59 }
0x12a9   :  { %13821 = vmatpush3.bf16.msra.mxu1 %v13818_v59  ;;  %v9072_v59 = vpop.permute.xlu1 %9071 }
0x12ac   :  { %12894 = vmatmul.mubr.msk.f32.vlgmr.msra.gmra.mrb[54].mxu1 %vm1356_vm15, %v8923_v55 }
0x12ad   :  { %12896 = vmatprep.mubr.msk.f32.mxu1 %vm1356_vm15, %v8924_v61 }
0x12b0   :  { %12897 = vmatmul.mubr.msk.f32.gmra.mrb[56].mxu1 %vm1356_vm15, %v8925_v63 }
0x12b1   :  { %12907 = vmatprep.mubr.msk.f32.mxu1 %vm1356_vm15, %v9051_v0 }
0x137f   :  { %v12895_v2 = vpop.f32.mrb[54].mxu1 }
0x1380   :  { %v9034_v4 = vadd.f32 %v12895_v2, %v8938_v1  ;;  %v9028_v49 = vpop.f32.mrb[55].mxu1 }
0x1381   :  { %v9029_v60 = vadd.f32 %v9028_v49, %v8933_v29 }
0x1382   :  { %v9048_v8 = vmax.f32 %v9034_v4, 0.0 }
0x1383   :  { %v9047_v7 = vmax.f32 %v9029_v60, 0.0  ;;  %v12898_v11 = vpop.f32.mrb[56].mxu1 }
0x1384   :  { %v9044_v19 = vadd.f32 %v12898_v11, %v8948_v9  ;;  %v9038_v23 = vpop.f32.mrb[57].mxu1 }
0x1385   :  { %v13822_v35 = vpack.c.bf16 %v9048_v8, %v9047_v7  ;;  %v9039_v10 = vadd.f32 %v9038_v23, %v8943_v17 }
0x1386   :  { %v9050_v25 = vmax.f32 %v9044_v19, 0.0 }
0x1387   :  { %v9049_v34 = vmax.f32 %v9039_v10, 0.0  ;;  %13823 = vmatprep.subr.bf16.mxu1 %v13822_v35 }
0x1388   :  { %13825 = vmatpush3.bf16.msra.mxu1 %v13822_v35 }
0x1389   :  { %v13826_v26 = vpack.c.bf16 %v9050_v25, %v9049_v34 }
0x138b   :  { %13827 = vmatprep.subr.bf16.mxu1 %v13826_v26 }
0x138c   :  { %13829 = vmatpush3.bf16.msra.mxu1 %v13826_v26 }
0x138d   :  { %13831 = vmatprep.subr.bf16.mxu1 %v13830_v36 }
0x138f   :  { %12908 = vmatmul.mubr.msk.f32.vlgmr.msra.gmra.mrb[58].mxu1 %vm1356_vm15, %v9052_v31 }
0x1390   :  { %12910 = vmatprep.mubr.msk.f32.mxu1 %vm1356_vm15, %v9053_v16  ;;  %13833 = vmatpush3.bf16.msra.mxu1 %v13830_v36 }
0x1391   :  { %13835 = vmatprep.subr.bf16.mxu1 %v13834_v12 }
0x1393   :  { %12911 = vmatmul.mubr.msk.f32.gmra.mrb[60].mxu1 %vm1356_vm15, %v9054_v32 }
0x1394   :  { %13837 = vmatpush3.bf16.msra.mxu1 %v13834_v12  ;;  %12921 = vmatprep.mubr.msk.f32.mxu1 %vm1356_vm15, %v9298_v22 }
0x1397   :  { %12922 = vmatmul.mubr.msk.f32.vlgmr.msra.gmra.mrb[62].mxu1 %vm1356_vm15, %v9299_v58 }
0x1398   :  { %12924 = vmatprep.mubr.msk.f32.mxu1 %vm1356_vm15, %v9300_v15 }
0x139b   :  { %12925 = vmatmul.mubr.msk.f32.gmra.mrb[64].mxu1 %vm1356_vm15, %v9301_v18 }
0x139c   :  { %12927 = vmatprep.mubr.msk.f32.mxu1 %vm1356_vm15, %v9302_v27 }
0x139f   :  { %12928 = vmatmul.mubr.msk.f32.gmra.mrb[66].mxu1 %vm1356_vm15, %v9303_v21 }
0x13a0   :  { %12930 = vmatprep.mubr.msk.f32.mxu1 %vm1356_vm15, %v9304_v24 }
0x13a3   :  { %12931 = vmatmul.mubr.msk.f32.gmra.mrb[68].mxu1 %vm1356_vm15, %v9305_v39 }
0x13a4   :  { %12933 = vmatprep.mubr.msk.f32.mxu1 %vm1356_vm15, %v9306_v38 }
0x13a7   :  { %12934 = vmatmul.mubr.msk.f32.gmra.mrb[70].mxu1 %vm1356_vm15, %v9307_v42  ;;  %v9242_v42 = vpop.permute.xlu0 %9241 }
0x13a8   :  { %12936 = vmatprep.mubr.msk.f32.mxu1 %vm1356_vm15, %v9308_v20  ;;  %v9237_v20 = vpop.permute.xlu1 %9236 }
0x13ab   :  { %12937 = vmatmul.mubr.msk.f32.gmra.mrb[72].mxu1 %vm1356_vm15, %v9309_v28 }
0x13ac   :  { %12939 = vmatprep.mubr.msk.f32.mxu1 %vm1356_vm15, %v9310_v41 }
0x13af   :  { %12940 = vmatmul.mubr.msk.f32.gmra.mrb[74].mxu1 %vm1356_vm15, %v9311_v43  ;;  %v9266_v43 = vpop.permute.xlu0 %9265 }
0x13b0   :  { %12942 = vmatprep.mubr.msk.f32.mxu1 %vm1356_vm15, %v9312_v40  ;;  %v9261_v40 = vpop.permute.xlu1 %9260 }
0x13b3   :  { %12943 = vmatmul.mubr.msk.f32.gmra.mrb[76].mxu1 %vm1356_vm15, %v9313_v44  ;;  %v9252_v44 = vpop.permute.xlu0 %9251 }
0x13b4   :  { %12953 = vmatprep.mubr.msk.f32.mxu1 %vm1356_vm15, %v9282_v30  ;;  %v9247_v30 = vpop.permute.xlu1 %9246 }
0x1462   :  { %v12909_v3 = vpop.f32.mrb[58].mxu1 }
0x1463   :  { %v9163_v13 = vadd.f32 %v12909_v3, %v9067_v62  ;;  %v9157_v46 = vpop.f32.mrb[59].mxu1 }
0x1464   :  { %v9158_v47 = vadd.f32 %v9157_v46, %v9062_v45 }
0x1465   :  { %v9177_v54 = vadd.f32 %v9163_v13, %v16732_v52 }
0x1466   :  { %v9176_v53 = vadd.f32 %v9158_v47, %v16734_v56  ;;  %v12912_v57 = vpop.f32.mrb[60].mxu1 }
0x1467   :  { %v9181_v55 = vmax.f32 %v9177_v54, 0.0  ;;  %v9173_v61 = vadd.f32 %v12912_v57, %v9077_v50  ;;  %v9167_v63 = vpop.f32.mrb[61].mxu1  ;;  %v9276_v57 = vpop.permute.xlu0 %9275 }
0x1468   :  { %v9180_v0 = vmax.f32 %v9176_v53, 0.0  ;;  %v9168_v1 = vadd.f32 %v9167_v63, %v9072_v59  ;;  %v9271_v59 = vpop.permute.xlu1 %9270 }
0x1469   :  { %v9193_v29 = vsel %vm7612_vm3, %v9181_v55, 0.0  ;;  %v9179_v2 = vadd.f32 %v9173_v61, %v16736_v51 }
0x146a   :  { %v9192_v4 = vsel %vm7612_vm3, %v9180_v0, 0.0  ;;  %v9178_v49 = vadd.f32 %v9168_v1, %v16738_v48 }
0x146b   :  { %v9194_v60 = vadd.f32 %v9193_v29, %v9192_v4  ;;  %v9183_v52 = vmax.f32 %v9179_v2, 0.0  ;;  %v9283_v2 = vld [vmem:[%s16797_s12 + $0x8] sm:$0xff]  ;;  %v9284_v4 = vld [vmem:[%s16797_s12 + $0x10] sm:$0xff] }
0x146c   :  { %v9182_v8 = vmax.f32 %v9178_v49, 0.0  ;;  %v9285_v49 = vld [vmem:[%s16797_s12 + $0x18] sm:$0xff] }
0x146d   :  { %v9197_v7 = vsel %vm7612_vm3, %v9183_v52, 0.0 }
0x146e   :  { %v9195_v56 = vsel %vm7612_vm3, %v9182_v8, 0.0 }
0x146f   :  { %v9196_v9 = vadd.f32 %v9195_v56, %v9194_v60  ;;  %v9286_v60 = vld [vmem:[%s16797_s12 + $0x20] sm:$0xff]  ;;  %v9289_v56 = vld [vmem:[%s16797_s12 + $0x38] sm:$0xff] }
0x1471   :  { %v9198_v11 = vadd.f32 %v9197_v7, %v9196_v9  ;;  %v9290_v9 = vld [vmem:[%s16797_s12 + $0x40] sm:$0xff]  ;;  %v9291_v7 = vld [vmem:[%s16797_s12 + $0x48] sm:$0xff] }
0x1473   :  { %v9199_v17 = vrot.slane %v9198_v11, 4 }
0x1475   :  { %v9200_v19 = vadd.f32 %v9199_v17, %v9198_v11  ;;  %v9292_v11 = vld [vmem:[%s16797_s12 + $0x50] sm:$0xff]  ;;  %v9293_v17 = vld [vmem:[%s16797_s12 + $0x58] sm:$0xff] }
0x1477   :  { %v9201_v23 = vrot.slane %v9200_v19, 2 }
0x1479   :  { %v9202_v35 = vadd.f32 %v9201_v23, %v9200_v19  ;;  %v9294_v19 = vld [vmem:[%s16797_s12 + $0x60] sm:$0xff]  ;;  %v9295_v23 = vld [vmem:[%s16797_s12 + $0x68] sm:$0xff] }
0x147b   :  { %v9203_v10 = vrot.slane %v9202_v35, 1 }
0x147d   :  { %v9204_v25 = vadd.f32 %v9203_v10, %v9202_v35  ;;  %v9296_v35 = vld [vmem:[%s16797_s12 + $0x70] sm:$0xff]  ;;  %v9297_v10 = vld [vmem:[%s16797_s12 + $0x78] sm:$0xff] }
0x147f   :  { %v9205_v51 = vmul.f32 0.03125, %v9204_v25  ;;  %v14830_v25 = vmov 0.0|0.0  }
0x1481   :  { %v9206_v34 = vsub.f32 %v9180_v0, %v9205_v51  ;;  %v9207_v26 = vsub.f32 %v9181_v55, %v9205_v51  ;;  %v9208_v31 = vsub.f32 %v9182_v8, %v9205_v51  ;;  %v9209_v48 = vsub.f32 %v9183_v52, %v9205_v51  ;;  %v9287_v52 = vld [vmem:[%s16797_s12 + $0x28] sm:$0xff]  ;;  %v9288_v8 = vld [vmem:[%s16797_s12 + $0x30] sm:$0xff]  ;;  %v9728_v51 = vpop.permute.xlu0 %9727 }
0x1483   :  { %v9210_v16 = vmul.f32 %v9206_v34, %v9206_v34  ;;  %v9211_v32 = vmul.f32 %v9207_v26, %v9207_v26  ;;  %v9212_v33 = vmul.f32 %v9208_v31, %v9208_v31  ;;  %v9213_v5 = vmul.f32 %v9209_v48, %v9209_v48 }
0x1485   :  { %v9214_v36 = vsel %vm7612_vm3, %v9210_v16, 0.0  ;;  %v9215_v6 = vsel %vm7612_vm3, %v9211_v32, 0.0  ;;  %v9217_v12 = vsel %vm7612_vm3, %v9212_v33, 0.0  ;;  %v9219_v58 = vsel %vm7612_vm3, %v9213_v5, 0.0 }
0x1486   :  { %v9216_v37 = vadd.f32 %v9215_v6, %v9214_v36 }
0x1488   :  { %v9218_v22 = vadd.f32 %v9217_v12, %v9216_v37 }
0x148a   :  { %v9220_v15 = vadd.f32 %v9219_v58, %v9218_v22 }
0x148c   :  { %v9221_v18 = vrot.slane %v9220_v15, 4 }
0x148e   :  { %v9222_v27 = vadd.f32 %v9221_v18, %v9220_v15 }
0x1490   :  { %v9223_v21 = vrot.slane %v9222_v27, 2 }
0x1492   :  { %v9224_v24 = vadd.f32 %v9223_v21, %v9222_v27 }
0x1494   :  { %v9225_v39 = vrot.slane %v9224_v24, 1 }
0x1496   :  { %v9226_v38 = vadd.f32 %v9225_v39, %v9224_v24 }
0x1498   :  { %v9227_v28 = vmul.f32 0.03125, %v9226_v38 }
0x149a   :  { %v9228_v41 = vadd.f32 1e-05, %v9227_v28 }
0x149c   :  { %14710 = vrsqrt.f32 %v9228_v41 }
0x14a6   :  { %v14711_v62 = vpop.eup %14710 }
0x14a7   :  { %v9232_v45 = vmul.f32 %v14711_v62, %v9208_v31  ;;  %v9230_v3 = vmul.f32 %v14711_v62, %v9206_v34  ;;  %v9231_v13 = vmul.f32 %v14711_v62, %v9207_v26  ;;  %v9233_v46 = vmul.f32 %v14711_v62, %v9209_v48  ;;  %v9723_v34 = vpop.permute.xlu1 %9722  ;;  %v9748_v26 = vpop.permute.xlu0 %9747 }
0x14a9   :  { %v9254_v47 = vmul.f32 %v9237_v20, %v9230_v3  ;;  %v9255_v54 = vmul.f32 %v9242_v42, %v9231_v13  ;;  %v9256_v50 = vmul.f32 %v9247_v30, %v9232_v45  ;;  %v9257_v53 = vmul.f32 %v9252_v44, %v9233_v46 }
0x14ab   :  { %v9278_v55 = vadd.f32 %v9261_v40, %v9254_v47  ;;  %v9279_v61 = vadd.f32 %v9266_v43, %v9255_v54  ;;  %v9280_v63 = vadd.f32 %v9271_v59, %v9256_v50  ;;  %v9281_v0 = vadd.f32 %v9276_v57, %v9257_v53  ;;  %v9743_v31 = vpop.permute.xlu1 %9742  ;;  %v9753_v48 = vpop.permute.xlu0 %9752 }
0x14ad   :  { %v13838_v1 = vpack.c.bf16 %v9279_v61, %v9278_v55  ;;  %v13842_v29 = vpack.c.bf16 %v9281_v0, %v9280_v63 }
0x14af   :  { %13839 = vmatprep.subr.bf16.mxu1 %v13838_v1  ;;  %v9733_v16 = vpop.permute.xlu1 %9732  ;;  %v9758_v32 = vpop.permute.xlu0 %9757 }
0x14b0   :  { %13841 = vmatpush3.bf16.msra.mxu1 %v13838_v1 }
0x14b1   :  { %13843 = vmatprep.subr.bf16.mxu1 %v13842_v29 }
0x14b3   :  { %v9738_v37 = vpop.permute.xlu1 %9737  ;;  %v16849_v22 = vpop.permute.xlu0 %9787 }
0x14b4   :  { %13845 = vmatpush3.bf16.msra.mxu1 %v13842_v29 }
0x14b5   :  { %13846 = vmatprep.subr.bf16.mxu1 %v14830_v25 }
0x14b7   :  { %12954 = vmatmul.mubr.msk.f32.vlgmr.msra.gmra.mrb[62].mxu1 %vm1356_vm15, %v9283_v2  ;;  %v9783_v20 = vpop.permute.xlu1 %9782  ;;  %v9768_v40 = vpop.permute.xlu0 %9767 }
0x14b8   :  { %12956 = vmatprep.mubr.msk.f32.mxu1 %vm1356_vm15, %v9284_v4 }
0x14bb   :  { %12957 = vmatmul.mubr.msk.f32.gmra.mrb[64].mxu1 %vm1356_vm15, %v9285_v49  ;;  %v9763_v53 = vpop.permute.xlu1 %9762  ;;  %v9773_v59 = vpop.permute.xlu0 %9772 }
0x14bc   :  { %12959 = vmatprep.mubr.msk.f32.mxu1 %vm1356_vm15, %v9286_v60 }
0x14bf   :  { %12960 = vmatmul.mubr.msk.f32.gmra.mrb[66].mxu1 %vm1356_vm15, %v9287_v52 }
0x14c0   :  { %12962 = vmatprep.mubr.msk.f32.mxu1 %vm1356_vm15, %v9288_v8 }
0x14c3   :  { %12963 = vmatmul.mubr.msk.f32.gmra.mrb[68].mxu1 %vm1356_vm15, %v9289_v56 }
0x14c4   :  { %12965 = vmatprep.mubr.msk.f32.mxu1 %vm1356_vm15, %v9290_v9 }
0x14c7   :  { %12966 = vmatmul.mubr.msk.f32.gmra.mrb[70].mxu1 %vm1356_vm15, %v9291_v7  ;;  %v9793_v7 = vpop.permute.xlu1 %9792 }
0x14c8   :  { %12968 = vmatprep.mubr.msk.f32.mxu1 %vm1356_vm15, %v9292_v11  ;;  %v9778_v11 = vpop.permute.xlu0 %9777 }
0x14cb   :  { %12969 = vmatmul.mubr.msk.f32.gmra.mrb[72].mxu1 %vm1356_vm15, %v9293_v17 }
0x14cc   :  { %12971 = vmatprep.mubr.msk.f32.mxu1 %vm1356_vm15, %v9294_v19 }
0x14cf   :  { %12972 = vmatmul.mubr.msk.f32.gmra.mrb[74].mxu1 %vm1356_vm15, %v9295_v23 }
0x14d0   :  { %12974 = vmatprep.mubr.msk.f32.mxu1 %vm1356_vm15, %v9296_v35 }
0x14d3   :  { %12975 = vmatmul.mubr.msk.f32.gmra.mrb[76].mxu1 %vm1356_vm15, %v9297_v10 }
0x14d4   :  { %12985 = vmatprep.mubr.msk.f32.mxu1 %vm14819_vm7, %v14817_v14 }
0x158a   :  { %v12955_v33 = vpop.f32.mrb[62].mxu1 }
0x158b   :  { %v9801_v5 = vadd.f32 %v12955_v33, %v9728_v51  ;;  %v9625_v36 = vpop.f32.mrb[63].mxu1 }
0x158c   :  { %v9800_v6 = vadd.f32 %v9723_v34, %v9625_v36  ;;  %v9798_v36 = vpop.permute.xlu1 %9797 }
0x158d   :  { %v9817_v12 = vsub.f32 0.0, %v9801_v5 }
0x158e   :  { %v9816_v58 = vsub.f32 0.0, %v9800_v6  ;;  %v12958_v14 = vpop.f32.mrb[64].mxu1 }
0x158f   :  { %v9822_v15 = vmul.f32 1.442695, %v9817_v12  ;;  %v9803_v18 = vadd.f32 %v12958_v14, %v9738_v37  ;;  %v9635_v27 = vpop.f32.mrb[65].mxu1 }
0x1590   :  { %v9820_v21 = vmul.f32 1.442695, %v9816_v58  ;;  %v9802_v24 = vadd.f32 %v9733_v16, %v9635_v27 }
0x1591   :  { %14712 = vpow2.f32 %v9822_v15  ;;  %v9819_v39 = vsub.f32 0.0, %v9803_v18 }
0x1592   :  { %14714 = vpow2.f32 %v9820_v21  ;;  %v9818_v38 = vsub.f32 0.0, %v9802_v24  ;;  %v12961_v42 = vpop.f32.mrb[66].mxu1 }
0x1593   :  { %v9826_v28 = vmul.f32 1.442695, %v9819_v39  ;;  %v9805_v41 = vadd.f32 %v12961_v42, %v9748_v26  ;;  %v9645_v43 = vpop.f32.mrb[67].mxu1 }
0x1594   :  { %v9824_v44 = vmul.f32 1.442695, %v9818_v38  ;;  %v9804_v30 = vadd.f32 %v9743_v31, %v9645_v43 }
0x1595   :  { %14716 = vpow2.f32 %v9826_v28  ;;  %v9841_v62 = vsub.f32 0.0, %v9805_v41 }
0x1596   :  { %14718 = vpow2.f32 %v9824_v44  ;;  %v9840_v45 = vsub.f32 0.0, %v9804_v30  ;;  %v12964_v3 = vpop.f32.mrb[68].mxu1 }
0x1597   :  { %v9846_v13 = vmul.f32 1.442695, %v9841_v62  ;;  %v9807_v46 = vadd.f32 %v12964_v3, %v9758_v32  ;;  %v9655_v47 = vpop.f32.mrb[69].mxu1 }
0x1598   :  { %v9844_v54 = vmul.f32 1.442695, %v9840_v45  ;;  %v9806_v50 = vadd.f32 %v9753_v48, %v9655_v47  ;;  %v9893_v45 = vld [vmem:[%s16855_s29 + $0x8] sm:$0xff] }
0x1599   :  { %14720 = vpow2.f32 %v9846_v13  ;;  %v9843_v57 = vsub.f32 0.0, %v9807_v46  ;;  %v9892_v13 = vld [vmem:[%s16855_s29] sm:$0xff] }
0x159a   :  { %14722 = vpow2.f32 %v9844_v54  ;;  %v9842_v55 = vsub.f32 0.0, %v9806_v50  ;;  %v12967_v61 = vpop.f32.mrb[70].mxu1 }
0x159b   :  { %v14713_v63 = vpop.eup %14712  ;;  %v9850_v0 = vmul.f32 1.442695, %v9843_v57  ;;  %v9665_v1 = vpop.f32.mrb[71].mxu1  ;;  %v9809_v60 = vadd.f32 %v12967_v61, %v9768_v40 }
0x159c   :  { %v14715_v29 = vpop.eup %14714  ;;  %v9829_v2 = vadd.f32 1.0, %v14713_v63  ;;  %v9848_v4 = vmul.f32 1.442695, %v9842_v55  ;;  %v9808_v19 = vadd.f32 %v9763_v53, %v9665_v1  ;;  %v9895_v55 = vld [vmem:[%s16855_s29 + $0x18] sm:$0xff] }
0x159d   :  { %v9828_v49 = vadd.f32 1.0, %v14715_v29  ;;  %14724 = vpow2.f32 %v9850_v0 }
0x159e   :  { %14726 = vrcp.f32 %v9829_v2  ;;  %v12970_v52 = vpop.f32.mrb[72].mxu1 }
0x159f   :  { %v14717_v8 = vpop.eup %14716  ;;  %14728 = vrcp.f32 %v9828_v49  ;;  %v9675_v56 = vpop.f32.mrb[73].mxu1  ;;  %v9811_v35 = vadd.f32 %v12970_v52, %v9778_v11 }
0x15a0   :  { %v14719_v9 = vpop.eup %14718  ;;  %v9831_v17 = vadd.f32 1.0, %v14717_v8  ;;  %14730 = vpow2.f32 %v9848_v4  ;;  %v9810_v16 = vadd.f32 %v9773_v59, %v9675_v56 }
0x15a1   :  { %v9830_v23 = vadd.f32 1.0, %v14719_v9  ;;  %14732 = vtanh.f32 %v9809_v60  ;;  %v9894_v60 = vld [vmem:[%s16855_s29 + $0x10] sm:$0xff] }
0x15a2   :  { %14734 = vrcp.f32 %v9831_v17  ;;  %v12973_v10 = vpop.f32.mrb[74].mxu1 }
0x15a3   :  { %v14721_v51 = vpop.eup %14720  ;;  %14736 = vrcp.f32 %v9830_v23  ;;  %v9813_v34 = vadd.f32 %v12973_v10, %v16849_v22  ;;  %v9685_v26 = vpop.f32.mrb[75].mxu1 }
0x15a4   :  { %v14723_v31 = vpop.eup %14722  ;;  %v9853_v48 = vadd.f32 1.0, %v14721_v51  ;;  %14738 = vtanh.f32 %v9808_v19  ;;  %v9812_v32 = vadd.f32 %v9783_v20, %v9685_v26 }
0x15a5   :  { %v9852_v33 = vadd.f32 1.0, %v14723_v31  ;;  %14740 = vtanh.f32 %v9811_v35  ;;  %v9869_v5 = vsub.f32 0.0, %v9813_v34 }
0x15a6   :  { %14742 = vrcp.f32 %v9853_v48  ;;  %v9868_v6 = vsub.f32 0.0, %v9812_v32  ;;  %v12976_v37 = vpop.f32.mrb[76].mxu1 }
0x15a7   :  { %v14725_v12 = vpop.eup %14724  ;;  %14744 = vrcp.f32 %v9852_v33  ;;  %v9874_v22 = vmul.f32 1.442695, %v9869_v5  ;;  %v9815_v58 = vadd.f32 %v12976_v37, %v9798_v36  ;;  %v9695_v14 = vpop.f32.mrb[77].mxu1 }
0x15a8   :  { %v14727_v15 = vpop.eup %14726  ;;  %v9855_v18 = vadd.f32 1.0, %v14725_v12  ;;  %14746 = vtanh.f32 %v9810_v16  ;;  %v9872_v27 = vmul.f32 1.442695, %v9868_v6  ;;  %v9814_v21 = vadd.f32 %v9793_v7, %v9695_v14 }
0x15a9   :  { %v14729_v24 = vpop.eup %14728  ;;  %14748 = vpow2.f32 %v9874_v22  ;;  %v9871_v39 = vsub.f32 0.0, %v9815_v58 }
0x15aa   :  { %v14731_v38 = vpop.eup %14730  ;;  %14750 = vrcp.f32 %v9855_v18  ;;  %v9870_v42 = vsub.f32 0.0, %v9814_v21 }
0x15ab   :  { %v14733_v20 = vpop.eup %14732  ;;  %v9854_v28 = vadd.f32 1.0, %v14731_v38  ;;  %14752 = vpow2.f32 %v9872_v27  ;;  %v9878_v41 = vmul.f32 1.442695, %v9871_v39 }
0x15ac   :  { %v14735_v43 = vpop.eup %14734  ;;  %v9901_v40 = vmul.f32 %v14733_v20, %v14727_v15  ;;  %v9876_v44 = vmul.f32 1.442695, %v9870_v42 }
0x15ad   :  { %v14737_v30 = vpop.eup %14736  ;;  %14754 = vrcp.f32 %v9854_v28 }
0x15ae   :  { %v14739_v62 = vpop.eup %14738  ;;  %14756 = vpow2.f32 %v9878_v41 }
0x15af   :  { %v14741_v3 = vpop.eup %14740  ;;  %v9900_v46 = vmul.f32 %v14739_v62, %v14729_v24  ;;  %14758 = vpow2.f32 %v9876_v44 }
0x15b0   :  { %v14743_v47 = vpop.eup %14742  ;;  %v9903_v54 = vmul.f32 %v14741_v3, %v14735_v43 }
0x15b1   :  { %v14745_v50 = vpop.eup %14744  ;;  %v9897_v53 = vmul.f32 %v14743_v47, %v9893_v45 }
0x15b2   :  { %v14747_v57 = vpop.eup %14746  ;;  %v9896_v59 = vmul.f32 %v14745_v50, %v9892_v13 }
0x15b3   :  { %v14749_v61 = vpop.eup %14748  ;;  %v9905_v63 = vadd.f32 %v9901_v40, %v9897_v53  ;;  %v9902_v0 = vmul.f32 %v14747_v57, %v14737_v30 }
0x15b4   :  { %v14751_v1 = vpop.eup %14750  ;;  %v9904_v29 = vadd.f32 %v9900_v46, %v9896_v59  ;;  %v9881_v2 = vadd.f32 1.0, %v14749_v61 }
0x15b5   :  { %v14753_v4 = vpop.eup %14752  ;;  %14760 = vtanh.f32 %v9905_v63  ;;  %9921 = vst.msk [vmem:[%s16860_s30 + $0x8] sm:$0xff] %vm7612_vm3, %v9905_v63  ;;  %v9899_v49 = vmul.f32 %v14751_v1, %v9895_v55  ;;  %v9977_v1 = vpop.permute.xlu1 %9976 }
0x15b6   :  { %14762 = vtanh.f32 %v9904_v29  ;;  %9920 = vst.msk [vmem:[%s16860_s30] sm:$0xff] %vm7612_vm3, %v9904_v29  ;;  %v9880_v52 = vadd.f32 1.0, %v14753_v4 }
0x15b7   :  { %v14755_v8 = vpop.eup %14754  ;;  %v9907_v56 = vadd.f32 %v9903_v54, %v9899_v49  ;;  %14764 = vrcp.f32 %v9881_v2 }
0x15b8   :  { %v14757_v9 = vpop.eup %14756  ;;  %v9898_v7 = vmul.f32 %v14755_v8, %v9894_v60  ;;  %14766 = vrcp.f32 %v9880_v52 }
0x15b9   :  { %v14759_v11 = vpop.eup %14758  ;;  %14768 = vtanh.f32 %v9907_v56  ;;  %9923 = vst.msk [vmem:[%s16860_s30 + $0x18] sm:$0xff] %vm7612_vm3, %v9907_v56  ;;  %v9883_v17 = vadd.f32 1.0, %v14757_v9  ;;  %v10001_v49 = vpop.permute.xlu1 %10000 }
0x15ba   :  { %v9906_v19 = vadd.f32 %v9902_v0, %v9898_v7  ;;  %v9882_v23 = vadd.f32 1.0, %v14759_v11  ;;  %v9982_v0 = vpop.permute.xlu0 %9981 }
0x15bb   :  { %14770 = vrcp.f32 %v9883_v17 }
0x15bc   :  { %14772 = vtanh.f32 %v9906_v19  ;;  %9922 = vst.msk [vmem:[%s16860_s30 + $0x10] sm:$0xff] %vm7612_vm3, %v9906_v19 }
0x15bd   :  { %14774 = vrcp.f32 %v9882_v23  ;;  %v9987_v52 = vpop.permute.xlu1 %9986 }
0x15be   :  { %v10006_v4 = vpop.permute.xlu0 %10005 }
0x15bf   :  { %v14761_v35 = vpop.eup %14760 }
0x15c0   :  { %v14763_v10 = vpop.eup %14762 }
0x15c1   :  { %v14765_v51 = vpop.eup %14764 }
0x15c2   :  { %v14767_v34 = vpop.eup %14766  ;;  %v9913_v26 = vmul.f32 %v14765_v51, %v14761_v35  ;;  %v9992_v60 = vpop.permute.xlu0 %9991 }
0x15c3   :  { %v14769_v31 = vpop.eup %14768  ;;  %v9912_v48 = vmul.f32 %v14767_v34, %v14763_v10  ;;  %v10011_v51 = vpop.permute.xlu1 %10010 }
0x15c4   :  { %9917 = vst.msk [vmem:[%s10152_s1 + $0x8] sm:$0xff] %vm7612_vm3, %v9913_v26  ;;  %v9933_v16 = vsel %vm7612_vm3, %v9913_v26, 0.0 }
0x15c5   :  { %v14771_v32 = vpop.eup %14770  ;;  %9916 = vst.msk [vmem:[%s10152_s1] sm:$0xff] %vm7612_vm3, %v9912_v48  ;;  %v9932_v33 = vsel %vm7612_vm3, %v9912_v48, 0.0 }
0x15c6   :  { %v14773_v5 = vpop.eup %14772  ;;  %v9934_v36 = vadd.f32 %v9933_v16, %v9932_v33  ;;  %v9915_v6 = vmul.f32 %v14771_v32, %v14769_v31  ;;  %v10016_v10 = vpop.permute.xlu0 %10015  ;;  %v10022_v33 = vld [vmem:[%s10149_s3] sm:$0x7f] }
0x15c7   :  { %v14775_v37 = vpop.eup %14774 }
0x15c8   :  { %9919 = vst.msk [vmem:[%s10152_s1 + $0x18] sm:$0xff] %vm7612_vm3, %v9915_v6  ;;  %v9914_v12 = vmul.f32 %v14775_v37, %v14773_v5  ;;  %v9937_v14 = vsel %vm7612_vm3, %v9915_v6, 0.0  ;;  %v10027_v5 = vpop.permute.xlu1 %10026 }
0x15ca   :  { %9918 = vst.msk [vmem:[%s10152_s1 + $0x10] sm:$0xff] %vm7612_vm3, %v9914_v12  ;;  %v9935_v22 = vsel %vm7612_vm3, %v9914_v12, 0.0 }
0x15cb   :  { %v9936_v58 = vadd.f32 %v9935_v22, %v9934_v36 }
0x15cd   :  { %v9938_v15 = vadd.f32 %v9937_v14, %v9936_v58 }
0x15cf   :  { %v9939_v18 = vrot.slane %v9938_v15, 4 }
0x15d1   :  { %v9940_v27 = vadd.f32 %v9939_v18, %v9938_v15 }
0x15d3   :  { %v9941_v21 = vrot.slane %v9940_v27, 2 }
0x15d5   :  { %v9942_v24 = vadd.f32 %v9941_v21, %v9940_v27 }
0x15d7   :  { %v9943_v39 = vrot.slane %v9942_v24, 1 }
0x15d9   :  { %v9944_v38 = vadd.f32 %v9943_v39, %v9942_v24 }
0x15db   :  { %v9945_v42 = vmul.f32 0.03125, %v9944_v38 }
0x15dd   :  { %v9948_v20 = vsub.f32 %v9914_v12, %v9945_v42  ;;  %v9946_v28 = vsub.f32 %v9912_v48, %v9945_v42  ;;  %v9947_v41 = vsub.f32 %v9913_v26, %v9945_v42  ;;  %v9949_v43 = vsub.f32 %v9915_v6, %v9945_v42 }
0x15df   :  { %v9952_v40 = vmul.f32 %v9948_v20, %v9948_v20  ;;  %v9950_v44 = vmul.f32 %v9946_v28, %v9946_v28  ;;  %v9951_v30 = vmul.f32 %v9947_v41, %v9947_v41  ;;  %v9953_v62 = vmul.f32 %v9949_v43, %v9949_v43 }
0x15e1   :  { %v9954_v45 = vsel %vm7612_vm3, %v9950_v44, 0.0  ;;  %v9955_v3 = vsel %vm7612_vm3, %v9951_v30, 0.0  ;;  %v9957_v46 = vsel %vm7612_vm3, %v9952_v40, 0.0  ;;  %v9959_v54 = vsel %vm7612_vm3, %v9953_v62, 0.0 }
0x15e2   :  { %v9956_v13 = vadd.f32 %v9955_v3, %v9954_v45 }
0x15e4   :  { %v9958_v47 = vadd.f32 %v9957_v46, %v9956_v13 }
0x15e6   :  { %v9960_v50 = vadd.f32 %v9959_v54, %v9958_v47 }
0x15e8   :  { %v9961_v53 = vrot.slane %v9960_v50, 4 }
0x15ea   :  { %v9962_v57 = vadd.f32 %v9961_v53, %v9960_v50 }
0x15ec   :  { %v9963_v59 = vrot.slane %v9962_v57, 2 }
0x15ee   :  { %v9964_v55 = vadd.f32 %v9963_v59, %v9962_v57 }
0x15f0   :  { %v9965_v61 = vrot.slane %v9964_v55, 1 }
0x15f2   :  { %v9966_v63 = vadd.f32 %v9965_v61, %v9964_v55 }
0x15f4   :  { %v9967_v29 = vmul.f32 0.03125, %v9966_v63 }
0x15f6   :  { %v9968_v2 = vadd.f32 1e-05, %v9967_v29 }
0x15f8   :  { %14776 = vrsqrt.f32 %v9968_v2 }
0x1602   :  { %v14777_v8 = vpop.eup %14776 }
0x1603   :  { %v9970_v56 = vmul.f32 %v14777_v8, %v9946_v28  ;;  %v9971_v9 = vmul.f32 %v14777_v8, %v9947_v41  ;;  %v9972_v7 = vmul.f32 %v14777_v8, %v9948_v20  ;;  %v9973_v11 = vmul.f32 %v14777_v8, %v9949_v43 }
0x1605   :  { %v9994_v17 = vmul.f32 %v9977_v1, %v9970_v56  ;;  %v9995_v19 = vmul.f32 %v9982_v0, %v9971_v9  ;;  %v9996_v23 = vmul.f32 %v9987_v52, %v9972_v7  ;;  %v9997_v35 = vmul.f32 %v9992_v60, %v9973_v11 }
0x1607   :  { %v10018_v34 = vadd.f32 %v10001_v49, %v9994_v17  ;;  %v10019_v26 = vadd.f32 %v10006_v4, %v9995_v19  ;;  %v10020_v31 = vadd.f32 %v10011_v51, %v9996_v23  ;;  %v10021_v48 = vadd.f32 %v10016_v10, %v9997_v35 }
0x1609   :  { %v13847_v16 = vpack.c.bf16 %v10019_v26, %v10018_v34  ;;  %v13850_v32 = vpack.c.bf16 %v10021_v48, %v10020_v31 }
0x160b   :  { %13848 = vmatpush3.bf16.msra.mxu1 %v13847_v16 }
0x160c   :  { %13849 = vmatprep.subr.bf16.mxu1 %v14830_v25 }
0x160f   :  { %13851 = vmatpush3.bf16.msra.mxu1 %v13850_v32 }
0x1612   :  { %12986 = vmatmul.mubr.msk.f32.vlgmr.msra.gmra.mrb[78].mxu1 %vm1356_vm15, %v10022_v33 }
0x16e5   :  { %v10098_v36 = vpop.f32.mrb[78].mxu1 }
0x16e6   :  { %v10099_v6 = vadd.f32 %v10098_v36, %v10027_v5  ;;  %v12987_v37 = vpop.f32.mrb[79].mxu1 }
0x16e8   :  { %10103 = vst.msk [vmem:[%s10151_s8] sm:$0x7f] %vm10102_vm12, %v10099_v6 }

</bundles_post_ra>
